<compile_context>
chip_gen: v5e
topology: v5e:2x2
jax: 0.10.0
libtpu: 0.0.40
codegen_flags: <defaults>
</compile_context>

<pallas_src>
import functools

import jax
import jax.numpy as jnp
from jax import lax
from jax.experimental import pallas as pl
from jax.experimental.pallas import tpu as pltpu

TEXT_DIM = 768
AUDIO_DIM = 768
HIDDEN_DIM = 512
HIDDEN_EXT = HIDDEN_DIM + 128        # hidden proj + folded score column, lane padded
NUM_GROUPS = 32
GROUP_SIZE = TEXT_DIM // NUM_GROUPS  # 24
FC1_OUT = 256
N_CLASSES = 2
OUT_PAD = 128                        # lane-dense padded output width
EPS = 1e-5


def _round_up(x, m):
    return ((x + m - 1) // m) * m


def student_kernel(lens_ref, inv_ref, text_ref, audio_ref,
                   gt_g_ref, gt_b_ref, ga_g_ref, ga_b_ref,
                   grp_ref, grp_t_ref,
                   wt_ref, bt_ref, wa_ref, ba_ref,
                   w1t_ref, w1b_ref, b1_ref, w2_ref, b2_ref,
                   out_ref, acc_t_ref, acc_a_ref,
                   *, st_text, st_audio, mask_text, mask_audio,
                   gate_text, gate_audio):
    s = pl.program_id(1)

    @pl.when(s == 0)
    def _init():
        acc_t_ref[...] = jnp.zeros_like(acc_t_ref)
        acc_a_ref[...] = jnp.zeros_like(acc_a_ref)

    len_t = lens_ref[0]
    len_a = lens_ref[1]

    # ---- streamed sequence-sum: read the backbone dtype, accumulate in f32 ----
    def block_sum(ref, start, length, st, needs_mask):
        x = ref[...].astype(jnp.float32)
        if needs_mask:  # only traced when S % ST != 0 (partial trailing block)
            row = lax.broadcasted_iota(jnp.int32, (1, st, 1), 1)
            x = jnp.where(start + row < length, x, 0.0)
        return jnp.sum(x, axis=1)

    def accum_text():
        acc_t_ref[...] += block_sum(text_ref, s * st_text, len_t, st_text, mask_text)

    def accum_audio():
        acc_a_ref[...] += block_sum(audio_ref, s * st_audio, len_a, st_audio, mask_audio)

    # gate_* is static: only the modality with fewer sequence blocks is gated, so
    # the shorter stream neither re-DMAs (clamped index_map) nor re-accumulates.
    if gate_text:
        pl.when(s * st_text < len_t)(accum_text)
    else:
        accum_text()
    if gate_audio:
        pl.when(s * st_audio < len_a)(accum_audio)
    else:
        accum_audio()

    @pl.when(s == pl.num_programs(1) - 1)
    def _head():
        nbt = acc_t_ref.shape[0]
        # mean over the TRUE sequence lengths (SMEM scalars)
        text_feat = acc_t_ref[...] * inv_ref[0]          # [BT, 768]
        audio_feat = acc_a_ref[...] * inv_ref[1]         # [BT, 768]

        # ---- GroupNorm(32, 768) for both modalities, two-pass statistics ----
        feats = jnp.concatenate([text_feat, audio_feat], axis=0)      # [2*BT, 768]
        mean_g = jnp.dot(feats, grp_ref[...],
                         preferred_element_type=jnp.float32) * (1.0 / GROUP_SIZE)
        mean_c = jnp.dot(mean_g, grp_t_ref[...], preferred_element_type=jnp.float32)
        cent = feats - mean_c
        var_g = jnp.dot(cent * cent, grp_ref[...],
                        preferred_element_type=jnp.float32) * (1.0 / GROUP_SIZE)
        var_c = jnp.dot(var_g, grp_t_ref[...], preferred_element_type=jnp.float32)
        xn = cent * lax.rsqrt(var_c + EPS)
        tn = xn[:nbt] * gt_g_ref[...] + gt_b_ref[...]    # [BT, 768]
        an = xn[nbt:] * ga_g_ref[...] + ga_b_ref[...]    # [BT, 768]

        # ---- AttentionBasedFusion: score column folded into the 768x640 proj ----
        th = jnp.dot(tn.astype(jnp.bfloat16), wt_ref[...],
                     preferred_element_type=jnp.float32) + bt_ref[...]   # [BT, 640]
        ah = jnp.dot(an.astype(jnp.bfloat16), wa_ref[...],
                     preferred_element_type=jnp.float32) + ba_ref[...]   # [BT, 640]
        text_hidden = th[:, :HIDDEN_DIM]
        audio_hidden = ah[:, :HIDDEN_DIM]
        score_t = th[:, HIDDEN_DIM:HIDDEN_DIM + 1]        # [BT, 1]
        score_a = ah[:, HIDDEN_DIM:HIDDEN_DIM + 1]        # [BT, 1]

        # two-way softmax (exact reciprocal: weights sum to 1)
        m = jnp.maximum(score_t, score_a)
        e_t = jnp.exp(score_t - m)
        e_a = jnp.exp(score_a - m)
        inv = 1.0 / (e_t + e_a)
        w_text = e_t * inv
        w_audio = e_a * inv

        # ---- fc head: Linear(1024,256)+ReLU+Linear(256,2); concat eliminated ----
        h = (jnp.dot((w_text * text_hidden).astype(jnp.bfloat16), w1t_ref[...],
                     preferred_element_type=jnp.float32)
             + jnp.dot((w_audio * audio_hidden).astype(jnp.bfloat16), w1b_ref[...],
                       preferred_element_type=jnp.float32)
             + b1_ref[...])
        h = jnp.maximum(h, 0.0)
        out_ref[...] = jnp.dot(h.astype(jnp.bfloat16), w2_ref[...],
                               preferred_element_type=jnp.float32) + b2_ref[...]


def make_params(key):
    ks = jax.random.split(key, 6)

    def linear_init(k, fan_in, fan_out):
        # torch default Linear init: U(-1/sqrt(fan_in), 1/sqrt(fan_in))
        bound = 1.0 / jnp.sqrt(float(fan_in))
        kw, kb = jax.random.split(k)
        w = jax.random.uniform(kw, (fan_in, fan_out), jnp.float32, -bound, bound)
        b = jax.random.uniform(kb, (fan_out,), jnp.float32, -bound, bound)
        return w, b

    def kaiming_linear(k, fan_in, fan_out):
        kw, kb = jax.random.split(k)
        std = jnp.sqrt(2.0 / float(fan_in))
        w = jax.random.normal(kw, (fan_in, fan_out), jnp.float32) * std
        bound = 1.0 / jnp.sqrt(float(fan_in))
        b = jax.random.uniform(kb, (fan_out,), jnp.float32, -bound, bound)
        return w, b

    p = {}
    p["gt_gamma"] = jnp.ones((TEXT_DIM,), jnp.float32)
    p["gt_beta"] = jnp.zeros((TEXT_DIM,), jnp.float32)
    p["ga_gamma"] = jnp.ones((AUDIO_DIM,), jnp.float32)
    p["ga_beta"] = jnp.zeros((AUDIO_DIM,), jnp.float32)

    p["wt"], p["bt"] = linear_init(ks[0], TEXT_DIM, HIDDEN_DIM)
    p["wa"], p["ba"] = linear_init(ks[1], AUDIO_DIM, HIDDEN_DIM)
    p["att_t_w"], p["att_t_b"] = linear_init(ks[2], HIDDEN_DIM, 1)
    p["att_a_w"], p["att_a_b"] = linear_init(ks[3], HIDDEN_DIM, 1)
    p["w1"], p["b1"] = kaiming_linear(ks[4], 2 * HIDDEN_DIM, FC1_OUT)
    p["w2"], p["b2"] = kaiming_linear(ks[5], FC1_OUT, N_CLASSES)
    return p


def prepare_kernel_params(params):
    """Fold / split / pad the torch-layout params into kernel-friendly arrays."""
    wt, bt = params["wt"], params["bt"]
    wa, ba = params["wa"], params["ba"]
    att_t_w, att_t_b = params["att_t_w"], params["att_t_b"]
    att_a_w, att_a_b = params["att_a_w"], params["att_a_b"]
    w1, b1 = params["w1"], params["b1"]
    w2, b2 = params["w2"], params["b2"]

    # group membership matrix: one-hot channel -> group
    ch = jnp.arange(TEXT_DIM) // GROUP_SIZE
    grp = jax.nn.one_hot(ch, NUM_GROUPS, dtype=jnp.float32)        # [768, 32]

    # fold the attention-score projection as column 512 of the hidden projection:
    #   score = tn @ (wt @ att_w) + (bt @ att_w + att_b)
    vt = wt @ att_t_w                                              # [768, 1]
    va = wa @ att_a_w
    ct = bt @ att_t_w + att_t_b                                    # [1]
    ca = ba @ att_a_w + att_a_b
    wt_ext = jnp.zeros((TEXT_DIM, HIDDEN_EXT), jnp.float32)
    wt_ext = wt_ext.at[:, :HIDDEN_DIM].set(wt).at[:, HIDDEN_DIM:HIDDEN_DIM + 1].set(vt)
    wa_ext = jnp.zeros((AUDIO_DIM, HIDDEN_EXT), jnp.float32)
    wa_ext = wa_ext.at[:, :HIDDEN_DIM].set(wa).at[:, HIDDEN_DIM:HIDDEN_DIM + 1].set(va)
    bt_ext = (jnp.zeros((1, HIDDEN_EXT), jnp.float32)
              .at[0, :HIDDEN_DIM].set(bt).at[0, HIDDEN_DIM].set(ct[0]))
    ba_ext = (jnp.zeros((1, HIDDEN_EXT), jnp.float32)
              .at[0, :HIDDEN_DIM].set(ba).at[0, HIDDEN_DIM].set(ca[0]))

    # pad the final classifier to 128 lanes (unmasked stores)
    w2_pad = jnp.zeros((FC1_OUT, OUT_PAD), jnp.float32).at[:, :N_CLASSES].set(w2)
    b2_pad = jnp.zeros((1, OUT_PAD), jnp.float32).at[0, :N_CLASSES].set(b2)

    return dict(
        gt_gamma=params["gt_gamma"].reshape(1, -1),
        gt_beta=params["gt_beta"].reshape(1, -1),
        ga_gamma=params["ga_gamma"].reshape(1, -1),
        ga_beta=params["ga_beta"].reshape(1, -1),
        grp=grp, grp_t=grp.T,
        wt_ext=wt_ext.astype(jnp.bfloat16), bt_ext=bt_ext,
        wa_ext=wa_ext.astype(jnp.bfloat16), ba_ext=ba_ext,
        w1_top=w1[:HIDDEN_DIM].astype(jnp.bfloat16),
        w1_bot=w1[HIDDEN_DIM:].astype(jnp.bfloat16),
        b1=b1.reshape(1, -1),
        w2_pad=w2_pad.astype(jnp.bfloat16), b2_pad=b2_pad)


def student_forward(text_hidden_state, audio_hidden_state, params):
    B, S_t, _ = text_hidden_state.shape
    B_a, S_a, _ = audio_hidden_state.shape
    assert B == B_a

    # ---- batch tiling: single full-batch block for small B (no wrapper copies) ----
    if B <= 8:
        BT, nb = B, 1
        text_in, audio_in = text_hidden_state, audio_hidden_state
    else:
        BT = 8
        B_pad = _round_up(B, BT)
        nb = B_pad // BT
        if B_pad != B:
            text_in = jnp.pad(text_hidden_state, ((0, B_pad - B), (0, 0), (0, 0)))
            audio_in = jnp.pad(audio_hidden_state, ((0, B_pad - B), (0, 0), (0, 0)))
        else:
            text_in, audio_in = text_hidden_state, audio_hidden_state
    B_out = nb * BT

    kp = prepare_kernel_params(params)
    weights = (kp["gt_gamma"], kp["gt_beta"], kp["ga_gamma"], kp["ga_beta"],
               kp["grp"], kp["grp_t"],
               kp["wt_ext"], kp["bt_ext"], kp["wa_ext"], kp["ba_ext"],
               kp["w1_top"], kp["w1_bot"], kp["b1"],
               kp["w2_pad"], kp["b2_pad"])
    weight_bytes = sum(int(w.size) * w.dtype.itemsize for w in weights)

    # ---- per-generation VMEM budget -> sequence tile cap ----
    try:
        vmem_cap = int(pltpu.get_tpu_info().vmem_capacity_bytes)
    except Exception:
        vmem_cap = 64 * 2**20                        # conservative (v7x-sized)
    limit_target = max(32 * 2**20, min(vmem_cap - 16 * 2**20, 100 * 2**20))

    elt = max(text_in.dtype.itemsize, audio_in.dtype.itemsize)
    reserve = (2 * weight_bytes                      # double-buffered constant blocks
               + 2 * BT * TEXT_DIM * 4               # f32 accumulators
               + 2 * BT * OUT_PAD * 4                # output block
               + 2 * 2**20)                          # slack
    stream_budget = max(8 * 2**20, limit_target - reserve)
    per_row = 2 * 2 * BT * TEXT_DIM * elt            # 2 modalities x 2 buffers per row
    st_cap = int(max(64, min(512, (stream_budget // per_row) // 16 * 16)))

    def seq_tiling(S):
        if S <= st_cap:
            return S, 1                              # full-length block: no pad, no mask
        return st_cap, int(pl.cdiv(S, st_cap))

    ST_text, ns_text = seq_tiling(S_t)
    ST_audio, ns_audio = seq_tiling(S_a)
    ns = max(ns_text, ns_audio)

    # Shorter modality: clamp its block index so Pallas skips the re-DMA once its
    # own sequence is exhausted (no padding of the short stream to the long one).
    def seq_index_map(ns_mod):
        if ns_mod == ns:
            return lambda b, s: (b, s, 0)
        last = ns_mod - 1
        return lambda b, s: (b, jnp.minimum(s, last), 0)

    in_specs = [
        pl.BlockSpec(memory_space=pltpu.MemorySpace.SMEM),   # seq lengths (int32)
        pl.BlockSpec(memory_space=pltpu.MemorySpace.SMEM),   # 1/seq lengths (f32)
        pl.BlockSpec((BT, ST_text, TEXT_DIM), seq_index_map(ns_text)),
        pl.BlockSpec((BT, ST_audio, AUDIO_DIM), seq_index_map(ns_audio)),
    ]
    in_specs += [pl.BlockSpec(tuple(w.shape), lambda b, s: (0, 0)) for w in weights]
    out_spec = pl.BlockSpec((BT, OUT_PAD), lambda b, s: (b, 0))

    stream_bytes = 2 * BT * TEXT_DIM * (ST_text + ST_audio) * elt
    vmem_limit = int(min(limit_target,
                         max(16 * 2**20, reserve + stream_bytes + 4 * 2**20)))

    # ---- advisory cost estimate for XLA scheduling ----
    pool_flops = 2 * B_out * (S_t + S_a) * TEXT_DIM
    head_flops = 2 * B_out * (2 * TEXT_DIM * HIDDEN_EXT
                              + 4 * TEXT_DIM * NUM_GROUPS
                              + 2 * HIDDEN_DIM * FC1_OUT
                              + FC1_OUT * OUT_PAD)
    cost = pl.CostEstimate(
        flops=int(pool_flops + head_flops),
        transcendentals=int(B_out * (2 * TEXT_DIM + 4)),
        bytes_accessed=int(text_in.size * text_in.dtype.itemsize
                           + audio_in.size * audio_in.dtype.itemsize
                           + weight_bytes + B_out * OUT_PAD * 4))

    kernel = functools.partial(
        student_kernel,
        st_text=ST_text, st_audio=ST_audio,
        mask_text=(S_t % ST_text != 0), mask_audio=(S_a % ST_audio != 0),
        gate_text=(ns_text < ns), gate_audio=(ns_audio < ns))

    seq_lens = jnp.array([S_t, S_a], jnp.int32)
    inv_lens = jnp.array([1.0 / S_t, 1.0 / S_a], jnp.float32)

    out = pl.pallas_call(
        kernel,
        out_shape=jax.ShapeDtypeStruct((B_out, OUT_PAD), jnp.float32),
        grid=(nb, ns),
        in_specs=in_specs,
        out_specs=out_spec,
        scratch_shapes=[pltpu.VMEM((BT, TEXT_DIM), jnp.float32),
                        pltpu.VMEM((BT, AUDIO_DIM), jnp.float32)],
        compiler_params=pltpu.CompilerParams(
            dimension_semantics=("parallel", "arbitrary"),
            vmem_limit_bytes=vmem_limit),
        cost_estimate=cost,
    )(seq_lens, inv_lens, text_in, audio_in, *weights)

    return out[:B, :N_CLASSES]


if __name__ == "__main__":
    key = jax.random.PRNGKey(0)
    k_params, k_text, k_audio = jax.random.split(key, 3)

    # Small stand-ins for BertModel / Wav2Vec2Model last_hidden_state outputs
    # (different seq lengths exercise the per-modality tiling path).
    B, S_TEXT, S_AUDIO = 4, 16, 24
    text_hidden_state = jax.random.normal(k_text, (B, S_TEXT, TEXT_DIM), jnp.float32)
    audio_hidden_state = jax.random.normal(k_audio, (B, S_AUDIO, AUDIO_DIM), jnp.float32)

    params = make_params(k_params)

    out = student_forward(text_hidden_state, audio_hidden_state, params)
    out = jax.block_until_ready(out)

    assert out.shape == (B, N_CLASSES), out.shape
    assert bool(jnp.all(jnp.isfinite(out)))
    print("KERNEL_OK")
</pallas_src>

<mosaic_0001>
module attributes {stable_mosaic.version = 11 : i64} {
  func.func @student_kernel(%arg0: i32, %arg1: i32, %arg2: memref<2xi32, #tpu.memory_space<smem>>, %arg3: memref<2xf32, #tpu.memory_space<smem>>, %arg4: memref<4x16x768xf32, #tpu.memory_space<vmem>>, %arg5: memref<4x24x768xf32, #tpu.memory_space<vmem>>, %arg6: memref<1x768xf32, #tpu.memory_space<vmem>>, %arg7: memref<1x768xf32, #tpu.memory_space<vmem>>, %arg8: memref<1x768xf32, #tpu.memory_space<vmem>>, %arg9: memref<1x768xf32, #tpu.memory_space<vmem>>, %arg10: memref<768x32xf32, #tpu.memory_space<vmem>>, %arg11: memref<32x768xf32, #tpu.memory_space<vmem>>, %arg12: memref<768x640xbf16, #tpu.memory_space<vmem>>, %arg13: memref<1x640xf32, #tpu.memory_space<vmem>>, %arg14: memref<768x640xbf16, #tpu.memory_space<vmem>>, %arg15: memref<1x640xf32, #tpu.memory_space<vmem>>, %arg16: memref<512x256xbf16, #tpu.memory_space<vmem>>, %arg17: memref<512x256xbf16, #tpu.memory_space<vmem>>, %arg18: memref<1x256xf32, #tpu.memory_space<vmem>>, %arg19: memref<256x128xbf16, #tpu.memory_space<vmem>>, %arg20: memref<1x128xf32, #tpu.memory_space<vmem>>, %arg21: memref<4x128xf32, #tpu.memory_space<vmem>>, %arg22: memref<4x768xf32, #tpu.memory_space<vmem>>, %arg23: memref<4x768xf32, #tpu.memory_space<vmem>>) attributes {dimension_semantics = [#tpu.dimension_semantics<parallel>, #tpu.dimension_semantics<arbitrary>], iteration_bounds = array<i64: 1, 1>, scalar_prefetch = 0 : i64, scratch_operands = 2 : i64, tpu.core_type = #tpu.core_type<tc>, window_params = [{transform_indices = @transform_0, window_bounds = array<i64: 2>}, {transform_indices = @transform_1, window_bounds = array<i64: 2>}, {transform_indices = @transform_2, window_bounds = array<i64: 4, 16, 768>}, {transform_indices = @transform_3, window_bounds = array<i64: 4, 24, 768>}, {pipeline_mode = #tpu.pipeline_mode<synchronous>, transform_indices = @transform_4, window_bounds = array<i64: 1, 768>}, {pipeline_mode = #tpu.pipeline_mode<synchronous>, transform_indices = @transform_5, window_bounds = array<i64: 1, 768>}, {pipeline_mode = #tpu.pipeline_mode<synchronous>, transform_indices = @transform_6, window_bounds = array<i64: 1, 768>}, {pipeline_mode = #tpu.pipeline_mode<synchronous>, transform_indices = @transform_7, window_bounds = array<i64: 1, 768>}, {pipeline_mode = #tpu.pipeline_mode<synchronous>, transform_indices = @transform_8, window_bounds = array<i64: 768, 32>}, {pipeline_mode = #tpu.pipeline_mode<synchronous>, transform_indices = @transform_9, window_bounds = array<i64: 32, 768>}, {pipeline_mode = #tpu.pipeline_mode<synchronous>, transform_indices = @transform_10, window_bounds = array<i64: 768, 640>}, {pipeline_mode = #tpu.pipeline_mode<synchronous>, transform_indices = @transform_11, window_bounds = array<i64: 1, 640>}, {pipeline_mode = #tpu.pipeline_mode<synchronous>, transform_indices = @transform_12, window_bounds = array<i64: 768, 640>}, {pipeline_mode = #tpu.pipeline_mode<synchronous>, transform_indices = @transform_13, window_bounds = array<i64: 1, 640>}, {pipeline_mode = #tpu.pipeline_mode<synchronous>, transform_indices = @transform_14, window_bounds = array<i64: 512, 256>}, {pipeline_mode = #tpu.pipeline_mode<synchronous>, transform_indices = @transform_15, window_bounds = array<i64: 512, 256>}, {pipeline_mode = #tpu.pipeline_mode<synchronous>, transform_indices = @transform_16, window_bounds = array<i64: 1, 256>}, {pipeline_mode = #tpu.pipeline_mode<synchronous>, transform_indices = @transform_17, window_bounds = array<i64: 256, 128>}, {pipeline_mode = #tpu.pipeline_mode<synchronous>, transform_indices = @transform_18, window_bounds = array<i64: 1, 128>}, {transform_indices = @transform_19, window_bounds = array<i64: 4, 128>}]} {
    %c0_i32 = arith.constant 0 : i32
    %0 = arith.cmpi eq, %arg1, %c0_i32 : i32
    %1 = arith.extui %0 : i1 to i32
    %c0_i32_0 = arith.constant 0 : i32
    %2 = arith.cmpi ne, %1, %c0_i32_0 : i32
    scf.if %2 {
      %cst_17 = arith.constant 0.000000e+00 : f32
      %16 = vector.broadcast %cst_17 : f32 to vector<4x768xf32>
      %c0_18 = arith.constant 0 : index
      %c0_19 = arith.constant 0 : index
      %17 = vector.load %arg22[%c0_18, %c0_19] : memref<4x768xf32, #tpu.memory_space<vmem>>, vector<4x768xf32>
      tpu.vector_store %arg22[%c0_18, %c0_19], %16 {strides = array<i32>} : memref<4x768xf32, #tpu.memory_space<vmem>>, vector<4x768xf32>,
      %cst_20 = arith.constant 0.000000e+00 : f32
      %18 = vector.broadcast %cst_20 : f32 to vector<4x768xf32>
      %c0_21 = arith.constant 0 : index
      %c0_22 = arith.constant 0 : index
      %19 = vector.load %arg23[%c0_21, %c0_22] : memref<4x768xf32, #tpu.memory_space<vmem>>, vector<4x768xf32>
      tpu.vector_store %arg23[%c0_21, %c0_22], %18 {strides = array<i32>} : memref<4x768xf32, #tpu.memory_space<vmem>>, vector<4x768xf32>,
    } else {
    }
    %c0 = arith.constant 0 : index
    %c0_1 = arith.constant 0 : index
    %3 = vector.load %arg22[%c0, %c0_1] : memref<4x768xf32, #tpu.memory_space<vmem>>, vector<4x768xf32>
    %c0_2 = arith.constant 0 : index
    %c0_3 = arith.constant 0 : index
    %c0_4 = arith.constant 0 : index
    %4 = vector.load %arg4[%c0_2, %c0_3, %c0_4] : memref<4x16x768xf32, #tpu.memory_space<vmem>>, vector<4x16x768xf32>
    %cst = arith.constant dense<0.000000e+00> : vector<4x768xf32>
    %5 = vector.multi_reduction <add>, %4, %cst [1] : vector<4x16x768xf32> to vector<4x768xf32>
    %6 = arith.addf %3, %5 : vector<4x768xf32>
    %c0_5 = arith.constant 0 : index
    %c0_6 = arith.constant 0 : index
    %7 = vector.load %arg22[%c0_5, %c0_6] : memref<4x768xf32, #tpu.memory_space<vmem>>, vector<4x768xf32>
    tpu.vector_store %arg22[%c0_5, %c0_6], %6 {strides = array<i32>} : memref<4x768xf32, #tpu.memory_space<vmem>>, vector<4x768xf32>,
    %c0_7 = arith.constant 0 : index
    %c0_8 = arith.constant 0 : index
    %8 = vector.load %arg23[%c0_7, %c0_8] : memref<4x768xf32, #tpu.memory_space<vmem>>, vector<4x768xf32>
    %c0_9 = arith.constant 0 : index
    %c0_10 = arith.constant 0 : index
    %c0_11 = arith.constant 0 : index
    %9 = vector.load %arg5[%c0_9, %c0_10, %c0_11] : memref<4x24x768xf32, #tpu.memory_space<vmem>>, vector<4x24x768xf32>
    %cst_12 = arith.constant dense<0.000000e+00> : vector<4x768xf32>
    %10 = vector.multi_reduction <add>, %9, %cst_12 [1] : vector<4x24x768xf32> to vector<4x768xf32>
    %11 = arith.addf %8, %10 : vector<4x768xf32>
    %c0_13 = arith.constant 0 : index
    %c0_14 = arith.constant 0 : index
    %12 = vector.load %arg23[%c0_13, %c0_14] : memref<4x768xf32, #tpu.memory_space<vmem>>, vector<4x768xf32>
    tpu.vector_store %arg23[%c0_13, %c0_14], %11 {strides = array<i32>} : memref<4x768xf32, #tpu.memory_space<vmem>>, vector<4x768xf32>,
    %c0_i32_15 = arith.constant 0 : i32
    %13 = arith.cmpi eq, %arg1, %c0_i32_15 : i32
    %14 = arith.extui %13 : i1 to i32
    %c0_i32_16 = arith.constant 0 : i32
    %15 = arith.cmpi ne, %14, %c0_i32_16 : i32
    scf.if %15 {
      %c0_17 = arith.constant 0 : index
      %c0_18 = arith.constant 0 : index
      %16 = vector.load %arg22[%c0_17, %c0_18] : memref<4x768xf32, #tpu.memory_space<vmem>>, vector<4x768xf32>
      %c0_19 = arith.constant 0 : index
      %17 = memref.load %arg3[%c0_19] : memref<2xf32, #tpu.memory_space<smem>>
      %18 = vector.broadcast %17 : f32 to vector<4x768xf32>
      %19 = arith.mulf %16, %18 : vector<4x768xf32>
      %c0_20 = arith.constant 0 : index
      %c0_21 = arith.constant 0 : index
      %20 = vector.load %arg23[%c0_20, %c0_21] : memref<4x768xf32, #tpu.memory_space<vmem>>, vector<4x768xf32>
      %c1 = arith.constant 1 : index
      %21 = memref.load %arg3[%c1] : memref<2xf32, #tpu.memory_space<smem>>
      %22 = vector.broadcast %21 : f32 to vector<4x768xf32>
      %23 = arith.mulf %20, %22 : vector<4x768xf32>
      %24 = tpu.concatenate %19, %23 in 0 : vector<4x768xf32>, vector<4x768xf32> -> vector<8x768xf32>
      %c0_22 = arith.constant 0 : index
      %c0_23 = arith.constant 0 : index
      %25 = vector.load %arg10[%c0_22, %c0_23] : memref<768x32xf32, #tpu.memory_space<vmem>>, vector<768x32xf32>
      %cst_24 = arith.constant dense<0.000000e+00> : vector<8x32xf32>
      %26 = tpu.matmul %24, %25, %cst_24 {dimension_numbers = #tpu.dot_dimension_numbers<[1], [0], [0], [1], [0, 0, 1, 1], [], []>} : vector<8x768xf32>, vector<768x32xf32>, vector<8x32xf32> -> vector<8x32xf32>
      %cst_25 = arith.constant 0.0416666679 : f32
      %27 = vector.broadcast %cst_25 : f32 to vector<8x32xf32>
      %28 = arith.mulf %26, %27 : vector<8x32xf32>
      %c0_26 = arith.constant 0 : index
      %c0_27 = arith.constant 0 : index
      %29 = vector.load %arg11[%c0_26, %c0_27] : memref<32x768xf32, #tpu.memory_space<vmem>>, vector<32x768xf32>
      %cst_28 = arith.constant dense<0.000000e+00> : vector<8x768xf32>
      %30 = tpu.matmul %28, %29, %cst_28 {dimension_numbers = #tpu.dot_dimension_numbers<[1], [0], [0], [1], [0, 0, 1, 1], [], []>} : vector<8x32xf32>, vector<32x768xf32>, vector<8x768xf32> -> vector<8x768xf32>
      %31 = arith.subf %24, %30 : vector<8x768xf32>
      %32 = arith.mulf %31, %31 : vector<8x768xf32>
      %c0_29 = arith.constant 0 : index
      %c0_30 = arith.constant 0 : index
      %33 = vector.load %arg10[%c0_29, %c0_30] : memref<768x32xf32, #tpu.memory_space<vmem>>, vector<768x32xf32>
      %cst_31 = arith.constant dense<0.000000e+00> : vector<8x32xf32>
      %34 = tpu.matmul %32, %33, %cst_31 {dimension_numbers = #tpu.dot_dimension_numbers<[1], [0], [0], [1], [0, 0, 1, 1], [], []>} : vector<8x768xf32>, vector<768x32xf32>, vector<8x32xf32> -> vector<8x32xf32>
      %cst_32 = arith.constant 0.0416666679 : f32
      %35 = vector.broadcast %cst_32 : f32 to vector<8x32xf32>
      %36 = arith.mulf %34, %35 : vector<8x32xf32>
      %c0_33 = arith.constant 0 : index
      %c0_34 = arith.constant 0 : index
      %37 = vector.load %arg11[%c0_33, %c0_34] : memref<32x768xf32, #tpu.memory_space<vmem>>, vector<32x768xf32>
      %cst_35 = arith.constant dense<0.000000e+00> : vector<8x768xf32>
      %38 = tpu.matmul %36, %37, %cst_35 {dimension_numbers = #tpu.dot_dimension_numbers<[1], [0], [0], [1], [0, 0, 1, 1], [], []>} : vector<8x32xf32>, vector<32x768xf32>, vector<8x768xf32> -> vector<8x768xf32>
      %cst_36 = arith.constant 9.99999974E-6 : f32
      %39 = vector.broadcast %cst_36 : f32 to vector<8x768xf32>
      %40 = arith.addf %38, %39 : vector<8x768xf32>
      %41 = math.rsqrt %40 : vector<8x768xf32>
      %42 = arith.mulf %31, %41 : vector<8x768xf32>
      %43 = vector.extract_strided_slice %42 {offsets = [0, 0], sizes = [4, 768], strides = [1, 1]} : vector<8x768xf32> to vector<4x768xf32>
      %c0_37 = arith.constant 0 : index
      %c0_38 = arith.constant 0 : index
      %44 = vector.load %arg6[%c0_37, %c0_38] : memref<1x768xf32, #tpu.memory_space<vmem>>, vector<1x768xf32>
      %45 = vector.broadcast %44 : vector<1x768xf32> to vector<4x768xf32>
      %46 = arith.mulf %43, %45 : vector<4x768xf32>
      %c0_39 = arith.constant 0 : index
      %c0_40 = arith.constant 0 : index
      %47 = vector.load %arg7[%c0_39, %c0_40] : memref<1x768xf32, #tpu.memory_space<vmem>>, vector<1x768xf32>
      %48 = vector.broadcast %47 : vector<1x768xf32> to vector<4x768xf32>
      %49 = arith.addf %46, %48 : vector<4x768xf32>
      %50 = vector.extract_strided_slice %42 {offsets = [4, 0], sizes = [4, 768], strides = [1, 1]} : vector<8x768xf32> to vector<4x768xf32>
      %c0_41 = arith.constant 0 : index
      %c0_42 = arith.constant 0 : index
      %51 = vector.load %arg8[%c0_41, %c0_42] : memref<1x768xf32, #tpu.memory_space<vmem>>, vector<1x768xf32>
      %52 = vector.broadcast %51 : vector<1x768xf32> to vector<4x768xf32>
      %53 = arith.mulf %50, %52 : vector<4x768xf32>
      %c0_43 = arith.constant 0 : index
      %c0_44 = arith.constant 0 : index
      %54 = vector.load %arg9[%c0_43, %c0_44] : memref<1x768xf32, #tpu.memory_space<vmem>>, vector<1x768xf32>
      %55 = vector.broadcast %54 : vector<1x768xf32> to vector<4x768xf32>
      %56 = arith.addf %53, %55 : vector<4x768xf32>
      %57 = arith.truncf %49 : vector<4x768xf32> to vector<4x768xbf16>
      %c0_45 = arith.constant 0 : index
      %c0_46 = arith.constant 0 : index
      %58 = vector.load %arg12[%c0_45, %c0_46] : memref<768x640xbf16, #tpu.memory_space<vmem>>, vector<768x640xbf16>
      %cst_47 = arith.constant dense<0.000000e+00> : vector<4x640xf32>
      %59 = tpu.matmul %57, %58, %cst_47 {dimension_numbers = #tpu.dot_dimension_numbers<[1], [0], [0], [1], [0, 0, 1, 1], [], []>} : vector<4x768xbf16>, vector<768x640xbf16>, vector<4x640xf32> -> vector<4x640xf32>
      %c0_48 = arith.constant 0 : index
      %c0_49 = arith.constant 0 : index
      %60 = vector.load %arg13[%c0_48, %c0_49] : memref<1x640xf32, #tpu.memory_space<vmem>>, vector<1x640xf32>
      %61 = vector.broadcast %60 : vector<1x640xf32> to vector<4x640xf32>
      %62 = arith.addf %59, %61 : vector<4x640xf32>
      %63 = arith.truncf %56 : vector<4x768xf32> to vector<4x768xbf16>
      %c0_50 = arith.constant 0 : index
      %c0_51 = arith.constant 0 : index
      %64 = vector.load %arg14[%c0_50, %c0_51] : memref<768x640xbf16, #tpu.memory_space<vmem>>, vector<768x640xbf16>
      %cst_52 = arith.constant dense<0.000000e+00> : vector<4x640xf32>
      %65 = tpu.matmul %63, %64, %cst_52 {dimension_numbers = #tpu.dot_dimension_numbers<[1], [0], [0], [1], [0, 0, 1, 1], [], []>} : vector<4x768xbf16>, vector<768x640xbf16>, vector<4x640xf32> -> vector<4x640xf32>
      %c0_53 = arith.constant 0 : index
      %c0_54 = arith.constant 0 : index
      %66 = vector.load %arg15[%c0_53, %c0_54] : memref<1x640xf32, #tpu.memory_space<vmem>>, vector<1x640xf32>
      %67 = vector.broadcast %66 : vector<1x640xf32> to vector<4x640xf32>
      %68 = arith.addf %65, %67 : vector<4x640xf32>
      %69 = vector.extract_strided_slice %62 {offsets = [0, 0], sizes = [4, 512], strides = [1, 1]} : vector<4x640xf32> to vector<4x512xf32>
      %70 = vector.extract_strided_slice %68 {offsets = [0, 0], sizes = [4, 512], strides = [1, 1]} : vector<4x640xf32> to vector<4x512xf32>
      %71 = vector.extract_strided_slice %62 {offsets = [0, 512], sizes = [4, 1], strides = [1, 1]} : vector<4x640xf32> to vector<4x1xf32>
      %72 = vector.extract_strided_slice %68 {offsets = [0, 512], sizes = [4, 1], strides = [1, 1]} : vector<4x640xf32> to vector<4x1xf32>
      %73 = arith.maximumf %71, %72 : vector<4x1xf32>
      %74 = arith.subf %71, %73 : vector<4x1xf32>
      %75 = math.exp %74 : vector<4x1xf32>
      %76 = arith.subf %72, %73 : vector<4x1xf32>
      %77 = math.exp %76 : vector<4x1xf32>
      %78 = arith.addf %75, %77 : vector<4x1xf32>
      %cst_55 = arith.constant 1.000000e+00 : f32
      %79 = vector.broadcast %cst_55 : f32 to vector<4x1xf32>
      %80 = arith.divf %79, %78 : vector<4x1xf32>
      %81 = arith.mulf %75, %80 : vector<4x1xf32>
      %82 = arith.mulf %77, %80 : vector<4x1xf32>
      %83 = vector.broadcast %81 : vector<4x1xf32> to vector<4x512xf32>
      %84 = arith.mulf %83, %69 : vector<4x512xf32>
      %85 = arith.truncf %84 : vector<4x512xf32> to vector<4x512xbf16>
      %c0_56 = arith.constant 0 : index
      %c0_57 = arith.constant 0 : index
      %86 = vector.load %arg16[%c0_56, %c0_57] : memref<512x256xbf16, #tpu.memory_space<vmem>>, vector<512x256xbf16>
      %cst_58 = arith.constant dense<0.000000e+00> : vector<4x256xf32>
      %87 = tpu.matmul %85, %86, %cst_58 {dimension_numbers = #tpu.dot_dimension_numbers<[1], [0], [0], [1], [0, 0, 1, 1], [], []>} : vector<4x512xbf16>, vector<512x256xbf16>, vector<4x256xf32> -> vector<4x256xf32>
      %88 = vector.broadcast %82 : vector<4x1xf32> to vector<4x512xf32>
      %89 = arith.mulf %88, %70 : vector<4x512xf32>
      %90 = arith.truncf %89 : vector<4x512xf32> to vector<4x512xbf16>
      %c0_59 = arith.constant 0 : index
      %c0_60 = arith.constant 0 : index
      %91 = vector.load %arg17[%c0_59, %c0_60] : memref<512x256xbf16, #tpu.memory_space<vmem>>, vector<512x256xbf16>
      %cst_61 = arith.constant dense<0.000000e+00> : vector<4x256xf32>
      %92 = tpu.matmul %90, %91, %cst_61 {dimension_numbers = #tpu.dot_dimension_numbers<[1], [0], [0], [1], [0, 0, 1, 1], [], []>} : vector<4x512xbf16>, vector<512x256xbf16>, vector<4x256xf32> -> vector<4x256xf32>
      %93 = arith.addf %87, %92 : vector<4x256xf32>
      %c0_62 = arith.constant 0 : index
      %c0_63 = arith.constant 0 : index
      %94 = vector.load %arg18[%c0_62, %c0_63] : memref<1x256xf32, #tpu.memory_space<vmem>>, vector<1x256xf32>
      %95 = vector.broadcast %94 : vector<1x256xf32> to vector<4x256xf32>
      %96 = arith.addf %93, %95 : vector<4x256xf32>
      %cst_64 = arith.constant 0.000000e+00 : f32
      %97 = vector.broadcast %cst_64 : f32 to vector<4x256xf32>
      %98 = arith.maximumf %96, %97 : vector<4x256xf32>
      %99 = arith.truncf %98 : vector<4x256xf32> to vector<4x256xbf16>
      %c0_65 = arith.constant 0 : index
      %c0_66 = arith.constant 0 : index
      %100 = vector.load %arg19[%c0_65, %c0_66] : memref<256x128xbf16, #tpu.memory_space<vmem>>, vector<256x128xbf16>
      %cst_67 = arith.constant dense<0.000000e+00> : vector<4x128xf32>
      %101 = tpu.matmul %99, %100, %cst_67 {dimension_numbers = #tpu.dot_dimension_numbers<[1], [0], [0], [1], [0, 0, 1, 1], [], []>} : vector<4x256xbf16>, vector<256x128xbf16>, vector<4x128xf32> -> vector<4x128xf32>
      %c0_68 = arith.constant 0 : index
      %c0_69 = arith.constant 0 : index
      %102 = vector.load %arg20[%c0_68, %c0_69] : memref<1x128xf32, #tpu.memory_space<vmem>>, vector<1x128xf32>
      %103 = vector.broadcast %102 : vector<1x128xf32> to vector<4x128xf32>
      %104 = arith.addf %101, %103 : vector<4x128xf32>
      %c0_70 = arith.constant 0 : index
      %c0_71 = arith.constant 0 : index
      %105 = vector.load %arg21[%c0_70, %c0_71] : memref<4x128xf32, #tpu.memory_space<vmem>>, vector<4x128xf32>
      tpu.vector_store %arg21[%c0_70, %c0_71], %104 {strides = array<i32>} : memref<4x128xf32, #tpu.memory_space<vmem>>, vector<4x128xf32>,
    } else {
    }
    return
  }
  func.func @transform_0(%arg0: i32, %arg1: i32) -> i32 {
    %c0_i32 = arith.constant 0 : i32
    %c0_i32_0 = arith.constant 0 : i32
    return %c0_i32 : i32
  }
  func.func @transform_1(%arg0: i32, %arg1: i32) -> i32 {
    %c0_i32 = arith.constant 0 : i32
    %c0_i32_0 = arith.constant 0 : i32
    return %c0_i32 : i32
  }
  func.func @transform_2(%arg0: i32, %arg1: i32) -> (i32, i32, i32) {
    %c0_i32 = arith.constant 0 : i32
    %c0_i32_0 = arith.constant 0 : i32
    return %arg0, %arg1, %c0_i32 : i32, i32, i32
  }
  func.func @transform_3(%arg0: i32, %arg1: i32) -> (i32, i32, i32) {
    %c0_i32 = arith.constant 0 : i32
    %c0_i32_0 = arith.constant 0 : i32
    return %arg0, %arg1, %c0_i32 : i32, i32, i32
  }
  func.func @transform_4(%arg0: i32, %arg1: i32) -> (i32, i32) {
    %c0_i32 = arith.constant 0 : i32
    %c0_i32_0 = arith.constant 0 : i32
    %c0_i32_1 = arith.constant 0 : i32
    return %c0_i32, %c0_i32_0 : i32, i32
  }
  func.func @transform_5(%arg0: i32, %arg1: i32) -> (i32, i32) {
    %c0_i32 = arith.constant 0 : i32
    %c0_i32_0 = arith.constant 0 : i32
    %c0_i32_1 = arith.constant 0 : i32
    return %c0_i32, %c0_i32_0 : i32, i32
  }
  func.func @transform_6(%arg0: i32, %arg1: i32) -> (i32, i32) {
    %c0_i32 = arith.constant 0 : i32
    %c0_i32_0 = arith.constant 0 : i32
    %c0_i32_1 = arith.constant 0 : i32
    return %c0_i32, %c0_i32_0 : i32, i32
  }
  func.func @transform_7(%arg0: i32, %arg1: i32) -> (i32, i32) {
    %c0_i32 = arith.constant 0 : i32
    %c0_i32_0 = arith.constant 0 : i32
    %c0_i32_1 = arith.constant 0 : i32
    return %c0_i32, %c0_i32_0 : i32, i32
  }
  func.func @transform_8(%arg0: i32, %arg1: i32) -> (i32, i32) {
    %c0_i32 = arith.constant 0 : i32
    %c0_i32_0 = arith.constant 0 : i32
    %c0_i32_1 = arith.constant 0 : i32
    return %c0_i32, %c0_i32_0 : i32, i32
  }
  func.func @transform_9(%arg0: i32, %arg1: i32) -> (i32, i32) {
    %c0_i32 = arith.constant 0 : i32
    %c0_i32_0 = arith.constant 0 : i32
    %c0_i32_1 = arith.constant 0 : i32
    return %c0_i32, %c0_i32_0 : i32, i32
  }
  func.func @transform_10(%arg0: i32, %arg1: i32) -> (i32, i32) {
    %c0_i32 = arith.constant 0 : i32
    %c0_i32_0 = arith.constant 0 : i32
    %c0_i32_1 = arith.constant 0 : i32
    return %c0_i32, %c0_i32_0 : i32, i32
  }
  func.func @transform_11(%arg0: i32, %arg1: i32) -> (i32, i32) {
    %c0_i32 = arith.constant 0 : i32
    %c0_i32_0 = arith.constant 0 : i32
    %c0_i32_1 = arith.constant 0 : i32
    return %c0_i32, %c0_i32_0 : i32, i32
  }
  func.func @transform_12(%arg0: i32, %arg1: i32) -> (i32, i32) {
    %c0_i32 = arith.constant 0 : i32
    %c0_i32_0 = arith.constant 0 : i32
    %c0_i32_1 = arith.constant 0 : i32
    return %c0_i32, %c0_i32_0 : i32, i32
  }
  func.func @transform_13(%arg0: i32, %arg1: i32) -> (i32, i32) {
    %c0_i32 = arith.constant 0 : i32
    %c0_i32_0 = arith.constant 0 : i32
    %c0_i32_1 = arith.constant 0 : i32
    return %c0_i32, %c0_i32_0 : i32, i32
  }
  func.func @transform_14(%arg0: i32, %arg1: i32) -> (i32, i32) {
    %c0_i32 = arith.constant 0 : i32
    %c0_i32_0 = arith.constant 0 : i32
    %c0_i32_1 = arith.constant 0 : i32
    return %c0_i32, %c0_i32_0 : i32, i32
  }
  func.func @transform_15(%arg0: i32, %arg1: i32) -> (i32, i32) {
    %c0_i32 = arith.constant 0 : i32
    %c0_i32_0 = arith.constant 0 : i32
    %c0_i32_1 = arith.constant 0 : i32
    return %c0_i32, %c0_i32_0 : i32, i32
  }
  func.func @transform_16(%arg0: i32, %arg1: i32) -> (i32, i32) {
    %c0_i32 = arith.constant 0 : i32
    %c0_i32_0 = arith.constant 0 : i32
    %c0_i32_1 = arith.constant 0 : i32
    return %c0_i32, %c0_i32_0 : i32, i32
  }
  func.func @transform_17(%arg0: i32, %arg1: i32) -> (i32, i32) {
    %c0_i32 = arith.constant 0 : i32
    %c0_i32_0 = arith.constant 0 : i32
    %c0_i32_1 = arith.constant 0 : i32
    return %c0_i32, %c0_i32_0 : i32, i32
  }
  func.func @transform_18(%arg0: i32, %arg1: i32) -> (i32, i32) {
    %c0_i32 = arith.constant 0 : i32
    %c0_i32_0 = arith.constant 0 : i32
    %c0_i32_1 = arith.constant 0 : i32
    return %c0_i32, %c0_i32_0 : i32, i32
  }
  func.func @transform_19(%arg0: i32, %arg1: i32) -> (i32, i32) {
    %c0_i32 = arith.constant 0 : i32
    %c0_i32_0 = arith.constant 0 : i32
    return %arg0, %c0_i32 : i32, i32
  }
}

</mosaic_0001>

<bundles_post_ra>
// kernel: tpu_custom_call.1
= control target key start
LH: loop header
LB: loop body
LE: loop exit
PB: predicated region body
PF: predicated region fallthrough
CT: control target
= control target key end

     0   :  { %s12235_s0 = inlined_call_operand.hbm [shape: s32[2], index: 0, kind: input, shape index: {}]   ;;  %s12236_s1 = inlined_call_operand.hbm [shape: f32[2], index: 1, kind: input, shape index: {}]   ;;  %s12237_s2 = inlined_call_operand.vmem [shape: f32[4,16,768], index: 2, kind: input, shape index: {}]   ;;  %s12238_s3 = inlined_call_operand.vmem [shape: f32[4,24,768], index: 3, kind: input, shape index: {}]   ;;  %s12239_s4 = inlined_call_operand.hbm [shape: f32[1,768], index: 4, kind: input, shape index: {}]   ;;  %s12240_s5 = inlined_call_operand.hbm [shape: f32[1,768], index: 5, kind: input, shape index: {}]   ;;  %s12241_s6 = inlined_call_operand.hbm [shape: f32[1,768], index: 6, kind: input, shape index: {}]   ;;  %s12242_s7 = inlined_call_operand.hbm [shape: f32[1,768], index: 7, kind: input, shape index: {}]   ;;  %s12243_s8 = inlined_call_operand.vmem [shape: f32[768,32], index: 8, kind: input, shape index: {}]   ;;  %s12244_s9 = inlined_call_operand.hbm [shape: f32[32,768], index: 9, kind: input, shape index: {}]   ;;  %s12245_s10 = inlined_call_operand.hbm [shape: bf16[768,640], index: 10, kind: input, shape index: {}]   ;;  %s12246_s11 = inlined_call_operand.vmem [shape: f32[1,640], index: 11, kind: input, shape index: {}]   ;;  %s12247_s12 = inlined_call_operand.hbm [shape: bf16[768,640], index: 12, kind: input, shape index: {}]   ;;  %s12248_s13 = inlined_call_operand.vmem [shape: f32[1,640], index: 13, kind: input, shape index: {}]   ;;  %s12249_s14 = inlined_call_operand.hbm [shape: bf16[512,256], index: 14, kind: input, shape index: {}]   ;;  %s12250_s15 = inlined_call_operand.hbm [shape: bf16[512,256], index: 15, kind: input, shape index: {}]   ;;  %s12251_s16 = inlined_call_operand.hbm [shape: f32[1,256], index: 16, kind: input, shape index: {}]   ;;  %s12252_s17 = inlined_call_operand.hbm [shape: bf16[256,128], index: 17, kind: input, shape index: {}]   ;;  %s12253_s18 = inlined_call_operand.hbm [shape: f32[1,128], index: 18, kind: input, shape index: {}]   ;;  %s12254_s19 = inlined_call_operand.hbm [shape: f32[4,128], index: 19, kind: output, shape index: {}]  }
   0x1   :  { %12258 = sst [smem:[#allocation39_spill]] %s12235_s0 }
   0x2   :  { %12259 = sst [smem:[#allocation40_spill]] %s12236_s1 }
   0x3   :  { %12260 = sst [smem:[#allocation41_spill]] %s12237_s2 }
   0x4   :  { %12261 = sst [smem:[#allocation42_spill]] %s12238_s3 }
   0x5   :  { %24 = vsyncpa [#allocation7], 0 }
   0x6   :  { %25 = vsyncpa [#allocation9], 0 }
   0x7   :  { %26 = vsyncpa [#allocation5], 0 }
   0x8   :  { %27 = vsyncpa [#allocation12], 0 }
   0x9   :  { %28 = vsyncpa [#allocation15], 0 }
   0xa   :  { %29 = vsyncpa [#allocation18], 0 }
   0xb   :  { %30 = vsyncpa [#allocation21], 0 }
   0xc   :  { %31 = vsyncpa [#allocation24], 0 }
   0xd   :  { %32 = vsyncpa [#allocation27], 0  ;;  %s72_s20 = sshll.u32 %s12240_s5, 4  ;;  %s73_s20 = int_to_ptr.hbm [resolvable:$true] %s72_s20 }
   0xe   :  { %33 = vsyncpa [#allocation6], 0  ;;  %s10512_s21 = smov [#allocation11]   ;;  %s94_s23 = sshll.u32 %s12242_s7, 4  ;;  %s95_s23 = int_to_ptr.hbm [resolvable:$true] %s94_s23 }
   0xf   :  { %s74_s1 = sshll.u32 %s10512_s21, 4  ;;  %s10513_s24 = smov [#allocation14]   ;;  %s75_s1 = int_to_ptr.vmem [resolvable:$true] %s74_s1 }
  0x10   :  { %77 = dma.hbm_to_vmem [thread:$0]  %s73_s20, 96, %s75_s1, [#allocation12]  }
  0x11   :  { %s96_s25 = sshll.u32 %s10513_s24, 4  ;;  %s119_s27 = sshll.u32 %s12245_s10, 4  ;;  %s97_s25 = int_to_ptr.vmem [resolvable:$true] %s96_s25  ;;  %s120_s27 = int_to_ptr.hbm [resolvable:$true] %s119_s27 }
  0x12   :  { %99 = dma.hbm_to_vmem [thread:$0]  %s95_s23, 96, %s97_s25, [#allocation15]  }
  0x13   :  { %s10514_s5 = smov [#allocation17]   ;;  %s149_s30 = sshll.u32 %s12249_s14, 4  ;;  %s150_s30 = int_to_ptr.hbm [resolvable:$true] %s149_s30 }
  0x14   :  { %s121_s28 = sshll.u32 %s10514_s5, 4  ;;  %s10515_s21 = smov 320   ;;  %s122_s28 = int_to_ptr.vmem [resolvable:$true] %s121_s28 }
  0x15   :  { %s10516_s7 = smov 20   ;;  %s10517_s20 = smov [#allocation20]  }
  0x16   :  { %127 = dma.hbm_to_vmem [thread:$0]  %s120_s27, 30720, %s122_s28, [#allocation18], %s10515_s21, %s10515_s21, %s10516_s7  }
  0x17   :  { %s151_s1 = sshll.u32 %s10517_s20, 4  ;;  %s12257_s10 = smov 128   ;;  %s152_s1 = int_to_ptr.vmem [resolvable:$true] %s151_s1 }
  0x18   :  { %s10519_s22 = smov 8   ;;  %s176_s14 = sshll.u32 %s12251_s16, 4  ;;  %s177_s14 = int_to_ptr.hbm [resolvable:$true] %s176_s14 }
  0x19   :  { %157 = dma.hbm_to_vmem [thread:$0]  %s150_s30, 8192, %s152_s1, [#allocation21], %s12257_s10, %s12257_s10, %s10519_s22  }
  0x1a   :  { %s10520_s24 = smov [#allocation23]   ;;  %s12262_s27 = sld [smem:[#allocation39_spill]] }
  0x1b   :  { %s178_s25 = sshll.u32 %s10520_s24, 4  ;;  %s10521_s28 = smov [#allocation4]   ;;  %s179_s25 = int_to_ptr.vmem [resolvable:$true] %s178_s25 }
  0x1c   :  { %181 = dma.hbm_to_vmem [thread:$0]  %s177_s14, 32, %s179_s25, [#allocation24]  }
  0x1d   :  { %s12263_s20 = sld [smem:[#allocation40_spill]]  ;;  %s61_s16 = sshll.u32 %s12239_s4, 4  ;;  %s62_s16 = int_to_ptr.hbm [resolvable:$true] %s61_s16 }
  0x1e   :  { %s10522_s23 = smov [#allocation8]   ;;  %s10523_s24 = smov [#allocation10]  }
  0x1f   :  { %s63_s10 = sshll.u32 %s10523_s24, 4  ;;  %s83_s14 = sshll.u32 %s12241_s6, 4  ;;  %s64_s10 = int_to_ptr.vmem [resolvable:$true] %s63_s10  ;;  %s84_s14 = int_to_ptr.hbm [resolvable:$true] %s83_s14 }
  0x20   :  { %s39_s5 = sshll.u32 %s12262_s27, 4  ;;  %s10525_s4 = smov [#allocation16]   ;;  %s40_s5 = int_to_ptr.hbm [resolvable:$true] %s39_s5 }
  0x21   :  { %42 = dma.hbm_to_smem %s40_s5, 16, %s10521_s28, [#allocation7]  }
  0x22   :  { %66 = dma.hbm_to_vmem [thread:$0]  %s62_s16, 96, %s64_s10, [#allocation5]  }
  0x23   :  { %s48_s30 = sshll.u32 %s12263_s20, 4  ;;  %s106_s5 = sshll.u32 %s12244_s9, 4  ;;  %s49_s30 = int_to_ptr.hbm [resolvable:$true] %s48_s30  ;;  %s107_s5 = int_to_ptr.hbm [resolvable:$true] %s106_s5 }
  0x24   :  { %51 = dma.hbm_to_smem %s49_s30, 16, %s10522_s23, [#allocation9]  }
  0x25   :  { %s10524_s28 = smov [#allocation13]   ;;  %s108_s0 = sshll.u32 %s10525_s4, 4  ;;  %s109_s0 = int_to_ptr.vmem [resolvable:$true] %s108_s0 }
  0x26   :  { %s85_s29 = sshll.u32 %s10524_s28, 4  ;;  %s10526_s20 = smov 768   ;;  %s86_s29 = int_to_ptr.vmem [resolvable:$true] %s85_s29 }
  0x27   :  { %88 = dma.hbm_to_vmem [thread:$0]  %s84_s14, 96, %s86_s29, [#allocation12]  }
  0x28   :  { %s10527_s30 = smov 48   ;;  %s134_s2 = sshll.u32 %s12247_s12, 4  ;;  %s135_s2 = int_to_ptr.hbm [resolvable:$true] %s134_s2 }
  0x29   :  { %114 = dma.hbm_to_vmem [thread:$0]  %s107_s5, 3072, %s109_s0, [#allocation15], %s10526_s20, %s10526_s20, %s10527_s30  }
  0x2a   :  { %s10528_s10 = smov [#allocation19]   ;;  %s162_s24 = sshll.u32 %s12250_s15, 4  ;;  %s163_s24 = int_to_ptr.hbm [resolvable:$true] %s162_s24 }
  0x2b   :  { %s136_s16 = sshll.u32 %s10528_s10, 4  ;;  %s10529_s3 = smov [#allocation22]   ;;  %s137_s16 = int_to_ptr.vmem [resolvable:$true] %s136_s16 }
  0x2c   :  { %142 = dma.hbm_to_vmem [thread:$0]  %s135_s2, 30720, %s137_s16, [#allocation18], %s10515_s21, %s10515_s21, %s10516_s7  }
  0x2d   :  { %s164_s26 = sshll.u32 %s10529_s3, 4  ;;  %s186_s27 = sshll.u32 %s12252_s17, 4  ;;  %s165_s26 = int_to_ptr.vmem [resolvable:$true] %s164_s26  ;;  %s187_s27 = int_to_ptr.hbm [resolvable:$true] %s186_s27 }
  0x2e   :  { %s12264_s12 = smov 128   ;;  %s10530_s5 = smov [#allocation25]  }
  0x2f   :  { %170 = dma.hbm_to_vmem [thread:$0]  %s163_s24, 8192, %s165_s26, [#allocation21], %s12264_s12, %s12264_s12, %s10519_s22  }
  0x30   :  { %s188_s28 = sshll.u32 %s10530_s5, 4  ;;  %s200_s21 = sshll.u32 %s12253_s18, 4  ;;  %s189_s28 = int_to_ptr.vmem [resolvable:$true] %s188_s28  ;;  %s201_s21 = int_to_ptr.hbm [resolvable:$true] %s200_s21 }
  0x31   :  { %s10531_s7 = smov 64   ;;  %s10532_s4 = smov 4  }
  0x32   :  { %194 = dma.hbm_to_vmem [thread:$0]  %s187_s27, 2048, %s189_s28, [#allocation24], %s10531_s7, %s10531_s7, %s10532_s4  }
  0x33   :  { %s10533_s0 = smov [#allocation26]  }
  0x34   :  { %s202_s20 = sshll.u32 %s10533_s0, 4  ;;  %s203_s20 = int_to_ptr.vmem [resolvable:$true] %s202_s20 }
  0x35   :  { %205 = dma.hbm_to_vmem [thread:$0]  %s201_s21, 16, %s203_s20, [#allocation27]  }
  0x36   :  { %10492 = dma.done.wait [#allocation7], 16  }
  0x37   :  { %10493 = vsyncadd [#allocation7], 4294967280 }
  0x38   :  { %10494 = dma.done.wait [#allocation9], 16  }
  0x39   :  { %10495 = vsyncadd [#allocation9], 4294967280 }
  0x3a   :  { %10496 = dma.done.wait [#allocation5], 96  }
  0x3b   :  { %10497 = vsyncadd [#allocation5], 4294967200 }
  0x3c   :  { %10498 = dma.done.wait [#allocation12], 192  }
  0x3d   :  { %10499 = vsyncadd [#allocation12], 4294967104 }
  0x3e   :  { %10500 = dma.done.wait [#allocation15], 3168  }
  0x3f   :  { %10501 = vsyncadd [#allocation15], 4294964128 }
  0x40   :  { %10502 = dma.done.wait [#allocation18], 61440  }
  0x41   :  { %10503 = vsyncadd [#allocation18], 4294905856 }
  0x42   :  { %10504 = dma.done.wait [#allocation21], 16384  }
  0x43   :  { %10505 = vsyncadd [#allocation21], 4294950912 }
  0x44   :  { %10506 = dma.done.wait [#allocation24], 2080  }
  0x45   :  { %10507 = vsyncadd [#allocation24], 4294965216 }
  0x46   :  { %10508 = dma.done.wait [#allocation27], 16  }
  0x47   :  { %10509 = vsyncadd [#allocation27], 4294967280 }
  0x48   :  { %262 = sfence }
  0x49   :  { %v1015_v0 = vld [vmem:[%s12243_s8 + $0x78] sm:$0xff]  ;;  %v1014_v1 = vld [vmem:[%s12243_s8 + $0x70] sm:$0xff]  ;;  %v1013_v4 = vld [vmem:[%s12243_s8 + $0x68] sm:$0xff]  ;;  %s12265_s23 = sld [smem:[#allocation41_spill]]  ;;  %vm528_vm0 = vcmask 1043456   ;;  %vm542_vm1 = vcmask 1041409  }
  0x4a   :  { %v1031_v2 = vld [vmem:[%s12243_s8 + $0xf8] sm:$0xff]  ;;  %1096 = vmatpush.msra.mxu0 %v1015_v0  ;;  %v1030_v3 = vld [vmem:[%s12243_s8 + $0xf0] sm:$0xff]  ;;  %v1029_v5 = vld [vmem:[%s12243_s8 + $0xe8] sm:$0xff]  ;;  %vm544_vm2 = vcmask 1045509   ;;  %vm547_vm3 = vcmask 1042434   ;;  %vm549_vm4 = vcmask 1046534  }
  0x4b   :  { %1116 = vmatpush.msra.mxu1 %v1031_v2  ;;  %v1012_v6 = vld [vmem:[%s12243_s8 + $0x60] sm:$0xff]  ;;  %v1011_v8 = vld [vmem:[%s12243_s8 + $0x58] sm:$0xff]  ;;  %v1046_v11 = vld [vmem:[%s12243_s8 + $0x170] sm:$0xff]  ;;  %s12266_s4 = sld [smem:[#allocation42_spill]]  ;;  %vm552_vm5 = vcmask 1043459   ;;  %vm554_vm6 = vcmask 1047559  }
  0x4c   :  { %1097 = vmatpush.msra.mxu0 %v1014_v1  ;;  %v1028_v7 = vld [vmem:[%s12243_s8 + $0xe0] sm:$0xff]  ;;  %v1027_v9 = vld [vmem:[%s12243_s8 + $0xd8] sm:$0xff]  ;;  %v1010_v13 = vld [vmem:[%s12243_s8 + $0x50] sm:$0xff]  ;;  %s11236_s28 = sld [smem:[#allocation8]]  ;;  %vm1241_vm7 = vcmask 261120  }
  0x4d   :  { %1117 = vmatpush.msra.mxu1 %v1030_v3  ;;  %v1047_v10 = vld [vmem:[%s12243_s8 + $0x178] sm:$0xff]  ;;  %v1026_v14 = vld [vmem:[%s12243_s8 + $0xd0] sm:$0xff]  ;;  %v1045_v15 = vld [vmem:[%s12243_s8 + $0x168] sm:$0xff]  ;;  %s11253_s20 = sld [smem:[#allocation8 + $0x1]] }
  0x4e   :  { %1098 = vmatpush.msra.mxu0 %v1013_v4  ;;  %v1063_v12 = vld [vmem:[%s12243_s8 + $0x1f8] sm:$0xff]  ;;  %1136 = vmatpush.msra.mxu2 %v1047_v10  ;;  %v1062_v16 = vld [vmem:[%s12243_s8 + $0x1f0] sm:$0xff]  ;;  %v1009_v17 = vld [vmem:[%s12243_s8 + $0x48] sm:$0xff] }
  0x4f   :  { %1118 = vmatpush.msra.mxu1 %v1029_v5  ;;  %1156 = vmatpush.msra.mxu3 %v1063_v12  ;;  %v1025_v18 = vld [vmem:[%s12243_s8 + $0xc8] sm:$0xff]  ;;  %v1044_v20 = vld [vmem:[%s12243_s8 + $0x160] sm:$0xff]  ;;  %v1043_v24 = vld [vmem:[%s12243_s8 + $0x158] sm:$0xff] }
  0x50   :  { %1099 = vmatpush.msra.mxu0 %v1012_v6  ;;  %1137 = vmatpush.msra.mxu2 %v1046_v11  ;;  %v1061_v19 = vld [vmem:[%s12243_s8 + $0x1e8] sm:$0xff]  ;;  %v1060_v21 = vld [vmem:[%s12243_s8 + $0x1e0] sm:$0xff]  ;;  %v1059_v25 = vld [vmem:[%s12243_s8 + $0x1d8] sm:$0xff] }
  0x51   :  { %1119 = vmatpush.msra.mxu1 %v1028_v7  ;;  %1157 = vmatpush.msra.mxu3 %v1062_v16  ;;  %v1008_v22 = vld [vmem:[%s12243_s8 + $0x40] sm:$0xff]  ;;  %v1007_v26 = vld [vmem:[%s12243_s8 + $0x38] sm:$0xff]  ;;  %v1042_v28 = vld [vmem:[%s12243_s8 + $0x150] sm:$0xff] }
  0x52   :  { %1100 = vmatpush.msra.mxu0 %v1011_v8  ;;  %v1024_v23 = vld [vmem:[%s12243_s8 + $0xc0] sm:$0xff]  ;;  %1138 = vmatpush.msra.mxu2 %v1045_v15  ;;  %v1023_v27 = vld [vmem:[%s12243_s8 + $0xb8] sm:$0xff]  ;;  %v1058_v29 = vld [vmem:[%s12243_s8 + $0x1d0] sm:$0xff] }
  0x53   :  { %1120 = vmatpush.msra.mxu1 %v1027_v9  ;;  %1158 = vmatpush.msra.mxu3 %v1061_v19  ;;  %v1006_v30 = vld [vmem:[%s12243_s8 + $0x30] sm:$0xff]  ;;  %v1041_v32 = vld [vmem:[%s12243_s8 + $0x148] sm:$0xff]  ;;  %v1040_v36 = vld [vmem:[%s12243_s8 + $0x140] sm:$0xff] }
  0x54   :  { %1101 = vmatpush.msra.mxu0 %v1010_v13  ;;  %1139 = vmatpush.msra.mxu2 %v1044_v20  ;;  %v1022_v31 = vld [vmem:[%s12243_s8 + $0xb0] sm:$0xff]  ;;  %v1057_v33 = vld [vmem:[%s12243_s8 + $0x1c8] sm:$0xff]  ;;  %v1056_v37 = vld [vmem:[%s12243_s8 + $0x1c0] sm:$0xff] }
  0x55   :  { %1121 = vmatpush.msra.mxu1 %v1026_v14  ;;  %1159 = vmatpush.msra.mxu3 %v1060_v21  ;;  %v1005_v34 = vld [vmem:[%s12243_s8 + $0x28] sm:$0xff]  ;;  %v1004_v38 = vld [vmem:[%s12243_s8 + $0x20] sm:$0xff]  ;;  %v1039_v40 = vld [vmem:[%s12243_s8 + $0x138] sm:$0xff] }
  0x56   :  { %1102 = vmatpush.msra.mxu0 %v1009_v17  ;;  %1140 = vmatpush.msra.mxu2 %v1043_v24  ;;  %v1021_v35 = vld [vmem:[%s12243_s8 + $0xa8] sm:$0xff]  ;;  %v1020_v39 = vld [vmem:[%s12243_s8 + $0xa0] sm:$0xff]  ;;  %v1055_v41 = vld [vmem:[%s12243_s8 + $0x1b8] sm:$0xff] }
  0x57   :  { %1122 = vmatpush.msra.mxu1 %v1025_v18  ;;  %1160 = vmatpush.msra.mxu3 %v1059_v25  ;;  %v1003_v42 = vld [vmem:[%s12243_s8 + $0x18] sm:$0xff]  ;;  %v1038_v44 = vld [vmem:[%s12243_s8 + $0x130] sm:$0xff]  ;;  %v1001_v48 = vld [vmem:[%s12243_s8 + $0x8] sm:$0xff] }
  0x58   :  { %1103 = vmatpush.msra.mxu0 %v1008_v22  ;;  %1141 = vmatpush.msra.mxu2 %v1042_v28  ;;  %v1019_v43 = vld [vmem:[%s12243_s8 + $0x98] sm:$0xff]  ;;  %v1054_v45 = vld [vmem:[%s12243_s8 + $0x1b0] sm:$0xff]  ;;  %v1037_v49 = vld [vmem:[%s12243_s8 + $0x128] sm:$0xff] }
  0x59   :  { %1123 = vmatpush.msra.mxu1 %v1024_v23  ;;  %1161 = vmatpush.msra.mxu3 %v1058_v29  ;;  %v1002_v46 = vld [vmem:[%s12243_s8 + $0x10] sm:$0xff]  ;;  %v1053_v50 = vld [vmem:[%s12243_s8 + $0x1a8] sm:$0xff]  ;;  %v1000_v51 = vld [vmem:[%s12243_s8] sm:$0xff] }
  0x5a   :  { %1104 = vmatpush.msra.mxu0 %v1007_v26  ;;  %1142 = vmatpush.msra.mxu2 %v1041_v32  ;;  %v1018_v47 = vld [vmem:[%s12243_s8 + $0x90] sm:$0xff]  ;;  %v1017_v52 = vld [vmem:[%s12243_s8 + $0x88] sm:$0xff]  ;;  %v1016_v53 = vld [vmem:[%s12243_s8 + $0x80] sm:$0xff] }
  0x5b   :  { %1124 = vmatpush.msra.mxu1 %v1023_v27  ;;  %1162 = vmatpush.msra.mxu3 %v1057_v33  ;;  %v1036_v54 = vld [vmem:[%s12243_s8 + $0x120] sm:$0xff]  ;;  %v1079_v55 = vld [vmem:[%s12243_s8 + $0x278] sm:$0xff]  ;;  %v277_v59 = vld [vmem:[%s12265_s23 + $0x8] sm:$0xff] }
  0x5c   :  { %1105 = vmatpush.msra.mxu0 %v1006_v30  ;;  %1143 = vmatpush.msra.mxu2 %v1040_v36  ;;  %v1095_v56 = vld [vmem:[%s12243_s8 + $0x2f8] sm:$0xff]  ;;  %v1052_v57 = vld [vmem:[%s12243_s8 + $0x1a0] sm:$0xff]  ;;  %v278_v62 = vld [vmem:[%s12265_s23 + $0x10] sm:$0xff] }
  0x5d   :  { %1125 = vmatpush.msra.mxu1 %v1022_v31  ;;  %1163 = vmatpush.msra.mxu3 %v1056_v37  ;;  %v276_v58 = vld [vmem:[%s12265_s23] sm:$0xff]  ;;  %v1035_v60 = vld [vmem:[%s12243_s8 + $0x118] sm:$0xff]  ;;  %v1078_v1 = vld [vmem:[%s12243_s8 + $0x270] sm:$0xff] }
  0x5e   :  { %1106 = vmatpush.msra.mxu0 %v1005_v34  ;;  %1144 = vmatpush.msra.mxu2 %v1039_v40  ;;  %v1051_v61 = vld [vmem:[%s12243_s8 + $0x198] sm:$0xff]  ;;  %v280_v0 = vld [vmem:[%s12265_s23 + $0x20] sm:$0xff]  ;;  %v281_v2 = vld [vmem:[%s12265_s23 + $0x28] sm:$0xff] }
  0x5f   :  { %1126 = vmatpush.msra.mxu1 %v1021_v35  ;;  %1164 = vmatpush.msra.mxu3 %v1055_v41  ;;  %v279_v63 = vld [vmem:[%s12265_s23 + $0x18] sm:$0xff]  ;;  %v282_v3 = vld [vmem:[%s12265_s23 + $0x30] sm:$0xff]  ;;  %v284_v5 = vld [vmem:[%s12265_s23 + $0x40] sm:$0xff] }
  0x60   :  { %1107 = vmatpush.msra.mxu0 %v1004_v38  ;;  %1145 = vmatpush.msra.mxu2 %v1038_v44  ;;  %v283_v4 = vld [vmem:[%s12265_s23 + $0x38] sm:$0xff]  ;;  %v285_v6 = vld [vmem:[%s12265_s23 + $0x48] sm:$0xff]  ;;  %v286_v7 = vld [vmem:[%s12265_s23 + $0x50] sm:$0xff]  ;;  %v324_v8 = vadd.f32 %v282_v3, %v276_v58  ;;  %v338_v13 = vadd.f32 %v284_v5, %v278_v62 }
  0x61   :  { %1127 = vmatpush.msra.mxu1 %v1020_v39  ;;  %1165 = vmatpush.msra.mxu3 %v1054_v45  ;;  %v331_v9 = vadd.f32 %v283_v4, %v277_v59  ;;  %v1094_v10 = vld [vmem:[%s12243_s8 + $0x2f0] sm:$0xff]  ;;  %v287_v11 = vld [vmem:[%s12265_s23 + $0x58] sm:$0xff]  ;;  %v288_v12 = vld [vmem:[%s12265_s23 + $0x60] sm:$0xff]  ;;  %v345_v14 = vadd.f32 %v285_v6, %v279_v63  ;;  %v352_v15 = vadd.f32 %v286_v7, %v280_v0 }
  0x62   :  { %1108 = vmatpush.msra.mxu0 %v1003_v42  ;;  %1146 = vmatpush.msra.mxu2 %v1037_v49  ;;  %v1077_v16 = vld [vmem:[%s12243_s8 + $0x268] sm:$0xff]  ;;  %v1034_v17 = vld [vmem:[%s12243_s8 + $0x110] sm:$0xff]  ;;  %v325_v19 = vrot.slane %v324_v8, 4  ;;  %v359_v21 = vadd.f32 %v287_v11, %v281_v2  ;;  %v339_v25 = vrot.slane %v338_v13, 4  ;;  %v295_v30 = vld [vmem:[%s12265_s23 + $0x98] sm:$0xff] }
  0x63   :  { %1128 = vmatpush.msra.mxu1 %v1019_v43  ;;  %1166 = vmatpush.msra.mxu3 %v1053_v50  ;;  %v1050_v18 = vld [vmem:[%s12243_s8 + $0x190] sm:$0xff]  ;;  %v332_v20 = vrot.slane %v331_v9, 4  ;;  %v1093_v22 = vld [vmem:[%s12243_s8 + $0x2e8] sm:$0xff]  ;;  %v346_v26 = vrot.slane %v345_v14, 4  ;;  %v353_v27 = vrot.slane %v352_v15, 4  ;;  %v1076_v35 = vld [vmem:[%s12243_s8 + $0x260] sm:$0xff] }
  0x64   :  { %1109 = vmatpush.msra.mxu0 %v1002_v46  ;;  %1147 = vmatpush.msra.mxu2 %v1036_v54  ;;  %v1033_v23 = vld [vmem:[%s12243_s8 + $0x108] sm:$0xff]  ;;  %v294_v24 = vld [vmem:[%s12265_s23 + $0x90] sm:$0xff]  ;;  %v326_v31 = vadd.f32 %v325_v19, %v324_v8  ;;  %v360_v33 = vrot.slane %v359_v21, 4  ;;  %v1092_v36 = vld [vmem:[%s12243_s8 + $0x2e0] sm:$0xff]  ;;  %v340_v37 = vadd.f32 %v339_v25, %v338_v13 }
  0x65   :  { %1129 = vmatpush.msra.mxu1 %v1018_v47  ;;  %1167 = vmatpush.msra.mxu3 %v1052_v57  ;;  %v1049_v28 = vld [vmem:[%s12243_s8 + $0x188] sm:$0xff]  ;;  %v333_v32 = vadd.f32 %v332_v20, %v331_v9  ;;  %v366_v34 = vadd.f32 %v294_v24, %v288_v12  ;;  %v347_v38 = vadd.f32 %v346_v26, %v345_v14  ;;  %v1032_v40 = vld [vmem:[%s12243_s8 + $0x100] sm:$0xff]  ;;  %v1075_v45 = vld [vmem:[%s12243_s8 + $0x258] sm:$0xff] }
  0x66   :  { %1110 = vmatpush.msra.mxu0 %v1001_v48  ;;  %1148 = vmatpush.msra.mxu2 %v1035_v60  ;;  %v289_v29 = vld [vmem:[%s12265_s23 + $0x68] sm:$0xff]  ;;  %v354_v39 = vadd.f32 %v353_v27, %v352_v15  ;;  %v327_v41 = vrot.slane %v326_v31, 2  ;;  %v361_v43 = vadd.f32 %v360_v33, %v359_v21  ;;  %v1091_v46 = vld [vmem:[%s12243_s8 + $0x2d8] sm:$0xff]  ;;  %v341_v47 = vrot.slane %v340_v37, 2  ;;  %v1090_v57 = vld [vmem:[%s12243_s8 + $0x2d0] sm:$0xff] }
  0x67   :  { %1130 = vmatpush.msra.mxu1 %v1017_v52  ;;  %1168 = vmatpush.msra.mxu3 %v1051_v61  ;;  %v334_v42 = vrot.slane %v333_v32, 2  ;;  %v367_v44 = vrot.slane %v366_v34, 4  ;;  %v348_v48 = vrot.slane %v347_v38, 2  ;;  %v373_v50 = vadd.f32 %v295_v30, %v289_v29  ;;  %v1089_v58 = vld [vmem:[%s12243_s8 + $0x2c8] sm:$0xff]  ;;  %v290_v59 = vld [vmem:[%s12265_s23 + $0x70] sm:$0xff]  ;;  %v291_v0 = vld [vmem:[%s12265_s23 + $0x78] sm:$0xff] }
  0x68   :  { %1111 = vmatpush.msra.mxu0 %v1000_v51  ;;  %1149 = vmatpush.msra.mxu2 %v1034_v17  ;;  %v355_v49 = vrot.slane %v354_v39, 2  ;;  %v1074_v51 = vld [vmem:[%s12243_s8 + $0x250] sm:$0xff]  ;;  %v328_v52 = vadd.f32 %v327_v41, %v326_v31  ;;  %v362_v54 = vrot.slane %v361_v43, 2  ;;  %v342_v60 = vadd.f32 %v341_v47, %v340_v37  ;;  %v293_v2 = vld [vmem:[%s12265_s23 + $0x88] sm:$0xff]  ;;  %v1072_v7 = vld [vmem:[%s12243_s8 + $0x240] sm:$0xff] }
  0x69   :  { %1131 = vmatpush.msra.mxu1 %v1016_v53  ;;  %1169 = vmatpush.msra.mxu3 %v1050_v18  ;;  %v335_v53 = vadd.f32 %v334_v42, %v333_v32  ;;  %v349_v61 = vadd.f32 %v348_v48, %v347_v38  ;;  %v374_v63 = vrot.slane %v373_v50, 4  ;;  %v296_v8 = vld [vmem:[%s12265_s23 + $0xa0] sm:$0xff]  ;;  %v297_v9 = vld [vmem:[%s12265_s23 + $0xa8] sm:$0xff]  ;;  %v299_v15 = vld [vmem:[%s12265_s23 + $0xb8] sm:$0xff] }
  0x6a   :  { %1176 = vmatpush.msrb.mxu0 %v1079_v55  ;;  %1150 = vmatpush.msra.mxu2 %v1033_v23  ;;  %v368_v55 = vadd.f32 %v367_v44, %v366_v34  ;;  %v356_v62 = vadd.f32 %v355_v49, %v354_v39  ;;  %v329_v3 = vrot.slane %v328_v52, 1  ;;  %v363_v5 = vadd.f32 %v362_v54, %v361_v43  ;;  %v306_v17 = vld [vmem:[%s12265_s23 + $0xf0] sm:$0xff]  ;;  %v301_v23 = vld [vmem:[%s12265_s23 + $0xc8] sm:$0xff]  ;;  %v307_v24 = vld [vmem:[%s12265_s23 + $0xf8] sm:$0xff] }
  0x6b   :  { %1196 = vmatpush.msrb.mxu1 %v1095_v56  ;;  %1170 = vmatpush.msra.mxu3 %v1049_v28  ;;  %v1073_v56 = vld [vmem:[%s12243_s8 + $0x248] sm:$0xff]  ;;  %v336_v4 = vrot.slane %v335_v53, 1  ;;  %v343_v11 = vrot.slane %v342_v60, 1  ;;  %v350_v12 = vrot.slane %v349_v61, 1  ;;  %v375_v14 = vadd.f32 %v374_v63, %v373_v50  ;;  %v1071_v29 = vld [vmem:[%s12243_s8 + $0x238] sm:$0xff] }
  0x6c   :  { %1177 = vmatpush.msrb.mxu0 %v1078_v1  ;;  %1151 = vmatpush.msra.mxu2 %v1032_v40  ;;  %v292_v1 = vld [vmem:[%s12265_s23 + $0x80] sm:$0xff]  ;;  %v369_v6 = vrot.slane %v368_v55, 2  ;;  %v357_v13 = vrot.slane %v356_v62, 1  ;;  %v11002_v18 = vadd.f32 %v329_v3, %v328_v52  ;;  %v364_v20 = vrot.slane %v363_v5, 1  ;;  %v1087_v34 = vld [vmem:[%s12243_s8 + $0x2b8] sm:$0xff] }
  0x6d   :  { %1197 = vmatpush.msrb.mxu1 %v1094_v10  ;;  %v298_v10 = vld [vmem:[%s12265_s23 + $0xb0] sm:$0xff]  ;;  %v11004_v19 = vadd.f32 %v336_v4, %v335_v53  ;;  %v11015_v25 = vadd.f32 %v343_v11, %v342_v60  ;;  %v11017_v26 = vadd.f32 %v350_v12, %v349_v61  ;;  %v376_v28 = vrot.slane %v375_v14, 2  ;;  %v303_v50 = vld [vmem:[%s12265_s23 + $0xd8] sm:$0xff] }
  0x6e   :  { %1178 = vmatpush.msrb.mxu0 %v1077_v16  ;;  %v300_v16 = vld [vmem:[%s12265_s23 + $0xc0] sm:$0xff]  ;;  %v370_v21 = vadd.f32 %v369_v6, %v368_v55  ;;  %v11019_v27 = vadd.f32 %v357_v13, %v356_v62  ;;  %v11024_v30 = vadd.f32 %v364_v20, %v363_v5  ;;  %v380_v32 = vadd.f32 %v296_v8, %v290_v59  ;;  %v305_v13 = vld [vmem:[%s12265_s23 + $0xe8] sm:$0xff] }
  0x6f   :  { %1198 = vmatpush.msrb.mxu1 %v1093_v22  ;;  %v1088_v22 = vld [vmem:[%s12243_s8 + $0x2c0] sm:$0xff]  ;;  %v387_v33 = vadd.f32 %v297_v9, %v291_v0  ;;  %v377_v37 = vadd.f32 %v376_v28, %v375_v14  ;;  %v394_v38 = vadd.f32 %v298_v10, %v292_v1  ;;  %v401_v39 = vadd.f32 %v299_v15, %v293_v2  ;;  %v310_v14 = vld [vmem:[%s12265_s23 + $0x110] sm:$0xff]  ;;  %v311_v15 = vld [vmem:[%s12265_s23 + $0x118] sm:$0xff] }
  0x70   :  { %1179 = vmatpush.msrb.mxu0 %v1076_v35  ;;  %v371_v31 = vrot.slane %v370_v21, 1  ;;  %v302_v35 = vld [vmem:[%s12265_s23 + $0xd0] sm:$0xff]  ;;  %v408_v40 = vadd.f32 %v306_v17, %v300_v16  ;;  %v381_v42 = vrot.slane %v380_v32, 4  ;;  %v415_v44 = vadd.f32 %v307_v24, %v301_v23  ;;  %v304_v8 = vld [vmem:[%s12265_s23 + $0xe0] sm:$0xff]  ;;  %v313_v23 = vld [vmem:[%s12265_s23 + $0x128] sm:$0xff] }
  0x71   :  { %1199 = vmatpush.msrb.mxu1 %v1092_v36  ;;  %v308_v36 = vld [vmem:[%s12265_s23 + $0x100] sm:$0xff]  ;;  %v388_v43 = vrot.slane %v387_v33, 4  ;;  %v395_v47 = vrot.slane %v394_v38, 4  ;;  %v402_v48 = vrot.slane %v401_v39, 4  ;;  %v314_v24 = vld [vmem:[%s12265_s23 + $0x130] sm:$0xff] }
  0x72   :  { %1180 = vmatpush.msrb.mxu0 %v1075_v45  ;;  %v11035_v41 = vadd.f32 %v371_v31, %v370_v21  ;;  %v1070_v45 = vld [vmem:[%s12243_s8 + $0x230] sm:$0xff]  ;;  %v409_v49 = vrot.slane %v408_v40, 4  ;;  %v382_v52 = vadd.f32 %v381_v42, %v380_v32  ;;  %v416_v54 = vrot.slane %v415_v44, 4  ;;  %v321_v42 = vld [vmem:[%s12265_s23 + $0x168] sm:$0xff] }
  0x73   :  { %1200 = vmatpush.msrb.mxu1 %v1091_v46  ;;  %v378_v46 = vrot.slane %v377_v37, 1  ;;  %v389_v53 = vadd.f32 %v388_v43, %v387_v33  ;;  %v422_v55 = vadd.f32 %v308_v36, %v302_v35  ;;  %v318_v33 = vld [vmem:[%s12265_s23 + $0x150] sm:$0xff]  ;;  %v320_v35 = vld [vmem:[%s12265_s23 + $0x160] sm:$0xff] }
  0x74   :  { %1181 = vmatpush.msrb.mxu0 %v1074_v51  ;;  %v309_v51 = vld [vmem:[%s12265_s23 + $0x108] sm:$0xff]  ;;  %v410_v59 = vadd.f32 %v409_v49, %v408_v40  ;;  %v383_v60 = vrot.slane %v382_v52, 2  ;;  %v417_v62 = vadd.f32 %v416_v54, %v415_v44  ;;  %v315_v40 = vld [vmem:[%s12265_s23 + $0x138] sm:$0xff]  ;;  %v436_v49 = vadd.f32 %v310_v14, %v304_v8 }
  0x75   :  { %1201 = vmatpush.msrb.mxu1 %v1090_v57  ;;  %v396_v57 = vadd.f32 %v395_v47, %v394_v38  ;;  %v390_v61 = vrot.slane %v389_v53, 2  ;;  %v423_v63 = vrot.slane %v422_v55, 4  ;;  %v429_v3 = vadd.f32 %v309_v51, %v303_v50  ;;  %v316_v51 = vld [vmem:[%s12265_s23 + $0x140] sm:$0xff] }
  0x76   :  { %1182 = vmatpush.msrb.mxu0 %v1073_v56  ;;  %v11046_v56 = vadd.f32 %v378_v46, %v377_v37  ;;  %v411_v2 = vrot.slane %v410_v59, 2  ;;  %v384_v4 = vadd.f32 %v383_v60, %v382_v52  ;;  %v418_v6 = vrot.slane %v417_v62, 2  ;;  %v322_v52 = vld [vmem:[%s12265_s23 + $0x170] sm:$0xff] }
  0x77   :  { %1202 = vmatpush.msrb.mxu1 %v1089_v58  ;;  %v403_v58 = vadd.f32 %v402_v48, %v401_v39  ;;  %v397_v0 = vrot.slane %v396_v57, 2  ;;  %v391_v5 = vadd.f32 %v390_v61, %v389_v53  ;;  %v430_v12 = vrot.slane %v429_v3, 4 }
  0x78   :  { %1183 = vmatpush.msrb.mxu0 %v1072_v7  ;;  %v424_v7 = vadd.f32 %v423_v63, %v422_v55  ;;  %v412_v11 = vadd.f32 %v411_v2, %v410_v59  ;;  %v385_v16 = vrot.slane %v384_v4, 1  ;;  %v419_v20 = vadd.f32 %v418_v6, %v417_v62  ;;  %v317_v2 = vld [vmem:[%s12265_s23 + $0x148] sm:$0xff] }
  0x79   :  { %1203 = vmatpush.msrb.mxu1 %v1088_v22  ;;  %v404_v1 = vrot.slane %v403_v58, 2  ;;  %v398_v9 = vadd.f32 %v397_v0, %v396_v57  ;;  %v392_v17 = vrot.slane %v391_v5, 1  ;;  %v312_v22 = vld [vmem:[%s12265_s23 + $0x120] sm:$0xff]  ;;  %v431_v32 = vadd.f32 %v430_v12, %v429_v3  ;;  %v323_v3 = vld [vmem:[%s12265_s23 + $0x178] sm:$0xff] }
  0x7a   :  { %1184 = vmatpush.msrb.mxu0 %v1071_v29  ;;  %v425_v21 = vrot.slane %v424_v7, 2  ;;  %v413_v31 = vrot.slane %v412_v11, 1  ;;  %v11078_v36 = vadd.f32 %v385_v16, %v384_v4  ;;  %v420_v38 = vrot.slane %v419_v20, 1 }
  0x7b   :  { %1204 = vmatpush.msrb.mxu1 %v1087_v34  ;;  %v405_v10 = vadd.f32 %v404_v1, %v403_v58  ;;  %v399_v28 = vrot.slane %v398_v9, 1  ;;  %v319_v34 = vld [vmem:[%s12265_s23 + $0x158] sm:$0xff]  ;;  %v11080_v37 = vadd.f32 %v392_v17, %v391_v5  ;;  %v432_v46 = vrot.slane %v431_v32, 2  ;;  %s6878_s23 = sshll.u32 %s12254_s19, 4  ;;  %s6879_s23 = int_to_ptr.hbm [resolvable:$true] %s6878_s23 }
  0x7c   :  { %1185 = vmatpush.msrb.mxu0 %v1070_v45  ;;  %v426_v39 = vadd.f32 %v425_v21, %v424_v7  ;;  %v11092_v45 = vadd.f32 %v413_v31, %v412_v11  ;;  %v11094_v47 = vadd.f32 %v420_v38, %v419_v20  ;;  %v443_v50 = vadd.f32 %v311_v15, %v305_v13 }
  0x7d   :  { %v406_v29 = vrot.slane %v405_v10, 1  ;;  %v11088_v43 = vadd.f32 %v399_v28, %v398_v9  ;;  %v433_v53 = vadd.f32 %v432_v46, %v431_v32  ;;  %v450_v54 = vadd.f32 %v318_v33, %v312_v22 }
  0x7e   :  { %v427_v48 = vrot.slane %v426_v39, 1  ;;  %v457_v55 = vadd.f32 %v319_v34, %v313_v23  ;;  %v464_v57 = vadd.f32 %v320_v35, %v314_v24  ;;  %v437_v59 = vrot.slane %v436_v49, 4 }
  0x7f   :  { %v11090_v44 = vadd.f32 %v406_v29, %v405_v10  ;;  %v444_v60 = vrot.slane %v443_v50, 4  ;;  %v471_v61 = vadd.f32 %v321_v42, %v315_v40  ;;  %v434_v62 = vrot.slane %v433_v53, 1 }
  0x80   :  { %v11102_v58 = vadd.f32 %v427_v48, %v426_v39  ;;  %v451_v63 = vrot.slane %v450_v54, 4  ;;  %v458_v0 = vrot.slane %v457_v55, 4  ;;  %v465_v1 = vrot.slane %v464_v57, 4 }
  0x81   :  { %v438_v4 = vadd.f32 %v437_v59, %v436_v49  ;;  %v445_v5 = vadd.f32 %v444_v60, %v443_v50  ;;  %v472_v6 = vrot.slane %v471_v61, 4  ;;  %v478_v7 = vadd.f32 %v322_v52, %v316_v51 }
  0x82   :  { %v11110_v8 = vadd.f32 %v434_v62, %v433_v53  ;;  %v452_v9 = vadd.f32 %v451_v63, %v450_v54  ;;  %v459_v10 = vadd.f32 %v458_v0, %v457_v55  ;;  %v466_v11 = vadd.f32 %v465_v1, %v464_v57 }
  0x83   :  { %v439_v12 = vrot.slane %v438_v4, 2  ;;  %v446_v13 = vrot.slane %v445_v5, 2  ;;  %v473_v14 = vadd.f32 %v472_v6, %v471_v61  ;;  %v479_v15 = vrot.slane %v478_v7, 4 }
  0x84   :  { %v453_v16 = vrot.slane %v452_v9, 2  ;;  %v460_v17 = vrot.slane %v459_v10, 2  ;;  %v467_v20 = vrot.slane %v466_v11, 2  ;;  %v485_v21 = vadd.f32 %v323_v3, %v317_v2 }
  0x85   :  { %v440_v22 = vadd.f32 %v439_v12, %v438_v4  ;;  %v447_v23 = vadd.f32 %v446_v13, %v445_v5  ;;  %v474_v24 = vrot.slane %v473_v14, 2  ;;  %v480_v28 = vadd.f32 %v479_v15, %v478_v7  ;;  %v594_v15 = vld [vmem:[%s12266_s4 + $0x40] sm:$0xff] }
  0x86   :  { %v454_v29 = vadd.f32 %v453_v16, %v452_v9  ;;  %v461_v31 = vadd.f32 %v460_v17, %v459_v10  ;;  %v468_v32 = vadd.f32 %v467_v20, %v466_v11  ;;  %v486_v33 = vrot.slane %v485_v21, 4  ;;  %v595_v16 = vld [vmem:[%s12266_s4 + $0x48] sm:$0xff] }
  0x87   :  { %v441_v34 = vrot.slane %v440_v22, 1  ;;  %v448_v35 = vrot.slane %v447_v23, 1  ;;  %v475_v38 = vadd.f32 %v474_v24, %v473_v14  ;;  %v481_v39 = vrot.slane %v480_v28, 2  ;;  %v612_v24 = vld [vmem:[%s12266_s4 + $0xd0] sm:$0xff] }
  0x88   :  { %v455_v40 = vrot.slane %v454_v29, 1  ;;  %v462_v42 = vrot.slane %v461_v31, 1  ;;  %v469_v46 = vrot.slane %v468_v32, 1  ;;  %v487_v48 = vadd.f32 %v486_v33, %v485_v21  ;;  %v600_v33 = vld [vmem:[%s12266_s4 + $0x70] sm:$0xff] }
  0x89   :  { %v442_v49 = vadd.f32 %v441_v34, %v440_v22  ;;  %v449_v50 = vadd.f32 %v448_v35, %v447_v23  ;;  %v476_v51 = vrot.slane %v475_v38, 1  ;;  %v482_v52 = vadd.f32 %v481_v39, %v480_v28  ;;  %v606_v23 = vld [vmem:[%s12266_s4 + $0xa0] sm:$0xff] }
  0x8a   :  { %v456_v53 = vadd.f32 %v455_v40, %v454_v29  ;;  %v463_v54 = vadd.f32 %v462_v42, %v461_v31  ;;  %v470_v55 = vadd.f32 %v469_v46, %v468_v32  ;;  %v488_v57 = vrot.slane %v487_v48, 2 }
  0x8b   :  { %v477_v59 = vadd.f32 %v476_v51, %v475_v38  ;;  %v483_v60 = vrot.slane %v482_v52, 1  ;;  %v516_v61 = vrot.slane %v11004_v19, 4  ;;  %v517_v62 = vrot.slane %v11017_v26, 4  ;;  %v601_v38 = vld [vmem:[%s12266_s4 + $0x78] sm:$0xff] }
  0x8c   :  { %v489_v63 = vadd.f32 %v488_v57, %v487_v48  ;;  %v518_v0 = vrot.slane %v11024_v30, 4  ;;  %v519_v1 = vrot.slane %v11046_v56, 4  ;;  %v520_v2 = vrot.slane %v11080_v37, 4  ;;  %v619_v57 = vld [vmem:[%s12266_s4 + $0x108] sm:$0xff] }
  0x8d   :  { %v484_v3 = vadd.f32 %v483_v60, %v482_v52  ;;  %v521_v4 = vrot.slane %v11090_v44, 4  ;;  %v522_v5 = vrot.slane %v11094_v47, 4  ;;  %v523_v6 = vrot.slane %v11110_v8, 4 }
  0x8e   :  { %v490_v7 = vrot.slane %v489_v63, 1  ;;  %v524_v9 = vrot.slane %v449_v50, 4  ;;  %v525_v10 = vrot.slane %v463_v54, 4  ;;  %v526_v19 = vrot.slane %v477_v59, 4  ;;  %v607_v54 = vld [vmem:[%s12266_s4 + $0xa8] sm:$0xff] }
  0x8f   :  { %v529_v30 = vsel %vm528_vm0, %v11002_v18, %v516_v61  ;;  %v530_v56 = vsel %vm528_vm0, %v11015_v25, %v517_v62  ;;  %v531_v37 = vsel %vm528_vm0, %v11019_v27, %v518_v0  ;;  %v532_v44 = vsel %vm528_vm0, %v11035_v41, %v519_v1  ;;  %v625_v0 = vld [vmem:[%s12266_s4 + $0x138] sm:$0xff]  ;;  %v630_v1 = vld [vmem:[%s12266_s4 + $0x160] sm:$0xff] }
  0x90   :  { %v491_v26 = vadd.f32 %v490_v7, %v489_v63  ;;  %v533_v47 = vsel %vm528_vm0, %v11078_v36, %v520_v2  ;;  %v534_v8 = vsel %vm528_vm0, %v11088_v43, %v521_v4  ;;  %v535_v11 = vsel %vm528_vm0, %v11092_v45, %v522_v5  ;;  %v588_v36 = vld [vmem:[%s12266_s4 + $0x10] sm:$0xff]  ;;  %v631_v5 = vld [vmem:[%s12266_s4 + $0x168] sm:$0xff] }
  0x91   :  { %v536_v18 = vsel %vm528_vm0, %v11102_v58, %v523_v6  ;;  %v537_v25 = vsel %vm528_vm0, %v442_v49, %v524_v9  ;;  %v538_v27 = vsel %vm528_vm0, %v456_v53, %v525_v10  ;;  %v539_v13 = vsel %vm528_vm0, %v470_v55, %v526_v19  ;;  %v589_v58 = vld [vmem:[%s12266_s4 + $0x18] sm:$0xff]  ;;  %v618_v49 = vld [vmem:[%s12266_s4 + $0x100] sm:$0xff]  ;;  %v624_v63 = vld [vmem:[%s12266_s4 + $0x130] sm:$0xff] }
  0x92   :  { %v527_v12 = vrot.slane %v491_v26, 4  ;;  %v541_v41 = vrot.slane %v532_v44, 7  ;;  %v546_v14 = vrot.slane %v535_v11, 6  ;;  %v551_v45 = vrot.slane %v538_v27, 5  ;;  %v613_v55 = vld [vmem:[%s12266_s4 + $0xd8] sm:$0xff]  ;;  %v642_v6 = vld [vmem:[%s12266_s4 + $0x1c0] sm:$0xff] }
  0x93   :  { %v556_v20 = vrot.slane %v533_v47, 7  ;;  %v559_v21 = vrot.slane %v536_v18, 6  ;;  %v562_v22 = vrot.slane %v539_v13, 5  ;;  %v565_v29 = vrot.slane %v534_v8, 7  ;;  %v648_v7 = vld [vmem:[%s12266_s4 + $0x1f0] sm:$0xff]  ;;  %v637_v11 = vld [vmem:[%s12266_s4 + $0x198] sm:$0xff] }
  0x94   :  { %v540_v43 = vsel %vm528_vm0, %v484_v3, %v527_v12  ;;  %v543_v17 = vsel %vm542_vm1, %v541_v41, %v529_v30  ;;  %v568_v31 = vrot.slane %v537_v25, 6  ;;  %v674_v39 = vadd.f32 %v594_v15, %v588_v36  ;;  %v636_v30 = vld [vmem:[%s12266_s4 + $0x190] sm:$0xff]  ;;  %v654_v12 = vld [vmem:[%s12266_s4 + $0x220] sm:$0xff]  ;;  %v655_v13 = vld [vmem:[%s12266_s4 + $0x228] sm:$0xff] }
  0x95   :  { %v545_v28 = vsel %vm544_vm2, %v541_v41, %v543_v17  ;;  %v571_v32 = vrot.slane %v540_v43, 5  ;;  %v557_v35 = vsel %vm542_vm1, %v556_v20, %v530_v56  ;;  %v682_v40 = vadd.f32 %v595_v16, %v589_v58  ;;  %v643_v56 = vld [vmem:[%s12266_s4 + $0x1c8] sm:$0xff] }
  0x96   :  { %v548_v34 = vsel %vm547_vm3, %v546_v14, %v545_v28  ;;  %v558_v46 = vsel %vm544_vm2, %v556_v20, %v557_v35  ;;  %v566_v48 = vsel %vm542_vm1, %v565_v29, %v531_v37  ;;  %v722_v50 = vadd.f32 %v612_v24, %v606_v23  ;;  %v649_v37 = vld [vmem:[%s12266_s4 + $0x1f8] sm:$0xff]  ;;  %v11241_v35 = vld [vmem:[%s12243_s8 + $0x180] sm:$0xff] }
  0x97   :  { %v550_v42 = vsel %vm549_vm4, %v546_v14, %v548_v34  ;;  %v560_v52 = vsel %vm547_vm3, %v559_v21, %v558_v46  ;;  %v567_v53 = vsel %vm544_vm2, %v565_v29, %v566_v48  ;;  %v675_v59 = vadd.f32 %v674_v39, %v600_v33  ;;  %v11251_v39 = vld [vmem:[%s12243_s8 + $0x2b0] sm:$0xff]  ;;  %1171 = vmatpush.msra.mxu3 %v11241_v35 }
  0x98   :  { %v553_v51 = vsel %vm552_vm5, %v551_v45, %v550_v42  ;;  %v561_v61 = vsel %vm549_vm4, %v559_v21, %v560_v52  ;;  %v569_v62 = vsel %vm547_vm3, %v568_v31, %v567_v53  ;;  %v683_v2 = vadd.f32 %v682_v40, %v601_v38  ;;  %v11246_v38 = vld [vmem:[%s12243_s8 + $0x228] sm:$0xff]  ;;  %1205 = vmatpush.msrb.mxu1 %v11251_v39 }
  0x99   :  { %v11187_v60 = vsel %vm554_vm6, %v551_v45, %v553_v51  ;;  %v563_v3 = vsel %vm552_vm5, %v562_v22, %v561_v61  ;;  %v570_v4 = vsel %vm549_vm4, %v568_v31, %v569_v62  ;;  %v676_v9 = vrot.slane %v675_v59, 4  ;;  %1186 = vmatpush.msrb.mxu0 %v11246_v38 }
  0x9a   :  { %v723_v10 = vadd.f32 %v722_v50, %v618_v49  ;;  %v11212_v19 = vsel %vm554_vm6, %v562_v22, %v563_v3  ;;  %v572_v26 = vsel %vm552_vm5, %v571_v32, %v570_v4  ;;  %v684_v44 = vrot.slane %v683_v2, 4  ;;  %v11260_v49 = vld [vmem:[%s12243_s8 + $0x220] sm:$0xff]  ;;  %v11265_v50 = vld [vmem:[%s12243_s8 + $0x2a8] sm:$0xff] }
  0x9b   :  { %v730_v47 = vadd.f32 %v613_v55, %v607_v54  ;;  %v11225_v8 = vsel %vm554_vm6, %v571_v32, %v572_v26  ;;  %v677_v18 = vadd.f32 %v676_v9, %v675_v59  ;;  %v770_v27 = vadd.f32 %v630_v1, %v624_v63  ;;  %1187 = vmatpush.msrb.mxu0 %v11260_v49  ;;  %v605_v26 = vld [vmem:[%s12266_s4 + $0x98] sm:$0xff] }
  0x9c   :  { %v724_v25 = vrot.slane %v723_v10, 4  ;;  %v685_v41 = vadd.f32 %v684_v44, %v683_v2  ;;  %v778_v36 = vadd.f32 %v631_v5, %v625_v0  ;;  %v818_v43 = vadd.f32 %v648_v7, %v642_v6  ;;  %1206 = vmatpush.msrb.mxu1 %v11265_v50 }
  0x9d   :  { %v731_v14 = vadd.f32 %v730_v47, %v619_v57  ;;  %v678_v45 = vrot.slane %v677_v18, 2  ;;  %v771_v15 = vadd.f32 %v770_v27, %v636_v30  ;;  %v826_v16 = vadd.f32 %v649_v37, %v643_v56  ;;  %v611_v30 = vld [vmem:[%s12266_s4 + $0xc8] sm:$0xff] }
  0x9e   :  { %v725_v58 = vadd.f32 %v724_v25, %v723_v10  ;;  %v686_v17 = vrot.slane %v685_v41, 2  ;;  %v779_v21 = vadd.f32 %v778_v36, %v637_v11  ;;  %v819_v22 = vadd.f32 %v818_v43, %v654_v12  ;;  %v586_v11 = vld [vmem:[%s12266_s4] sm:$0xff]  ;;  %v587_v12 = vld [vmem:[%s12266_s4 + $0x8] sm:$0xff] }
  0x9f   :  { %v732_v20 = vrot.slane %v731_v14, 4  ;;  %v679_v23 = vadd.f32 %v678_v45, %v677_v18  ;;  %v772_v28 = vrot.slane %v771_v15, 4  ;;  %v827_v29 = vadd.f32 %v826_v16, %v655_v13  ;;  %v592_v18 = vld [vmem:[%s12266_s4 + $0x30] sm:$0xff]  ;;  %v622_v16 = vld [vmem:[%s12266_s4 + $0x120] sm:$0xff] }
  0xa0   :  { %v726_v24 = vrot.slane %v725_v58, 2  ;;  %v687_v31 = vadd.f32 %v686_v17, %v685_v41  ;;  %v780_v33 = vrot.slane %v779_v21, 4  ;;  %v820_v34 = vrot.slane %v819_v22, 4  ;;  %v628_v17 = vld [vmem:[%s12266_s4 + $0x150] sm:$0xff] }
  0xa1   :  { %v733_v32 = vadd.f32 %v732_v20, %v731_v14  ;;  %v680_v40 = vrot.slane %v679_v23, 1  ;;  %v773_v46 = vadd.f32 %v772_v28, %v771_v15  ;;  %v828_v48 = vrot.slane %v827_v29, 4  ;;  %v610_v14 = vld [vmem:[%s12266_s4 + $0xc0] sm:$0xff] }
  0xa2   :  { %v727_v42 = vadd.f32 %v726_v24, %v725_v58  ;;  %v688_v51 = vrot.slane %v687_v31, 1  ;;  %v781_v53 = vadd.f32 %v780_v33, %v779_v21  ;;  %v821_v54 = vadd.f32 %v820_v34, %v819_v22  ;;  %v598_v15 = vld [vmem:[%s12266_s4 + $0x60] sm:$0xff] }
  0xa3   :  { %v734_v52 = vrot.slane %v733_v32, 2  ;;  %v681_v55 = vadd.f32 %v680_v40, %v679_v23  ;;  %v774_v59 = vrot.slane %v773_v46, 2  ;;  %v829_v61 = vadd.f32 %v828_v48, %v827_v29  ;;  %v616_v23 = vld [vmem:[%s12266_s4 + $0xf0] sm:$0xff]  ;;  %v617_v29 = vld [vmem:[%s12266_s4 + $0xf8] sm:$0xff] }
  0xa4   :  { %v728_v57 = vrot.slane %v727_v42, 1  ;;  %v689_v62 = vadd.f32 %v688_v51, %v687_v31  ;;  %v782_v0 = vrot.slane %v781_v53, 2  ;;  %v822_v1 = vrot.slane %v821_v54, 2  ;;  %v634_v31 = vld [vmem:[%s12266_s4 + $0x180] sm:$0xff] }
  0xa5   :  { %v735_v63 = vadd.f32 %v734_v52, %v733_v32  ;;  %v775_v3 = vadd.f32 %v774_v59, %v773_v46  ;;  %v830_v4 = vrot.slane %v829_v61, 2  ;;  %v941_v5 = vstv %s11236_s28  ;;  %v629_v59 = vld [vmem:[%s12266_s4 + $0x158] sm:$0xff] }
  0xa6   :  { %v729_v2 = vadd.f32 %v728_v57, %v727_v42  ;;  %v783_v7 = vadd.f32 %v782_v0, %v781_v53  ;;  %v823_v9 = vadd.f32 %v822_v1, %v821_v54  ;;  %v875_v10 = vrot.slane %v689_v62, 4  ;;  %v623_v53 = vld [vmem:[%s12266_s4 + $0x128] sm:$0xff]  ;;  %v646_v62 = vld [vmem:[%s12266_s4 + $0x1e0] sm:$0xff] }
  0xa7   :  { %v736_v6 = vrot.slane %v735_v63, 1  ;;  %v776_v56 = vrot.slane %v775_v3, 1  ;;  %v831_v37 = vadd.f32 %v830_v4, %v829_v61  ;;  %v942_v44 = vmul.f32 %v941_v5, %v11187_v60  ;;  %v593_v60 = vld [vmem:[%s12266_s4 + $0x38] sm:$0xff]  ;;  %v640_v61 = vld [vmem:[%s12266_s4 + $0x1b0] sm:$0xff] }
  0xa8   :  { %v943_v47 = vmul.f32 %v941_v5, %v11212_v19  ;;  %v784_v27 = vrot.slane %v783_v7, 1  ;;  %v824_v13 = vrot.slane %v823_v9, 1  ;;  %v887_v41 = vsel %vm528_vm0, %v681_v55, %v875_v10  ;;  %v604_v19 = vld [vmem:[%s12266_s4 + $0x90] sm:$0xff] }
  0xa9   :  { %v737_v25 = vadd.f32 %v736_v6, %v735_v63  ;;  %v777_v36 = vadd.f32 %v776_v56, %v775_v3  ;;  %v832_v43 = vrot.slane %v831_v37, 1  ;;  %v944_v45 = vmul.f32 %v941_v5, %v11225_v8  ;;  %956 = vst [vmem:[#allocation1] ss:$2 sm:$0xff] %v942_v44  ;;  %v599_v8 = vld [vmem:[%s12266_s4 + $0x68] sm:$0xff] }
  0xaa   :  { %v11300_v58 = vstv %s11253_s20  ;;  %v785_v20 = vadd.f32 %v784_v27, %v783_v7  ;;  %v825_v21 = vadd.f32 %v824_v13, %v823_v9  ;;  %958 = vst [vmem:[#allocation1 + $0x10] ss:$2 sm:$0xff] %v943_v47  ;;  %v658_v24 = vadd.f32 %v592_v18, %v586_v11  ;;  %v635_v9 = vld [vmem:[%s12266_s4 + $0x188] sm:$0xff]  ;;  %v652_v13 = vld [vmem:[%s12266_s4 + $0x210] sm:$0xff] }
  0xab   :  { %v878_v22 = vrot.slane %v737_v25, 4  ;;  %v833_v28 = vadd.f32 %v832_v43, %v831_v37  ;;  %960 = vst [vmem:[#allocation1 + $0x20] ss:$2 sm:$0xff] %v944_v45  ;;  %v666_v32 = vadd.f32 %v593_v60, %v587_v12  ;;  %v706_v33 = vadd.f32 %v610_v14, %v604_v19  ;;  %v641_v43 = vld [vmem:[%s12266_s4 + $0x1b8] sm:$0xff]  ;;  %v647_v45 = vld [vmem:[%s12266_s4 + $0x1e8] sm:$0xff] }
  0xac   :  { %v714_v34 = vadd.f32 %v611_v30, %v605_v26  ;;  %v881_v40 = vrot.slane %v785_v20, 4  ;;  %v659_v46 = vadd.f32 %v658_v24, %v598_v15  ;;  %v754_v48 = vadd.f32 %v628_v17, %v622_v16 }
  0xad   :  { %v890_v42 = vsel %vm528_vm0, %v729_v2, %v878_v22  ;;  %v884_v51 = vrot.slane %v833_v28, 4  ;;  %v667_v54 = vadd.f32 %v666_v32, %v599_v8  ;;  %v707_v55 = vadd.f32 %v706_v33, %v616_v23  ;;  %v653_v23 = vld [vmem:[%s12266_s4 + $0x218] sm:$0xff] }
  0xae   :  { %v907_v52 = vrot.slane %v890_v42, 7  ;;  %v893_v57 = vsel %vm528_vm0, %v777_v36, %v881_v40  ;;  %v660_v63 = vrot.slane %v659_v46, 4  ;;  %v715_v0 = vadd.f32 %v714_v34, %v617_v29  ;;  %v590_v42 = vld [vmem:[%s12266_s4 + $0x20] sm:$0xff] }
  0xaf   :  { %v755_v1 = vadd.f32 %v754_v48, %v634_v31  ;;  %v896_v2 = vsel %vm528_vm0, %v825_v21, %v884_v51  ;;  %v910_v4 = vrot.slane %v893_v57, 6  ;;  %v668_v5 = vrot.slane %v667_v54, 4  ;;  %v602_v57 = vld [vmem:[%s12266_s4 + $0x80] sm:$0xff] }
  0xb0   :  { %v908_v3 = vsel %vm542_vm1, %v907_v52, %v887_v41  ;;  %v913_v7 = vrot.slane %v896_v2, 5  ;;  %v661_v10 = vadd.f32 %v660_v63, %v659_v46  ;;  %v708_v26 = vrot.slane %v707_v55, 4  ;;  %v596_v46 = vld [vmem:[%s12266_s4 + $0x50] sm:$0xff] }
  0xb1   :  { %v909_v6 = vsel %vm544_vm2, %v907_v52, %v908_v3  ;;  %v669_v56 = vadd.f32 %v668_v5, %v667_v54  ;;  %v762_v37 = vadd.f32 %v629_v59, %v623_v53  ;;  %v802_v44 = vadd.f32 %v646_v62, %v640_v61  ;;  %v11346_v27 = vld.sshfl [vmem:[#allocation1 + $0x10] sm:$0xff pattern:$0x75316420]  ;;  %v11352_v36 = vld.sshfl [vmem:[#allocation1 + $0x18] sm:$0xff pattern:$0x75316420] }
  0xb2   :  { %v911_v30 = vsel %vm547_vm3, %v910_v4, %v909_v6  ;;  %v662_v11 = vrot.slane %v661_v10, 2  ;;  %v709_v12 = vadd.f32 %v708_v26, %v707_v55  ;;  %v716_v18 = vrot.slane %v715_v0, 4  ;;  %v591_v54 = vld [vmem:[%s12266_s4 + $0x28] sm:$0xff]  ;;  %v597_v55 = vld [vmem:[%s12266_s4 + $0x58] sm:$0xff]  ;;  %v11392_v2 = vld [vmem:[%s12243_s8 + $0x210] sm:$0xff] }
  0xb3   :  { %v912_v47 = vsel %vm549_vm4, %v910_v4, %v911_v30  ;;  %v670_v41 = vrot.slane %v669_v56, 2  ;;  %v756_v60 = vrot.slane %v755_v1, 4  ;;  %v763_v19 = vadd.f32 %v762_v37, %v635_v9  ;;  %v11399_v6 = vld [vmem:[%s12243_s8 + $0x298] sm:$0xff]  ;;  %v614_v9 = vld [vmem:[%s12266_s4 + $0xe0] sm:$0xff] }
  0xb4   :  { %v914_v25 = vsel %vm552_vm5, %v913_v7, %v912_v47  ;;  %v663_v15 = vadd.f32 %v662_v11, %v661_v10  ;;  %v710_v16 = vrot.slane %v709_v12, 2  ;;  %v717_v17 = vadd.f32 %v716_v18, %v715_v0  ;;  %v11382_v0 = vld [vmem:[%s12243_s8 + $0x218] sm:$0xff]  ;;  %v11415_v47 = vld [vmem:[%s12243_s8 + $0x290] sm:$0xff]  ;;  %v603_v11 = vld [vmem:[%s12266_s4 + $0x88] sm:$0xff] }
  0xb5   :  { %v915_v14 = vsel %vm554_vm6, %v913_v7, %v914_v25  ;;  %v671_v21 = vadd.f32 %v670_v41, %v669_v56  ;;  %v757_v22 = vadd.f32 %v756_v60, %v755_v1  ;;  %v764_v8 = vrot.slane %v763_v19, 4  ;;  %v11387_v1 = vld [vmem:[%s12243_s8 + $0x2a0] sm:$0xff]  ;;  %1188 = vmatpush.msrb.mxu0 %v11382_v0  ;;  %v608_v7 = vld [vmem:[%s12266_s4 + $0xb0] sm:$0xff]  ;;  %v609_v25 = vld [vmem:[%s12266_s4 + $0xb8] sm:$0xff] }
  0xb6   :  { %v951_v20 = vmul.f32 %v11300_v58, %v915_v14  ;;  %v664_v24 = vrot.slane %v663_v15, 1  ;;  %v711_v28 = vadd.f32 %v710_v16, %v709_v12  ;;  %v718_v29 = vrot.slane %v717_v17, 2  ;;  %1207 = vmatpush.msrb.mxu1 %v11387_v1  ;;  %v11437_v16 = vld [vmem:[%s12243_s8 + $0x288] sm:$0xff] }
  0xb7   :  { %v803_v31 = vadd.f32 %v802_v44, %v652_v13  ;;  %v672_v32 = vrot.slane %v671_v21, 1  ;;  %v758_v33 = vrot.slane %v757_v22, 2  ;;  %v765_v34 = vadd.f32 %v764_v8, %v763_v19  ;;  %v11410_v44 = vld [vmem:[%s12243_s8 + $0x208] sm:$0xff]  ;;  %1189 = vmatpush.msrb.mxu0 %v11392_v2 }
  0xb8   :  { %979 = vst [vmem:[#allocation1 + $0x11] ss:$2 sm:$0xff] %v951_v20  ;;  %v810_v40 = vadd.f32 %v647_v45, %v641_v43  ;;  %v665_v48 = vadd.f32 %v664_v24, %v663_v15  ;;  %v712_v51 = vrot.slane %v711_v28, 1  ;;  %v719_v52 = vadd.f32 %v718_v29, %v717_v17  ;;  %1208 = vmatpush.msrb.mxu1 %v11399_v6  ;;  %v615_v13 = vld [vmem:[%s12266_s4 + $0xe8] sm:$0xff]  ;;  %v11432_v15 = vld [vmem:[%s12243_s8 + $0x200] sm:$0xff]  ;;  %v620_v17 = vld [vmem:[%s12266_s4 + $0x110] sm:$0xff] }
  0xb9   :  { %v804_v53 = vrot.slane %v803_v31, 4  ;;  %v673_v59 = vadd.f32 %v672_v32, %v671_v21  ;;  %v759_v61 = vadd.f32 %v758_v33, %v757_v22  ;;  %v766_v62 = vrot.slane %v765_v34, 2  ;;  %1190 = vmatpush.msrb.mxu0 %v11410_v44 }
  0xba   :  { %v811_v63 = vadd.f32 %v810_v40, %v653_v23  ;;  %v713_v3 = vadd.f32 %v712_v51, %v711_v28  ;;  %v720_v4 = vrot.slane %v719_v52, 1  ;;  %v690_v10 = vadd.f32 %v596_v46, %v590_v42  ;;  %1209 = vmatpush.msrb.mxu1 %v11415_v47 }
  0xbb   :  { %v805_v5 = vadd.f32 %v804_v53, %v803_v31  ;;  %v760_v26 = vrot.slane %v759_v61, 1  ;;  %v767_v30 = vadd.f32 %v766_v62, %v765_v34  ;;  %v874_v37 = vrot.slane %v673_v59, 4  ;;  %1191 = vmatpush.msrb.mxu0 %v11432_v15  ;;  %v626_v53 = vld [vmem:[%s12266_s4 + $0x140] sm:$0xff] }
  0xbc   :  { %v812_v56 = vrot.slane %v811_v63, 4  ;;  %v721_v12 = vadd.f32 %v720_v4, %v719_v52  ;;  %v691_v41 = vadd.f32 %v690_v10, %v602_v57  ;;  %v698_v60 = vadd.f32 %v597_v55, %v591_v54  ;;  %1210 = vmatpush.msrb.mxu1 %v11437_v16  ;;  %v632_v54 = vld [vmem:[%s12266_s4 + $0x170] sm:$0xff] }
  0xbd   :  { %v806_v18 = vrot.slane %v805_v5, 2  ;;  %v761_v19 = vadd.f32 %v760_v26, %v759_v61  ;;  %v768_v14 = vrot.slane %v767_v30, 1  ;;  %v886_v45 = vsel %vm528_vm0, %v665_v48, %v874_v37 }
  0xbe   :  { %v813_v43 = vadd.f32 %v812_v56, %v811_v63  ;;  %v699_v8 = vadd.f32 %v698_v60, %v603_v11  ;;  %v738_v23 = vadd.f32 %v614_v9, %v608_v7  ;;  %v877_v33 = vrot.slane %v721_v12, 4  ;;  %v627_v11 = vld [vmem:[%s12266_s4 + $0x148] sm:$0xff]  ;;  %v633_v12 = vld [vmem:[%s12266_s4 + $0x178] sm:$0xff] }
  0xbf   :  { %v984_v20 = vld.sshfl [vmem:[#allocation1 + $0x10] sm:$0xff pattern:$0x75316420]  ;;  %v985_v21 = vld.sshfl [vmem:[#allocation1 + $0x18] sm:$0xff pattern:$0x75316420]  ;;  %v807_v22 = vadd.f32 %v806_v18, %v805_v5  ;;  %v769_v29 = vadd.f32 %v768_v14, %v767_v30  ;;  %v746_v48 = vadd.f32 %v615_v13, %v609_v25  ;;  %v786_v56 = vadd.f32 %v632_v54, %v626_v53 }
  0xc0   :  { %v11446_v24 = vsel %vm528_vm0, %v11346_v27, %v984_v20  ;;  %v11450_v28 = vsel %vm528_vm0, %v11352_v36, %v985_v21  ;;  %v814_v31 = vrot.slane %v813_v43, 2  ;;  %v692_v34 = vrot.slane %v691_v41, 4  ;;  %v621_v27 = vld [vmem:[%s12266_s4 + $0x118] sm:$0xff]  ;;  %v650_v20 = vld [vmem:[%s12266_s4 + $0x200] sm:$0xff] }
  0xc1   :  { %1152 = vmatmul.f32.vlgmr.msra.gmra.mxu2 %v11446_v24  ;;  %1172 = vmatmul.f32.vlgmr.msra.gmra.mxu3 %v11450_v28  ;;  %v808_v32 = vrot.slane %v807_v22, 1  ;;  %v700_v40 = vrot.slane %v699_v8, 4  ;;  %v880_v46 = vrot.slane %v769_v29, 4  ;;  %v739_v36 = vadd.f32 %v738_v23, %v620_v17  ;;  %v644_v17 = vld [vmem:[%s12266_s4 + $0x1d0] sm:$0xff]  ;;  %v645_v23 = vld [vmem:[%s12266_s4 + $0x1d8] sm:$0xff]  ;;  %v651_v29 = vld [vmem:[%s12266_s4 + $0x208] sm:$0xff] }
  0xc2   :  { %v815_v42 = vadd.f32 %v814_v31, %v813_v43  ;;  %v889_v52 = vsel %vm528_vm0, %v713_v3, %v877_v33  ;;  %v693_v55 = vadd.f32 %v692_v34, %v691_v41  ;;  %v638_v3 = vld [vmem:[%s12266_s4 + $0x1a0] sm:$0xff]  ;;  %v747_v9 = vadd.f32 %v746_v48, %v621_v27  ;;  %v657_v27 = vld [vmem:[%s12266_s4 + $0x238] sm:$0xff] }
  0xc3   :  { %v809_v51 = vadd.f32 %v808_v32, %v807_v22  ;;  %v701_v57 = vadd.f32 %v700_v40, %v699_v8  ;;  %v892_v61 = vsel %vm528_vm0, %v761_v19, %v880_v46  ;;  %v898_v62 = vrot.slane %v889_v52, 7  ;;  %v656_v46 = vld [vmem:[%s12266_s4 + $0x230] sm:$0xff]  ;;  %v961_v54 = vld.sshfl [vmem:[#allocation1] sm:$0xff pattern:$0x75316420] }
  0xc4   :  { %v816_v59 = vrot.slane %v815_v42, 1  ;;  %v740_v63 = vrot.slane %v739_v36, 4  ;;  %v901_v4 = vrot.slane %v892_v61, 6  ;;  %v694_v5 = vrot.slane %v693_v55, 2 }
  0xc5   :  { %v702_v7 = vrot.slane %v701_v57, 2  ;;  %v899_v26 = vsel %vm542_vm1, %v898_v62, %v886_v45  ;;  %v748_v13 = vrot.slane %v747_v9, 4  ;;  %v787_v14 = vadd.f32 %v786_v56, %v638_v3  ;;  %v639_v45 = vld [vmem:[%s12266_s4 + $0x1a8] sm:$0xff] }
  0xc6   :  { %v817_v10 = vadd.f32 %v816_v59, %v815_v42  ;;  %v741_v30 = vadd.f32 %v740_v63, %v739_v36  ;;  %v900_v37 = vsel %vm544_vm2, %v898_v62, %v899_v26  ;;  %v695_v18 = vadd.f32 %v694_v5, %v693_v55  ;;  %v962_v62 = vld.sshfl [vmem:[#allocation1 + $0x8] sm:$0xff pattern:$0x75316420] }
  0xc7   :  { %v703_v25 = vadd.f32 %v702_v7, %v701_v57  ;;  %v902_v60 = vsel %vm547_vm3, %v901_v4, %v900_v37  ;;  %v749_v22 = vadd.f32 %v748_v13, %v747_v9  ;;  %v788_v32 = vrot.slane %v787_v14, 4 }
  0xc8   :  { %v883_v41 = vrot.slane %v817_v10, 4  ;;  %v742_v19 = vrot.slane %v741_v30, 2  ;;  %v903_v43 = vsel %vm549_vm4, %v901_v4, %v902_v60  ;;  %v794_v33 = vadd.f32 %v633_v12, %v627_v11  ;;  %v11508_v10 = vld [vmem:[%s12243_s8 + $0x280] sm:$0xff] }
  0xc9   :  { %v704_v21 = vrot.slane %v703_v25, 1  ;;  %v696_v40 = vrot.slane %v695_v18, 1  ;;  %v750_v42 = vrot.slane %v749_v22, 2  ;;  %v789_v48 = vadd.f32 %v788_v32, %v787_v14  ;;  %1211 = vmatpush.msrb.mxu1 %v11508_v10 }
  0xca   :  { %v895_v8 = vsel %vm528_vm0, %v809_v51, %v883_v41  ;;  %v743_v31 = vadd.f32 %v742_v19, %v741_v30  ;;  %v795_v51 = vadd.f32 %v794_v33, %v639_v45  ;;  %v834_v52 = vadd.f32 %v650_v20, %v644_v17 }
  0xcb   :  { %v904_v34 = vrot.slane %v895_v8, 5  ;;  %v705_v36 = vadd.f32 %v704_v21, %v703_v25  ;;  %v751_v57 = vadd.f32 %v750_v42, %v749_v22  ;;  %v842_v59 = vadd.f32 %v651_v29, %v645_v23 }
  0xcc   :  { %v744_v55 = vrot.slane %v743_v31, 1  ;;  %v790_v63 = vrot.slane %v789_v48, 2  ;;  %v796_v4 = vrot.slane %v795_v51, 4  ;;  %v835_v7 = vadd.f32 %v834_v52, %v656_v46 }
  0xcd   :  { %v905_v53 = vsel %vm552_vm5, %v904_v34, %v903_v43  ;;  %v752_v5 = vrot.slane %v751_v57, 1  ;;  %v843_v9 = vadd.f32 %v842_v59, %v657_v27  ;;  %v697_v26 = vadd.f32 %v696_v40, %v695_v18 }
  0xce   :  { %v906_v61 = vsel %vm554_vm6, %v904_v34, %v905_v53  ;;  %v791_v30 = vadd.f32 %v790_v63, %v789_v48  ;;  %v797_v56 = vadd.f32 %v796_v4, %v795_v51  ;;  %v876_v37 = vrot.slane %v705_v36, 4  ;;  %v10073_v53 = vld [vmem:[%s12243_s8 + $0x178] sm:$0xff]  ;;  %v10076_v63 = vld [vmem:[%s12243_s8 + $0x1f0] sm:$0xff] }
  0xcf   :  { %v950_v3 = vmul.f32 %v11300_v58, %v906_v61  ;;  %v745_v11 = vadd.f32 %v744_v55, %v743_v31  ;;  %v753_v12 = vadd.f32 %v752_v5, %v751_v57  ;;  %v836_v25 = vrot.slane %v835_v7, 4  ;;  %v10077_v5 = vld [vmem:[%s12243_s8 + $0x168] sm:$0xff] }
  0xd0   :  { %v844_v13 = vrot.slane %v843_v9, 4  ;;  %v798_v41 = vrot.slane %v797_v56, 2  ;;  %v792_v43 = vrot.slane %v791_v30, 1  ;;  %v888_v18 = vsel %vm528_vm0, %v697_v26, %v876_v37 }
  0xd1   :  { %977 = vst [vmem:[#allocation1 + $0x1] ss:$2 sm:$0xff] %v950_v3  ;;  %v837_v60 = vadd.f32 %v836_v25, %v835_v7  ;;  %v879_v14 = vrot.slane %v753_v12, 4  ;;  %v10078_v7 = vld [vmem:[%s12243_s8 + $0x1e8] sm:$0xff] }
  0xd2   :  { %v845_v19 = vadd.f32 %v844_v13, %v843_v9  ;;  %v799_v45 = vadd.f32 %v798_v41, %v797_v56  ;;  %v793_v33 = vadd.f32 %v792_v43, %v791_v30  ;;  %v10079_v30 = vld [vmem:[%s12243_s8 + $0x160] sm:$0xff]  ;;  %v966_v25 = vld.sshfl [vmem:[#allocation1 + $0x28] sm:$0xff pattern:$0x75316420]  ;;  %v10081_v13 = vld [vmem:[%s12243_s8 + $0x158] sm:$0xff] }
  0xd3   :  { %v838_v17 = vrot.slane %v837_v60, 2  ;;  %v891_v21 = vsel %vm528_vm0, %v745_v11, %v879_v14  ;;  %v10080_v56 = vld [vmem:[%s12243_s8 + $0x1e0] sm:$0xff]  ;;  %v10082_v41 = vld [vmem:[%s12243_s8 + $0x1d8] sm:$0xff]  ;;  %v10084_v14 = vld [vmem:[%s12243_s8 + $0x1d0] sm:$0xff] }
  0xd4   :  { %v846_v20 = vrot.slane %v845_v19, 2  ;;  %v800_v22 = vrot.slane %v799_v45, 1  ;;  %v916_v8 = vrot.slane %v891_v21, 7  ;;  %v965_v12 = vld.sshfl [vmem:[#allocation1 + $0x20] sm:$0xff pattern:$0x75316420] }
  0xd5   :  { %v839_v23 = vadd.f32 %v838_v17, %v837_v60  ;;  %v10085_v43 = vld [vmem:[%s12243_s8 + $0x148] sm:$0xff]  ;;  %v10088_v17 = vld [vmem:[%s12243_s8 + $0x1c0] sm:$0xff] }
  0xd6   :  { %v847_v29 = vadd.f32 %v846_v20, %v845_v19  ;;  %v801_v34 = vadd.f32 %v800_v22, %v799_v45  ;;  %v917_v40 = vsel %vm542_vm1, %v916_v8, %v888_v18  ;;  %v10083_v19 = vld [vmem:[%s12243_s8 + $0x150] sm:$0xff]  ;;  %v10087_v45 = vld [vmem:[%s12243_s8 + $0x140] sm:$0xff]  ;;  %v10089_v20 = vld [vmem:[%s12243_s8 + $0x138] sm:$0xff] }
  0xd7   :  { %v840_v27 = vrot.slane %v839_v23, 1  ;;  %v918_v57 = vsel %vm544_vm2, %v916_v8, %v917_v40  ;;  %v10090_v18 = vld [vmem:[%s12243_s8 + $0x1b8] sm:$0xff]  ;;  %v10091_v8 = vld [vmem:[%s12243_s8 + $0x130] sm:$0xff]  ;;  %v10096_v40 = vld [vmem:[%s12243_s8 + $0x1a0] sm:$0xff] }
  0xd8   :  { %v982_v31 = vld.sshfl [vmem:[#allocation1] sm:$0xff pattern:$0x75316420]  ;;  %v983_v32 = vld.sshfl [vmem:[#allocation1 + $0x8] sm:$0xff pattern:$0x75316420] }
  0xd9   :  { %v11515_v42 = vsel %vm528_vm0, %v961_v54, %v982_v31  ;;  %v11518_v46 = vsel %vm528_vm0, %v962_v62, %v983_v32  ;;  %v848_v36 = vrot.slane %v847_v29, 1  ;;  %v882_v48 = vrot.slane %v801_v34, 4  ;;  %v10074_v54 = vld [vmem:[%s12243_s8 + $0x1f8] sm:$0xff]  ;;  %v10075_v62 = vld [vmem:[%s12243_s8 + $0x170] sm:$0xff]  ;;  %v10093_v32 = vld [vmem:[%s12243_s8 + $0x128] sm:$0xff] }
  0xda   :  { %1112 = vmatmul.f32.vlgmr.msra.gmra.mxu0 %v11515_v42  ;;  %1132 = vmatmul.f32.vlgmr.msra.gmra.mxu1 %v11518_v46  ;;  %v841_v51 = vadd.f32 %v840_v27, %v839_v23  ;;  %v10092_v23 = vld [vmem:[%s12243_s8 + $0x1b0] sm:$0xff]  ;;  %v10095_v34 = vld [vmem:[%s12243_s8 + $0x120] sm:$0xff]  ;;  %v10097_v27 = vld [vmem:[%s12243_s8 + $0x118] sm:$0xff] }
  0xdb   :  { %v849_v52 = vadd.f32 %v848_v36, %v847_v29  ;;  %1417 = vmatpush.msra.mxu0 %v10073_v53  ;;  %1437 = vmatpush.msra.mxu1 %v10074_v54  ;;  %v894_v55 = vsel %vm528_vm0, %v793_v33, %v882_v48  ;;  %v10094_v33 = vld [vmem:[%s12243_s8 + $0x1a8] sm:$0xff]  ;;  %v10098_v36 = vld [vmem:[%s12243_s8 + $0x198] sm:$0xff]  ;;  %v10099_v48 = vld [vmem:[%s12243_s8 + $0x110] sm:$0xff] }
  0xdc   :  { %v919_v61 = vrot.slane %v894_v55, 6  ;;  %v10102_v53 = vld [vmem:[%s12243_s8 + $0x188] sm:$0xff]  ;;  %v10103_v54 = vld [vmem:[%s12243_s8 + $0x100] sm:$0xff]  ;;  %v11632_v55 = vld [vmem:[#allocation16 + $0x90] sm:$0xff] }
  0xdd   :  { %v885_v59 = vrot.slane %v849_v52, 4  ;;  %1418 = vmatpush.msra.mxu0 %v10075_v62  ;;  %1438 = vmatpush.msra.mxu1 %v10076_v63  ;;  %v10101_v52 = vld [vmem:[%s12243_s8 + $0x108] sm:$0xff]  ;;  %v11644_v62 = vld [vmem:[#allocation16 + $0x30] sm:$0xff]  ;;  %v11646_v63 = vld [vmem:[#allocation16 + $0x38] sm:$0xff] }
  0xde   :  { %v920_v3 = vsel %vm547_vm3, %v919_v61, %v918_v57  ;;  %v11634_v57 = vld [vmem:[#allocation16 + $0x98] sm:$0xff]  ;;  %1257 = vmatpush.msrb.mxu2 %v11632_v55 }
  0xdf   :  { %v897_v4 = vsel %vm528_vm0, %v841_v51, %v885_v59  ;;  %1419 = vmatpush.msra.mxu0 %v10077_v5  ;;  %1439 = vmatpush.msra.mxu1 %v10078_v7  ;;  %v921_v9 = vsel %vm549_vm4, %v919_v61, %v920_v3  ;;  %v10100_v51 = vld [vmem:[%s12243_s8 + $0x190] sm:$0xff]  ;;  %v11638_v59 = vld [vmem:[#allocation16 + $0x60] sm:$0xff]  ;;  %v11640_v61 = vld [vmem:[#allocation16 + $0x68] sm:$0xff] }
  0xe0   :  { %v922_v26 = vrot.slane %v897_v4, 5  ;;  %1277 = vmatpush.msrb.mxu3 %v11634_v57  ;;  %1258 = vmatpush.msrb.mxu2 %v11638_v59  ;;  %v11652_v4 = vld [vmem:[#allocation16 + $0x8] sm:$0xff]  ;;  %v11656_v3 = vld [vmem:[#allocation16 + $0xa0] sm:$0xff]  ;;  %v11660_v7 = vld [vmem:[#allocation16 + $0x70] sm:$0xff] }
  0xe1   :  { %1420 = vmatpush.msra.mxu0 %v10079_v30  ;;  %1440 = vmatpush.msra.mxu1 %v10080_v56  ;;  %v11658_v5 = vld [vmem:[#allocation16 + $0xa8] sm:$0xff]  ;;  %v11672_v56 = vld [vmem:[#allocation16 + $0x10] sm:$0xff] }
  0xe2   :  { %v923_v37 = vsel %vm552_vm5, %v922_v26, %v921_v9  ;;  %1278 = vmatpush.msrb.mxu3 %v11640_v61  ;;  %1259 = vmatpush.msrb.mxu2 %v11644_v62  ;;  %v11664_v9 = vld [vmem:[#allocation16 + $0x78] sm:$0xff]  ;;  %v11668_v30 = vld [vmem:[#allocation16 + $0x48] sm:$0xff] }
  0xe3   :  { %v924_v11 = vsel %vm554_vm6, %v922_v26, %v923_v37  ;;  %1421 = vmatpush.msra.mxu0 %v10081_v13  ;;  %1441 = vmatpush.msra.mxu1 %v10082_v41  ;;  %v11666_v26 = vld [vmem:[#allocation16 + $0x40] sm:$0xff]  ;;  %v11674_v37 = vld [vmem:[#allocation16 + $0x18] sm:$0xff]  ;;  %v1234_v13 = vld [vmem:[#allocation16 + $0x88] sm:$0xff] }
  0xe4   :  { %v952_v60 = vmul.f32 %v11300_v58, %v924_v11  ;;  %v10086_v58 = vld [vmem:[%s12243_s8 + $0x1c8] sm:$0xff]  ;;  %1279 = vmatpush.msrb.mxu3 %v11646_v63  ;;  %v1239_v11 = vld [vmem:[#allocation16 + $0xb0] sm:$0xff] }
  0xe5   :  { %1422 = vmatpush.msra.mxu0 %v10083_v19  ;;  %1442 = vmatpush.msra.mxu1 %v10084_v14  ;;  %v1227_v41 = vld [vmem:[#allocation16 + $0x50] sm:$0xff] }
  0xe6   :  { %981 = vst [vmem:[#allocation1 + $0x21] ss:$2 sm:$0xff] %v952_v60  ;;  %1280 = vmatpush.msrb.mxu3 %v11652_v4  ;;  %v1228_v60 = vld [vmem:[#allocation16 + $0x58] sm:$0xff] }
  0xe7   :  { %1423 = vmatpush.msra.mxu0 %v10085_v43  ;;  %1443 = vmatpush.msra.mxu1 %v10086_v58  ;;  %v1221_v43 = vld [vmem:[#allocation16 + $0x20] sm:$0xff]  ;;  %v1222_v58 = vld [vmem:[#allocation16 + $0x28] sm:$0xff] }
  0xe8   :  { %1317 = vmatpush.msra.mxu3 %v11658_v5 }
  0xe9   :  { %1424 = vmatpush.msra.mxu0 %v10087_v45  ;;  %1444 = vmatpush.msra.mxu1 %v10088_v17 }
  0xea   :  { %1318 = vmatpush.msra.mxu3 %v11664_v9 }
  0xeb   :  { %1425 = vmatpush.msra.mxu0 %v10089_v20  ;;  %1445 = vmatpush.msra.mxu1 %v10090_v18 }
  0xec   :  { %1319 = vmatpush.msra.mxu3 %v11668_v30 }
  0xed   :  { %v986_v21 = vld.sshfl [vmem:[#allocation1 + $0x20] sm:$0xff pattern:$0x75316420]  ;;  %v987_v22 = vld.sshfl [vmem:[#allocation1 + $0x28] sm:$0xff pattern:$0x75316420]  ;;  %1426 = vmatpush.msra.mxu0 %v10091_v8  ;;  %1446 = vmatpush.msra.mxu1 %v10092_v23 }
  0xee   :  { %v11591_v29 = vsel %vm528_vm0, %v965_v12, %v986_v21  ;;  %v11594_v31 = vsel %vm528_vm0, %v966_v25, %v987_v22  ;;  %1320 = vmatpush.msra.mxu3 %v11674_v37  ;;  %v1240_v12 = vld [vmem:[#allocation16 + $0xb8] sm:$0xff]  ;;  %v1233_v25 = vld [vmem:[#allocation16 + $0x80] sm:$0xff] }
  0xef   :  { %1192 = vmatmul.f32.vlgmr.msrb.gmra.mxu0 %v11591_v29  ;;  %1212 = vmatmul.f32.vlgmr.msrb.gmra.mxu1 %v11594_v31 }
  0xf0   :  { %1427 = vmatpush.msra.mxu0 %v10093_v32  ;;  %1447 = vmatpush.msra.mxu1 %v10094_v33 }
  0xf2   :  { %1428 = vmatpush.msra.mxu0 %v10095_v34  ;;  %1448 = vmatpush.msra.mxu1 %v10096_v40  ;;  %v10104_v34 = vld [vmem:[%s12243_s8 + $0x78] sm:$0xff] }
  0xf3   :  { %v10105_v40 = vld [vmem:[%s12243_s8 + $0xf8] sm:$0xff] }
  0xf4   :  { %1429 = vmatpush.msra.mxu0 %v10097_v27  ;;  %1449 = vmatpush.msra.mxu1 %v10098_v36  ;;  %v10106_v27 = vld [vmem:[%s12243_s8 + $0x70] sm:$0xff] }
  0xf5   :  { %v10107_v36 = vld [vmem:[%s12243_s8 + $0xf0] sm:$0xff] }
  0xf6   :  { %1430 = vmatpush.msra.mxu0 %v10099_v48  ;;  %1450 = vmatpush.msra.mxu1 %v10100_v51  ;;  %v10108_v48 = vld [vmem:[%s12243_s8 + $0x68] sm:$0xff] }
  0xf7   :  { %v10109_v51 = vld [vmem:[%s12243_s8 + $0xe8] sm:$0xff] }
  0xf8   :  { %1431 = vmatpush.msra.mxu0 %v10101_v52  ;;  %1451 = vmatpush.msra.mxu1 %v10102_v53  ;;  %v10110_v52 = vld [vmem:[%s12243_s8 + $0x60] sm:$0xff] }
  0xf9   :  { %v10111_v53 = vld [vmem:[%s12243_s8 + $0xe0] sm:$0xff] }
  0xfa   :  { %1432 = vmatpush.msra.mxu0 %v10103_v54  ;;  %1452 = vmatpush.msra.mxu1 %v11241_v35  ;;  %v11650_v35 = vld [vmem:[#allocation16] sm:$0xff]  ;;  %v10112_v54 = vld [vmem:[%s12243_s8 + $0x58] sm:$0xff] }
  0xfb   :  { %1260 = vmatpush.msrb.mxu2 %v11650_v35 }
  0xfc   :  { %1593 = vmatpush.msrb.mxu0 %v1239_v11  ;;  %1613 = vmatpush.msrb.mxu1 %v1240_v12 }
  0xfd   :  { %1297 = vmatpush.msra.mxu2 %v11656_v3 }
  0xfe   :  { %1594 = vmatpush.msrb.mxu0 %v1233_v25  ;;  %1614 = vmatpush.msrb.mxu1 %v1234_v13 }
  0xff   :  { %1298 = vmatpush.msra.mxu2 %v11660_v7 }
 0x100   :  { %1595 = vmatpush.msrb.mxu0 %v1227_v41  ;;  %1615 = vmatpush.msrb.mxu1 %v1228_v60 }
 0x101   :  { %1299 = vmatpush.msra.mxu2 %v11666_v26 }
 0x102   :  { %1596 = vmatpush.msrb.mxu0 %v1221_v43  ;;  %1616 = vmatpush.msrb.mxu1 %v1222_v58 }
 0x103   :  { %1300 = vmatpush.msra.mxu2 %v11672_v56 }
 0x144   :  { %v1153_v17 = vpop.f32.mrf.mxu2  ;;  %v1173_v18 = vpop.f32.mrf.mxu3 }
 0x157   :  { %v1113_v19 = vpop.f32.mrf.mxu0  ;;  %v1133_v14 = vpop.f32.mrf.mxu1 }
 0x158   :  { %v1134_v45 = vadd.f32 %v1133_v14, %v1113_v19  ;;  %v10119_v19 = vld [vmem:[%s12243_s8 + $0xc0] sm:$0xff]  ;;  %v10120_v14 = vld [vmem:[%s12243_s8 + $0x38] sm:$0xff] }
 0x15a   :  { %v1154_v20 = vadd.f32 %v1153_v17, %v1134_v45  ;;  %v10123_v45 = vld [vmem:[%s12243_s8 + $0xb0] sm:$0xff]  ;;  %v10124_v17 = vld [vmem:[%s12243_s8 + $0x28] sm:$0xff] }
 0x15c   :  { %v1174_v21 = vadd.f32 %v1173_v18, %v1154_v20  ;;  %v10125_v20 = vld [vmem:[%s12243_s8 + $0xa8] sm:$0xff]  ;;  %v10126_v18 = vld [vmem:[%s12243_s8 + $0x20] sm:$0xff] }
 0x16c   :  { %v1193_v22 = vpop.f32.mrf.mxu0  ;;  %v1213_v8 = vpop.f32.mrf.mxu1 }
 0x16d   :  { %v1194_v23 = vadd.f32 %v1193_v22, %v1174_v21  ;;  %v10127_v21 = vld [vmem:[%s12243_s8 + $0xa0] sm:$0xff]  ;;  %v10128_v22 = vld [vmem:[%s12243_s8 + $0x18] sm:$0xff] }
 0x16f   :  { %v1214_v32 = vadd.f32 %v1213_v8, %v1194_v23  ;;  %v10129_v8 = vld [vmem:[%s12243_s8 + $0x98] sm:$0xff]  ;;  %v10130_v23 = vld [vmem:[%s12243_s8 + $0x10] sm:$0xff] }
 0x171   :  { %v1216_v33 = vmul.f32 0.041666668, %v1214_v32  ;;  %v10131_v32 = vld [vmem:[%s12243_s8 + $0x90] sm:$0xff] }
 0x173   :  { %6897 = vmatmul.msk.f32.vlgmr.msrb.gmra.mxu2 %vm1241_vm7, %v1216_v33  ;;  %6898 = vmatmul.msk.f32.vlgmr.msrb.gmra.mxu3 %vm1241_vm7, %v1216_v33 }
 0x174   :  { %1337 = vmatpush.msrb.mxu2 %v1239_v11  ;;  %1357 = vmatpush.msrb.mxu3 %v1240_v12  ;;  %v10113_v11 = vld [vmem:[%s12243_s8 + $0xd8] sm:$0xff]  ;;  %v10114_v12 = vld [vmem:[%s12243_s8 + $0x50] sm:$0xff] }
 0x176   :  { %1338 = vmatpush.msrb.mxu2 %v1233_v25  ;;  %1358 = vmatpush.msrb.mxu3 %v1234_v13  ;;  %v10115_v25 = vld [vmem:[%s12243_s8 + $0xd0] sm:$0xff]  ;;  %v10116_v13 = vld [vmem:[%s12243_s8 + $0x48] sm:$0xff] }
 0x178   :  { %1339 = vmatpush.msrb.mxu2 %v1227_v41  ;;  %1359 = vmatpush.msrb.mxu3 %v1228_v60  ;;  %v10117_v41 = vld [vmem:[%s12243_s8 + $0xc8] sm:$0xff]  ;;  %v10118_v60 = vld [vmem:[%s12243_s8 + $0x40] sm:$0xff] }
 0x17a   :  { %1340 = vmatpush.msrb.mxu2 %v1221_v43  ;;  %1360 = vmatpush.msrb.mxu3 %v1222_v58  ;;  %v10121_v43 = vld [vmem:[%s12243_s8 + $0xb8] sm:$0xff]  ;;  %v10122_v58 = vld [vmem:[%s12243_s8 + $0x30] sm:$0xff] }
 0x17b   :  { %6899 = vmatmul.msk.f32.vlgmr.msra.gmra.mxu2 %vm1241_vm7, %v1216_v33  ;;  %6900 = vmatmul.msk.f32.vlgmr.msra.gmra.mxu3 %vm1241_vm7, %v1216_v33 }
 0x17c   :  { %1377 = vmatpush.msra.mxu2 %v10104_v34  ;;  %1397 = vmatpush.msra.mxu3 %v10105_v40  ;;  %v10133_v34 = vld [vmem:[%s12243_s8 + $0x88] sm:$0xff]  ;;  %v10134_v40 = vld [vmem:[%s12243_s8] sm:$0xff] }
 0x17e   :  { %1378 = vmatpush.msra.mxu2 %v10106_v27  ;;  %1398 = vmatpush.msra.mxu3 %v10107_v36  ;;  %v10135_v27 = vld [vmem:[%s12243_s8 + $0x80] sm:$0xff]  ;;  %v10136_v36 = vld [vmem:[%s12243_s8 + $0x278] sm:$0xff] }
 0x180   :  { %1379 = vmatpush.msra.mxu2 %v10108_v48  ;;  %1399 = vmatpush.msra.mxu3 %v10109_v51  ;;  %v10137_v48 = vld [vmem:[%s12243_s8 + $0x2f8] sm:$0xff]  ;;  %v10138_v51 = vld [vmem:[%s12243_s8 + $0x270] sm:$0xff] }
 0x182   :  { %1380 = vmatpush.msra.mxu2 %v10110_v52  ;;  %1400 = vmatpush.msra.mxu3 %v10111_v53  ;;  %v10139_v52 = vld [vmem:[%s12243_s8 + $0x2f0] sm:$0xff]  ;;  %v10140_v53 = vld [vmem:[%s12243_s8 + $0x268] sm:$0xff] }
 0x183   :  { %6901 = vmatmul.msk.f32.vlgmr.msrb.gmra.mxu2 %vm1241_vm7, %v1216_v33  ;;  %6902 = vmatmul.msk.f32.vlgmr.msrb.gmra.mxu3 %vm1241_vm7, %v1216_v33  ;;  %v10132_v33 = vld [vmem:[%s12243_s8 + $0x8] sm:$0xff] }
 0x184   :  { %1381 = vmatpush.msra.mxu2 %v10112_v54  ;;  %1401 = vmatpush.msra.mxu3 %v10113_v11  ;;  %v10141_v54 = vld [vmem:[%s12243_s8 + $0x2e8] sm:$0xff]  ;;  %v10142_v11 = vld [vmem:[%s12243_s8 + $0x260] sm:$0xff] }
 0x186   :  { %1382 = vmatpush.msra.mxu2 %v10114_v12  ;;  %1402 = vmatpush.msra.mxu3 %v10115_v25  ;;  %v10143_v12 = vld [vmem:[%s12243_s8 + $0x2e0] sm:$0xff]  ;;  %v10144_v25 = vld [vmem:[%s12243_s8 + $0x258] sm:$0xff] }
 0x188   :  { %1383 = vmatpush.msra.mxu2 %v10116_v13  ;;  %1403 = vmatpush.msra.mxu3 %v10117_v41  ;;  %v10145_v13 = vld [vmem:[%s12243_s8 + $0x2d8] sm:$0xff]  ;;  %v10146_v41 = vld [vmem:[%s12243_s8 + $0x250] sm:$0xff] }
 0x18a   :  { %1384 = vmatpush.msra.mxu2 %v10118_v60  ;;  %1404 = vmatpush.msra.mxu3 %v10119_v19  ;;  %v10147_v60 = vld [vmem:[%s12243_s8 + $0x2d0] sm:$0xff]  ;;  %v10148_v19 = vld [vmem:[%s12243_s8 + $0x248] sm:$0xff] }
 0x18c   :  { %1385 = vmatpush.msra.mxu2 %v10120_v14  ;;  %1405 = vmatpush.msra.mxu3 %v10121_v43  ;;  %v10149_v14 = vld [vmem:[%s12243_s8 + $0x2c8] sm:$0xff]  ;;  %v10150_v43 = vld [vmem:[%s12243_s8 + $0x240] sm:$0xff] }
 0x18e   :  { %1386 = vmatpush.msra.mxu2 %v10122_v58  ;;  %1406 = vmatpush.msra.mxu3 %v10123_v45  ;;  %v10151_v58 = vld [vmem:[%s12243_s8 + $0x2c0] sm:$0xff]  ;;  %v10152_v45 = vld [vmem:[%s12243_s8 + $0x238] sm:$0xff] }
 0x190   :  { %1387 = vmatpush.msra.mxu2 %v10124_v17  ;;  %1407 = vmatpush.msra.mxu3 %v10125_v20  ;;  %v10153_v17 = vld [vmem:[%s12243_s8 + $0x2b8] sm:$0xff]  ;;  %v10154_v20 = vld [vmem:[%s12243_s8 + $0x230] sm:$0xff] }
 0x192   :  { %1388 = vmatpush.msra.mxu2 %v10126_v18  ;;  %1408 = vmatpush.msra.mxu3 %v10127_v21  ;;  %v7171_v18 = vld [vmem:[#allocation17 + $0x208] sm:$0xf] }
 0x194   :  { %1389 = vmatpush.msra.mxu2 %v10128_v22  ;;  %1409 = vmatpush.msra.mxu3 %v10129_v8 }
 0x196   :  { %1390 = vmatpush.msra.mxu2 %v10130_v23  ;;  %1410 = vmatpush.msra.mxu3 %v10131_v32  ;;  %v6991_v23 = vld [vmem:[#allocation17 + $0xa0] sm:$0xf]  ;;  %v9427_v32 = vld [vmem:[#allocation17 + $0xb0] sm:$0xf0] }
 0x198   :  { %1391 = vmatpush.msra.mxu2 %v10132_v33  ;;  %1411 = vmatpush.msra.mxu3 %v10133_v34  ;;  %v7151_v34 = vld [vmem:[#allocation17 + $0x1e0] sm:$0xf] }
 0x19a   :  { %1392 = vmatpush.msra.mxu2 %v10134_v40  ;;  %1412 = vmatpush.msra.mxu3 %v10135_v27  ;;  %v9467_v40 = vld [vmem:[#allocation17 + $0x1f0] sm:$0xf0]  ;;  %v6992_v27 = vor.u32 %v9427_v32, %v6991_v23 }
 0x19c   :  { %1457 = vmatpush.msrb.mxu2 %v10136_v36  ;;  %1477 = vmatpush.msrb.mxu3 %v10137_v48  ;;  %v7152_v48 = vor.u32 %v9467_v40, %v7151_v34  ;;  %v9542_v34 = vld [vmem:[#allocation17 + $0x448] sm:$0xf0] }
 0x19e   :  { %1458 = vmatpush.msrb.mxu2 %v10138_v51  ;;  %1478 = vmatpush.msrb.mxu3 %v10139_v52  ;;  %v6971_v51 = vld [vmem:[#allocation17 + $0x78] sm:$0xf]  ;;  %v9422_v52 = vld [vmem:[#allocation17 + $0x88] sm:$0xf0] }
 0x1a0   :  { %1459 = vmatpush.msrb.mxu2 %v10140_v53  ;;  %1479 = vmatpush.msrb.mxu3 %v10141_v54  ;;  %v7131_v53 = vld [vmem:[#allocation17 + $0x1b8] sm:$0xf]  ;;  %v9462_v54 = vld [vmem:[#allocation17 + $0x1c8] sm:$0xf0] }
 0x1a2   :  { %1460 = vmatpush.msrb.mxu2 %v10142_v11  ;;  %1480 = vmatpush.msrb.mxu3 %v10143_v12  ;;  %v6972_v12 = vor.u32 %v9422_v52, %v6971_v51  ;;  %v9447_v52 = vld [vmem:[#allocation17 + $0x150] sm:$0xf0] }
 0x1a4   :  { %1461 = vmatpush.msrb.mxu2 %v10144_v25  ;;  %1481 = vmatpush.msrb.mxu3 %v10145_v13  ;;  %v7132_v13 = vor.u32 %v9462_v54, %v7131_v53  ;;  %v7271_v53 = vld [vmem:[#allocation17 + $0x2d0] sm:$0xf]  ;;  %v9497_v54 = vld [vmem:[#allocation17 + $0x2e0] sm:$0xf0] }
 0x1a6   :  { %1462 = vmatpush.msrb.mxu2 %v10146_v41  ;;  %1482 = vmatpush.msrb.mxu3 %v10147_v60  ;;  %v6951_v41 = vld [vmem:[#allocation17 + $0x50] sm:$0xf]  ;;  %v9417_v60 = vld [vmem:[#allocation17 + $0x60] sm:$0xf0] }
 0x1a8   :  { %1463 = vmatpush.msrb.mxu2 %v10148_v19  ;;  %1483 = vmatpush.msrb.mxu3 %v10149_v14 }
 0x1aa   :  { %1464 = vmatpush.msrb.mxu2 %v10150_v43  ;;  %1484 = vmatpush.msrb.mxu3 %v10151_v58  ;;  %v7371_v43 = vld [vmem:[#allocation17 + $0x398] sm:$0xf] }
 0x1ac   :  { %1465 = vmatpush.msrb.mxu2 %v10152_v45  ;;  %1485 = vmatpush.msrb.mxu3 %v10153_v17  ;;  %v9522_v45 = vld [vmem:[#allocation17 + $0x3a8] sm:$0xf0]  ;;  %v7531_v17 = vld [vmem:[#allocation17 + $0x4d8] sm:$0xf] }
 0x1ae   :  { %1466 = vmatpush.msrb.mxu2 %v10154_v20  ;;  %1486 = vmatpush.msrb.mxu3 %v11251_v39  ;;  %v9562_v20 = vld [vmem:[#allocation17 + $0x4e8] sm:$0xf0] }
 0x1b0   :  { %1467 = vmatpush.msrb.mxu2 %v11246_v38  ;;  %1487 = vmatpush.msrb.mxu3 %v11265_v50 }
 0x1b2   :  { %1468 = vmatpush.msrb.mxu2 %v11260_v49  ;;  %1488 = vmatpush.msrb.mxu3 %v11387_v1 }
 0x1b4   :  { %1469 = vmatpush.msrb.mxu2 %v11382_v0  ;;  %1489 = vmatpush.msrb.mxu3 %v11399_v6 }
 0x1b6   :  { %1470 = vmatpush.msrb.mxu2 %v11392_v2  ;;  %1490 = vmatpush.msrb.mxu3 %v11415_v47 }
 0x1b8   :  { %1471 = vmatpush.msrb.mxu2 %v11410_v44  ;;  %1491 = vmatpush.msrb.mxu3 %v11437_v16 }
 0x1ba   :  { %1472 = vmatpush.msrb.mxu2 %v11432_v15  ;;  %1492 = vmatpush.msrb.mxu3 %v11508_v10 }
 0x1f6   :  { %v1262_v38 = vpop.f32.mrf.mxu2  ;;  %v1282_v39 = vpop.f32.mrf.mxu3 }
 0x1f7   :  { %v11853_v49 = vsub.f32 %v11515_v42, %v1262_v38  ;;  %v11856_v50 = vsub.f32 %v11518_v46, %v1282_v39  ;;  %v6952_v38 = vor.u32 %v9417_v60, %v6951_v41  ;;  %v7691_v41 = vld [vmem:[#allocation17 + $0x618] sm:$0xf] }
 0x1f9   :  { %v1371_v0 = vmul.f32 %v11853_v49, %v11853_v49  ;;  %v1372_v1 = vmul.f32 %v11856_v50, %v11856_v50 }
 0x1fb   :  { %1393 = vmatmul.f32.vlgmr.msra.gmra.mxu2 %v1371_v0  ;;  %1413 = vmatmul.f32.vlgmr.msra.gmra.mxu3 %v1372_v1  ;;  %v7111_v0 = vld [vmem:[#allocation17 + $0x190] sm:$0xf]  ;;  %v9457_v1 = vld [vmem:[#allocation17 + $0x1a0] sm:$0xf0] }
 0x1fc   :  { %1513 = vmatpush.msra.mxu2 %v11632_v55  ;;  %1533 = vmatpush.msra.mxu3 %v11634_v57  ;;  %v7211_v57 = vld [vmem:[#allocation17 + $0x258] sm:$0xf] }
 0x1fe   :  { %v1302_v2 = vpop.f32.mrf.mxu2  ;;  %v1322_v6 = vpop.f32.mrf.mxu3  ;;  %1514 = vmatpush.msra.mxu2 %v11638_v59  ;;  %1534 = vmatpush.msra.mxu3 %v11640_v61  ;;  %v9482_v61 = vld [vmem:[#allocation17 + $0x268] sm:$0xf0] }
 0x1ff   :  { %v11867_v44 = vsub.f32 %v11446_v24, %v1302_v2  ;;  %v11870_v47 = vsub.f32 %v11450_v28, %v1322_v6  ;;  %v7372_v6 = vor.u32 %v9522_v45, %v7371_v43  ;;  %v9642_v43 = vld [vmem:[#allocation17 + $0x768] sm:$0xf0] }
 0x200   :  { %1515 = vmatpush.msra.mxu2 %v11644_v62  ;;  %1535 = vmatpush.msra.mxu3 %v11646_v63  ;;  %v7031_v62 = vld [vmem:[#allocation17 + $0xf0] sm:$0xf]  ;;  %v9437_v63 = vld [vmem:[#allocation17 + $0x100] sm:$0xf0] }
 0x201   :  { %v1373_v15 = vmul.f32 %v11867_v44, %v11867_v44  ;;  %v1374_v16 = vmul.f32 %v11870_v47, %v11870_v47 }
 0x202   :  { %1516 = vmatpush.msra.mxu2 %v11650_v35  ;;  %1536 = vmatpush.msra.mxu3 %v11652_v4  ;;  %v7212_v35 = vor.u32 %v9482_v61, %v7211_v57  ;;  %v7191_v4 = vld [vmem:[#allocation17 + $0x230] sm:$0xf]  ;;  %v7331_v57 = vld [vmem:[#allocation17 + $0x348] sm:$0xf] }
 0x203   :  { %1433 = vmatmul.f32.vlgmr.msra.gmra.mxu0 %v1373_v15  ;;  %1453 = vmatmul.f32.vlgmr.msra.gmra.mxu1 %v1374_v16  ;;  %v7532_v15 = vor.u32 %v9562_v20, %v7531_v17  ;;  %v7351_v16 = vld [vmem:[#allocation17 + $0x370] sm:$0xf]  ;;  %v7491_v61 = vld [vmem:[#allocation17 + $0x488] sm:$0xf]  ;;  %v9492_v20 = vld [vmem:[#allocation17 + $0x2b8] sm:$0xf0] }
 0x204   :  { %3334 = vmatpush.bf16.msra.mxu1 %v7212_v35  ;;  %v7251_v17 = vld [vmem:[#allocation17 + $0x2a8] sm:$0xf] }
 0x206   :  { %v1342_v24 = vpop.f32.mrf.mxu2  ;;  %v1362_v10 = vpop.f32.mrf.mxu3 }
 0x207   :  { %v11881_v28 = vsub.f32 %v11591_v29, %v1342_v24  ;;  %v11884_v42 = vsub.f32 %v11594_v31, %v1362_v10  ;;  %v7051_v29 = vld [vmem:[#allocation17 + $0x118] sm:$0xf]  ;;  %v9442_v31 = vld [vmem:[#allocation17 + $0x128] sm:$0xf0]  ;;  %v9517_v24 = vld [vmem:[#allocation17 + $0x380] sm:$0xf0] }
 0x208   :  { %v7052_v59 = vor.u32 %v9442_v31, %v7051_v29  ;;  %v7511_v10 = vld [vmem:[#allocation17 + $0x4b0] sm:$0xf]  ;;  %v7352_v29 = vor.u32 %v9517_v24, %v7351_v16  ;;  %v9637_v24 = vld [vmem:[#allocation17 + $0x740] sm:$0xf0] }
 0x209   :  { %v1375_v46 = vmul.f32 %v11881_v28, %v11881_v28  ;;  %v1376_v55 = vmul.f32 %v11884_v42, %v11884_v42  ;;  %v7831_v16 = vld [vmem:[#allocation17 + $0x730] sm:$0xf] }
 0x20a   :  { %3321 = vmatpush.bf16.msra.mxu0 %v7052_v59  ;;  %v9512_v59 = vld [vmem:[#allocation17 + $0x358] sm:$0xf0] }
 0x20b   :  { %1473 = vmatmul.f32.vlgmr.msrb.gmra.mxu2 %v1375_v46  ;;  %1493 = vmatmul.f32.vlgmr.msrb.gmra.mxu3 %v1376_v55  ;;  %v9557_v46 = vld [vmem:[#allocation17 + $0x4c0] sm:$0xf0]  ;;  %v7112_v55 = vor.u32 %v9457_v1, %v7111_v0  ;;  %v9532_v0 = vld [vmem:[#allocation17 + $0x3f8] sm:$0xf0]  ;;  %v7671_v1 = vld [vmem:[#allocation17 + $0x5f0] sm:$0xf] }
 0x20c   :  { %1553 = vmatpush.msrb.mxu2 %v11656_v3  ;;  %1573 = vmatpush.msrb.mxu3 %v11658_v5  ;;  %v9477_v3 = vld [vmem:[#allocation17 + $0x240] sm:$0xf0]  ;;  %v7032_v5 = vor.u32 %v9437_v63, %v7031_v62  ;;  %v7512_v31 = vor.u32 %v9557_v46, %v7511_v10  ;;  %v9552_v62 = vld [vmem:[#allocation17 + $0x498] sm:$0xf0]  ;;  %v7332_v63 = vor.u32 %v9512_v59, %v7331_v57  ;;  %v7231_v46 = vld [vmem:[#allocation17 + $0x280] sm:$0xf] }
 0x20d   :  { %v7492_v35 = vor.u32 %v9552_v62, %v7491_v61  ;;  %v7832_v10 = vor.u32 %v9637_v24, %v7831_v16  ;;  %v9527_v57 = vld [vmem:[#allocation17 + $0x3d0] sm:$0xf0]  ;;  %v7651_v59 = vld [vmem:[#allocation17 + $0x5c8] sm:$0xf]  ;;  %v9592_v61 = vld [vmem:[#allocation17 + $0x5d8] sm:$0xf0] }
 0x20e   :  { %1554 = vmatpush.msrb.mxu2 %v11660_v7  ;;  %1574 = vmatpush.msrb.mxu3 %v11664_v9  ;;  %v7192_v7 = vor.u32 %v9477_v3, %v7191_v4  ;;  %v7011_v9 = vld [vmem:[#allocation17 + $0xc8] sm:$0xf]  ;;  %v7311_v4 = vld [vmem:[#allocation17 + $0x320] sm:$0xf]  ;;  %v9507_v3 = vld [vmem:[#allocation17 + $0x330] sm:$0xf0] }
 0x20f   :  { %3322 = vmatpush.bf16.msra.mxu0 %v7032_v5  ;;  %v7471_v5 = vld [vmem:[#allocation17 + $0x460] sm:$0xf]  ;;  %v9572_v16 = vld [vmem:[#allocation17 + $0x538] sm:$0xf0]  ;;  %v7731_v24 = vld [vmem:[#allocation17 + $0x668] sm:$0xf] }
 0x210   :  { %1555 = vmatpush.msrb.mxu2 %v11666_v26  ;;  %1575 = vmatpush.msrb.mxu3 %v11668_v30  ;;  %v9432_v26 = vld [vmem:[#allocation17 + $0xd8] sm:$0xf0] }
 0x211   :  { %v7012_v21 = vor.u32 %v9432_v26, %v7011_v9  ;;  %3335 = vmatpush.bf16.msra.mxu1 %v7192_v7  ;;  %v9547_v7 = vld [vmem:[#allocation17 + $0x470] sm:$0xf0]  ;;  %v7312_v9 = vor.u32 %v9507_v3, %v7311_v4  ;;  %v9632_v4 = vld [vmem:[#allocation17 + $0x718] sm:$0xf0] }
 0x212   :  { %1556 = vmatpush.msrb.mxu2 %v11672_v56  ;;  %1576 = vmatpush.msrb.mxu3 %v11674_v37  ;;  %v9472_v37 = vld [vmem:[#allocation17 + $0x218] sm:$0xf0]  ;;  %v7472_v26 = vor.u32 %v9547_v7, %v7471_v5  ;;  %v7053_v7 = vld [vmem:[#allocation17 + $0x12c] sm:$0xf0] }
 0x213   :  { %v7172_v8 = vor.u32 %v9472_v37, %v7171_v18  ;;  %3323 = vmatpush.bf16.msra.mxu0 %v7012_v21  ;;  %v7091_v18 = vld [vmem:[#allocation17 + $0x168] sm:$0xf]  ;;  %v9452_v21 = vld [vmem:[#allocation17 + $0x178] sm:$0xf0] }
 0x214   :  { %v7092_v23 = vor.u32 %v9452_v21, %v7091_v18  ;;  %v9440_v3 = vld [vmem:[#allocation17 + $0x11c] sm:$0xf]  ;;  %v7631_v18 = vld [vmem:[#allocation17 + $0x5a0] sm:$0xf] }
 0x215   :  { %3336 = vmatpush.bf16.msra.mxu1 %v7172_v8  ;;  %v9502_v8 = vld [vmem:[#allocation17 + $0x308] sm:$0xf0]  ;;  %v7791_v21 = vld [vmem:[#allocation17 + $0x6e0] sm:$0xf] }
 0x217   :  { %3324 = vmatpush.bf16.msra.mxu0 %v6992_v27  ;;  %v6911_v27 = vld [vmem:[#allocation17] sm:$0xf] }
 0x219   :  { %3337 = vmatpush.bf16.msra.mxu1 %v7152_v48  ;;  %v7071_v48 = vld [vmem:[#allocation17 + $0x140] sm:$0xf] }
 0x21b   :  { %3325 = vmatpush.bf16.msra.mxu0 %v6972_v12  ;;  %v7272_v12 = vor.u32 %v9497_v54, %v7271_v53  ;;  %v9622_v54 = vld [vmem:[#allocation17 + $0x6c8] sm:$0xf0] }
 0x21d   :  { %3338 = vmatpush.bf16.msra.mxu1 %v7132_v13  ;;  %v9537_v13 = vld [vmem:[#allocation17 + $0x420] sm:$0xf0] }
 0x21f   :  { %3326 = vmatpush.bf16.msra.mxu0 %v6952_v38  ;;  %v7411_v38 = vld [vmem:[#allocation17 + $0x3e8] sm:$0xf] }
 0x221   :  { %3339 = vmatpush.bf16.msra.mxu1 %v7112_v55  ;;  %v9487_v55 = vld [vmem:[#allocation17 + $0x290] sm:$0xf0] }
 0x225   :  { %3340 = vmatpush.bf16.msra.mxu1 %v7092_v23  ;;  %v9435_v23 = vld [vmem:[#allocation17 + $0xf4] sm:$0xf] }
 0x27e   :  { %v1394_v30 = vpop.f32.mrf.mxu2  ;;  %v1414_v56 = vpop.f32.mrf.mxu3 }
 0x27f   :  { %v1415_v22 = vadd.f32 %v1414_v56, %v1394_v30  ;;  %v6931_v30 = vld [vmem:[#allocation17 + $0x28] sm:$0xf]  ;;  %v9412_v56 = vld [vmem:[#allocation17 + $0x38] sm:$0xf0] }
 0x280   :  { %v1434_v33 = vpop.f32.mrf.mxu0  ;;  %v1454_v11 = vpop.f32.mrf.mxu1  ;;  %v6932_v37 = vor.u32 %v9412_v56, %v6931_v30  ;;  %v7056_v30 = vor.u32 %v9440_v3, %v7053_v7  ;;  %v9567_v3 = vld [vmem:[#allocation17 + $0x510] sm:$0xf0] }
 0x281   :  { %v1435_v36 = vadd.f32 %v1434_v33, %v1415_v22  ;;  %v7291_v22 = vld [vmem:[#allocation17 + $0x2f8] sm:$0xf] }
 0x282   :  { %v7292_v32 = vor.u32 %v9502_v8, %v7291_v22  ;;  %v7451_v33 = vld [vmem:[#allocation17 + $0x438] sm:$0xf]  ;;  %3327 = vmatpush.bf16.msra.mxu0 %v6932_v37  ;;  %v9587_v37 = vld [vmem:[#allocation17 + $0x5b0] sm:$0xf0] }
 0x283   :  { %v1455_v25 = vadd.f32 %v1454_v11, %v1435_v36  ;;  %v7452_v40 = vor.u32 %v9542_v34, %v7451_v33  ;;  %v9407_v36 = vld [vmem:[#allocation17 + $0x10] sm:$0xf0]  ;;  %v7072_v11 = vor.u32 %v9447_v52, %v7071_v48  ;;  %v7632_v22 = vor.u32 %v9587_v37, %v7631_v18  ;;  %v7611_v48 = vld [vmem:[#allocation17 + $0x578] sm:$0xf]  ;;  %v6953_v37 = vld [vmem:[#allocation17 + $0x64] sm:$0xf0] }
 0x284   :  { %v6912_v51 = vor.u32 %v9407_v36, %v6911_v27  ;;  %v9627_v8 = vld [vmem:[#allocation17 + $0x6f0] sm:$0xf0]  ;;  %v7193_v27 = vld [vmem:[#allocation17 + $0x244] sm:$0xf0]  ;;  %v7771_v52 = vld [vmem:[#allocation17 + $0x6b8] sm:$0xf] }
 0x285   :  { %3341 = vmatpush.bf16.msra.mxu1 %v7072_v11  ;;  %v7792_v33 = vor.u32 %v9627_v8, %v7791_v21  ;;  %v9430_v11 = vld [vmem:[#allocation17 + $0xcc] sm:$0xf]  ;;  %v9415_v18 = vld [vmem:[#allocation17 + $0x54] sm:$0xf]  ;;  %v7113_v8 = vld [vmem:[#allocation17 + $0x1a4] sm:$0xf0] }
 0x286   :  { %3328 = vmatpush.bf16.msra.mxu0 %v6912_v51  ;;  %v9582_v51 = vld [vmem:[#allocation17 + $0x588] sm:$0xf0]  ;;  %v6956_v21 = vor.u32 %v9415_v18, %v6953_v37 }
 0x287   :  { %v7612_v53 = vor.u32 %v9582_v51, %v7611_v48  ;;  %v9450_v51 = vld [vmem:[#allocation17 + $0x16c] sm:$0xf] }
 0x28e   :  { %v1474_v19 = vpop.f32.mrf.mxu2  ;;  %v1494_v58 = vpop.f32.mrf.mxu3 }
 0x28f   :  { %v1475_v14 = vadd.f32 %v1474_v19, %v1455_v25  ;;  %v7431_v25 = vld [vmem:[#allocation17 + $0x410] sm:$0xf]  ;;  %v9602_v19 = vld [vmem:[#allocation17 + $0x628] sm:$0xf0] }
 0x290   :  { %v7432_v60 = vor.u32 %v9537_v13, %v7431_v25  ;;  %v7013_v25 = vld [vmem:[#allocation17 + $0xdc] sm:$0xf0]  ;;  %v9470_v13 = vld [vmem:[#allocation17 + $0x20c] sm:$0xf] }
 0x291   :  { %v1495_v39 = vadd.f32 %v1494_v58, %v1475_v14  ;;  %v7851_v14 = vld [vmem:[#allocation17 + $0x758] sm:$0xf]  ;;  %v7692_v58 = vor.u32 %v9602_v19, %v7691_v41  ;;  %v7173_v41 = vld [vmem:[#allocation17 + $0x21c] sm:$0xf0] }
 0x292   :  { %v7852_v45 = vor.u32 %v9642_v43, %v7851_v14  ;;  %v7176_v19 = vor.u32 %v9470_v13, %v7173_v41  ;;  %v7591_v14 = vld [vmem:[#allocation17 + $0x550] sm:$0xf]  ;;  %v9577_v43 = vld [vmem:[#allocation17 + $0x560] sm:$0xf0]  ;;  %v7073_v41 = vld [vmem:[#allocation17 + $0x154] sm:$0xf0] }
 0x293   :  { %v1497_v2 = vmul.f32 0.041666668, %v1495_v39  ;;  %v7252_v39 = vor.u32 %v9492_v20, %v7251_v17  ;;  %v9617_v17 = vld [vmem:[#allocation17 + $0x6a0] sm:$0xf0] }
 0x294   :  { %v9425_v20 = vld [vmem:[#allocation17 + $0xa4] sm:$0xf] }
 0x295   :  { %6903 = vmatmul.msk.f32.vlgmr.msra.gmra.mxu2 %vm1241_vm7, %v1497_v2  ;;  %6904 = vmatmul.msk.f32.vlgmr.msra.gmra.mxu3 %vm1241_vm7, %v1497_v2 }
 0x296   :  { %6907 = vmatmul.msk.f32.vlgmr.msrb.gmra.mxu0 %vm1241_vm7, %v1497_v2  ;;  %6908 = vmatmul.msk.f32.vlgmr.msrb.gmra.mxu1 %vm1241_vm7, %v1497_v2 }
 0x297   :  { %3347 = vmatpush.bf16.msra.mxu2 %v7372_v6  ;;  %3360 = vmatpush.bf16.msra.mxu3 %v7532_v15  ;;  %v7412_v6 = vor.u32 %v9532_v0, %v7411_v38  ;;  %v6993_v38 = vld [vmem:[#allocation17 + $0xb4] sm:$0xf0] }
 0x298   :  { %3373 = vmatpush.bf16.msrb.mxu0 %v7692_v58  ;;  %3386 = vmatpush.bf16.msrb.mxu1 %v7852_v45  ;;  %v7751_v58 = vld [vmem:[#allocation17 + $0x690] sm:$0xf]  ;;  %v7592_v45 = vor.u32 %v9577_v43, %v7591_v14  ;;  %v6996_v0 = vor.u32 %v9425_v20, %v6993_v38 }
 0x29b   :  { %3348 = vmatpush.bf16.msra.mxu2 %v7352_v29  ;;  %3361 = vmatpush.bf16.msra.mxu3 %v7512_v31  ;;  %v7391_v29 = vld [vmem:[#allocation17 + $0x3c0] sm:$0xf]  ;;  %v7232_v31 = vor.u32 %v9487_v55, %v7231_v46 }
 0x29c   :  { %3387 = vmatpush.bf16.msrb.mxu1 %v7832_v10  ;;  %v7392_v62 = vor.u32 %v9527_v57, %v7391_v29  ;;  %v9612_v10 = vld [vmem:[#allocation17 + $0x678] sm:$0xf0] }
 0x29d   :  { %6905 = vmatmul.msk.f32.vlgmr.msrb.gmra.mxu2 %vm1241_vm7, %v1497_v2  ;;  %6906 = vmatmul.msk.f32.vlgmr.msrb.gmra.mxu3 %vm1241_vm7, %v1497_v2  ;;  %v9597_v2 = vld [vmem:[#allocation17 + $0x600] sm:$0xf0]  ;;  %v7732_v55 = vor.u32 %v9612_v10, %v7731_v24  ;;  %v9420_v29 = vld [vmem:[#allocation17 + $0x7c] sm:$0xf] }
 0x29e   :  { %v7672_v15 = vor.u32 %v9597_v2, %v7671_v1  ;;  %v9465_v1 = vld [vmem:[#allocation17 + $0x1e4] sm:$0xf]  ;;  %v7153_v2 = vld [vmem:[#allocation17 + $0x1f4] sm:$0xf0]  ;;  %v9460_v57 = vld [vmem:[#allocation17 + $0x1bc] sm:$0xf] }
 0x29f   :  { %3349 = vmatpush.bf16.msra.mxu2 %v7332_v63  ;;  %3362 = vmatpush.bf16.msra.mxu3 %v7492_v35  ;;  %v7652_v63 = vor.u32 %v9592_v61, %v7651_v59  ;;  %v7811_v35 = vld [vmem:[#allocation17 + $0x708] sm:$0xf]  ;;  %v7133_v61 = vld [vmem:[#allocation17 + $0x1cc] sm:$0xf0] }
 0x2a0   :  { %3374 = vmatpush.bf16.msrb.mxu0 %v7672_v15  ;;  %v7812_v5 = vor.u32 %v9632_v4, %v7811_v35  ;;  %v7571_v15 = vld [vmem:[#allocation17 + $0x528] sm:$0xf]  ;;  %v7136_v35 = vor.u32 %v9460_v57, %v7133_v61  ;;  %v7551_v4 = vld [vmem:[#allocation17 + $0x500] sm:$0xf] }
 0x2a1   :  { %v7572_v46 = vor.u32 %v9572_v16, %v7571_v15 }
 0x2a2   :  { %3388 = vmatpush.bf16.msrb.mxu1 %v7812_v5  ;;  %v7711_v5 = vld [vmem:[#allocation17 + $0x640] sm:$0xf] }
 0x2a3   :  { %3350 = vmatpush.bf16.msra.mxu2 %v7312_v9  ;;  %3363 = vmatpush.bf16.msra.mxu3 %v7472_v26  ;;  %v9480_v9 = vld [vmem:[#allocation17 + $0x25c] sm:$0xf]  ;;  %v7213_v26 = vld [vmem:[#allocation17 + $0x26c] sm:$0xf0] }
 0x2a4   :  { %v7216_v56 = vor.u32 %v9480_v9, %v7213_v26  ;;  %3375 = vmatpush.bf16.msrb.mxu0 %v7652_v63  ;;  %v7552_v26 = vor.u32 %v9567_v3, %v7551_v4  ;;  %v11936_v3 = vld [vmem:[#allocation11] sm:$0x3f] }
 0x2a6   :  { %3389 = vmatpush.bf16.msrb.mxu1 %v7792_v33 }
 0x2a7   :  { %3351 = vmatpush.bf16.msra.mxu2 %v7292_v32  ;;  %3364 = vmatpush.bf16.msra.mxu3 %v7452_v40  ;;  %v7033_v32 = vld [vmem:[#allocation17 + $0x104] sm:$0xf0]  ;;  %v9475_v40 = vld [vmem:[#allocation17 + $0x234] sm:$0xf] }
 0x2a8   :  { %v7036_v34 = vor.u32 %v9435_v23, %v7033_v32  ;;  %v7196_v36 = vor.u32 %v9475_v40, %v7193_v27  ;;  %3376 = vmatpush.bf16.msrb.mxu0 %v7632_v22  ;;  %v9455_v22 = vld [vmem:[#allocation17 + $0x194] sm:$0xf] }
 0x2a9   :  { %v7116_v33 = vor.u32 %v9455_v22, %v7113_v8  ;;  %v9520_v22 = vld [vmem:[#allocation17 + $0x39c] sm:$0xf]  ;;  %v7373_v8 = vld [vmem:[#allocation17 + $0x3ac] sm:$0xf0] }
 0x2ab   :  { %3352 = vmatpush.bf16.msra.mxu2 %v7272_v12  ;;  %3365 = vmatpush.bf16.msra.mxu3 %v7432_v60  ;;  %v7772_v12 = vor.u32 %v9622_v54, %v7771_v52  ;;  %v7016_v60 = vor.u32 %v9430_v11, %v7013_v25  ;;  %v7093_v52 = vld [vmem:[#allocation17 + $0x17c] sm:$0xf0]  ;;  %v9405_v11 = vld [vmem:[#allocation17 + $0x4] sm:$0xf] }
 0x2ac   :  { %3377 = vmatpush.bf16.msrb.mxu0 %v7612_v53  ;;  %v7096_v53 = vor.u32 %v9450_v51, %v7093_v52  ;;  %v9445_v25 = vld [vmem:[#allocation17 + $0x144] sm:$0xf]  ;;  %v7376_v52 = vor.u32 %v9520_v22, %v7373_v8  ;;  %v1713_v22 = vperm.slane %v11936_v3, 4 }
 0x2ad   :  { %3390 = vmatpush.bf16.msrb.mxu1 %v7772_v12  ;;  %v6913_v12 = vld [vmem:[#allocation17 + $0x14] sm:$0xf0] }
 0x2ae   :  { %v6916_v13 = vor.u32 %v9405_v11, %v6913_v12  ;;  %v9560_v12 = vld [vmem:[#allocation17 + $0x4dc] sm:$0xf] }
 0x2af   :  { %3353 = vmatpush.bf16.msra.mxu2 %v7252_v39  ;;  %3366 = vmatpush.bf16.msra.mxu3 %v7412_v6  ;;  %v7752_v39 = vor.u32 %v9617_v17, %v7751_v58  ;;  %v7156_v6 = vor.u32 %v9465_v1, %v7153_v2 }
 0x2b0   :  { %3378 = vmatpush.bf16.msrb.mxu0 %v7592_v45 }
 0x2b1   :  { %3391 = vmatpush.bf16.msrb.mxu1 %v7752_v39 }
 0x2b3   :  { %3354 = vmatpush.bf16.msra.mxu2 %v7232_v31  ;;  %3367 = vmatpush.bf16.msra.mxu3 %v7392_v62  ;;  %v6973_v31 = vld [vmem:[#allocation17 + $0x8c] sm:$0xf0] }
 0x2b4   :  { %v6976_v59 = vor.u32 %v9420_v29, %v6973_v31  ;;  %3379 = vmatpush.bf16.msrb.mxu0 %v7572_v46 }
 0x2b5   :  { %3392 = vmatpush.bf16.msrb.mxu1 %v7732_v55  ;;  %v11926_v55 = vld [vmem:[#allocation10] sm:$0x3f] }
 0x2b7   :  { %3399 = vmatpush.bf16.msrb.mxu2 %v7056_v30  ;;  %3412 = vmatpush.bf16.msrb.mxu3 %v7216_v56  ;;  %v9607_v30 = vld [vmem:[#allocation17 + $0x650] sm:$0xf0] }
 0x2b8   :  { %v7712_v56 = vor.u32 %v9607_v30, %v7711_v5  ;;  %3380 = vmatpush.bf16.msrb.mxu0 %v7552_v26  ;;  %v1709_v30 = vperm.slane %v11936_v3, 0 }
 0x2ba   :  { %3393 = vmatpush.bf16.msrb.mxu1 %v7712_v56 }
 0x2bb   :  { %3400 = vmatpush.bf16.msrb.mxu2 %v7036_v34  ;;  %3413 = vmatpush.bf16.msrb.mxu3 %v7196_v36  ;;  %v9410_v34 = vld [vmem:[#allocation17 + $0x2c] sm:$0xf]  ;;  %v6933_v36 = vld [vmem:[#allocation17 + $0x3c] sm:$0xf0] }
 0x2bc   :  { %v6936_v48 = vor.u32 %v9410_v34, %v6933_v36  ;;  %v1691_v34 = vperm.slane %v11926_v55, 2 }
 0x2bf   :  { %3401 = vmatpush.bf16.msrb.mxu2 %v7016_v60  ;;  %3414 = vmatpush.bf16.msrb.mxu3 %v7176_v19  ;;  %v7076_v19 = vor.u32 %v9445_v25, %v7073_v41  ;;  %v7533_v25 = vld [vmem:[#allocation17 + $0x4ec] sm:$0xf0] }
 0x2c3   :  { %3402 = vmatpush.bf16.msrb.mxu2 %v6996_v0  ;;  %3415 = vmatpush.bf16.msrb.mxu3 %v7156_v6 }
 0x2c7   :  { %3403 = vmatpush.bf16.msrb.mxu2 %v6976_v59  ;;  %3416 = vmatpush.bf16.msrb.mxu3 %v7136_v35  ;;  %v1689_v59 = vperm.slane %v11926_v55, 0  ;;  %v1690_v35 = vperm.slane %v11926_v55, 1 }
 0x2cb   :  { %3404 = vmatpush.bf16.msrb.mxu2 %v6956_v21  ;;  %3417 = vmatpush.bf16.msrb.mxu3 %v7116_v33  ;;  %v1710_v21 = vperm.slane %v11936_v3, 1 }
 0x2cf   :  { %3405 = vmatpush.bf16.msrb.mxu2 %v6936_v48  ;;  %3418 = vmatpush.bf16.msrb.mxu3 %v7096_v53 }
 0x2d3   :  { %3406 = vmatpush.bf16.msrb.mxu2 %v6916_v13  ;;  %3419 = vmatpush.bf16.msrb.mxu3 %v7076_v19 }
 0x313   :  { %v1598_v62 = vpop.f32.mrf.mxu0  ;;  %v1618_v63 = vpop.f32.mrf.mxu1 }
 0x314   :  { %v11904_v7 = vadd.f32 1e-05, %v1598_v62  ;;  %v11906_v9 = vadd.f32 1e-05, %v1618_v63 }
 0x316   :  { %10055 = vrsqrt.f32 %v11904_v7  ;;  %vm1667_vm14 = vweird.f32 %v11904_v7  ;;  %vm1677_vm5 = vweird.f32 %v11906_v9 }
 0x317   :  { %10057 = vrsqrt.f32 %v11906_v9 }
 0x318   :  { %v1518_v23 = vpop.f32.mrf.mxu2  ;;  %v1538_v32 = vpop.f32.mrf.mxu3 }
 0x319   :  { %v1519_v40 = vadd.f32 1e-05, %v1518_v23  ;;  %v1539_v27 = vadd.f32 1e-05, %v1538_v32 }
 0x31b   :  { %10059 = vrsqrt.f32 %v1519_v40  ;;  %vm1627_vm10 = vweird.f32 %v1519_v40  ;;  %vm1637_vm12 = vweird.f32 %v1539_v27 }
 0x31c   :  { %v11910_v54 = vpop.eup %10055  ;;  %10061 = vrsqrt.f32 %v1539_v27 }
 0x31d   :  { %v11912_v60 = vpop.eup %10057  ;;  %v1662_v14 = vmul.f32 %v11910_v54, %v11904_v7  ;;  %vm1668_vm15 = vweird.f32 %v11910_v54  ;;  %v7353_v7 = vld [vmem:[#allocation17 + $0x384] sm:$0xf0] }
 0x31e   :  { %v1672_v17 = vmul.f32 %v11912_v60, %v11906_v9  ;;  %vm1678_vm1 = vweird.f32 %v11912_v60  ;;  %vm11962_vm3 = vmor %vm1667_vm14, %vm1668_vm15 }
 0x31f   :  { %v1663_v1 = vmul.f32 %v11910_v54, %v1662_v14 }
 0x320   :  { %v1558_v43 = vpop.f32.mrf.mxu2  ;;  %v1578_v58 = vpop.f32.mrf.mxu3  ;;  %v1673_v15 = vmul.f32 %v11912_v60, %v1672_v17  ;;  %v9515_v17 = vld [vmem:[#allocation17 + $0x374] sm:$0xf] }
 0x321   :  { %v10060_v45 = vpop.eup %10059  ;;  %v11918_v20 = vadd.f32 1e-05, %v1558_v43  ;;  %v11920_v38 = vadd.f32 1e-05, %v1578_v58  ;;  %v1664_v10 = vmul.f32 0.5, %v1663_v1 }
 0x322   :  { %v10062_v39 = vpop.eup %10061  ;;  %v1622_v0 = vmul.f32 %v10060_v45, %v1519_v40  ;;  %vm1628_vm8 = vweird.f32 %v10060_v45  ;;  %v1674_v57 = vmul.f32 0.5, %v1673_v15  ;;  %v9555_v1 = vld [vmem:[#allocation17 + $0x4b4] sm:$0xf]  ;;  %v1692_v15 = vperm.slane %v11926_v55, 3 }
 0x323   :  { %v1632_v2 = vmul.f32 %v10062_v39, %v1539_v27  ;;  %10063 = vrsqrt.f32 %v11918_v20  ;;  %vm1638_vm9 = vweird.f32 %v10062_v39  ;;  %v1665_v5 = vsub.f32 1.5, %v1664_v10  ;;  %vm1629_vm11 = vmor %vm1627_vm10, %vm1628_vm8 }
 0x324   :  { %v1623_v6 = vmul.f32 %v10060_v45, %v1622_v0  ;;  %10065 = vrsqrt.f32 %v11920_v38  ;;  %vm1639_vm13 = vmor %vm1637_vm12, %vm1638_vm9  ;;  %v1675_v23 = vsub.f32 1.5, %v1674_v57  ;;  %vm1647_vm2 = vweird.f32 %v11918_v20 }
 0x325   :  { %v1633_v16 = vmul.f32 %v10062_v39, %v1632_v2  ;;  %v1666_v48 = vmul.f32 %v11910_v54, %v1665_v5  ;;  %vm1657_vm7 = vweird.f32 %v11920_v38  ;;  %vm11977_vm8 = vmor %vm1677_vm5, %vm1678_vm1  ;;  %v7513_v2 = vld [vmem:[#allocation17 + $0x4c4] sm:$0xf0]  ;;  %v9550_v5 = vld [vmem:[#allocation17 + $0x48c] sm:$0xf] }
 0x326   :  { %v1624_v24 = vmul.f32 0.5, %v1623_v6 }
 0x327   :  { %v1634_v46 = vmul.f32 0.5, %v1633_v16  ;;  %v1711_v16 = vperm.slane %v11936_v3, 2 }
 0x328   :  { %v1625_v29 = vsub.f32 1.5, %v1624_v24  ;;  %v1693_v24 = vperm.slane %v11926_v55, 4 }
 0x329   :  { %v11928_v31 = vpop.eup %10063  ;;  %v1635_v61 = vsub.f32 1.5, %v1634_v46  ;;  %v9510_v46 = vld [vmem:[#allocation17 + $0x34c] sm:$0xf] }
 0x32a   :  { %v11931_v62 = vpop.eup %10065  ;;  %v1626_v63 = vmul.f32 %v10060_v45, %v1625_v29  ;;  %v1642_v4 = vmul.f32 %v11928_v31, %v11918_v20  ;;  %vm1648_vm0 = vweird.f32 %v11928_v31  ;;  %v1670_v20 = vsel %vm11962_vm3, %v11910_v54, %v1666_v48 }
 0x32b   :  { %v1636_v26 = vmul.f32 %v10062_v39, %v1635_v61  ;;  %v1652_v37 = vmul.f32 %v11931_v62, %v11920_v38  ;;  %vm1658_vm4 = vweird.f32 %v11931_v62  ;;  %vm1649_vm6 = vmor %vm1647_vm2, %vm1648_vm0  ;;  %v12001_v29 = vmul.f32 %v1670_v20, %v11881_v28  ;;  %v7333_v61 = vld [vmem:[#allocation17 + $0x35c] sm:$0xf0] }
 0x32c   :  { %v1630_v56 = vsel %vm1629_vm11, %v10060_v45, %v1626_v63  ;;  %v1643_v18 = vmul.f32 %v11928_v31, %v1642_v4  ;;  %v7536_v45 = vor.u32 %v9560_v12, %v7533_v25  ;;  %vm1659_vm9 = vmor %vm1657_vm7, %vm1658_vm4  ;;  %v9600_v63 = vld [vmem:[#allocation17 + $0x61c] sm:$0xf]  ;;  %v1694_v4 = vperm.slane %v11926_v55, 5  ;;  %v7833_v12 = vld [vmem:[#allocation17 + $0x744] sm:$0xf0] }
 0x32d   :  { %v11944_v32 = vmul.f32 %v1630_v56, %v11853_v49  ;;  %v1640_v33 = vsel %vm1639_vm13, %v10062_v39, %v1636_v26  ;;  %v1653_v36 = vmul.f32 %v11931_v62, %v1652_v37  ;;  %v7493_v26 = vld [vmem:[#allocation17 + $0x49c] sm:$0xf0]  ;;  %v9640_v56 = vld [vmem:[#allocation17 + $0x75c] sm:$0xf]  ;;  %v1705_v8 = vmul.f32 %v1693_v24, %v12001_v29  ;;  %v9630_v39 = vld [vmem:[#allocation17 + $0x70c] sm:$0xf] }
 0x32e   :  { %v11949_v40 = vmul.f32 %v1640_v33, %v11856_v50  ;;  %v1644_v27 = vmul.f32 0.5, %v1643_v18  ;;  %v1676_v50 = vmul.f32 %v11912_v60, %v1675_v23  ;;  %v7853_v18 = vld [vmem:[#allocation17 + $0x76c] sm:$0xf0]  ;;  %v7496_v55 = vor.u32 %v9550_v5, %v7493_v26  ;;  %v7313_v33 = vld [vmem:[#allocation17 + $0x334] sm:$0xf0] }
 0x32f   :  { %v1701_v51 = vmul.f32 %v1689_v59, %v11944_v32  ;;  %v1654_v11 = vmul.f32 0.5, %v1653_v36  ;;  %v7516_v59 = vor.u32 %v9555_v1, %v7513_v2  ;;  %v7856_v48 = vor.u32 %v9640_v56, %v7853_v18  ;;  %v7653_v20 = vld [vmem:[#allocation17 + $0x5dc] sm:$0xf0]  ;;  %v9535_v24 = vld [vmem:[#allocation17 + $0x414] sm:$0xf] }
 0x330   :  { %v1702_v49 = vmul.f32 %v1690_v35, %v11949_v40  ;;  %v1645_v53 = vsub.f32 1.5, %v1644_v27  ;;  %v1680_v6 = vsel %vm11977_vm8, %v11912_v60, %v1676_v50  ;;  %v7356_v60 = vor.u32 %v9515_v17, %v7353_v7  ;;  %v7673_v27 = vld [vmem:[#allocation17 + $0x604] sm:$0xf0]  ;;  %v7453_v17 = vld [vmem:[#allocation17 + $0x44c] sm:$0xf0] }
 0x331   :  { %v1721_v13 = vadd.f32 %v1709_v30, %v1701_v51  ;;  %v1655_v14 = vsub.f32 1.5, %v1654_v11  ;;  %v12008_v35 = vmul.f32 %v1680_v6, %v11884_v42  ;;  %v9545_v51 = vld [vmem:[#allocation17 + $0x464] sm:$0xf]  ;;  %v9635_v11 = vld [vmem:[#allocation17 + $0x734] sm:$0xf]  ;;  %v1725_v41 = vadd.f32 %v1713_v22, %v1705_v8 }
 0x332   :  { %v1646_v19 = vmul.f32 %v11928_v31, %v1645_v53  ;;  %v1722_v43 = vadd.f32 %v1710_v21, %v1702_v49  ;;  %v9505_v21 = vld [vmem:[#allocation17 + $0x324] sm:$0xf]  ;;  %v1714_v49 = vperm.slane %v11936_v3, 5  ;;  %v9590_v7 = vld [vmem:[#allocation17 + $0x5cc] sm:$0xf] }
 0x333   :  { %v11970_v58 = vpack.c.bf16 %v1721_v13, %v1721_v13  ;;  %v1656_v0 = vmul.f32 %v11931_v62, %v1655_v14  ;;  %v1706_v36 = vmul.f32 %v1694_v4, %v12008_v35  ;;  %v7316_v25 = vor.u32 %v9505_v21, %v7313_v33  ;;  %v7293_v14 = vld [vmem:[#allocation17 + $0x30c] sm:$0xf0]  ;;  %v9490_v5 = vld [vmem:[#allocation17 + $0x2ac] sm:$0xf]  ;;  %v7253_v26 = vld [vmem:[#allocation17 + $0x2bc] sm:$0xf0] }
 0x334   :  { %v1650_v9 = vsel %vm1649_vm6, %v11928_v31, %v1646_v19  ;;  %v11983_v38 = vpack.c.bf16 %v1722_v43, %v1722_v43  ;;  %v9500_v19 = vld [vmem:[#allocation17 + $0x2fc] sm:$0xf]  ;;  %v12022_v1 = vpack.c.bf16 %v1725_v41, %v1725_v41  ;;  %v7656_v6 = vor.u32 %v9590_v7, %v7653_v20  ;;  %v7413_v56 = vld [vmem:[#allocation17 + $0x3fc] sm:$0xf0]  ;;  %v7773_v21 = vld [vmem:[#allocation17 + $0x6cc] sm:$0xf0] }
 0x335   :  { %v11989_v54 = vmul.f32 %v1650_v9, %v11867_v44  ;;  %3329 = vmatmul.bf16.vlgmr.msra.gmra.mxu0 %v11970_v58  ;;  %v1660_v10 = vsel %vm1659_vm9, %v11931_v62, %v1656_v0  ;;  %v1712_v44 = vperm.slane %v11936_v3, 3  ;;  %v7693_v62 = vld [vmem:[#allocation17 + $0x62c] sm:$0xf0]  ;;  %v9540_v43 = vld [vmem:[#allocation17 + $0x43c] sm:$0xf]  ;;  %v7836_v3 = vor.u32 %v9635_v11, %v7833_v12 }
 0x336   :  { %3342 = vmatmul.bf16.vlgmr.msra.gmra.mxu1 %v11983_v38  ;;  %3425 = vmatpush.bf16.msra.mxu0 %v7376_v52  ;;  %v12005_v57 = vmul.f32 %v1660_v10, %v11870_v47  ;;  %v7336_v47 = vor.u32 %v9510_v46, %v7333_v61  ;;  %v7696_v37 = vor.u32 %v9600_v63, %v7693_v62  ;;  %v7473_v52 = vld [vmem:[#allocation17 + $0x474] sm:$0xf0]  ;;  %v7813_v9 = vld [vmem:[#allocation17 + $0x71c] sm:$0xf0]  ;;  %v9585_v46 = vld [vmem:[#allocation17 + $0x5a4] sm:$0xf] }
 0x337   :  { %v1703_v31 = vmul.f32 %v1691_v34, %v11989_v54  ;;  %3438 = vmatpush.bf16.msra.mxu1 %v7536_v45  ;;  %v9595_v34 = vld [vmem:[#allocation17 + $0x5f4] sm:$0xf]  ;;  %v7476_v13 = vor.u32 %v9545_v51, %v7473_v52  ;;  %v1726_v45 = vadd.f32 %v1714_v49, %v1706_v36  ;;  %v7296_v0 = vor.u32 %v9500_v19, %v7293_v14  ;;  %v7793_v61 = vld [vmem:[#allocation17 + $0x6f4] sm:$0xf0]  ;;  %v9580_v18 = vld [vmem:[#allocation17 + $0x57c] sm:$0xf] }
 0x338   :  { %v1704_v28 = vmul.f32 %v1692_v15, %v12005_v57  ;;  %v7676_v50 = vor.u32 %v9595_v34, %v7673_v27  ;;  %v7456_v2 = vor.u32 %v9540_v43, %v7453_v17  ;;  %v9495_v15 = vld [vmem:[#allocation17 + $0x2d4] sm:$0xf]  ;;  %v7256_v22 = vor.u32 %v9490_v5, %v7253_v26  ;;  %v9485_v8 = vld [vmem:[#allocation17 + $0x284] sm:$0xf]  ;;  %v7393_v34 = vld [vmem:[#allocation17 + $0x3d4] sm:$0xf0] }
 0x339   :  { %v1723_v30 = vadd.f32 %v1711_v16, %v1703_v31  ;;  %v7273_v16 = vld [vmem:[#allocation17 + $0x2e4] sm:$0xf0]  ;;  %v12024_v10 = vpack.c.bf16 %v1726_v45, %v1726_v45  ;;  %v7633_v31 = vld [vmem:[#allocation17 + $0x5b4] sm:$0xf0]  ;;  %v9525_v33 = vld [vmem:[#allocation17 + $0x3c4] sm:$0xf] }
 0x33a   :  { %3426 = vmatpush.bf16.msra.mxu0 %v7356_v60  ;;  %v1724_v23 = vadd.f32 %v1712_v44, %v1704_v28  ;;  %v7816_v60 = vor.u32 %v9630_v39, %v7813_v9  ;;  %v7433_v44 = vld [vmem:[#allocation17 + $0x424] sm:$0xf0]  ;;  %v7276_v63 = vor.u32 %v9495_v15, %v7273_v16  ;;  %v7636_v4 = vor.u32 %v9585_v46, %v7633_v31  ;;  %v7059_v51 = vld [vmem:[#allocation17 + $0x120] sm:$0xf]  ;;  %v9443_v52 = vld [vmem:[#allocation17 + $0x130] sm:$0xf0] }
 0x33b   :  { %3439 = vmatpush.bf16.msra.mxu1 %v7516_v59  ;;  %v12014_v42 = vpack.c.bf16 %v1723_v30, %v1723_v30  ;;  %v9625_v59 = vld [vmem:[#allocation17 + $0x6e4] sm:$0xf]  ;;  %v7436_v62 = vor.u32 %v9535_v24, %v7433_v44  ;;  %v9530_v30 = vld [vmem:[#allocation17 + $0x3ec] sm:$0xf]  ;;  %v7593_v49 = vld [vmem:[#allocation17 + $0x564] sm:$0xf0]  ;;  %v7396_v41 = vor.u32 %v9525_v33, %v7393_v34  ;;  %v7060_v19 = vor.u32 %v9443_v52, %v7059_v51 }
 0x33c   :  { %v12019_v53 = vpack.c.bf16 %v1724_v23, %v1724_v23  ;;  %v7796_v28 = vor.u32 %v9625_v59, %v7793_v61  ;;  %v7416_v23 = vor.u32 %v9530_v30, %v7413_v56  ;;  %v9615_v11 = vld [vmem:[#allocation17 + $0x694] sm:$0xf]  ;;  %v7753_v12 = vld [vmem:[#allocation17 + $0x6a4] sm:$0xf0]  ;;  %v7039_v45 = vld [vmem:[#allocation17 + $0xf8] sm:$0xf] }
 0x33d   :  { %3355 = vmatmul.bf16.vlgmr.msra.gmra.mxu2 %v12014_v42  ;;  %v7756_v43 = vor.u32 %v9615_v11, %v7753_v12  ;;  %v9438_v17 = vld [vmem:[#allocation17 + $0x108] sm:$0xf0]  ;;  %v7573_v20 = vld [vmem:[#allocation17 + $0x53c] sm:$0xf0]  ;;  %v9565_v15 = vld [vmem:[#allocation17 + $0x504] sm:$0xf] }
 0x33e   :  { %3427 = vmatpush.bf16.msra.mxu0 %v7336_v47  ;;  %3451 = vmatpush.bf16.msra.mxu2 %v7696_v37  ;;  %v7613_v47 = vld [vmem:[#allocation17 + $0x58c] sm:$0xf0]  ;;  %v9620_v37 = vld [vmem:[#allocation17 + $0x6bc] sm:$0xf]  ;;  %v9610_v39 = vld [vmem:[#allocation17 + $0x66c] sm:$0xf] }
 0x33f   :  { %3368 = vmatmul.bf16.vlgmr.msra.gmra.mxu3 %v12019_v53  ;;  %3440 = vmatpush.bf16.msra.mxu1 %v7496_v55  ;;  %v7233_v55 = vld [vmem:[#allocation17 + $0x294] sm:$0xf0]  ;;  %v7616_v27 = vor.u32 %v9580_v18, %v7613_v47  ;;  %v7776_v36 = vor.u32 %v9620_v37, %v7773_v21  ;;  %v7733_v9 = vld [vmem:[#allocation17 + $0x67c] sm:$0xf0]  ;;  %v7019_v44 = vld [vmem:[#allocation17 + $0xd0] sm:$0xf] }
 0x340   :  { %3464 = vmatpush.bf16.msra.mxu3 %v7856_v48  ;;  %v9575_v48 = vld [vmem:[#allocation17 + $0x554] sm:$0xf]  ;;  %v7736_v24 = vor.u32 %v9610_v39, %v7733_v9  ;;  %v9433_v46 = vld [vmem:[#allocation17 + $0xe0] sm:$0xf0]  ;;  %v7713_v61 = vld [vmem:[#allocation17 + $0x654] sm:$0xf0] }
 0x341   :  { %v7596_v14 = vor.u32 %v9575_v48, %v7593_v49  ;;  %v9605_v59 = vld [vmem:[#allocation17 + $0x644] sm:$0xf]  ;;  %v9523_v5 = vld [vmem:[#allocation17 + $0x3b0] sm:$0xf0]  ;;  %v7020_v26 = vor.u32 %v9433_v46, %v7019_v44  ;;  %v6999_v21 = vld [vmem:[#allocation17 + $0xa8] sm:$0xf] }
 0x342   :  { %3428 = vmatpush.bf16.msra.mxu0 %v7316_v25  ;;  %3452 = vmatpush.bf16.msra.mxu2 %v7676_v50  ;;  %v7236_v25 = vor.u32 %v9485_v8, %v7233_v55  ;;  %v7219_v50 = vld [vmem:[#allocation17 + $0x260] sm:$0xf]  ;;  %v9563_v30 = vld [vmem:[#allocation17 + $0x4f0] sm:$0xf0]  ;;  %v7716_v18 = vor.u32 %v9605_v59, %v7713_v61  ;;  %v7159_v8 = vld [vmem:[#allocation17 + $0x1e8] sm:$0xf] }
 0x343   :  { %3441 = vmatpush.bf16.msra.mxu1 %v7476_v13  ;;  %v9483_v13 = vld [vmem:[#allocation17 + $0x270] sm:$0xf0]  ;;  %v9468_v55 = vld [vmem:[#allocation17 + $0x1f8] sm:$0xf0]  ;;  %v7359_v33 = vld [vmem:[#allocation17 + $0x378] sm:$0xf] }
 0x344   :  { %3465 = vmatpush.bf16.msra.mxu3 %v7836_v3  ;;  %v9570_v3 = vld [vmem:[#allocation17 + $0x52c] sm:$0xf]  ;;  %v7220_v7 = vor.u32 %v9483_v13, %v7219_v50  ;;  %v7160_v51 = vor.u32 %v9468_v55, %v7159_v8  ;;  %v6979_v49 = vld [vmem:[#allocation17 + $0x80] sm:$0xf]  ;;  %v9423_v11 = vld [vmem:[#allocation17 + $0x90] sm:$0xf0] }
 0x345   :  { %3381 = vmatmul.bf16.vlgmr.msrb.gmra.mxu0 %v12022_v1  ;;  %v7576_v16 = vor.u32 %v9570_v3, %v7573_v20  ;;  %v9518_v34 = vld [vmem:[#allocation17 + $0x388] sm:$0xf0]  ;;  %v7139_v12 = vld [vmem:[#allocation17 + $0x1c0] sm:$0xf]  ;;  %v9463_v50 = vld [vmem:[#allocation17 + $0x1d0] sm:$0xf0] }
 0x346   :  { %3394 = vmatmul.bf16.vlgmr.msrb.gmra.mxu1 %v12024_v10  ;;  %3429 = vmatpush.bf16.msra.mxu0 %v7296_v0  ;;  %v7199_v0 = vld [vmem:[#allocation17 + $0x238] sm:$0xf]  ;;  %v7360_v52 = vor.u32 %v9518_v34, %v7359_v33  ;;  %v7339_v13 = vld [vmem:[#allocation17 + $0x350] sm:$0xf]  ;;  %v7140_v3 = vor.u32 %v9463_v50, %v7139_v12  ;;  %v9458_v9 = vld [vmem:[#allocation17 + $0x1a8] sm:$0xf0] }
 0x347   :  { %3442 = vmatpush.bf16.msra.mxu1 %v7456_v2  ;;  %3453 = vmatpush.bf16.msra.mxu2 %v7656_v6  ;;  %v9478_v2 = vld [vmem:[#allocation17 + $0x248] sm:$0xf0]  ;;  %v7040_v6 = vor.u32 %v9438_v17, %v7039_v45  ;;  %v6959_v17 = vld [vmem:[#allocation17 + $0x58] sm:$0xf]  ;;  %v6939_v44 = vld [vmem:[#allocation17 + $0x30] sm:$0xf] }
 0x348   :  { %3466 = vmatpush.bf16.msra.mxu3 %v7816_v60  ;;  %v7553_v60 = vld [vmem:[#allocation17 + $0x514] sm:$0xf0]  ;;  %v7200_v31 = vor.u32 %v9478_v2, %v7199_v0  ;;  %v7319_v0 = vld [vmem:[#allocation17 + $0x328] sm:$0xf]  ;;  %v9508_v2 = vld [vmem:[#allocation17 + $0x338] sm:$0xf0] }
 0x349   :  { %v7556_v56 = vor.u32 %v9565_v15, %v7553_v60  ;;  %v7119_v20 = vld [vmem:[#allocation17 + $0x198] sm:$0xf]  ;;  %v9548_v15 = vld [vmem:[#allocation17 + $0x478] sm:$0xf0]  ;;  %v7320_v60 = vor.u32 %v9508_v2, %v7319_v0  ;;  %v9413_v46 = vld [vmem:[#allocation17 + $0x40] sm:$0xf0] }
 0x34a   :  { %3430 = vmatpush.bf16.msra.mxu0 %v7276_v63  ;;  %v7179_v63 = vld [vmem:[#allocation17 + $0x210] sm:$0xf]  ;;  %v9453_v61 = vld [vmem:[#allocation17 + $0x180] sm:$0xf0]  ;;  %v9498_v8 = vld [vmem:[#allocation17 + $0x2e8] sm:$0xf0] }
 0x34b   :  { %3443 = vmatpush.bf16.msra.mxu1 %v7436_v62  ;;  %3454 = vmatpush.bf16.msra.mxu2 %v7636_v4  ;;  %v9473_v62 = vld [vmem:[#allocation17 + $0x220] sm:$0xf0]  ;;  %v7379_v4 = vld [vmem:[#allocation17 + $0x3a0] sm:$0xf]  ;;  %v9538_v55 = vld [vmem:[#allocation17 + $0x428] sm:$0xf0] }
 0x34c   :  { %3467 = vmatpush.bf16.msra.mxu3 %v7796_v28  ;;  %v7539_v28 = vld [vmem:[#allocation17 + $0x4e0] sm:$0xf]  ;;  %v7180_v47 = vor.u32 %v9473_v62, %v7179_v63  ;;  %v7380_v37 = vor.u32 %v9523_v5, %v7379_v4  ;;  %v9503_v62 = vld [vmem:[#allocation17 + $0x310] sm:$0xf0]  ;;  %v7259_v12 = vld [vmem:[#allocation17 + $0x2b0] sm:$0xf] }
 0x34d   :  { %3407 = vmatmul.bf16.vlgmr.msrb.gmra.mxu2 %v11970_v58  ;;  %v7299_v63 = vld [vmem:[#allocation17 + $0x300] sm:$0xf]  ;;  %v9543_v5 = vld [vmem:[#allocation17 + $0x450] sm:$0xf0]  ;;  %v7419_v50 = vld [vmem:[#allocation17 + $0x3f0] sm:$0xf] }
 0x34e   :  { %3431 = vmatpush.bf16.msra.mxu0 %v7256_v22  ;;  %v9428_v22 = vld [vmem:[#allocation17 + $0xb8] sm:$0xf0]  ;;  %v7459_v4 = vld [vmem:[#allocation17 + $0x440] sm:$0xf]  ;;  %v9603_v34 = vld [vmem:[#allocation17 + $0x630] sm:$0xf0] }
 0x34f   :  { %3420 = vmatmul.bf16.vlgmr.msrb.gmra.mxu3 %v11983_v38  ;;  %3444 = vmatpush.bf16.msra.mxu1 %v7416_v23  ;;  %v7540_v23 = vor.u32 %v9563_v30, %v7539_v28  ;;  %v7000_v48 = vor.u32 %v9428_v22, %v6999_v21  ;;  %v6919_v28 = vld [vmem:[#allocation17 + $0x8] sm:$0xf]  ;;  %v7460_v21 = vor.u32 %v9543_v5, %v7459_v4  ;;  %v7279_v22 = vld [vmem:[#allocation17 + $0x2d8] sm:$0xf]  ;;  %v7699_v33 = vld [vmem:[#allocation17 + $0x620] sm:$0xf] }
 0x350   :  { %3455 = vmatpush.bf16.msra.mxu2 %v7616_v27  ;;  %3468 = vmatpush.bf16.msra.mxu3 %v7776_v36  ;;  %v7519_v27 = vld [vmem:[#allocation17 + $0x4b8] sm:$0xf]  ;;  %v9558_v36 = vld [vmem:[#allocation17 + $0x4c8] sm:$0xf0]  ;;  %v9528_v0 = vld [vmem:[#allocation17 + $0x3d8] sm:$0xf0] }
 0x351   :  { %v7639_v5 = vld [vmem:[#allocation17 + $0x5a8] sm:$0xf] }
 0x352   :  { %3432 = vmatpush.bf16.msra.mxu0 %v7236_v25  ;;  %v7520_v25 = vor.u32 %v9558_v36, %v7519_v27  ;;  %v7859_v36 = vld [vmem:[#allocation17 + $0x760] sm:$0xf] }
 0x353   :  { %3445 = vmatpush.bf16.msra.mxu1 %v7396_v41  ;;  %v9513_v41 = vld [vmem:[#allocation17 + $0x360] sm:$0xf0] }
 0x354   :  { %3456 = vmatpush.bf16.msra.mxu2 %v7596_v14  ;;  %3469 = vmatpush.bf16.msra.mxu3 %v7756_v43  ;;  %v9553_v14 = vld [vmem:[#allocation17 + $0x4a0] sm:$0xf0]  ;;  %v6980_v43 = vor.u32 %v9423_v11, %v6979_v49  ;;  %v7340_v45 = vor.u32 %v9513_v41, %v7339_v13  ;;  %v7700_v11 = vor.u32 %v9603_v34, %v7699_v33  ;;  %v9583_v33 = vld [vmem:[#allocation17 + $0x590] sm:$0xf0]  ;;  %v7779_v34 = vld [vmem:[#allocation17 + $0x6c0] sm:$0xf] }
 0x355   :  { %3433 = vmatmul.bf16.vlgmr.msra.gmra.mxu0 %v12014_v42  ;;  %v9533_v41 = vld [vmem:[#allocation17 + $0x400] sm:$0xf0] }
 0x356   :  { %3477 = vmatpush.bf16.msrb.mxu0 %v7060_v19  ;;  %3446 = vmatmul.bf16.vlgmr.msra.gmra.mxu1 %v12019_v53  ;;  %v7499_v19 = vld [vmem:[#allocation17 + $0x490] sm:$0xf] }
 0x357   :  { %3490 = vmatpush.bf16.msrb.mxu1 %v7220_v7  ;;  %v9418_v7 = vld [vmem:[#allocation17 + $0x68] sm:$0xf0]  ;;  %v7500_v39 = vor.u32 %v9553_v14, %v7499_v19  ;;  %v7679_v19 = vld [vmem:[#allocation17 + $0x5f8] sm:$0xf] }
 0x358   :  { %3457 = vmatpush.bf16.msra.mxu2 %v7576_v16  ;;  %3470 = vmatpush.bf16.msra.mxu3 %v7736_v24  ;;  %v6960_v16 = vor.u32 %v9418_v7, %v6959_v17  ;;  %v7120_v24 = vor.u32 %v9458_v9, %v7119_v20  ;;  %v9598_v14 = vld [vmem:[#allocation17 + $0x608] sm:$0xf0]  ;;  %v7239_v17 = vld [vmem:[#allocation17 + $0x288] sm:$0xf]  ;;  %v7420_v7 = vor.u32 %v9533_v41, %v7419_v50  ;;  %v7599_v50 = vld [vmem:[#allocation17 + $0x558] sm:$0xf] }
 0x359   :  { %v7680_v20 = vor.u32 %v9598_v14, %v7679_v19  ;;  %v7399_v9 = vld [vmem:[#allocation17 + $0x3c8] sm:$0xf]  ;;  %v7759_v41 = vld [vmem:[#allocation17 + $0x698] sm:$0xf]  ;;  %v9618_v14 = vld [vmem:[#allocation17 + $0x6a8] sm:$0xf0] }
 0x35a   :  { %3478 = vmatpush.bf16.msrb.mxu0 %v7040_v6  ;;  %v7479_v6 = vld [vmem:[#allocation17 + $0x468] sm:$0xf] }
 0x35b   :  { %3491 = vmatpush.bf16.msrb.mxu1 %v7200_v31  ;;  %v7099_v31 = vld [vmem:[#allocation17 + $0x170] sm:$0xf]  ;;  %v7480_v59 = vor.u32 %v9548_v15, %v7479_v6  ;;  %v9593_v15 = vld [vmem:[#allocation17 + $0x5e0] sm:$0xf0] }
 0x35c   :  { %3458 = vmatpush.bf16.msra.mxu2 %v7556_v56  ;;  %3471 = vmatpush.bf16.msra.mxu3 %v7716_v18  ;;  %v7100_v30 = vor.u32 %v9453_v61, %v7099_v31  ;;  %v7300_v56 = vor.u32 %v9503_v62, %v7299_v63  ;;  %v9408_v18 = vld [vmem:[#allocation17 + $0x18] sm:$0xf0]  ;;  %v7659_v6 = vld [vmem:[#allocation17 + $0x5d0] sm:$0xf]  ;;  %v9481_v31 = vld [vmem:[#allocation17 + $0x264] sm:$0xf]  ;;  %v7400_v61 = vor.u32 %v9528_v0, %v7399_v9 }
 0x35d   :  { %v6920_v27 = vor.u32 %v9408_v18, %v6919_v28  ;;  %v7660_v63 = vor.u32 %v9593_v15, %v7659_v6  ;;  %v7799_v28 = vld [vmem:[#allocation17 + $0x6e8] sm:$0xf]  ;;  %v9436_v18 = vld [vmem:[#allocation17 + $0xfc] sm:$0xf]  ;;  %v7579_v9 = vld [vmem:[#allocation17 + $0x530] sm:$0xf] }
 0x35e   :  { %3479 = vmatpush.bf16.msrb.mxu0 %v7020_v26  ;;  %v6940_v26 = vor.u32 %v9413_v46, %v6939_v44  ;;  %v7061_v44 = vld [vmem:[#allocation17 + $0x134] sm:$0xf0]  ;;  %v9573_v0 = vld [vmem:[#allocation17 + $0x540] sm:$0xf0] }
 0x35f   :  { %3492 = vmatpush.bf16.msrb.mxu1 %v7180_v47  ;;  %3459 = vmatmul.bf16.vlgmr.msra.gmra.mxu2 %v12022_v1  ;;  %v7079_v47 = vld [vmem:[#allocation17 + $0x148] sm:$0xf]  ;;  %v9613_v15 = vld [vmem:[#allocation17 + $0x680] sm:$0xf0] }
 0x360   :  { %3503 = vmatpush.bf16.msrb.mxu2 %v7380_v37  ;;  %3516 = vmatpush.bf16.msrb.mxu3 %v7540_v23  ;;  %v9448_v37 = vld [vmem:[#allocation17 + $0x158] sm:$0xf0]  ;;  %v7439_v23 = vld [vmem:[#allocation17 + $0x418] sm:$0xf] }
 0x361   :  { %3472 = vmatmul.bf16.vlgmr.msra.gmra.mxu3 %v12024_v10  ;;  %v7440_v49 = vor.u32 %v9538_v55, %v7439_v23  ;;  %v7619_v55 = vld [vmem:[#allocation17 + $0x580] sm:$0xf] }
 0x362   :  { %3480 = vmatpush.bf16.msrb.mxu0 %v7000_v48  ;;  %v9643_v48 = vld [vmem:[#allocation17 + $0x770] sm:$0xf0] }
 0x363   :  { %3493 = vmatpush.bf16.msrb.mxu1 %v7160_v51  ;;  %v7080_v51 = vor.u32 %v9448_v37, %v7079_v47  ;;  %v7860_v13 = vor.u32 %v9643_v48, %v7859_v36  ;;  %v7041_v47 = vld [vmem:[#allocation17 + $0x10c] sm:$0xf0]  ;;  %v9476_v37 = vld [vmem:[#allocation17 + $0x23c] sm:$0xf]  ;;  %v9623_v36 = vld [vmem:[#allocation17 + $0x6d0] sm:$0xf0] }
 0x364   :  { %3504 = vmatpush.bf16.msrb.mxu2 %v7360_v52  ;;  %3517 = vmatpush.bf16.msrb.mxu3 %v7520_v25  ;;  %v7280_v52 = vor.u32 %v9498_v8, %v7279_v22  ;;  %v9493_v25 = vld [vmem:[#allocation17 + $0x2c0] sm:$0xf0]  ;;  %v7044_v23 = vor.u32 %v9436_v18, %v7041_v47  ;;  %v9431_v48 = vld [vmem:[#allocation17 + $0xd4] sm:$0xf]  ;;  %v7381_v47 = vld [vmem:[#allocation17 + $0x3b4] sm:$0xf0] }
 0x365   :  { %v9521_v18 = vld [vmem:[#allocation17 + $0x3a4] sm:$0xf] }
 0x366   :  { %3481 = vmatpush.bf16.msrb.mxu0 %v6980_v43  ;;  %v7839_v43 = vld [vmem:[#allocation17 + $0x738] sm:$0xf] }
 0x367   :  { %3494 = vmatpush.bf16.msrb.mxu1 %v7140_v3  ;;  %v9638_v3 = vld [vmem:[#allocation17 + $0x748] sm:$0xf0] }
 0x368   :  { %3505 = vmatpush.bf16.msrb.mxu2 %v7340_v45  ;;  %3518 = vmatpush.bf16.msrb.mxu3 %v7500_v39  ;;  %v7260_v45 = vor.u32 %v9493_v25, %v7259_v12  ;;  %v9488_v39 = vld [vmem:[#allocation17 + $0x298] sm:$0xf0]  ;;  %v7840_v2 = vor.u32 %v9638_v3, %v7839_v43  ;;  %v7780_v12 = vor.u32 %v9623_v36, %v7779_v34  ;;  %v9426_v43 = vld [vmem:[#allocation17 + $0xac] sm:$0xf]  ;;  %v7001_v3 = vld [vmem:[#allocation17 + $0xbc] sm:$0xf0] }
 0x369   :  { %v7240_v46 = vor.u32 %v9488_v39, %v7239_v17  ;;  %v7161_v17 = vld [vmem:[#allocation17 + $0x1fc] sm:$0xf0]  ;;  %v7004_v39 = vor.u32 %v9426_v43, %v7001_v3  ;;  %v9411_v34 = vld [vmem:[#allocation17 + $0x34] sm:$0xf] }
 0x36a   :  { %3482 = vmatpush.bf16.msrb.mxu0 %v6960_v16  ;;  %v7819_v16 = vld [vmem:[#allocation17 + $0x710] sm:$0xf]  ;;  %v9451_v36 = vld [vmem:[#allocation17 + $0x174] sm:$0xf]  ;;  %v7081_v43 = vld [vmem:[#allocation17 + $0x15c] sm:$0xf0] }
 0x36b   :  { %3495 = vmatpush.bf16.msrb.mxu1 %v7120_v24  ;;  %v9633_v24 = vld [vmem:[#allocation17 + $0x720] sm:$0xf0] }
 0x36c   :  { %3506 = vmatpush.bf16.msrb.mxu2 %v7320_v60  ;;  %3519 = vmatpush.bf16.msrb.mxu3 %v7480_v59  ;;  %v9441_v60 = vld [vmem:[#allocation17 + $0x124] sm:$0xf]  ;;  %v7221_v59 = vld [vmem:[#allocation17 + $0x274] sm:$0xf0]  ;;  %v7820_v62 = vor.u32 %v9633_v24, %v7819_v16 }
 0x36d   :  { %v7064_v4 = vor.u32 %v9441_v60, %v7061_v44  ;;  %v9421_v16 = vld [vmem:[#allocation17 + $0x84] sm:$0xf]  ;;  %v6981_v24 = vld [vmem:[#allocation17 + $0x94] sm:$0xf0] }
 0x36e   :  { %3483 = vmatpush.bf16.msrb.mxu0 %v6940_v26  ;;  %v9588_v26 = vld [vmem:[#allocation17 + $0x5b8] sm:$0xf0]  ;;  %v9461_v60 = vld [vmem:[#allocation17 + $0x1c4] sm:$0xf]  ;;  %v7141_v44 = vld [vmem:[#allocation17 + $0x1d4] sm:$0xf0] }
 0x36f   :  { %3496 = vmatpush.bf16.msrb.mxu1 %v7100_v30  ;;  %v7224_v30 = vor.u32 %v9481_v31, %v7221_v59  ;;  %v7640_v22 = vor.u32 %v9588_v26, %v7639_v5  ;;  %v7559_v31 = vld [vmem:[#allocation17 + $0x508] sm:$0xf]  ;;  %v7144_v5 = vor.u32 %v9461_v60, %v7141_v44  ;;  %v9416_v26 = vld [vmem:[#allocation17 + $0x5c] sm:$0xf]  ;;  %v9506_v44 = vld [vmem:[#allocation17 + $0x32c] sm:$0xf] }
 0x370   :  { %3507 = vmatpush.bf16.msrb.mxu2 %v7300_v56  ;;  %3520 = vmatpush.bf16.msrb.mxu3 %v7460_v21  ;;  %v9628_v56 = vld [vmem:[#allocation17 + $0x6f8] sm:$0xf0]  ;;  %v7201_v21 = vld [vmem:[#allocation17 + $0x24c] sm:$0xf0] }
 0x371   :  { %v7800_v8 = vor.u32 %v9628_v56, %v7799_v28  ;;  %v6961_v28 = vld [vmem:[#allocation17 + $0x6c] sm:$0xf0] }
 0x372   :  { %3484 = vmatpush.bf16.msrb.mxu0 %v6920_v27  ;;  %v7204_v27 = vor.u32 %v9476_v37, %v7201_v21  ;;  %v7121_v56 = vld [vmem:[#allocation17 + $0x1ac] sm:$0xf0]  ;;  %v9561_v21 = vld [vmem:[#allocation17 + $0x4e4] sm:$0xf] }
 0x373   :  { %3497 = vmatpush.bf16.msrb.mxu1 %v7080_v51  ;;  %v7021_v51 = vld [vmem:[#allocation17 + $0xe4] sm:$0xf0] }
 0x374   :  { %3508 = vmatpush.bf16.msrb.mxu2 %v7280_v52  ;;  %3521 = vmatpush.bf16.msrb.mxu3 %v7440_v49  ;;  %v9471_v52 = vld [vmem:[#allocation17 + $0x214] sm:$0xf]  ;;  %v7181_v49 = vld [vmem:[#allocation17 + $0x224] sm:$0xf0]  ;;  %v7024_v25 = vor.u32 %v9431_v48, %v7021_v51 }
 0x375   :  { %3485 = vmatmul.bf16.vlgmr.msrb.gmra.mxu0 %v11970_v58  ;;  %v7184_v19 = vor.u32 %v9471_v52, %v7181_v49  ;;  %v7101_v51 = vld [vmem:[#allocation17 + $0x184] sm:$0xf0]  ;;  %v9516_v52 = vld [vmem:[#allocation17 + $0x37c] sm:$0xf]  ;;  %v7361_v49 = vld [vmem:[#allocation17 + $0x38c] sm:$0xf0] }
 0x376   :  { %3529 = vmatpush.bf16.msra.mxu0 %v7700_v11  ;;  %3498 = vmatmul.bf16.vlgmr.msrb.gmra.mxu1 %v11983_v38  ;;  %v7620_v11 = vor.u32 %v9583_v33, %v7619_v55  ;;  %v7384_v33 = vor.u32 %v9521_v18, %v7381_v47  ;;  %v7301_v18 = vld [vmem:[#allocation17 + $0x314] sm:$0xf0]  ;;  %v9541_v47 = vld [vmem:[#allocation17 + $0x444] sm:$0xf] }
 0x377   :  { %3542 = vmatpush.bf16.msra.mxu1 %v7860_v13  ;;  %v9578_v13 = vld [vmem:[#allocation17 + $0x568] sm:$0xf0] }
 0x378   :  { %3509 = vmatpush.bf16.msrb.mxu2 %v7260_v45  ;;  %3522 = vmatpush.bf16.msrb.mxu3 %v7420_v7  ;;  %v9466_v45 = vld [vmem:[#allocation17 + $0x1ec] sm:$0xf]  ;;  %v7600_v7 = vor.u32 %v9578_v13, %v7599_v50  ;;  %v7104_v13 = vor.u32 %v9451_v36, %v7101_v51  ;;  %v9496_v36 = vld [vmem:[#allocation17 + $0x2dc] sm:$0xf] }
 0x379   :  { %v7164_v6 = vor.u32 %v9466_v45, %v7161_v17  ;;  %v9406_v50 = vld [vmem:[#allocation17 + $0xc] sm:$0xf]  ;;  %v9511_v45 = vld [vmem:[#allocation17 + $0x354] sm:$0xf]  ;;  %v7341_v17 = vld [vmem:[#allocation17 + $0x364] sm:$0xf0] }
 0x37a   :  { %3530 = vmatpush.bf16.msra.mxu0 %v7680_v20  ;;  %v7760_v20 = vor.u32 %v9618_v14, %v7759_v41  ;;  %v7364_v41 = vor.u32 %v9516_v52, %v7361_v49  ;;  %v9446_v14 = vld [vmem:[#allocation17 + $0x14c] sm:$0xf]  ;;  %v9536_v51 = vld [vmem:[#allocation17 + $0x41c] sm:$0xf]  ;;  %v7441_v49 = vld [vmem:[#allocation17 + $0x42c] sm:$0xf0] }
 0x37b   :  { %3543 = vmatpush.bf16.msra.mxu1 %v7840_v2  ;;  %v7739_v2 = vld [vmem:[#allocation17 + $0x670] sm:$0xf] }
 0x37c   :  { %3510 = vmatpush.bf16.msrb.mxu2 %v7240_v46  ;;  %3523 = vmatpush.bf16.msrb.mxu3 %v7400_v61  ;;  %v7580_v46 = vor.u32 %v9573_v0, %v7579_v9  ;;  %v7740_v59 = vor.u32 %v9613_v15, %v7739_v2  ;;  %v6984_v61 = vor.u32 %v9421_v16, %v6981_v24  ;;  %v7701_v9 = vld [vmem:[#allocation17 + $0x634] sm:$0xf0]  ;;  %v9641_v2 = vld [vmem:[#allocation17 + $0x764] sm:$0xf] }
 0x37d   :  { %v7084_v15 = vor.u32 %v9446_v14, %v7081_v43  ;;  %v7344_v16 = vor.u32 %v9511_v45, %v7341_v17  ;;  %v9491_v14 = vld [vmem:[#allocation17 + $0x2b4] sm:$0xf]  ;;  %v7261_v43 = vld [vmem:[#allocation17 + $0x2c4] sm:$0xf0] }
 0x37e   :  { %3531 = vmatpush.bf16.msra.mxu0 %v7660_v63  ;;  %v9568_v63 = vld [vmem:[#allocation17 + $0x518] sm:$0xf0]  ;;  %v7421_v17 = vld [vmem:[#allocation17 + $0x404] sm:$0xf0] }
 0x37f   :  { %3544 = vmatpush.bf16.msra.mxu1 %v7820_v62  ;;  %3511 = vmatmul.bf16.vlgmr.msrb.gmra.mxu2 %v12014_v42  ;;  %v7719_v62 = vld [vmem:[#allocation17 + $0x648] sm:$0xf]  ;;  %v7560_v37 = vor.u32 %v9568_v63, %v7559_v31  ;;  %v9546_v31 = vld [vmem:[#allocation17 + $0x46c] sm:$0xf]  ;;  %v9596_v63 = vld [vmem:[#allocation17 + $0x5fc] sm:$0xf] }
 0x380   :  { %3555 = vmatpush.bf16.msra.mxu2 %v7064_v4  ;;  %3568 = vmatpush.bf16.msra.mxu3 %v7224_v30  ;;  %v9608_v4 = vld [vmem:[#allocation17 + $0x658] sm:$0xf0] }
 0x381   :  { %3524 = vmatmul.bf16.vlgmr.msrb.gmra.mxu3 %v12019_v53  ;;  %v9456_v30 = vld [vmem:[#allocation17 + $0x19c] sm:$0xf] }
 0x382   :  { %3532 = vmatpush.bf16.msra.mxu0 %v7640_v22  ;;  %v7541_v22 = vld [vmem:[#allocation17 + $0x4f4] sm:$0xf0]  ;;  %v7124_v55 = vor.u32 %v9456_v30, %v7121_v56  ;;  %v9501_v56 = vld [vmem:[#allocation17 + $0x304] sm:$0xf] }
 0x383   :  { %3545 = vmatpush.bf16.msra.mxu1 %v7800_v8  ;;  %v7720_v8 = vor.u32 %v9608_v4, %v7719_v62  ;;  %v7544_v48 = vor.u32 %v9561_v21, %v7541_v22  ;;  %v7681_v62 = vld [vmem:[#allocation17 + $0x60c] sm:$0xf0]  ;;  %v9636_v4 = vld [vmem:[#allocation17 + $0x73c] sm:$0xf]  ;;  %v7461_v21 = vld [vmem:[#allocation17 + $0x454] sm:$0xf0] }
 0x384   :  { %3556 = vmatpush.bf16.msra.mxu2 %v7044_v23  ;;  %3569 = vmatpush.bf16.msra.mxu3 %v7204_v27  ;;  %v6964_v23 = vor.u32 %v9416_v26, %v6961_v28  ;;  %v6941_v27 = vld [vmem:[#allocation17 + $0x44] sm:$0xf0]  ;;  %v7684_v30 = vor.u32 %v9596_v63, %v7681_v62  ;;  %v9591_v22 = vld [vmem:[#allocation17 + $0x5d4] sm:$0xf]  ;;  %v9444_v62 = vld [vmem:[#allocation17 + $0x138] sm:$0xf0] }
 0x385   :  { %v7067_v63 = vld [vmem:[#allocation17 + $0x128] sm:$0xf] }
 0x386   :  { %3533 = vmatpush.bf16.msra.mxu0 %v7620_v11  ;;  %v9556_v11 = vld [vmem:[#allocation17 + $0x4bc] sm:$0xf] }
 0x387   :  { %3546 = vmatpush.bf16.msra.mxu1 %v7780_v12  ;;  %v7521_v12 = vld [vmem:[#allocation17 + $0x4cc] sm:$0xf0] }
 0x388   :  { %3557 = vmatpush.bf16.msra.mxu2 %v7024_v25  ;;  %3570 = vmatpush.bf16.msra.mxu3 %v7184_v19  ;;  %v6944_v25 = vor.u32 %v9411_v34, %v6941_v27  ;;  %v6921_v19 = vld [vmem:[#allocation17 + $0x1c] sm:$0xf0]  ;;  %v7524_v3 = vor.u32 %v9556_v11, %v7521_v12  ;;  %v7464_v34 = vor.u32 %v9541_v47, %v7461_v21  ;;  %v9586_v11 = vld [vmem:[#allocation17 + $0x5ac] sm:$0xf]  ;;  %v9571_v47 = vld [vmem:[#allocation17 + $0x534] sm:$0xf] }
 0x389   :  { %v6924_v0 = vor.u32 %v9406_v50, %v6921_v19  ;;  %v7641_v12 = vld [vmem:[#allocation17 + $0x5bc] sm:$0xf0]  ;;  %v9611_v21 = vld [vmem:[#allocation17 + $0x674] sm:$0xf] }
 0x38a   :  { %3534 = vmatpush.bf16.msra.mxu0 %v7600_v7  ;;  %v9551_v7 = vld [vmem:[#allocation17 + $0x494] sm:$0xf]  ;;  %v7801_v50 = vld [vmem:[#allocation17 + $0x6fc] sm:$0xf0]  ;;  %v7644_v19 = vor.u32 %v9586_v11, %v7641_v12  ;;  %v9606_v11 = vld [vmem:[#allocation17 + $0x64c] sm:$0xf] }
 0x38b   :  { %3547 = vmatpush.bf16.msra.mxu1 %v7760_v20  ;;  %v7501_v20 = vld [vmem:[#allocation17 + $0x4a4] sm:$0xf0]  ;;  %v7721_v12 = vld [vmem:[#allocation17 + $0x65c] sm:$0xf0] }
 0x38c   :  { %3558 = vmatpush.bf16.msra.mxu2 %v7004_v39  ;;  %3571 = vmatpush.bf16.msra.mxu3 %v7164_v6  ;;  %v9601_v39 = vld [vmem:[#allocation17 + $0x624] sm:$0xf]  ;;  %v7861_v6 = vld [vmem:[#allocation17 + $0x774] sm:$0xf0]  ;;  %v7504_v24 = vor.u32 %v9551_v7, %v7501_v20 }
 0x38d   :  { %v7704_v60 = vor.u32 %v9601_v39, %v7701_v9  ;;  %v9581_v7 = vld [vmem:[#allocation17 + $0x584] sm:$0xf]  ;;  %v7621_v20 = vld [vmem:[#allocation17 + $0x594] sm:$0xf0] }
 0x38e   :  { %3535 = vmatpush.bf16.msra.mxu0 %v7580_v46  ;;  %v7321_v46 = vld [vmem:[#allocation17 + $0x33c] sm:$0xf0]  ;;  %v9621_v39 = vld [vmem:[#allocation17 + $0x6c4] sm:$0xf]  ;;  %v7781_v9 = vld [vmem:[#allocation17 + $0x6d4] sm:$0xf0] }
 0x38f   :  { %3548 = vmatpush.bf16.msra.mxu1 %v7740_v59  ;;  %v7864_v59 = vor.u32 %v9641_v2, %v7861_v6  ;;  %v7324_v26 = vor.u32 %v9506_v44, %v7321_v46  ;;  %v9486_v2 = vld [vmem:[#allocation17 + $0x28c] sm:$0xf]  ;;  %v7784_v44 = vor.u32 %v9621_v39, %v7781_v9  ;;  %v9576_v46 = vld [vmem:[#allocation17 + $0x55c] sm:$0xf] }
 0x390   :  { %3559 = vmatpush.bf16.msra.mxu2 %v6984_v61  ;;  %3572 = vmatpush.bf16.msra.mxu3 %v7144_v5  ;;  %v7481_v61 = vld [vmem:[#allocation17 + $0x47c] sm:$0xf0]  ;;  %v7841_v5 = vld [vmem:[#allocation17 + $0x74c] sm:$0xf0] }
 0x391   :  { %v7484_v28 = vor.u32 %v9546_v31, %v7481_v61  ;;  %v7601_v31 = vld [vmem:[#allocation17 + $0x56c] sm:$0xf0] }
 0x392   :  { %3536 = vmatpush.bf16.msra.mxu0 %v7560_v37  ;;  %v7844_v37 = vor.u32 %v9636_v4, %v7841_v5  ;;  %v7761_v61 = vld [vmem:[#allocation17 + $0x6ac] sm:$0xf0]  ;;  %v7227_v5 = vld [vmem:[#allocation17 + $0x268] sm:$0xf] }
 0x393   :  { %3549 = vmatpush.bf16.msra.mxu1 %v7720_v8  ;;  %v7661_v8 = vld [vmem:[#allocation17 + $0x5e4] sm:$0xf0] }
 0x394   :  { %3560 = vmatpush.bf16.msra.mxu2 %v6964_v23  ;;  %3573 = vmatpush.bf16.msra.mxu3 %v7124_v55  ;;  %v9631_v23 = vld [vmem:[#allocation17 + $0x714] sm:$0xf]  ;;  %v7821_v55 = vld [vmem:[#allocation17 + $0x724] sm:$0xf0]  ;;  %v7664_v27 = vor.u32 %v9591_v22, %v7661_v8 }
 0x395   :  { %3537 = vmatmul.bf16.vlgmr.msra.gmra.mxu0 %v12022_v1  ;;  %v7824_v52 = vor.u32 %v9631_v23, %v7821_v55  ;;  %v7741_v8 = vld [vmem:[#allocation17 + $0x684] sm:$0xf0]  ;;  %v7047_v23 = vld [vmem:[#allocation17 + $0x100] sm:$0xf]  ;;  %v9439_v55 = vld [vmem:[#allocation17 + $0x110] sm:$0xf0] }
 0x396   :  { %3581 = vmatpush.bf16.msrb.mxu0 %v7384_v33  ;;  %3550 = vmatmul.bf16.vlgmr.msra.gmra.mxu1 %v12024_v10  ;;  %v7304_v33 = vor.u32 %v9501_v56, %v7301_v18  ;;  %v7068_v18 = vor.u32 %v9444_v62, %v7067_v63  ;;  %v7527_v63 = vld [vmem:[#allocation17 + $0x4c0] sm:$0xf]  ;;  %v9559_v62 = vld [vmem:[#allocation17 + $0x4d0] sm:$0xf0] }
 0x397   :  { %3594 = vmatpush.bf16.msrb.mxu1 %v7544_v48  ;;  %v7281_v48 = vld [vmem:[#allocation17 + $0x2ec] sm:$0xf0] }
 0x398   :  { %3561 = vmatpush.bf16.msra.mxu2 %v6944_v25  ;;  %3574 = vmatpush.bf16.msra.mxu3 %v7104_v13  ;;  %v9626_v25 = vld [vmem:[#allocation17 + $0x6ec] sm:$0xf]  ;;  %v7284_v13 = vor.u32 %v9496_v36, %v7281_v48 }
 0x399   :  { %v7804_v45 = vor.u32 %v9626_v25, %v7801_v50  ;;  %v9566_v48 = vld [vmem:[#allocation17 + $0x50c] sm:$0xf]  ;;  %v7027_v25 = vld [vmem:[#allocation17 + $0xd8] sm:$0xf] }
 0x39a   :  { %3582 = vmatpush.bf16.msrb.mxu0 %v7364_v41  ;;  %v7444_v41 = vor.u32 %v9536_v51, %v7441_v49  ;;  %v7561_v51 = vld [vmem:[#allocation17 + $0x51c] sm:$0xf0]  ;;  %v7048_v49 = vor.u32 %v9439_v55, %v7047_v23 }
 0x39b   :  { %3595 = vmatpush.bf16.msrb.mxu1 %v7524_v3  ;;  %v9531_v3 = vld [vmem:[#allocation17 + $0x3f4] sm:$0xf] }
 0x39c   :  { %3562 = vmatpush.bf16.msra.mxu2 %v6924_v0  ;;  %3575 = vmatpush.bf16.msra.mxu3 %v7084_v15  ;;  %v7264_v0 = vor.u32 %v9491_v14, %v7261_v43  ;;  %v7424_v6 = vor.u32 %v9531_v3, %v7421_v17  ;;  %v7624_v15 = vor.u32 %v9581_v7, %v7621_v20  ;;  %v9474_v14 = vld [vmem:[#allocation17 + $0x228] sm:$0xf0]  ;;  %v7387_v43 = vld [vmem:[#allocation17 + $0x3a8] sm:$0xf]  ;;  %v9524_v3 = vld [vmem:[#allocation17 + $0x3b8] sm:$0xf0] }
 0x39d   :  { %v7547_v17 = vld [vmem:[#allocation17 + $0x4e8] sm:$0xf]  ;;  %v9564_v7 = vld [vmem:[#allocation17 + $0x4f8] sm:$0xf0]  ;;  %v7724_v20 = vor.u32 %v9606_v11, %v7721_v12  ;;  %v9459_v11 = vld [vmem:[#allocation17 + $0x1b0] sm:$0xf0] }
 0x39e   :  { %3583 = vmatpush.bf16.msrb.mxu0 %v7344_v16  ;;  %v7241_v16 = vld [vmem:[#allocation17 + $0x29c] sm:$0xf0]  ;;  %v7327_v12 = vld [vmem:[#allocation17 + $0x330] sm:$0xf] }
 0x39f   :  { %3596 = vmatpush.bf16.msrb.mxu1 %v7504_v24  ;;  %3563 = vmatmul.bf16.vlgmr.msra.gmra.mxu2 %v11970_v58  ;;  %v9526_v24 = vld [vmem:[#allocation17 + $0x3cc] sm:$0xf]  ;;  %v7244_v4 = vor.u32 %v9486_v2, %v7241_v16  ;;  %v7388_v2 = vor.u32 %v9524_v3, %v7387_v43  ;;  %v7007_v16 = vld [vmem:[#allocation17 + $0xb0] sm:$0xf]  ;;  %v6947_v43 = vld [vmem:[#allocation17 + $0x38] sm:$0xf] }
 0x3a0   :  { %3607 = vmatpush.bf16.msrb.mxu2 %v7704_v60  ;;  %3620 = vmatpush.bf16.msrb.mxu3 %v7864_v59  ;;  %v7401_v60 = vld [vmem:[#allocation17 + $0x3dc] sm:$0xf0]  ;;  %v9616_v59 = vld [vmem:[#allocation17 + $0x69c] sm:$0xf]  ;;  %v9414_v3 = vld [vmem:[#allocation17 + $0x48] sm:$0xf0] }
 0x3a1   :  { %3576 = vmatmul.bf16.vlgmr.msra.gmra.mxu3 %v11983_v38  ;;  %v7764_v56 = vor.u32 %v9616_v59, %v7761_v61  ;;  %v9519_v59 = vld [vmem:[#allocation17 + $0x390] sm:$0xf0] }
 0x3a2   :  { %3584 = vmatpush.bf16.msrb.mxu0 %v7324_v26  ;;  %v9484_v26 = vld [vmem:[#allocation17 + $0x278] sm:$0xf0] }
 0x3a3   :  { %3597 = vmatpush.bf16.msrb.mxu1 %v7484_v28  ;;  %v7404_v28 = vor.u32 %v9526_v24, %v7401_v60  ;;  %v7228_v22 = vor.u32 %v9484_v26, %v7227_v5  ;;  %v9429_v24 = vld [vmem:[#allocation17 + $0xc0] sm:$0xf0]  ;;  %v7167_v60 = vld [vmem:[#allocation17 + $0x1f0] sm:$0xf] }
 0x3a4   :  { %3608 = vmatpush.bf16.msrb.mxu2 %v7684_v30  ;;  %3621 = vmatpush.bf16.msrb.mxu3 %v7844_v37  ;;  %v7604_v30 = vor.u32 %v9576_v46, %v7601_v31  ;;  %v7581_v37 = vld [vmem:[#allocation17 + $0x544] sm:$0xf0]  ;;  %v9469_v46 = vld [vmem:[#allocation17 + $0x200] sm:$0xf0]  ;;  %v7367_v31 = vld [vmem:[#allocation17 + $0x380] sm:$0xf] }
 0x3a5   :  { %v7584_v36 = vor.u32 %v9571_v47, %v7581_v37  ;;  %v7168_v5 = vor.u32 %v9469_v46, %v7167_v60  ;;  %v7368_v26 = vor.u32 %v9519_v59, %v7367_v31  ;;  %v9464_v47 = vld [vmem:[#allocation17 + $0x1d8] sm:$0xf0]  ;;  %v7347_v37 = vld [vmem:[#allocation17 + $0x358] sm:$0xf]  ;;  %v6927_v60 = vld [vmem:[#allocation17 + $0x10] sm:$0xf] }
 0x3a6   :  { %3585 = vmatpush.bf16.msrb.mxu0 %v7304_v33  ;;  %v7207_v33 = vld [vmem:[#allocation17 + $0x240] sm:$0xf] }
 0x3a7   :  { %3598 = vmatpush.bf16.msrb.mxu1 %v7464_v34  ;;  %v9479_v34 = vld [vmem:[#allocation17 + $0x250] sm:$0xf0] }
 0x3a8   :  { %3609 = vmatpush.bf16.msrb.mxu2 %v7664_v27  ;;  %3622 = vmatpush.bf16.msrb.mxu3 %v7824_v52  ;;  %v12045_v27 = vld [vmem:[%s12246_s11] sm:$0x1f]  ;;  %v7744_v52 = vor.u32 %v9611_v21, %v7741_v8  ;;  %v7208_v50 = vor.u32 %v9479_v34, %v7207_v33  ;;  %v9514_v21 = vld [vmem:[#allocation17 + $0x368] sm:$0xf0] }
 0x3a9   :  { %v9554_v8 = vld [vmem:[#allocation17 + $0x4a8] sm:$0xf0]  ;;  %v7348_v34 = vor.u32 %v9514_v21, %v7347_v37  ;;  %v7867_v21 = vld [vmem:[#allocation17 + $0x768] sm:$0xf] }
 0x3aa   :  { %3586 = vmatpush.bf16.msrb.mxu0 %v7284_v13  ;;  %v9434_v13 = vld [vmem:[#allocation17 + $0xe8] sm:$0xf0] }
 0x3ab   :  { %3599 = vmatpush.bf16.msrb.mxu1 %v7444_v41  ;;  %v7187_v41 = vld [vmem:[#allocation17 + $0x218] sm:$0xf]  ;;  %v7028_v39 = vor.u32 %v9434_v13, %v7027_v25  ;;  %v9509_v25 = vld [vmem:[#allocation17 + $0x340] sm:$0xf0] }
 0x3ac   :  { %3610 = vmatpush.bf16.msrb.mxu2 %v7644_v19  ;;  %3623 = vmatpush.bf16.msrb.mxu3 %v7804_v45  ;;  %v2063_v19 = vperm.slane %v12045_v27, 0  ;;  %v7564_v45 = vor.u32 %v9566_v48, %v7561_v51  ;;  %v6967_v48 = vld [vmem:[#allocation17 + $0x60] sm:$0xf]  ;;  %v9419_v51 = vld [vmem:[#allocation17 + $0x70] sm:$0xf0] }
 0x3ad   :  { %v9549_v13 = vld [vmem:[#allocation17 + $0x480] sm:$0xf0] }
 0x3ae   :  { %3587 = vmatpush.bf16.msrb.mxu0 %v7264_v0  ;;  %v7188_v0 = vor.u32 %v9474_v14, %v7187_v41  ;;  %v6968_v41 = vor.u32 %v9419_v51, %v6967_v48  ;;  %v7328_v14 = vor.u32 %v9509_v25, %v7327_v12  ;;  %v7267_v48 = vld [vmem:[#allocation17 + $0x2b8] sm:$0xf]  ;;  %v9494_v51 = vld [vmem:[#allocation17 + $0x2c8] sm:$0xf0]  ;;  %v7687_v12 = vld [vmem:[#allocation17 + $0x600] sm:$0xf] }
 0x3af   :  { %3600 = vmatpush.bf16.msrb.mxu1 %v7424_v6  ;;  %v9599_v25 = vld [vmem:[#allocation17 + $0x610] sm:$0xf0] }
 0x3b0   :  { %3611 = vmatpush.bf16.msrb.mxu2 %v7624_v15  ;;  %3624 = vmatpush.bf16.msrb.mxu3 %v7784_v44  ;;  %v7548_v44 = vor.u32 %v9564_v7, %v7547_v17 }
 0x3b2   :  { %3588 = vmatpush.bf16.msrb.mxu0 %v7244_v4  ;;  %v3330_v9 = vpop.f32.mrf.mxu0  ;;  %v7008_v4 = vor.u32 %v9429_v24, %v7007_v16  ;;  %v6948_v16 = vor.u32 %v9414_v3, %v6947_v43  ;;  %v7247_v3 = vld [vmem:[#allocation17 + $0x290] sm:$0xf] }
 0x3b3   :  { %3601 = vmatpush.bf16.msrb.mxu1 %v7404_v28  ;;  %v3331_v6 = vadd.f32 %v3330_v9, %v2063_v19  ;;  %v3343_v15 = vpop.f32.mrf.mxu1  ;;  %v6987_v28 = vld [vmem:[#allocation17 + $0x88] sm:$0xf]  ;;  %v9504_v9 = vld [vmem:[#allocation17 + $0x318] sm:$0xf0] }
 0x3b4   :  { %3612 = vmatpush.bf16.msrb.mxu2 %v7604_v30  ;;  %3625 = vmatpush.bf16.msrb.mxu3 %v7764_v56  ;;  %v9424_v30 = vld [vmem:[#allocation17 + $0x98] sm:$0xf0]  ;;  %v7147_v56 = vld [vmem:[#allocation17 + $0x1c8] sm:$0xf] }
 0x3b5   :  { %3589 = vmatmul.bf16.vlgmr.msrb.gmra.mxu0 %v12014_v42  ;;  %v3344_v61 = vadd.f32 %v3343_v15, %v3331_v6  ;;  %v6988_v23 = vor.u32 %v9424_v30, %v6987_v28  ;;  %v7148_v33 = vor.u32 %v9464_v47, %v7147_v56  ;;  %v9544_v6 = vld [vmem:[#allocation17 + $0x458] sm:$0xf0]  ;;  %v7447_v28 = vld [vmem:[#allocation17 + $0x420] sm:$0xf]  ;;  %v9539_v56 = vld [vmem:[#allocation17 + $0x430] sm:$0xf0] }
 0x3b6   :  { %3633 = vmatpush.bf16.msra.mxu0 %v7068_v18  ;;  %3602 = vmatmul.bf16.vlgmr.msrb.gmra.mxu1 %v12019_v53  ;;  %v7528_v18 = vor.u32 %v9559_v62, %v7527_v63  ;;  %v9409_v63 = vld [vmem:[#allocation17 + $0x20] sm:$0xf0]  ;;  %v7087_v62 = vld [vmem:[#allocation17 + $0x150] sm:$0xf]  ;;  %v9604_v47 = vld [vmem:[#allocation17 + $0x638] sm:$0xf0] }
 0x3b7   :  { %3646 = vmatpush.bf16.msra.mxu1 %v7228_v22  ;;  %v7507_v22 = vld [vmem:[#allocation17 + $0x498] sm:$0xf]  ;;  %v6928_v37 = vor.u32 %v9409_v63, %v6927_v60  ;;  %v9682_v60 = vld [vmem:[#allocation19 + $0x128] sm:$0xf0] }
 0x3b8   :  { %3613 = vmatpush.bf16.msrb.mxu2 %v7584_v36  ;;  %3626 = vmatpush.bf16.msrb.mxu3 %v7744_v52  ;;  %v7127_v52 = vld [vmem:[#allocation17 + $0x1a0] sm:$0xf] }
 0x3b9   :  { %v7128_v19 = vor.u32 %v9459_v11, %v7127_v52  ;;  %v7427_v52 = vld [vmem:[#allocation17 + $0x3f8] sm:$0xf]  ;;  %v9534_v11 = vld [vmem:[#allocation17 + $0x408] sm:$0xf0] }
 0x3ba   :  { %3634 = vmatpush.bf16.msra.mxu0 %v7048_v49  ;;  %v3332_v55 = vpop.f32.mrf.mxu0  ;;  %v7508_v49 = vor.u32 %v9554_v8, %v7507_v22  ;;  %v9644_v22 = vld [vmem:[#allocation17 + $0x778] sm:$0xf0] }
 0x3bb   :  { %3647 = vmatpush.bf16.msra.mxu1 %v7208_v50  ;;  %v3345_v36 = vpop.f32.mrf.mxu1  ;;  %v7487_v50 = vld [vmem:[#allocation17 + $0x470] sm:$0xf] }
 0x3bc   :  { %3614 = vmatpush.bf16.msrb.mxu2 %v7564_v45  ;;  %3627 = vmatpush.bf16.msrb.mxu3 %v7724_v20  ;;  %v7107_v45 = vld [vmem:[#allocation17 + $0x178] sm:$0xf]  ;;  %v7488_v17 = vor.u32 %v9549_v13, %v7487_v50  ;;  %v9454_v20 = vld [vmem:[#allocation17 + $0x188] sm:$0xf0] }
 0x3bd   :  { %v7108_v46 = vor.u32 %v9454_v20, %v7107_v45  ;;  %v9489_v45 = vld [vmem:[#allocation17 + $0x2a0] sm:$0xf0]  ;;  %v7407_v20 = vld [vmem:[#allocation17 + $0x3d0] sm:$0xf] }
 0x3be   :  { %3635 = vmatpush.bf16.msra.mxu0 %v7028_v39  ;;  %v7307_v39 = vld [vmem:[#allocation17 + $0x308] sm:$0xf] }
 0x3bf   :  { %3648 = vmatpush.bf16.msra.mxu1 %v7188_v0  ;;  %3615 = vmatmul.bf16.vlgmr.msrb.gmra.mxu2 %v12022_v1  ;;  %v7308_v31 = vor.u32 %v9504_v9, %v7307_v39  ;;  %v9529_v39 = vld [vmem:[#allocation17 + $0x3e0] sm:$0xf0]  ;;  %v7667_v9 = vld [vmem:[#allocation17 + $0x5d8] sm:$0xf] }
 0x3c0   :  { %3659 = vmatpush.bf16.msra.mxu2 %v7388_v2  ;;  %3672 = vmatpush.bf16.msra.mxu3 %v7548_v44  ;;  %v3356_v7 = vpop.f32.mrf.mxu2  ;;  %v7467_v2 = vld [vmem:[#allocation17 + $0x448] sm:$0xf] }
 0x3c1   :  { %3628 = vmatmul.bf16.vlgmr.msrb.gmra.mxu3 %v12024_v10  ;;  %v3357_v0 = vadd.f32 %v3356_v7, %v3344_v61  ;;  %v9499_v61 = vld [vmem:[#allocation17 + $0x2f0] sm:$0xf0]  ;;  %v7688_v7 = vor.u32 %v9599_v25, %v7687_v12  ;;  %v9624_v12 = vld [vmem:[#allocation17 + $0x6d8] sm:$0xf0]  ;;  %v7971_v25 = vld [vmem:[#allocation19 + $0xc8] sm:$0xf] }
 0x3c2   :  { %3636 = vmatpush.bf16.msra.mxu0 %v7008_v4  ;;  %v3369_v15 = vpop.f32.mrf.mxu3  ;;  %v3382_v24 = vpop.f32.mrf.mxu0  ;;  %v9449_v4 = vld [vmem:[#allocation17 + $0x160] sm:$0xf0] }
 0x3c3   :  { %3649 = vmatpush.bf16.msra.mxu1 %v7168_v5  ;;  %v3370_v44 = vadd.f32 %v3369_v15, %v3357_v0  ;;  %v3395_v59 = vpop.f32.mrf.mxu1  ;;  %v7468_v5 = vor.u32 %v9544_v6, %v7467_v2  ;;  %v9594_v2 = vld [vmem:[#allocation17 + $0x5e8] sm:$0xf0]  ;;  %v7827_v6 = vld [vmem:[#allocation17 + $0x718] sm:$0xf]  ;;  %v2064_v15 = vperm.slane %v12045_v27, 1 }
 0x3c4   :  { %3660 = vmatpush.bf16.msra.mxu2 %v7368_v26  ;;  %3673 = vmatpush.bf16.msra.mxu3 %v7528_v18  ;;  %v7287_v26 = vld [vmem:[#allocation17 + $0x2e0] sm:$0xf]  ;;  %v7707_v18 = vld [vmem:[#allocation17 + $0x628] sm:$0xf]  ;;  %v7668_v63 = vor.u32 %v9594_v2, %v7667_v9 }
 0x3c5   :  { %v3383_v30 = vadd.f32 %v3382_v24, %v3370_v44  ;;  %v7288_v55 = vor.u32 %v9499_v61, %v7287_v26  ;;  %v8011_v24 = vld [vmem:[#allocation19 + $0x118] sm:$0xf]  ;;  %v7248_v44 = vor.u32 %v9489_v45, %v7247_v3  ;;  %v7647_v26 = vld [vmem:[#allocation17 + $0x5b0] sm:$0xf]  ;;  %v9589_v61 = vld [vmem:[#allocation17 + $0x5c0] sm:$0xf0] }
 0x3c6   :  { %3637 = vmatpush.bf16.msra.mxu0 %v6988_v23  ;;  %v7088_v23 = vor.u32 %v9449_v4, %v7087_v62  ;;  %v8012_v4 = vor.u32 %v9682_v60, %v8011_v24  ;;  %v7951_v2 = vld [vmem:[#allocation19 + $0xa0] sm:$0xf] }
 0x3c7   :  { %3650 = vmatpush.bf16.msra.mxu1 %v7148_v33  ;;  %v12052_v8 = vadd.f32 %v3395_v59, %v3383_v30  ;;  %v7448_v33 = vor.u32 %v9539_v56, %v7447_v28  ;;  %v7408_v59 = vor.u32 %v9529_v39, %v7407_v20  ;;  %v7807_v28 = vld [vmem:[#allocation17 + $0x6f0] sm:$0xf]  ;;  %v7767_v20 = vld [vmem:[#allocation17 + $0x6a0] sm:$0xf] }
 0x3c8   :  { %3661 = vmatpush.bf16.msra.mxu2 %v7348_v34  ;;  %3674 = vmatpush.bf16.msra.mxu3 %v7508_v49  ;;  %v7708_v34 = vor.u32 %v9604_v47, %v7707_v18  ;;  %v3358_v36 = vpop.f32.mrf.mxu2  ;;  %v7868_v49 = vor.u32 %v9644_v22, %v7867_v21  ;;  %v9629_v18 = vld [vmem:[#allocation17 + $0x700] sm:$0xf0]  ;;  %v7991_v47 = vld [vmem:[#allocation19 + $0xf0] sm:$0xf] }
 0x3c9   :  { %v7808_v36 = vor.u32 %v9629_v18, %v7807_v28 }
 0x3ca   :  { %3638 = vmatpush.bf16.msra.mxu0 %v6968_v41  ;;  %v3371_v50 = vpop.f32.mrf.mxu3  ;;  %v3384_v13 = vpop.f32.mrf.mxu0  ;;  %v7847_v41 = vld [vmem:[#allocation17 + $0x740] sm:$0xf] }
 0x3cb   :  { %3651 = vmatpush.bf16.msra.mxu1 %v7128_v19  ;;  %v9639_v19 = vld [vmem:[#allocation17 + $0x750] sm:$0xf0]  ;;  %v3397_v43 = vpop.f32.mrf.mxu1  ;;  %v9672_v50 = vld [vmem:[#allocation19 + $0xd8] sm:$0xf0] }
 0x3cc   :  { %3662 = vmatpush.bf16.msra.mxu2 %v7328_v14  ;;  %3675 = vmatpush.bf16.msra.mxu3 %v7488_v17  ;;  %v7268_v14 = vor.u32 %v9494_v51, %v7267_v48  ;;  %v7428_v17 = vor.u32 %v9534_v11, %v7427_v52  ;;  %v7848_v0 = vor.u32 %v9639_v19, %v7847_v41  ;;  %v7627_v51 = vld [vmem:[#allocation17 + $0x588] sm:$0xf]  ;;  %v9584_v52 = vld [vmem:[#allocation17 + $0x598] sm:$0xf0] }
 0x3cd   :  { %v8131_v41 = vld [vmem:[#allocation19 + $0x208] sm:$0xf]  ;;  %v9712_v19 = vld [vmem:[#allocation19 + $0x218] sm:$0xf0]  ;;  %v7972_v45 = vor.u32 %v9672_v50, %v7971_v25 }
 0x3ce   :  { %3639 = vmatpush.bf16.msra.mxu0 %v6948_v16  ;;  %v9634_v16 = vld [vmem:[#allocation17 + $0x728] sm:$0xf0] }
 0x3cf   :  { %3652 = vmatpush.bf16.msra.mxu1 %v7108_v46  ;;  %v8171_v46 = vld [vmem:[#allocation19 + $0x258] sm:$0xf] }
 0x3d0   :  { %3663 = vmatpush.bf16.msra.mxu2 %v7308_v31  ;;  %3676 = vmatpush.bf16.msra.mxu3 %v7468_v5  ;;  %v9722_v31 = vld [vmem:[#allocation19 + $0x268] sm:$0xf0]  ;;  %v3408_v62 = vpop.f32.mrf.mxu2 }
 0x3d1   :  { %v3409_v5 = vadd.f32 %v3408_v62, %v2064_v15  ;;  %v8111_v15 = vld [vmem:[#allocation19 + $0x1e0] sm:$0xf]  ;;  %v9614_v62 = vld [vmem:[#allocation17 + $0x688] sm:$0xf0] }
 0x3d2   :  { %3640 = vmatpush.bf16.msra.mxu0 %v6928_v37  ;;  %v3421_v30 = vpop.f32.mrf.mxu3  ;;  %v3434_v56 = vpop.f32.mrf.mxu0  ;;  %v9677_v37 = vld [vmem:[#allocation19 + $0x100] sm:$0xf0] }
 0x3d3   :  { %3653 = vmatpush.bf16.msra.mxu1 %v7088_v23  ;;  %v3422_v21 = vadd.f32 %v3421_v30, %v3409_v5  ;;  %v3447_v22 = vpop.f32.mrf.mxu1  ;;  %v8151_v23 = vld [vmem:[#allocation19 + $0x230] sm:$0xf]  ;;  %v7992_v48 = vor.u32 %v9677_v37, %v7991_v47  ;;  %v12059_v5 = vld [vmem:[#allocation13] sm:$0x3f]  ;;  %v9569_v37 = vld [vmem:[#allocation17 + $0x520] sm:$0xf0] }
 0x3d4   :  { %3664 = vmatpush.bf16.msra.mxu2 %v7288_v55  ;;  %3677 = vmatpush.bf16.msra.mxu3 %v7448_v33  ;;  %v9717_v55 = vld [vmem:[#allocation19 + $0x240] sm:$0xf0]  ;;  %v7648_v33 = vor.u32 %v9589_v61, %v7647_v26  ;;  %v8091_v26 = vld [vmem:[#allocation19 + $0x1b8] sm:$0xf]  ;;  %v9702_v61 = vld [vmem:[#allocation19 + $0x1c8] sm:$0xf0] }
 0x3d5   :  { %3641 = vmatmul.bf16.vlgmr.msra.gmra.mxu0 %v11970_v58  ;;  %v7828_v58 = vor.u32 %v9634_v16, %v7827_v6  ;;  %v8152_v11 = vor.u32 %v9717_v55, %v8151_v23  ;;  %v9707_v16 = vld [vmem:[#allocation19 + $0x1f0] sm:$0xf0]  ;;  %v1729_v28 = vperm.slane %v12059_v5, 0  ;;  %v12063_v23 = vld [vmem:[#allocation14] sm:$0x3f]  ;;  %v8092_v55 = vor.u32 %v9702_v61, %v8091_v26 }
 0x3d6   :  { %3685 = vmatpush.bf16.msrb.mxu0 %v7708_v34  ;;  %3654 = vmatmul.bf16.vlgmr.msra.gmra.mxu1 %v11983_v38  ;;  %v8172_v38 = vor.u32 %v9722_v31, %v8171_v46  ;;  %v3435_v34 = vadd.f32 %v3434_v56, %v3422_v21  ;;  %v7587_v46 = vld [vmem:[#allocation17 + $0x538] sm:$0xf]  ;;  %v9574_v31 = vld [vmem:[#allocation17 + $0x548] sm:$0xf0]  ;;  %v7567_v56 = vld [vmem:[#allocation17 + $0x510] sm:$0xf] }
 0x3d7   :  { %3698 = vmatpush.bf16.msrb.mxu1 %v7868_v49  ;;  %v7787_v49 = vld [vmem:[#allocation17 + $0x6c8] sm:$0xf]  ;;  %v7588_v30 = vor.u32 %v9574_v31, %v7587_v46  ;;  %v7727_v21 = vld [vmem:[#allocation17 + $0x650] sm:$0xf]  ;;  %v1741_v25 = vmul.f32 %v1729_v28, %v11944_v32  ;;  %v7568_v50 = vor.u32 %v9569_v37, %v7567_v56  ;;  %v9752_v61 = vld [vmem:[#allocation19 + $0x358] sm:$0xf0] }
 0x3d8   :  { %3665 = vmatpush.bf16.msra.mxu2 %v7268_v14  ;;  %3678 = vmatpush.bf16.msra.mxu3 %v7428_v17  ;;  %v3448_v13 = vadd.f32 %v3447_v22, %v3435_v34  ;;  %v7628_v14 = vor.u32 %v9584_v52, %v7627_v51  ;;  %v3410_v43 = vpop.f32.mrf.mxu2  ;;  %v7788_v3 = vor.u32 %v9624_v12, %v7787_v49  ;;  %v7607_v17 = vld [vmem:[#allocation17 + $0x560] sm:$0xf]  ;;  %v9609_v22 = vld [vmem:[#allocation17 + $0x660] sm:$0xf0]  ;;  %v8071_v51 = vld [vmem:[#allocation19 + $0x190] sm:$0xf] }
 0x3d9   :  { %v9697_v49 = vld [vmem:[#allocation19 + $0x1a0] sm:$0xf0]  ;;  %v9762_v12 = vld [vmem:[#allocation19 + $0x3a8] sm:$0xf0]  ;;  %v7891_v32 = vld [vmem:[#allocation19 + $0x28] sm:$0xf] }
 0x3da   :  { %3686 = vmatpush.bf16.msrb.mxu0 %v7688_v7  ;;  %v9579_v7 = vld [vmem:[#allocation17 + $0x570] sm:$0xf0]  ;;  %v3423_v39 = vpop.f32.mrf.mxu3  ;;  %v3436_v9 = vpop.f32.mrf.mxu0  ;;  %v8291_v26 = vld [vmem:[#allocation19 + $0x348] sm:$0xf]  ;;  %v9842_v56 = vld [vmem:[#allocation19 + $0x628] sm:$0xf0] }
 0x3db   :  { %3699 = vmatpush.bf16.msrb.mxu1 %v7848_v0  ;;  %v9619_v0 = vld [vmem:[#allocation17 + $0x6b0] sm:$0xf0]  ;;  %v3449_v6 = vpop.f32.mrf.mxu1  ;;  %v7608_v24 = vor.u32 %v9579_v7, %v7607_v17  ;;  %v1750_v17 = vperm.slane %v12063_v23, 1  ;;  %v8072_v7 = vor.u32 %v9697_v49, %v8071_v51  ;;  %v8051_v39 = vld [vmem:[#allocation19 + $0x168] sm:$0xf] }
 0x3dc   :  { %3666 = vmatpush.bf16.msra.mxu2 %v7248_v44  ;;  %3679 = vmatpush.bf16.msra.mxu3 %v7408_v59  ;;  %v7768_v60 = vor.u32 %v9619_v0, %v7767_v20  ;;  %v7747_v59 = vld [vmem:[#allocation17 + $0x678] sm:$0xf]  ;;  %v9692_v0 = vld [vmem:[#allocation19 + $0x178] sm:$0xf0]  ;;  %v8471_v6 = vld [vmem:[#allocation19 + $0x4b0] sm:$0xf] }
 0x3dd   :  { %v7748_v18 = vor.u32 %v9614_v62, %v7747_v59  ;;  %v9647_v59 = vld [vmem:[#allocation19 + $0x10] sm:$0xf0]  ;;  %v8451_v28 = vld [vmem:[#allocation19 + $0x488] sm:$0xf]  ;;  %v9882_v37 = vld [vmem:[#allocation19 + $0x768] sm:$0xf0] }
 0x3de   :  { %3687 = vmatpush.bf16.msrb.mxu0 %v7668_v63  ;;  %v8112_v63 = vor.u32 %v9707_v16, %v8111_v15  ;;  %v9797_v15 = vld [vmem:[#allocation19 + $0x4c0] sm:$0xf0]  ;;  %v9687_v62 = vld [vmem:[#allocation19 + $0x150] sm:$0xf0]  ;;  %v8431_v51 = vld [vmem:[#allocation19 + $0x460] sm:$0xf] }
 0x3df   :  { %3700 = vmatpush.bf16.msrb.mxu1 %v7828_v58  ;;  %3667 = vmatmul.bf16.vlgmr.msra.gmra.mxu2 %v12014_v42  ;;  %v8132_v42 = vor.u32 %v9712_v19, %v8131_v41  ;;  %v7931_v58 = vld [vmem:[#allocation19 + $0x78] sm:$0xf]  ;;  %v9802_v19 = vld [vmem:[#allocation19 + $0x4e8] sm:$0xf0] }
 0x3e0   :  { %5283 = vmatpush.bf16.msrb.mxu2 %v8012_v4  ;;  %5296 = vmatpush.bf16.msrb.mxu3 %v8172_v38  ;;  %v9662_v4 = vld [vmem:[#allocation19 + $0x88] sm:$0xf0]  ;;  %v1730_v38 = vperm.slane %v12059_v5, 1  ;;  %v8491_v41 = vld [vmem:[#allocation19 + $0x4d8] sm:$0xf] }
 0x3e1   :  { %3680 = vmatmul.bf16.vlgmr.msra.gmra.mxu3 %v12019_v53  ;;  %v9667_v53 = vld [vmem:[#allocation19 + $0xb0] sm:$0xf0]  ;;  %v7932_v47 = vor.u32 %v9662_v4, %v7931_v58  ;;  %v8492_v9 = vor.u32 %v9802_v19, %v8491_v41  ;;  %v8472_v4 = vor.u32 %v9797_v15, %v8471_v6  ;;  %v9877_v19 = vld [vmem:[#allocation19 + $0x740] sm:$0xf0]  ;;  %v9872_v6 = vld [vmem:[#allocation19 + $0x718] sm:$0xf0] }
 0x3e2   :  { %3688 = vmatpush.bf16.msrb.mxu0 %v7648_v33  ;;  %v7952_v44 = vor.u32 %v9667_v53, %v7951_v2  ;;  %v3460_v33 = vpop.f32.mrf.mxu2  ;;  %v8311_v2 = vld [vmem:[#allocation19 + $0x370] sm:$0xf]  ;;  %v9757_v53 = vld [vmem:[#allocation19 + $0x380] sm:$0xf0]  ;;  %v1731_v15 = vperm.slane %v12059_v5, 2 }
 0x3e3   :  { %3701 = vmatpush.bf16.msrb.mxu1 %v7808_v36  ;;  %v7911_v36 = vld [vmem:[#allocation19 + $0x50] sm:$0xf]  ;;  %v3461_v52 = vadd.f32 %v3460_v33, %v3448_v13  ;;  %v1742_v13 = vmul.f32 %v1730_v38, %v11949_v40  ;;  %v8052_v40 = vor.u32 %v9692_v0, %v8051_v39  ;;  %v9792_v38 = vld [vmem:[#allocation19 + $0x498] sm:$0xf0]  ;;  %v8611_v0 = vld [vmem:[#allocation19 + $0x5c8] sm:$0xf] }
 0x3e4   :  { %5284 = vmatpush.bf16.msrb.mxu2 %v7992_v48  ;;  %5297 = vmatpush.bf16.msrb.mxu3 %v8152_v11  ;;  %v3473_v34 = vpop.f32.mrf.mxu3  ;;  %v9657_v48 = vld [vmem:[#allocation19 + $0x60] sm:$0xf0]  ;;  %v8331_v11 = vld [vmem:[#allocation19 + $0x398] sm:$0xf] }
 0x3e5   :  { %v12067_v43 = vadd.f32 %v3473_v34, %v3461_v52  ;;  %v8332_v20 = vor.u32 %v9762_v12, %v8331_v11  ;;  %v1762_v58 = vadd.f32 %v1750_v17, %v1742_v13  ;;  %v8452_v34 = vor.u32 %v9792_v38, %v8451_v28  ;;  %v9787_v11 = vld [vmem:[#allocation19 + $0x470] sm:$0xf0]  ;;  %v8631_v12 = vld [vmem:[#allocation19 + $0x5f0] sm:$0xf] }
 0x3e6   :  { %3689 = vmatpush.bf16.msrb.mxu0 %v7628_v14  ;;  %v1749_v14 = vperm.slane %v12063_v23, 0  ;;  %v8432_v13 = vor.u32 %v9787_v11, %v8431_v51  ;;  %v9867_v28 = vld [vmem:[#allocation19 + $0x6f0] sm:$0xf0]  ;;  %v1743_v38 = vmul.f32 %v1731_v15, %v11989_v54  ;;  %v9822_v54 = vld [vmem:[#allocation19 + $0x588] sm:$0xf0] }
 0x3e7   :  { %3702 = vmatpush.bf16.msrb.mxu1 %v7788_v3  ;;  %v7728_v3 = vor.u32 %v9609_v22, %v7727_v21  ;;  %v2065_v22 = vperm.slane %v12045_v27, 2  ;;  %v3712_v33 = vpack.c.bf16 %v1762_v58, %v1762_v58  ;;  %v8791_v27 = vld [vmem:[#allocation19 + $0x730] sm:$0xf]  ;;  %v8591_v58 = vld [vmem:[#allocation19 + $0x5a0] sm:$0xf] }
 0x3e8   :  { %5285 = vmatpush.bf16.msrb.mxu2 %v7972_v45  ;;  %5298 = vmatpush.bf16.msrb.mxu3 %v8132_v42  ;;  %v7912_v45 = vor.u32 %v9657_v48, %v7911_v36  ;;  %v9652_v42 = vld [vmem:[#allocation19 + $0x38] sm:$0xf0]  ;;  %v8271_v48 = vld [vmem:[#allocation19 + $0x320] sm:$0xf]  ;;  %v8792_v39 = vor.u32 %v9877_v19, %v8791_v27  ;;  %v9862_v51 = vld [vmem:[#allocation19 + $0x6c8] sm:$0xf0] }
 0x3e9   :  { %v7892_v16 = vor.u32 %v9652_v42, %v7891_v32  ;;  %v9742_v32 = vld [vmem:[#allocation19 + $0x308] sm:$0xf0]  ;;  %v8411_v42 = vld [vmem:[#allocation19 + $0x438] sm:$0xf]  ;;  %v8351_v27 = vld [vmem:[#allocation19 + $0x3c0] sm:$0xf] }
 0x3ea   :  { %3690 = vmatpush.bf16.msrb.mxu0 %v7608_v24  ;;  %v7871_v24 = vld [vmem:[#allocation19] sm:$0xf]  ;;  %v3462_v46 = vpop.f32.mrf.mxu2  ;;  %v9767_v19 = vld [vmem:[#allocation19 + $0x3d0] sm:$0xf0]  ;;  %v9720_v15 = vld [vmem:[#allocation19 + $0x25c] sm:$0xf] }
 0x3eb   :  { %3703 = vmatpush.bf16.msrb.mxu1 %v7768_v60  ;;  %v1761_v60 = vadd.f32 %v1749_v14, %v1741_v25  ;;  %v9837_v25 = vld [vmem:[#allocation19 + $0x600] sm:$0xf0] }
 0x3ec   :  { %5286 = vmatpush.bf16.msrb.mxu2 %v7952_v44  ;;  %5299 = vmatpush.bf16.msrb.mxu3 %v8112_v63  ;;  %v8312_v44 = vor.u32 %v9757_v53, %v8311_v2  ;;  %v3475_v31 = vpop.f32.mrf.mxu3  ;;  %v8031_v63 = vld [vmem:[#allocation19 + $0x140] sm:$0xf]  ;;  %v9832_v2 = vld [vmem:[#allocation19 + $0x5d8] sm:$0xf0]  ;;  %v8771_v53 = vld [vmem:[#allocation19 + $0x708] sm:$0xf] }
 0x3ed   :  { %v3711_v21 = vpack.c.bf16 %v1761_v60, %v1761_v60  ;;  %v9737_v46 = vld [vmem:[#allocation19 + $0x2e0] sm:$0xf0]  ;;  %v8391_v31 = vld [vmem:[#allocation19 + $0x410] sm:$0xf] }
 0x3ee   :  { %3691 = vmatpush.bf16.msrb.mxu0 %v7588_v30  ;;  %v8651_v30 = vld [vmem:[#allocation19 + $0x618] sm:$0xf] }
 0x3ef   :  { %3704 = vmatpush.bf16.msrb.mxu1 %v7748_v18  ;;  %v7872_v18 = vor.u32 %v9647_v59, %v7871_v24  ;;  %v8652_v36 = vor.u32 %v9842_v56, %v8651_v30  ;;  %v12074_v14 = vrot.slane %v3711_v21, 2  ;;  %v8772_v59 = vor.u32 %v9872_v6, %v8771_v53 }
 0x3f0   :  { %5287 = vmatpush.bf16.msrb.mxu2 %v7932_v47  ;;  %5300 = vmatpush.bf16.msrb.mxu3 %v8092_v55  ;;  %v8811_v47 = vld [vmem:[#allocation19 + $0x758] sm:$0xf]  ;;  %v8032_v55 = vor.u32 %v9687_v62, %v8031_v63  ;;  %v9777_v62 = vld [vmem:[#allocation19 + $0x420] sm:$0xf0]  ;;  %v1751_v56 = vperm.slane %v12063_v23, 2 }
 0x3f1   :  { %v8812_v52 = vor.u32 %v9882_v37, %v8811_v47  ;;  %v8392_v37 = vor.u32 %v9777_v62, %v8391_v31  ;;  %v9812_v62 = vld [vmem:[#allocation19 + $0x538] sm:$0xf0] }
 0x3f2   :  { %3692 = vmatpush.bf16.msrb.mxu0 %v7568_v50  ;;  %v3486_v49 = vpop.f32.mrf.mxu0  ;;  %v1763_v11 = vadd.f32 %v1751_v56, %v1743_v38  ;;  %v9715_v38 = vld [vmem:[#allocation19 + $0x234] sm:$0xf] }
 0x3f3   :  { %3705 = vmatpush.bf16.msrb.mxu1 %v7728_v3  ;;  %v3487_v50 = vadd.f32 %v3486_v49, %v2065_v22  ;;  %v3499_v41 = vpop.f32.mrf.mxu1  ;;  %v12076_v3 = vrot.slane %v3712_v33, 2  ;;  %v8211_v22 = vld [vmem:[#allocation19 + $0x2a8] sm:$0xf]  ;;  %v8191_v49 = vld [vmem:[#allocation19 + $0x280] sm:$0xf] }
 0x3f4   :  { %5288 = vmatpush.bf16.msrb.mxu2 %v7912_v45  ;;  %5301 = vmatpush.bf16.msrb.mxu3 %v8072_v7  ;;  %v8632_v7 = vor.u32 %v9837_v25, %v8631_v12 }
 0x3f5   :  { %3693 = vmatmul.bf16.vlgmr.msrb.gmra.mxu0 %v12022_v1  ;;  %v8292_v1 = vor.u32 %v9752_v61, %v8291_v26  ;;  %v12078_v17 = vadd.f32 %v3499_v41, %v3487_v50  ;;  %v8751_v61 = vld [vmem:[#allocation19 + $0x6e0] sm:$0xf]  ;;  %v9727_v41 = vld [vmem:[#allocation19 + $0x290] sm:$0xf0] }
 0x3f6   :  { %5309 = vmatpush.bf16.msra.mxu0 %v8332_v20  ;;  %3706 = vmatmul.bf16.vlgmr.msrb.gmra.mxu1 %v12024_v10  ;;  %v9747_v10 = vld [vmem:[#allocation19 + $0x330] sm:$0xf0]  ;;  %v8251_v20 = vld [vmem:[#allocation19 + $0x2f8] sm:$0xf]  ;;  %v8752_v33 = vor.u32 %v9867_v28, %v8751_v61  ;;  %v8192_v6 = vor.u32 %v9727_v41, %v8191_v49  ;;  %v7993_v28 = vld [vmem:[#allocation19 + $0x104] sm:$0xf0] }
 0x3f7   :  { %5322 = vmatpush.bf16.msra.mxu1 %v8492_v9  ;;  %v8272_v45 = vor.u32 %v9747_v10, %v8271_v48  ;;  %v9782_v9 = vld [vmem:[#allocation19 + $0x448] sm:$0xf0]  ;;  %v8252_v24 = vor.u32 %v9742_v32, %v8251_v20  ;;  %v1733_v48 = vperm.slane %v12059_v5, 4  ;;  %v8731_v10 = vld [vmem:[#allocation19 + $0x6b8] sm:$0xf] }
 0x3f8   :  { %5289 = vmatpush.bf16.msrb.mxu2 %v7892_v16  ;;  %5302 = vmatpush.bf16.msrb.mxu3 %v8052_v40  ;;  %v1732_v16 = vperm.slane %v12059_v5, 3  ;;  %v8412_v60 = vor.u32 %v9782_v9, %v8411_v42  ;;  %v8612_v40 = vor.u32 %v9832_v2, %v8611_v0  ;;  %v8551_v32 = vld [vmem:[#allocation19 + $0x550] sm:$0xf]  ;;  %v9857_v9 = vld [vmem:[#allocation19 + $0x6a0] sm:$0xf0] }
 0x3f9   :  { %v8711_v42 = vld [vmem:[#allocation19 + $0x690] sm:$0xf]  ;;  %v9680_v0 = vld [vmem:[#allocation19 + $0x11c] sm:$0xf]  ;;  %v9675_v61 = vld [vmem:[#allocation19 + $0xf4] sm:$0xf] }
 0x3fa   :  { %5310 = vmatpush.bf16.msra.mxu0 %v8312_v44  ;;  %v8231_v44 = vld [vmem:[#allocation19 + $0x2d0] sm:$0xf]  ;;  %v3488_v63 = vpop.f32.mrf.mxu0  ;;  %v1744_v47 = vmul.f32 %v1732_v16, %v12005_v57  ;;  %v8712_v31 = vor.u32 %v9857_v9, %v8711_v42  ;;  %v9755_v9 = vld [vmem:[#allocation19 + $0x374] sm:$0xf] }
 0x3fb   :  { %5323 = vmatpush.bf16.msra.mxu1 %v8472_v4  ;;  %v9827_v4 = vld [vmem:[#allocation19 + $0x5b0] sm:$0xf0]  ;;  %v3501_v26 = vpop.f32.mrf.mxu1  ;;  %v8232_v30 = vor.u32 %v9737_v46, %v8231_v44  ;;  %v8013_v2 = vld [vmem:[#allocation19 + $0x12c] sm:$0xf0]  ;;  %v1754_v46 = vperm.slane %v12063_v23, 5 }
 0x3fc   :  { %5290 = vmatpush.bf16.msrb.mxu2 %v7872_v18  ;;  %5303 = vmatpush.bf16.msrb.mxu3 %v8032_v55  ;;  %v1752_v18 = vperm.slane %v12063_v23, 3  ;;  %v8592_v21 = vor.u32 %v9827_v4, %v8591_v58  ;;  %v9732_v55 = vld [vmem:[#allocation19 + $0x2b8] sm:$0xf0]  ;;  %v8173_v16 = vld [vmem:[#allocation19 + $0x26c] sm:$0xf0] }
 0x3fd   :  { %v8212_v57 = vor.u32 %v9732_v55, %v8211_v22  ;;  %v8531_v63 = vld [vmem:[#allocation19 + $0x528] sm:$0xf]  ;;  %v8176_v4 = vor.u32 %v9720_v15, %v8173_v16  ;;  %v9852_v26 = vld [vmem:[#allocation19 + $0x678] sm:$0xf0]  ;;  %v7996_v55 = vor.u32 %v9675_v61, %v7993_v28  ;;  %v8333_v49 = vld [vmem:[#allocation19 + $0x3ac] sm:$0xf0] }
 0x3fe   :  { %5311 = vmatpush.bf16.msra.mxu0 %v8292_v1  ;;  %v8371_v1 = vld [vmem:[#allocation19 + $0x3e8] sm:$0xf]  ;;  %v9795_v15 = vld [vmem:[#allocation19 + $0x4b4] sm:$0xf] }
 0x3ff   :  { %5324 = vmatpush.bf16.msra.mxu1 %v8452_v34  ;;  %5291 = vmatmul.bf16.vlgmr.msrb.gmra.mxu2 %v12074_v14  ;;  %v9772_v34 = vld [vmem:[#allocation19 + $0x3f8] sm:$0xf0]  ;;  %v8691_v58 = vld [vmem:[#allocation19 + $0x668] sm:$0xf] }
 0x400   :  { %5335 = vmatpush.bf16.msra.mxu2 %v8652_v36  ;;  %5348 = vmatpush.bf16.msra.mxu3 %v8812_v52  ;;  %v8571_v36 = vld [vmem:[#allocation19 + $0x578] sm:$0xf]  ;;  %v1734_v52 = vperm.slane %v12059_v5, 5  ;;  %v8372_v12 = vor.u32 %v9772_v34, %v8371_v1  ;;  %v9817_v5 = vld [vmem:[#allocation19 + $0x560] sm:$0xf0] }
 0x401   :  { %5304 = vmatmul.bf16.vlgmr.msrb.gmra.mxu3 %v12076_v3  ;;  %v8572_v25 = vor.u32 %v9822_v54, %v8571_v36  ;;  %v9807_v1 = vld [vmem:[#allocation19 + $0x510] sm:$0xf0]  ;;  %v8473_v16 = vld [vmem:[#allocation19 + $0x4c4] sm:$0xf0] }
 0x402   :  { %5312 = vmatpush.bf16.msra.mxu0 %v8272_v45  ;;  %v3512_v50 = vpop.f32.mrf.mxu2  ;;  %v1764_v45 = vadd.f32 %v1752_v18, %v1744_v47  ;;  %v8511_v47 = vld [vmem:[#allocation19 + $0x500] sm:$0xf]  ;;  %v9847_v34 = vld [vmem:[#allocation19 + $0x650] sm:$0xf0] }
 0x403   :  { %5325 = vmatpush.bf16.msra.mxu1 %v8432_v13  ;;  %v8732_v13 = vor.u32 %v9862_v51, %v8731_v10  ;;  %v7973_v10 = vld [vmem:[#allocation19 + $0xdc] sm:$0xf0]  ;;  %v9710_v51 = vld [vmem:[#allocation19 + $0x20c] sm:$0xf] }
 0x404   :  { %5336 = vmatpush.bf16.msra.mxu2 %v8632_v7  ;;  %5349 = vmatpush.bf16.msra.mxu3 %v8792_v39  ;;  %v3513_v7 = vadd.f32 %v3512_v50, %v12078_v17  ;;  %v3525_v20 = vpop.f32.mrf.mxu3  ;;  %v1745_v39 = vmul.f32 %v1733_v48, %v12001_v29  ;;  %v8352_v17 = vor.u32 %v9767_v19, %v8351_v27  ;;  %v9670_v48 = vld [vmem:[#allocation19 + $0xcc] sm:$0xf] }
 0x405   :  { %v3714_v44 = vpack.c.bf16 %v1764_v45, %v1764_v45  ;;  %v1746_v29 = vmul.f32 %v1734_v52, %v12008_v35  ;;  %v8532_v35 = vor.u32 %v9812_v62, %v8531_v63  ;;  %v8133_v52 = vld [vmem:[#allocation19 + $0x21c] sm:$0xf0]  ;;  %v7976_v27 = vor.u32 %v9670_v48, %v7973_v10  ;;  %v8093_v63 = vld [vmem:[#allocation19 + $0x1cc] sm:$0xf0]  ;;  %v9750_v62 = vld [vmem:[#allocation19 + $0x34c] sm:$0xf] }
 0x406   :  { %5313 = vmatpush.bf16.msra.mxu0 %v8252_v24  ;;  %v12092_v53 = vadd.f32 %v3525_v20, %v3513_v7  ;;  %v3713_v24 = vpack.c.bf16 %v1763_v11, %v1763_v11  ;;  %v8512_v11 = vor.u32 %v9807_v1, %v8511_v47  ;;  %v8136_v45 = vor.u32 %v9710_v51, %v8133_v52  ;;  %v9665_v7 = vld [vmem:[#allocation19 + $0xa4] sm:$0xf]  ;;  %v7953_v20 = vld [vmem:[#allocation19 + $0xb4] sm:$0xf0]  ;;  %v7893_v51 = vld [vmem:[#allocation19 + $0x3c] sm:$0xf0] }
 0x407   :  { %5326 = vmatpush.bf16.msra.mxu1 %v8412_v60  ;;  %v1753_v60 = vperm.slane %v12063_v23, 4  ;;  %v12099_v23 = vrot.slane %v3714_v44, 2  ;;  %v1766_v36 = vadd.f32 %v1754_v46, %v1746_v29  ;;  %v9660_v29 = vld [vmem:[#allocation19 + $0x7c] sm:$0xf]  ;;  %v9690_v52 = vld [vmem:[#allocation19 + $0x16c] sm:$0xf] }
 0x408   :  { %5337 = vmatpush.bf16.msra.mxu2 %v8612_v40  ;;  %5350 = vmatpush.bf16.msra.mxu3 %v8772_v59  ;;  %v8552_v40 = vor.u32 %v9817_v5, %v8551_v32  ;;  %v8016_v59 = vor.u32 %v9680_v0, %v8013_v2  ;;  %v12097_v56 = vrot.slane %v3713_v24, 2  ;;  %v9705_v32 = vld [vmem:[#allocation19 + $0x1e4] sm:$0xf]  ;;  %v8313_v0 = vld [vmem:[#allocation19 + $0x384] sm:$0xf0] }
 0x409   :  { %v3716_v19 = vpack.c.bf16 %v1766_v36, %v1766_v36  ;;  %v8316_v46 = vor.u32 %v9755_v9, %v8313_v0 }
 0x40a   :  { %5314 = vmatpush.bf16.msra.mxu0 %v8232_v30  ;;  %v8153_v30 = vld [vmem:[#allocation19 + $0x244] sm:$0xf0]  ;;  %v3514_v18 = vpop.f32.mrf.mxu2 }
 0x40b   :  { %5327 = vmatpush.bf16.msra.mxu1 %v8392_v37  ;;  %v1765_v37 = vadd.f32 %v1753_v60, %v1745_v39  ;;  %v8156_v54 = vor.u32 %v9715_v38, %v8153_v30  ;;  %v8113_v39 = vld [vmem:[#allocation19 + $0x1f4] sm:$0xf0]  ;;  %v12106_v60 = vrot.slane %v3716_v19, 2  ;;  %v9655_v30 = vld [vmem:[#allocation19 + $0x54] sm:$0xf] }
 0x40c   :  { %5338 = vmatpush.bf16.msra.mxu2 %v8592_v21  ;;  %5351 = vmatpush.bf16.msra.mxu3 %v8752_v33  ;;  %v8692_v21 = vor.u32 %v9852_v26, %v8691_v58  ;;  %v3527_v22 = vpop.f32.mrf.mxu3  ;;  %v8671_v33 = vld [vmem:[#allocation19 + $0x640] sm:$0xf]  ;;  %v8116_v44 = vor.u32 %v9705_v32, %v8113_v39  ;;  %v9695_v18 = vld [vmem:[#allocation19 + $0x194] sm:$0xf]  ;;  %v7873_v32 = vld [vmem:[#allocation19 + $0x14] sm:$0xf0] }
 0x40d   :  { %v3715_v50 = vpack.c.bf16 %v1765_v37, %v1765_v37  ;;  %v8672_v41 = vor.u32 %v9847_v34, %v8671_v33  ;;  %v8293_v58 = vld [vmem:[#allocation19 + $0x35c] sm:$0xf0]  ;;  %v9745_v22 = vld [vmem:[#allocation19 + $0x324] sm:$0xf]  ;;  %v8433_v34 = vld [vmem:[#allocation19 + $0x474] sm:$0xf0] }
 0x40e   :  { %5315 = vmatpush.bf16.msra.mxu0 %v8212_v57  ;;  %v9760_v57 = vld [vmem:[#allocation19 + $0x39c] sm:$0xf]  ;;  %v8453_v26 = vld [vmem:[#allocation19 + $0x49c] sm:$0xf0]  ;;  %v8296_v38 = vor.u32 %v9750_v62, %v8293_v58  ;;  %v9785_v33 = vld [vmem:[#allocation19 + $0x464] sm:$0xf] }
 0x40f   :  { %5328 = vmatpush.bf16.msra.mxu1 %v8372_v12  ;;  %v9800_v12 = vld [vmem:[#allocation19 + $0x4dc] sm:$0xf]  ;;  %v12104_v24 = vrot.slane %v3715_v50, 2 }
 0x410   :  { %5339 = vmatpush.bf16.msra.mxu2 %v8572_v25  ;;  %5352 = vmatpush.bf16.msra.mxu3 %v8732_v13  ;;  %v8493_v25 = vld [vmem:[#allocation19 + $0x4ec] sm:$0xf0]  ;;  %v8336_v13 = vor.u32 %v9760_v57, %v8333_v49  ;;  %v8053_v57 = vld [vmem:[#allocation19 + $0x17c] sm:$0xf0]  ;;  %v8436_v49 = vor.u32 %v9785_v33, %v8433_v34  ;;  %v8193_v34 = vld [vmem:[#allocation19 + $0x294] sm:$0xf0] }
 0x411   :  { %v8496_v5 = vor.u32 %v9800_v12, %v8493_v25  ;;  %v8253_v12 = vld [vmem:[#allocation19 + $0x30c] sm:$0xf0]  ;;  %v12115_v25 = vld [vmem:[%s12246_s11] sm:$0x1f] }
 0x412   :  { %5316 = vmatpush.bf16.msra.mxu0 %v8192_v6  ;;  %v3538_v42 = vpop.f32.mrf.mxu0  ;;  %v2066_v50 = vperm.slane %v12115_v25, 3 }
 0x413   :  { %5329 = vmatpush.bf16.msra.mxu1 %v8352_v17  ;;  %v3539_v2 = vadd.f32 %v3538_v42, %v12092_v53  ;;  %v3551_v6 = vpop.f32.mrf.mxu1  ;;  %v7956_v17 = vor.u32 %v9665_v7, %v7953_v20  ;;  %v8476_v53 = vor.u32 %v9795_v15, %v8473_v16  ;;  %v8033_v42 = vld [vmem:[#allocation19 + $0x154] sm:$0xf0]  ;;  %v9775_v15 = vld [vmem:[#allocation19 + $0x414] sm:$0xf]  ;;  %v8393_v16 = vld [vmem:[#allocation19 + $0x424] sm:$0xf0] }
 0x414   :  { %5340 = vmatpush.bf16.msra.mxu2 %v8552_v40  ;;  %5353 = vmatpush.bf16.msra.mxu3 %v8712_v31  ;;  %v7933_v31 = vld [vmem:[#allocation19 + $0x8c] sm:$0xf0]  ;;  %v8396_v62 = vor.u32 %v9775_v15, %v8393_v16  ;;  %v8159_v15 = vld [vmem:[#allocation19 + $0x238] sm:$0xf]  ;;  %v9718_v16 = vld [vmem:[#allocation19 + $0x248] sm:$0xf0] }
 0x415   :  { %5317 = vmatmul.bf16.vlgmr.msra.gmra.mxu0 %v12097_v56  ;;  %v12108_v40 = vadd.f32 %v3551_v6, %v3539_v2  ;;  %v7936_v61 = vor.u32 %v9660_v29, %v7933_v31  ;;  %v9735_v2 = vld [vmem:[#allocation19 + $0x2d4] sm:$0xf]  ;;  %v8233_v6 = vld [vmem:[#allocation19 + $0x2e4] sm:$0xf0]  ;;  %v9880_v31 = vld [vmem:[#allocation19 + $0x75c] sm:$0xf] }
 0x416   :  { %5361 = vmatpush.bf16.msrb.mxu0 %v8016_v59  ;;  %5330 = vmatmul.bf16.vlgmr.msra.gmra.mxu1 %v12099_v23  ;;  %v9700_v59 = vld [vmem:[#allocation19 + $0x1bc] sm:$0xf] }
 0x417   :  { %5374 = vmatpush.bf16.msrb.mxu1 %v8176_v4  ;;  %v9790_v4 = vld [vmem:[#allocation19 + $0x48c] sm:$0xf]  ;;  %v8096_v28 = vor.u32 %v9700_v59, %v8093_v63  ;;  %v8813_v59 = vld [vmem:[#allocation19 + $0x76c] sm:$0xf0]  ;;  %v8236_v63 = vor.u32 %v9735_v2, %v8233_v6 }
 0x418   :  { %5341 = vmatpush.bf16.msra.mxu2 %v8532_v35  ;;  %5354 = vmatpush.bf16.msra.mxu3 %v8692_v21  ;;  %v7913_v35 = vld [vmem:[#allocation19 + $0x64] sm:$0xf0]  ;;  %v8456_v47 = vor.u32 %v9790_v4, %v8453_v26  ;;  %v9730_v4 = vld [vmem:[#allocation19 + $0x2ac] sm:$0xf]  ;;  %v8213_v26 = vld [vmem:[#allocation19 + $0x2bc] sm:$0xf0] }
 0x419   :  { %v8073_v21 = vld [vmem:[#allocation19 + $0x1a4] sm:$0xf0]  ;;  %v7916_v36 = vor.u32 %v9655_v30, %v7913_v35  ;;  %v9835_v30 = vld [vmem:[#allocation19 + $0x5f4] sm:$0xf] }
 0x41a   :  { %5362 = vmatpush.bf16.msrb.mxu0 %v7996_v55  ;;  %v3540_v37 = vpop.f32.mrf.mxu0  ;;  %v8273_v55 = vld [vmem:[#allocation19 + $0x334] sm:$0xf0]  ;;  %v8076_v48 = vor.u32 %v9695_v18, %v8073_v21  ;;  %v8633_v35 = vld [vmem:[#allocation19 + $0x604] sm:$0xf0]  ;;  %v9875_v18 = vld [vmem:[#allocation19 + $0x734] sm:$0xf] }
 0x41b   :  { %5375 = vmatpush.bf16.msrb.mxu1 %v8156_v54  ;;  %v3553_v1 = vpop.f32.mrf.mxu1  ;;  %v9650_v54 = vld [vmem:[#allocation19 + $0x2c] sm:$0xf]  ;;  %v8276_v10 = vor.u32 %v9745_v22, %v8273_v55  ;;  %v8216_v37 = vor.u32 %v9730_v4, %v8213_v26  ;;  %v9725_v22 = vld [vmem:[#allocation19 + $0x284] sm:$0xf]  ;;  %v8636_v33 = vor.u32 %v9835_v30, %v8633_v35  ;;  %v8139_v26 = vld [vmem:[#allocation19 + $0x210] sm:$0xf] }
 0x41c   :  { %5342 = vmatpush.bf16.msra.mxu2 %v8512_v11  ;;  %5355 = vmatpush.bf16.msra.mxu3 %v8672_v41  ;;  %v9740_v11 = vld [vmem:[#allocation19 + $0x2fc] sm:$0xf]  ;;  %v7896_v19 = vor.u32 %v9650_v54, %v7893_v51  ;;  %v8353_v54 = vld [vmem:[#allocation19 + $0x3d4] sm:$0xf0]  ;;  %v8613_v51 = vld [vmem:[#allocation19 + $0x5dc] sm:$0xf0] }
 0x41d   :  { %v9780_v41 = vld [vmem:[#allocation19 + $0x43c] sm:$0xf]  ;;  %v8256_v7 = vor.u32 %v9740_v11, %v8253_v12  ;;  %v9683_v11 = vld [vmem:[#allocation19 + $0x130] sm:$0xf0]  ;;  %v8196_v12 = vor.u32 %v9725_v22, %v8193_v34  ;;  %v9673_v4 = vld [vmem:[#allocation19 + $0xe0] sm:$0xf0] }
 0x41e   :  { %5363 = vmatpush.bf16.msrb.mxu0 %v7976_v27  ;;  %v8413_v27 = vld [vmem:[#allocation19 + $0x44c] sm:$0xf0]  ;;  %v9815_v35 = vld [vmem:[#allocation19 + $0x554] sm:$0xf]  ;;  %v8713_v22 = vld [vmem:[#allocation19 + $0x6a4] sm:$0xf0] }
 0x41f   :  { %5376 = vmatpush.bf16.msrb.mxu1 %v8136_v45  ;;  %5343 = vmatmul.bf16.vlgmr.msra.gmra.mxu2 %v12104_v24  ;;  %v9645_v45 = vld [vmem:[#allocation19 + $0x4] sm:$0xf]  ;;  %v8416_v39 = vor.u32 %v9780_v41, %v8413_v27  ;;  %v9723_v41 = vld [vmem:[#allocation19 + $0x270] sm:$0xf0]  ;;  %v8119_v34 = vld [vmem:[#allocation19 + $0x1e8] sm:$0xf] }
 0x420   :  { %5387 = vmatpush.bf16.msrb.mxu2 %v8336_v13  ;;  %5400 = vmatpush.bf16.msrb.mxu3 %v8496_v5  ;;  %v8056_v13 = vor.u32 %v9690_v52, %v8053_v57  ;;  %v9685_v5 = vld [vmem:[#allocation19 + $0x144] sm:$0xf]  ;;  %v7876_v29 = vor.u32 %v9645_v45, %v7873_v32  ;;  %v9870_v52 = vld [vmem:[#allocation19 + $0x70c] sm:$0xf]  ;;  %v8773_v57 = vld [vmem:[#allocation19 + $0x71c] sm:$0xf0] }
 0x421   :  { %5356 = vmatmul.bf16.vlgmr.msra.gmra.mxu3 %v12106_v60  ;;  %v8776_v45 = vor.u32 %v9870_v52, %v8773_v57  ;;  %v9865_v32 = vld [vmem:[#allocation19 + $0x6e4] sm:$0xf]  ;;  %v8533_v52 = vld [vmem:[#allocation19 + $0x53c] sm:$0xf0]  ;;  %v9850_v57 = vld [vmem:[#allocation19 + $0x66c] sm:$0xf] }
 0x422   :  { %5364 = vmatpush.bf16.msrb.mxu0 %v7956_v17  ;;  %v3564_v20 = vpop.f32.mrf.mxu2  ;;  %v9840_v17 = vld [vmem:[#allocation19 + $0x61c] sm:$0xf] }
 0x423   :  { %5377 = vmatpush.bf16.msrb.mxu1 %v8116_v44  ;;  %v3565_v9 = vadd.f32 %v3564_v20, %v2066_v50  ;;  %v8653_v44 = vld [vmem:[#allocation19 + $0x62c] sm:$0xf0]  ;;  %v8179_v50 = vld [vmem:[#allocation19 + $0x260] sm:$0xf]  ;;  %v8593_v20 = vld [vmem:[#allocation19 + $0x5b4] sm:$0xf0] }
 0x424   :  { %5388 = vmatpush.bf16.msrb.mxu2 %v8316_v46  ;;  %5401 = vmatpush.bf16.msrb.mxu3 %v8476_v53  ;;  %v3577_v0 = vpop.f32.mrf.mxu3  ;;  %v8036_v53 = vor.u32 %v9685_v5, %v8033_v42  ;;  %v8656_v58 = vor.u32 %v9840_v17, %v8653_v44  ;;  %v8180_v5 = vor.u32 %v9723_v41, %v8179_v50  ;;  %v9663_v50 = vld [vmem:[#allocation19 + $0x90] sm:$0xf0]  ;;  %v8099_v41 = vld [vmem:[#allocation19 + $0x1c0] sm:$0xf] }
 0x425   :  { %v12118_v46 = vadd.f32 %v3577_v0, %v3565_v9  ;;  %v7999_v9 = vld [vmem:[#allocation19 + $0xf8] sm:$0xf]  ;;  %v9678_v0 = vld [vmem:[#allocation19 + $0x108] sm:$0xf0] }
 0x426   :  { %5365 = vmatpush.bf16.msrb.mxu0 %v7936_v61  ;;  %v9770_v61 = vld [vmem:[#allocation19 + $0x3ec] sm:$0xf] }
 0x427   :  { %5378 = vmatpush.bf16.msrb.mxu1 %v8096_v28  ;;  %v8816_v28 = vor.u32 %v9880_v31, %v8813_v59  ;;  %v8000_v31 = vor.u32 %v9678_v0, %v7999_v9  ;;  %v9820_v59 = vld [vmem:[#allocation19 + $0x57c] sm:$0xf] }
 0x428   :  { %5389 = vmatpush.bf16.msrb.mxu2 %v8296_v38  ;;  %5402 = vmatpush.bf16.msrb.mxu3 %v8456_v47  ;;  %v8373_v38 = vld [vmem:[#allocation19 + $0x3fc] sm:$0xf0]  ;;  %v8793_v47 = vld [vmem:[#allocation19 + $0x744] sm:$0xf0] }
 0x429   :  { %v8376_v55 = vor.u32 %v9770_v61, %v8373_v38  ;;  %v9713_v61 = vld [vmem:[#allocation19 + $0x220] sm:$0xf0] }
 0x42a   :  { %5366 = vmatpush.bf16.msrb.mxu0 %v7916_v36  ;;  %v3566_v21 = vpop.f32.mrf.mxu2  ;;  %v9765_v36 = vld [vmem:[#allocation19 + $0x3c4] sm:$0xf] }
 0x42b   :  { %5379 = vmatpush.bf16.msrb.mxu1 %v8076_v48  ;;  %v8796_v48 = vor.u32 %v9875_v18, %v8793_v47  ;;  %v8356_v27 = vor.u32 %v9765_v36, %v8353_v54  ;;  %v8553_v18 = vld [vmem:[#allocation19 + $0x564] sm:$0xf0]  ;;  %v9855_v47 = vld [vmem:[#allocation19 + $0x694] sm:$0xf]  ;;  %v9708_v36 = vld [vmem:[#allocation19 + $0x1f8] sm:$0xf0] }
 0x42c   :  { %5390 = vmatpush.bf16.msrb.mxu2 %v8276_v10  ;;  %5403 = vmatpush.bf16.msrb.mxu3 %v8436_v49  ;;  %v3579_v1 = vpop.f32.mrf.mxu3  ;;  %v9830_v10 = vld [vmem:[#allocation19 + $0x5cc] sm:$0xf]  ;;  %v8019_v49 = vld [vmem:[#allocation19 + $0x120] sm:$0xf]  ;;  %v8556_v54 = vor.u32 %v9815_v35, %v8553_v18  ;;  %v8479_v18 = vld [vmem:[#allocation19 + $0x4b8] sm:$0xf] }
 0x42d   :  { %v9668_v1 = vld [vmem:[#allocation19 + $0xb8] sm:$0xf0]  ;;  %v9758_v35 = vld [vmem:[#allocation19 + $0x388] sm:$0xf0] }
 0x42e   :  { %5367 = vmatpush.bf16.msrb.mxu0 %v7896_v19  ;;  %v8616_v19 = vor.u32 %v9830_v10, %v8613_v51  ;;  %v9810_v51 = vld [vmem:[#allocation19 + $0x52c] sm:$0xf] }
 0x42f   :  { %5380 = vmatpush.bf16.msrb.mxu1 %v8056_v13  ;;  %v8020_v13 = vor.u32 %v9683_v11, %v8019_v49  ;;  %v8120_v49 = vor.u32 %v9708_v36, %v8119_v34  ;;  %v8693_v11 = vld [vmem:[#allocation19 + $0x67c] sm:$0xf0]  ;;  %v9648_v34 = vld [vmem:[#allocation19 + $0x18] sm:$0xf0]  ;;  %v8039_v36 = vld [vmem:[#allocation19 + $0x148] sm:$0xf] }
 0x430   :  { %5391 = vmatpush.bf16.msrb.mxu2 %v8256_v7  ;;  %5404 = vmatpush.bf16.msrb.mxu3 %v8416_v39  ;;  %v9825_v7 = vld [vmem:[#allocation19 + $0x5a4] sm:$0xf]  ;;  %v8753_v39 = vld [vmem:[#allocation19 + $0x6f4] sm:$0xf0] }
 0x431   :  { %v8596_v17 = vor.u32 %v9825_v7, %v8593_v20 }
 0x432   :  { %5368 = vmatpush.bf16.msrb.mxu0 %v7876_v29  ;;  %v3590_v42 = vpop.f32.mrf.mxu0  ;;  %v8756_v29 = vor.u32 %v9865_v32, %v8753_v39  ;;  %v8513_v32 = vld [vmem:[#allocation19 + $0x514] sm:$0xf0] }
 0x433   :  { %5381 = vmatpush.bf16.msrb.mxu1 %v8036_v53  ;;  %v3591_v2 = vadd.f32 %v3590_v42, %v12118_v46  ;;  %v3603_v6 = vpop.f32.mrf.mxu1  ;;  %v8573_v53 = vld [vmem:[#allocation19 + $0x58c] sm:$0xf0]  ;;  %v8673_v42 = vld [vmem:[#allocation19 + $0x654] sm:$0xf0] }
 0x434   :  { %5392 = vmatpush.bf16.msrb.mxu2 %v8236_v63  ;;  %5405 = vmatpush.bf16.msrb.mxu3 %v8396_v62  ;;  %v9860_v63 = vld [vmem:[#allocation19 + $0x6bc] sm:$0xf]  ;;  %v8160_v62 = vor.u32 %v9718_v16, %v8159_v15  ;;  %v7979_v46 = vld [vmem:[#allocation19 + $0xd0] sm:$0xf]  ;;  %v8079_v15 = vld [vmem:[#allocation19 + $0x198] sm:$0xf] }
 0x435   :  { %5369 = vmatmul.bf16.vlgmr.msrb.gmra.mxu0 %v12074_v14  ;;  %v3604_v44 = vadd.f32 %v3603_v6, %v3591_v2  ;;  %v7980_v30 = vor.u32 %v9673_v4, %v7979_v46  ;;  %v7919_v2 = vld [vmem:[#allocation19 + $0x58] sm:$0xf]  ;;  %v9658_v6 = vld [vmem:[#allocation19 + $0x68] sm:$0xf0]  ;;  %v7899_v4 = vld [vmem:[#allocation19 + $0x30] sm:$0xf] }
 0x436   :  { %5413 = vmatpush.bf16.msra.mxu0 %v8656_v58  ;;  %5382 = vmatmul.bf16.vlgmr.msrb.gmra.mxu1 %v12076_v3  ;;  %v8733_v58 = vld [vmem:[#allocation19 + $0x6cc] sm:$0xf0]  ;;  %v9698_v16 = vld [vmem:[#allocation19 + $0x1a8] sm:$0xf0] }
 0x437   :  { %5426 = vmatpush.bf16.msra.mxu1 %v8816_v28  ;;  %v8576_v28 = vor.u32 %v9820_v59, %v8573_v53  ;;  %v8736_v38 = vor.u32 %v9860_v63, %v8733_v58  ;;  %v8499_v53 = vld [vmem:[#allocation19 + $0x4e0] sm:$0xf]  ;;  %v9803_v63 = vld [vmem:[#allocation19 + $0x4f0] sm:$0xf0]  ;;  %v7920_v58 = vor.u32 %v9658_v6, %v7919_v2  ;;  %v8080_v46 = vor.u32 %v9698_v16, %v8079_v15  ;;  %v9838_v2 = vld [vmem:[#allocation19 + $0x608] sm:$0xf0] }
 0x438   :  { %5393 = vmatpush.bf16.msrb.mxu2 %v8216_v37  ;;  %5406 = vmatpush.bf16.msrb.mxu3 %v8376_v55  ;;  %v8140_v37 = vor.u32 %v9713_v61, %v8139_v26  ;;  %v7959_v55 = vld [vmem:[#allocation19 + $0xa8] sm:$0xf]  ;;  %v9653_v26 = vld [vmem:[#allocation19 + $0x40] sm:$0xf0]  ;;  %v8059_v61 = vld [vmem:[#allocation19 + $0x170] sm:$0xf] }
 0x439   :  { %v7960_v10 = vor.u32 %v9668_v1, %v7959_v55  ;;  %v8799_v16 = vld [vmem:[#allocation19 + $0x738] sm:$0xf] }
 0x43a   :  { %5414 = vmatpush.bf16.msra.mxu0 %v8636_v33  ;;  %v3592_v21 = vpop.f32.mrf.mxu0 }
 0x43b   :  { %5427 = vmatpush.bf16.msra.mxu1 %v8796_v48  ;;  %v3605_v33 = vpop.f32.mrf.mxu1  ;;  %v8716_v48 = vor.u32 %v9855_v47, %v8713_v22  ;;  %v9798_v47 = vld [vmem:[#allocation19 + $0x4c8] sm:$0xf0]  ;;  %v7879_v22 = vld [vmem:[#allocation19 + $0x8] sm:$0xf] }
 0x43c   :  { %5394 = vmatpush.bf16.msrb.mxu2 %v8196_v12  ;;  %5407 = vmatpush.bf16.msrb.mxu3 %v8356_v27  ;;  %v7939_v12 = vld [vmem:[#allocation19 + $0x80] sm:$0xf]  ;;  %v9703_v27 = vld [vmem:[#allocation19 + $0x1d0] sm:$0xf0] }
 0x43d   :  { %v7940_v7 = vor.u32 %v9663_v50, %v7939_v12  ;;  %v8100_v39 = vor.u32 %v9703_v27, %v8099_v41  ;;  %v7880_v12 = vor.u32 %v9648_v34, %v7879_v22  ;;  %v8819_v50 = vld [vmem:[#allocation19 + $0x760] sm:$0xf]  ;;  %v9883_v41 = vld [vmem:[#allocation19 + $0x770] sm:$0xf0]  ;;  %v2067_v27 = vperm.slane %v12115_v25, 4 }
 0x43e   :  { %5415 = vmatpush.bf16.msra.mxu0 %v8616_v19  ;;  %v8536_v19 = vor.u32 %v9810_v51, %v8533_v52  ;;  %v9753_v51 = vld [vmem:[#allocation19 + $0x360] sm:$0xf0]  ;;  %v8459_v52 = vld [vmem:[#allocation19 + $0x490] sm:$0xf]  ;;  %v9878_v25 = vld [vmem:[#allocation19 + $0x748] sm:$0xf0] }
 0x43f   :  { %5428 = vmatpush.bf16.msra.mxu1 %v8776_v45  ;;  %5395 = vmatmul.bf16.vlgmr.msrb.gmra.mxu2 %v12097_v56  ;;  %v9805_v45 = vld [vmem:[#allocation19 + $0x504] sm:$0xf] }
 0x440   :  { %5439 = vmatpush.bf16.msra.mxu2 %v8020_v13  ;;  %5452 = vmatpush.bf16.msra.mxu3 %v8180_v5  ;;  %v8696_v13 = vor.u32 %v9850_v57, %v8693_v11  ;;  %v9845_v5 = vld [vmem:[#allocation19 + $0x644] sm:$0xf]  ;;  %v8516_v59 = vor.u32 %v9805_v45, %v8513_v32  ;;  %v9843_v11 = vld [vmem:[#allocation19 + $0x630] sm:$0xf0]  ;;  %v9748_v32 = vld [vmem:[#allocation19 + $0x338] sm:$0xf0] }
 0x441   :  { %5408 = vmatmul.bf16.vlgmr.msrb.gmra.mxu3 %v12099_v23  ;;  %v9793_v57 = vld [vmem:[#allocation19 + $0x4a0] sm:$0xf0] }
 0x442   :  { %5416 = vmatpush.bf16.msra.mxu0 %v8596_v17  ;;  %v3616_v20 = vpop.f32.mrf.mxu2  ;;  %v8339_v17 = vld [vmem:[#allocation19 + $0x3a0] sm:$0xf] }
 0x443   :  { %5429 = vmatpush.bf16.msra.mxu1 %v8756_v29  ;;  %v3617_v9 = vadd.f32 %v3616_v20, %v3604_v44  ;;  %v9763_v29 = vld [vmem:[#allocation19 + $0x3b0] sm:$0xf0]  ;;  %v8279_v20 = vld [vmem:[#allocation19 + $0x328] sm:$0xf] }
 0x444   :  { %5440 = vmatpush.bf16.msra.mxu2 %v8000_v31  ;;  %5453 = vmatpush.bf16.msra.mxu3 %v8160_v62  ;;  %v3629_v0 = vpop.f32.mrf.mxu3  ;;  %v8676_v62 = vor.u32 %v9845_v5, %v8673_v42  ;;  %v8340_v44 = vor.u32 %v9763_v29, %v8339_v17  ;;  %v8439_v5 = vld [vmem:[#allocation19 + $0x468] sm:$0xf]  ;;  %v8820_v42 = vor.u32 %v9883_v41, %v8819_v50  ;;  %v8579_v50 = vld [vmem:[#allocation19 + $0x580] sm:$0xf]  ;;  %v9823_v41 = vld [vmem:[#allocation19 + $0x590] sm:$0xf0] }
 0x445   :  { %v12125_v31 = vadd.f32 %v3629_v0, %v3617_v9  ;;  %v9788_v9 = vld [vmem:[#allocation19 + $0x478] sm:$0xf0]  ;;  %v8639_v0 = vld [vmem:[#allocation19 + $0x5f8] sm:$0xf]  ;;  %v8280_v17 = vor.u32 %v9748_v32, %v8279_v20  ;;  %v8580_v20 = vor.u32 %v9823_v41, %v8579_v50  ;;  %v9801_v41 = vld [vmem:[#allocation19 + $0x4e4] sm:$0xf] }
 0x446   :  { %5417 = vmatpush.bf16.msra.mxu0 %v8576_v28  ;;  %v8500_v28 = vor.u32 %v9803_v63, %v8499_v53  ;;  %v8640_v53 = vor.u32 %v9838_v2, %v8639_v0  ;;  %v8259_v63 = vld [vmem:[#allocation19 + $0x300] sm:$0xf] }
 0x447   :  { %5430 = vmatpush.bf16.msra.mxu1 %v8736_v38  ;;  %v9693_v38 = vld [vmem:[#allocation19 + $0x180] sm:$0xf0] }
 0x448   :  { %5441 = vmatpush.bf16.msra.mxu2 %v7980_v30  ;;  %5454 = vmatpush.bf16.msra.mxu3 %v8140_v37  ;;  %v8319_v30 = vld [vmem:[#allocation19 + $0x378] sm:$0xf]  ;;  %v7900_v37 = vor.u32 %v9653_v26, %v7899_v4  ;;  %v8060_v55 = vor.u32 %v9693_v38, %v8059_v61  ;;  %v8619_v4 = vld [vmem:[#allocation19 + $0x5d0] sm:$0xf]  ;;  %v9833_v26 = vld [vmem:[#allocation19 + $0x5e0] sm:$0xf0] }
 0x449   :  { %v8320_v33 = vor.u32 %v9758_v35, %v8319_v30  ;;  %v8779_v61 = vld [vmem:[#allocation19 + $0x710] sm:$0xf]  ;;  %v8620_v35 = vor.u32 %v9833_v26, %v8619_v4 }
 0x44a   :  { %5418 = vmatpush.bf16.msra.mxu0 %v8556_v54  ;;  %v3618_v21 = vpop.f32.mrf.mxu2  ;;  %v9688_v54 = vld [vmem:[#allocation19 + $0x158] sm:$0xf0]  ;;  %v8539_v26 = vld [vmem:[#allocation19 + $0x530] sm:$0xf] }
 0x44b   :  { %5431 = vmatpush.bf16.msra.mxu1 %v8716_v48  ;;  %v8480_v48 = vor.u32 %v9798_v47, %v8479_v18  ;;  %v8239_v18 = vld [vmem:[#allocation19 + $0x2d8] sm:$0xf]  ;;  %v9738_v47 = vld [vmem:[#allocation19 + $0x2e8] sm:$0xf0] }
 0x44c   :  { %5442 = vmatpush.bf16.msra.mxu2 %v7960_v10  ;;  %5455 = vmatpush.bf16.msra.mxu3 %v8120_v49  ;;  %v3631_v1 = vpop.f32.mrf.mxu3  ;;  %v8299_v10 = vld [vmem:[#allocation19 + $0x350] sm:$0xf]  ;;  %v8659_v49 = vld [vmem:[#allocation19 + $0x620] sm:$0xf] }
 0x44d   :  { %v8300_v45 = vor.u32 %v9753_v51, %v8299_v10  ;;  %v8599_v1 = vld [vmem:[#allocation19 + $0x5a8] sm:$0xf] }
 0x44e   :  { %5419 = vmatpush.bf16.msra.mxu0 %v8536_v19  ;;  %v8040_v19 = vor.u32 %v9688_v54, %v8039_v36  ;;  %v8759_v36 = vld [vmem:[#allocation19 + $0x6e8] sm:$0xf]  ;;  %v9868_v54 = vld [vmem:[#allocation19 + $0x6f8] sm:$0xf0] }
 0x44f   :  { %5432 = vmatpush.bf16.msra.mxu1 %v8696_v13  ;;  %v8460_v13 = vor.u32 %v9793_v57, %v8459_v52  ;;  %v8219_v52 = vld [vmem:[#allocation19 + $0x2b0] sm:$0xf]  ;;  %v9733_v57 = vld [vmem:[#allocation19 + $0x2c0] sm:$0xf0] }
 0x450   :  { %5443 = vmatpush.bf16.msra.mxu2 %v7940_v7  ;;  %5456 = vmatpush.bf16.msra.mxu3 %v8100_v39  ;;  %v8660_v7 = vor.u32 %v9843_v11, %v8659_v49  ;;  %v8379_v49 = vld [vmem:[#allocation19 + $0x3f0] sm:$0xf]  ;;  %v8760_v11 = vor.u32 %v9868_v54, %v8759_v36  ;;  %v9808_v36 = vld [vmem:[#allocation19 + $0x518] sm:$0xf0]  ;;  %v8679_v54 = vld [vmem:[#allocation19 + $0x648] sm:$0xf] }
 0x452   :  { %5420 = vmatpush.bf16.msra.mxu0 %v8516_v59  ;;  %v3642_v39 = vpop.f32.mrf.mxu0  ;;  %v8440_v59 = vor.u32 %v9788_v9, %v8439_v5  ;;  %v9728_v5 = vld [vmem:[#allocation19 + $0x298] sm:$0xf0] }
 0x453   :  { %5433 = vmatpush.bf16.msra.mxu1 %v8676_v62  ;;  %v3643_v6 = vadd.f32 %v3642_v39, %v2067_v27  ;;  %v3655_v15 = vpop.f32.mrf.mxu1  ;;  %v9743_v62 = vld [vmem:[#allocation19 + $0x310] sm:$0xf0]  ;;  %v8739_v27 = vld [vmem:[#allocation19 + $0x6c0] sm:$0xf]  ;;  %v9768_v39 = vld [vmem:[#allocation19 + $0x3d8] sm:$0xf0] }
 0x454   :  { %5444 = vmatpush.bf16.msra.mxu2 %v7920_v58  ;;  %5457 = vmatpush.bf16.msra.mxu3 %v8080_v46  ;;  %v8419_v58 = vld [vmem:[#allocation19 + $0x440] sm:$0xf]  ;;  %v8800_v46 = vor.u32 %v9878_v25, %v8799_v16  ;;  %v8260_v38 = vor.u32 %v9743_v62, %v8259_v63  ;;  %v8719_v16 = vld [vmem:[#allocation19 + $0x698] sm:$0xf]  ;;  %v9858_v25 = vld [vmem:[#allocation19 + $0x6a8] sm:$0xf0] }
 0x455   :  { %5421 = vmatmul.bf16.vlgmr.msra.gmra.mxu0 %v12104_v24  ;;  %v3656_v29 = vadd.f32 %v3655_v15, %v3643_v6  ;;  %v8559_v6 = vld [vmem:[#allocation19 + $0x558] sm:$0xf]  ;;  %v9818_v15 = vld [vmem:[#allocation19 + $0x568] sm:$0xf0]  ;;  %v9721_v62 = vld [vmem:[#allocation19 + $0x264] sm:$0xf]  ;;  %v8720_v4 = vor.u32 %v9858_v25, %v8719_v16 }
 0x456   :  { %5465 = vmatpush.bf16.msrb.mxu0 %v8340_v44  ;;  %5434 = vmatmul.bf16.vlgmr.msra.gmra.mxu1 %v12106_v60  ;;  %v9783_v44 = vld [vmem:[#allocation19 + $0x450] sm:$0xf0]  ;;  %v9796_v16 = vld [vmem:[#allocation19 + $0x4bc] sm:$0xf]  ;;  %v8481_v25 = vld [vmem:[#allocation19 + $0x4cc] sm:$0xf0] }
 0x457   :  { %5478 = vmatpush.bf16.msrb.mxu1 %v8500_v28  ;;  %v9873_v28 = vld [vmem:[#allocation19 + $0x720] sm:$0xf0]  ;;  %v8420_v30 = vor.u32 %v9783_v44, %v8419_v58  ;;  %v8181_v58 = vld [vmem:[#allocation19 + $0x274] sm:$0xf0]  ;;  %v8560_v44 = vor.u32 %v9818_v15, %v8559_v6 }
 0x458   :  { %5445 = vmatpush.bf16.msra.mxu2 %v7900_v37  ;;  %5458 = vmatpush.bf16.msra.mxu3 %v8060_v55  ;;  %v8399_v37 = vld [vmem:[#allocation19 + $0x418] sm:$0xf]  ;;  %v8780_v21 = vor.u32 %v9873_v28, %v8779_v61  ;;  %v9778_v55 = vld [vmem:[#allocation19 + $0x428] sm:$0xf0]  ;;  %v9813_v61 = vld [vmem:[#allocation19 + $0x540] sm:$0xf0] }
 0x459   :  { %v8400_v10 = vor.u32 %v9778_v55, %v8399_v37  ;;  %v8699_v28 = vld [vmem:[#allocation19 + $0x670] sm:$0xf]  ;;  %v8519_v55 = vld [vmem:[#allocation19 + $0x508] sm:$0xf] }
 0x45a   :  { %5466 = vmatpush.bf16.msrb.mxu0 %v8320_v33  ;;  %v3644_v22 = vpop.f32.mrf.mxu0  ;;  %v9828_v33 = vld [vmem:[#allocation19 + $0x5b8] sm:$0xf0]  ;;  %v8161_v37 = vld [vmem:[#allocation19 + $0x24c] sm:$0xf0]  ;;  %v8520_v50 = vor.u32 %v9808_v36, %v8519_v55  ;;  %v9786_v36 = vld [vmem:[#allocation19 + $0x46c] sm:$0xf] }
 0x45b   :  { %5479 = vmatpush.bf16.msrb.mxu1 %v8480_v48  ;;  %v3657_v34 = vpop.f32.mrf.mxu1  ;;  %v8240_v48 = vor.u32 %v9738_v47, %v8239_v18  ;;  %v8600_v51 = vor.u32 %v9828_v33, %v8599_v1  ;;  %v8001_v18 = vld [vmem:[#allocation19 + $0x10c] sm:$0xf0]  ;;  %v9716_v47 = vld [vmem:[#allocation19 + $0x23c] sm:$0xf] }
 0x45c   :  { %5446 = vmatpush.bf16.msra.mxu2 %v7880_v12  ;;  %5459 = vmatpush.bf16.msra.mxu3 %v8040_v19  ;;  %v9773_v12 = vld [vmem:[#allocation19 + $0x400] sm:$0xf0]  ;;  %v9863_v19 = vld [vmem:[#allocation19 + $0x6d0] sm:$0xf0]  ;;  %v8081_v55 = vld [vmem:[#allocation19 + $0x1ac] sm:$0xf0] }
 0x45d   :  { %v8740_v9 = vor.u32 %v9863_v19, %v8739_v27  ;;  %v8501_v27 = vld [vmem:[#allocation19 + $0x4f4] sm:$0xf0] }
 0x45e   :  { %5467 = vmatpush.bf16.msrb.mxu0 %v8300_v45  ;;  %v8220_v45 = vor.u32 %v9733_v57, %v8219_v52  ;;  %v7981_v52 = vld [vmem:[#allocation19 + $0xe4] sm:$0xf0]  ;;  %v9711_v57 = vld [vmem:[#allocation19 + $0x214] sm:$0xf] }
 0x45f   :  { %5480 = vmatpush.bf16.msrb.mxu1 %v8460_v13  ;;  %5447 = vmatmul.bf16.vlgmr.msra.gmra.mxu2 %v12074_v14  ;;  %v8199_v13 = vld [vmem:[#allocation19 + $0x288] sm:$0xf] }
 0x460   :  { %5491 = vmatpush.bf16.msrb.mxu2 %v8660_v7  ;;  %5504 = vmatpush.bf16.msrb.mxu3 %v8820_v42  ;;  %v8380_v7 = vor.u32 %v9773_v12, %v8379_v49  ;;  %v8359_v42 = vld [vmem:[#allocation19 + $0x3c8] sm:$0xf]  ;;  %v8200_v63 = vor.u32 %v9728_v5, %v8199_v13  ;;  %v8341_v12 = vld [vmem:[#allocation19 + $0x3b4] sm:$0xf0]  ;;  %v9706_v5 = vld [vmem:[#allocation19 + $0x1ec] sm:$0xf] }
 0x461   :  { %5460 = vmatmul.bf16.vlgmr.msra.gmra.mxu3 %v12076_v3  ;;  %v8141_v49 = vld [vmem:[#allocation19 + $0x224] sm:$0xf0] }
 0x462   :  { %5468 = vmatpush.bf16.msrb.mxu0 %v8280_v17  ;;  %v3668_v32 = vpop.f32.mrf.mxu2  ;;  %v9681_v17 = vld [vmem:[#allocation19 + $0x124] sm:$0xf]  ;;  %v8144_v13 = vor.u32 %v9711_v57, %v8141_v49  ;;  %v7901_v49 = vld [vmem:[#allocation19 + $0x44] sm:$0xf0] }
 0x463   :  { %5481 = vmatpush.bf16.msrb.mxu1 %v8440_v59  ;;  %v3669_v0 = vadd.f32 %v3668_v32, %v3656_v29  ;;  %v8021_v59 = vld [vmem:[#allocation19 + $0x134] sm:$0xf0]  ;;  %v7961_v32 = vld [vmem:[#allocation19 + $0xbc] sm:$0xf0] }
 0x464   :  { %5492 = vmatpush.bf16.msrb.mxu2 %v8640_v53  ;;  %5505 = vmatpush.bf16.msrb.mxu3 %v8800_v46  ;;  %v3681_v2 = vpop.f32.mrf.mxu3  ;;  %v8360_v46 = vor.u32 %v9768_v39, %v8359_v42  ;;  %v8024_v29 = vor.u32 %v9681_v17, %v8021_v59  ;;  %v8504_v42 = vor.u32 %v9801_v41, %v8501_v27  ;;  %v9741_v41 = vld [vmem:[#allocation19 + $0x304] sm:$0xf]  ;;  %v8261_v27 = vld [vmem:[#allocation19 + $0x314] sm:$0xf0] }
 0x465   :  { %v12132_v53 = vadd.f32 %v3681_v2, %v3669_v0  ;;  %v9756_v0 = vld [vmem:[#allocation19 + $0x37c] sm:$0xf]  ;;  %v8321_v2 = vld [vmem:[#allocation19 + $0x38c] sm:$0xf0] }
 0x466   :  { %5469 = vmatpush.bf16.msrb.mxu0 %v8260_v38  ;;  %v8184_v38 = vor.u32 %v9721_v62, %v8181_v58  ;;  %v8324_v62 = vor.u32 %v9756_v0, %v8321_v2  ;;  %v9661_v58 = vld [vmem:[#allocation19 + $0x84] sm:$0xf]  ;;  %v8041_v0 = vld [vmem:[#allocation19 + $0x15c] sm:$0xf0] }
 0x467   :  { %5482 = vmatpush.bf16.msrb.mxu1 %v8420_v30  ;;  %v9853_v30 = vld [vmem:[#allocation19 + $0x680] sm:$0xf0] }
 0x468   :  { %5493 = vmatpush.bf16.msrb.mxu2 %v8620_v35  ;;  %5506 = vmatpush.bf16.msrb.mxu3 %v8780_v21  ;;  %v9676_v35 = vld [vmem:[#allocation19 + $0xfc] sm:$0xf]  ;;  %v8540_v21 = vor.u32 %v9813_v61, %v8539_v26  ;;  %v8700_v1 = vor.u32 %v9853_v30, %v8699_v28  ;;  %v8301_v26 = vld [vmem:[#allocation19 + $0x364] sm:$0xf0]  ;;  %v9791_v61 = vld [vmem:[#allocation19 + $0x494] sm:$0xf] }
 0x469   :  { %v8004_v34 = vor.u32 %v9676_v35, %v8001_v18  ;;  %v8461_v28 = vld [vmem:[#allocation19 + $0x4a4] sm:$0xf0]  ;;  %v9656_v18 = vld [vmem:[#allocation19 + $0x5c] sm:$0xf] }
 0x46a   :  { %5470 = vmatpush.bf16.msrb.mxu0 %v8240_v48  ;;  %v3670_v22 = vpop.f32.mrf.mxu2  ;;  %v9848_v48 = vld [vmem:[#allocation19 + $0x658] sm:$0xf0] }
 0x46b   :  { %5483 = vmatpush.bf16.msrb.mxu1 %v8400_v10  ;;  %v8164_v10 = vor.u32 %v9716_v47, %v8161_v37  ;;  %v8680_v19 = vor.u32 %v9848_v48, %v8679_v54  ;;  %v7921_v47 = vld [vmem:[#allocation19 + $0x6c] sm:$0xf0]  ;;  %v9696_v37 = vld [vmem:[#allocation19 + $0x19c] sm:$0xf]  ;;  %v8441_v54 = vld [vmem:[#allocation19 + $0x47c] sm:$0xf0] }
 0x46c   :  { %5494 = vmatpush.bf16.msrb.mxu2 %v8600_v51  ;;  %5507 = vmatpush.bf16.msrb.mxu3 %v8760_v11  ;;  %v3683_v33 = vpop.f32.mrf.mxu3  ;;  %v9671_v51 = vld [vmem:[#allocation19 + $0xd4] sm:$0xf]  ;;  %v9761_v11 = vld [vmem:[#allocation19 + $0x3a4] sm:$0xf] }
 0x46d   :  { %v8281_v33 = vld [vmem:[#allocation19 + $0x33c] sm:$0xf0] }
 0x46e   :  { %5471 = vmatpush.bf16.msrb.mxu0 %v8220_v45  ;;  %v7984_v45 = vor.u32 %v9671_v51, %v7981_v52  ;;  %v12144_v48 = vld [vmem:[%s12248_s13] sm:$0x1f]  ;;  %v9651_v51 = vld [vmem:[#allocation19 + $0x34] sm:$0xf]  ;;  %v8084_v52 = vor.u32 %v9696_v37, %v8081_v55  ;;  %v9836_v37 = vld [vmem:[#allocation19 + $0x5fc] sm:$0xf] }
 0x46f   :  { %5484 = vmatpush.bf16.msrb.mxu1 %v8380_v7  ;;  %v8344_v7 = vor.u32 %v9761_v11, %v8341_v12  ;;  %v9691_v11 = vld [vmem:[#allocation19 + $0x174] sm:$0xf]  ;;  %v8061_v12 = vld [vmem:[#allocation19 + $0x184] sm:$0xf0]  ;;  %v8801_v55 = vld [vmem:[#allocation19 + $0x74c] sm:$0xf0] }
 0x470   :  { %5495 = vmatpush.bf16.msrb.mxu2 %v8580_v20  ;;  %5508 = vmatpush.bf16.msrb.mxu3 %v8740_v9  ;;  %v9666_v20 = vld [vmem:[#allocation19 + $0xac] sm:$0xf]  ;;  %v8121_v9 = vld [vmem:[#allocation19 + $0x1fc] sm:$0xf0]  ;;  %s10535_s13 = smov [#allocation28]  }
 0x471   :  { %v7964_v17 = vor.u32 %v9666_v20, %v7961_v32  ;;  %v9646_v20 = vld [vmem:[#allocation19 + $0xc] sm:$0xf]  ;;  %v8064_v32 = vor.u32 %v9691_v11, %v8061_v12  ;;  %v9831_v11 = vld [vmem:[#allocation19 + $0x5d4] sm:$0xf]  ;;  %v8621_v12 = vld [vmem:[#allocation19 + $0x5e4] sm:$0xf0] }
 0x472   :  { %5472 = vmatpush.bf16.msrb.mxu0 %v8200_v63  ;;  %v3694_v39 = vpop.f32.mrf.mxu0  ;;  %v8124_v63 = vor.u32 %v9706_v5, %v8121_v9  ;;  %v8264_v5 = vor.u32 %v9741_v41, %v8261_v27  ;;  %v9686_v9 = vld [vmem:[#allocation19 + $0x14c] sm:$0xf]  ;;  %v8781_v41 = vld [vmem:[#allocation19 + $0x724] sm:$0xf0]  ;;  %s6876_s15 = sshll.u32 %s10535_s13, 4  ;;  %s6877_s15 = int_to_ptr.vmem [resolvable:$true] %s6876_s15 }
 0x473   :  { %5485 = vmatpush.bf16.msrb.mxu1 %v8360_v46  ;;  %v3695_v6 = vadd.f32 %v3694_v39, %v12132_v53  ;;  %v3707_v15 = vpop.f32.mrf.mxu1  ;;  %v7941_v46 = vld [vmem:[#allocation19 + $0x94] sm:$0xf0]  ;;  %v7881_v39 = vld [vmem:[#allocation19 + $0x1c] sm:$0xf0]  ;;  %v8027_v27 = vld [vmem:[#allocation19 + $0x128] sm:$0xf] }
 0x474   :  { %5496 = vmatpush.bf16.msrb.mxu2 %v8560_v44  ;;  %5509 = vmatpush.bf16.msrb.mxu3 %v8720_v4  ;;  %v9701_v44 = vld [vmem:[#allocation19 + $0x1c4] sm:$0xf]  ;;  %v8484_v4 = vor.u32 %v9796_v16, %v8481_v25  ;;  %v8101_v53 = vld [vmem:[#allocation19 + $0x1d4] sm:$0xf0]  ;;  %v9736_v16 = vld [vmem:[#allocation19 + $0x2dc] sm:$0xf] }
 0x475   :  { %5473 = vmatmul.bf16.vlgmr.msrb.gmra.mxu0 %v12097_v56  ;;  %v12137_v59 = vadd.f32 %v3707_v15, %v3695_v6  ;;  %v8104_v30 = vor.u32 %v9701_v44, %v8101_v53  ;;  %v8241_v25 = vld [vmem:[#allocation19 + $0x2ec] sm:$0xf0]  ;;  %v7884_v44 = vor.u32 %v9646_v20, %v7881_v39  ;;  %v8821_v53 = vld [vmem:[#allocation19 + $0x774] sm:$0xf0]  ;;  %v9826_v39 = vld [vmem:[#allocation19 + $0x5ac] sm:$0xf] }
 0x476   :  { %5517 = vmatpush.bf16.msra.mxu0 %v8024_v29  ;;  %5486 = vmatmul.bf16.vlgmr.msrb.gmra.mxu1 %v12099_v23  ;;  %v9751_v29 = vld [vmem:[#allocation19 + $0x354] sm:$0xf] }
 0x477   :  { %5530 = vmatpush.bf16.msra.mxu1 %v8184_v38  ;;  %v7944_v38 = vor.u32 %v9661_v58, %v7941_v46  ;;  %v8304_v35 = vor.u32 %v9751_v29, %v8301_v26  ;;  %v8661_v58 = vld [vmem:[#allocation19 + $0x634] sm:$0xf0]  ;;  %v8044_v29 = vor.u32 %v9686_v9, %v8041_v0  ;;  %v8244_v26 = vor.u32 %v9736_v16, %v8241_v25  ;;  %v8601_v9 = vld [vmem:[#allocation19 + $0x5bc] sm:$0xf0]  ;;  %v9866_v0 = vld [vmem:[#allocation19 + $0x6ec] sm:$0xf] }
 0x478   :  { %5497 = vmatpush.bf16.msrb.mxu2 %v8540_v21  ;;  %5510 = vmatpush.bf16.msrb.mxu3 %v8700_v1  ;;  %v8464_v21 = vor.u32 %v9791_v61, %v8461_v28  ;;  %v9746_v1 = vld [vmem:[#allocation19 + $0x32c] sm:$0xf]  ;;  %v8007_v16 = vld [vmem:[#allocation19 + $0x100] sm:$0xf]  ;;  %v9679_v25 = vld [vmem:[#allocation19 + $0x110] sm:$0xf0] }
 0x479   :  { %v8284_v57 = vor.u32 %v9746_v1, %v8281_v33 }
 0x47a   :  { %5518 = vmatpush.bf16.msra.mxu0 %v8004_v34  ;;  %v3696_v22 = vpop.f32.mrf.mxu0 }
 0x47b   :  { %5531 = vmatpush.bf16.msra.mxu1 %v8164_v10  ;;  %v3709_v34 = vpop.f32.mrf.mxu1  ;;  %v7924_v10 = vor.u32 %v9656_v18, %v7921_v47  ;;  %v8381_v47 = vld [vmem:[#allocation19 + $0x404] sm:$0xf0]  ;;  %v9876_v22 = vld [vmem:[#allocation19 + $0x73c] sm:$0xf] }
 0x47c   :  { %5498 = vmatpush.bf16.msrb.mxu2 %v8520_v50  ;;  %5511 = vmatpush.bf16.msrb.mxu3 %v8680_v19  ;;  %v8444_v50 = vor.u32 %v9786_v36, %v8441_v54  ;;  %v4007_v19 = vperm.slane %v12144_v48, 0  ;;  %v9726_v34 = vld [vmem:[#allocation19 + $0x28c] sm:$0xf] }
 0x47e   :  { %5519 = vmatpush.bf16.msra.mxu0 %v7984_v45  ;;  %v9781_v45 = vld [vmem:[#allocation19 + $0x444] sm:$0xf] }
 0x47f   :  { %5532 = vmatpush.bf16.msra.mxu1 %v8144_v13  ;;  %5499 = vmatmul.bf16.vlgmr.msrb.gmra.mxu2 %v12104_v24  ;;  %v8421_v13 = vld [vmem:[#allocation19 + $0x454] sm:$0xf0] }
 0x480   :  { %5543 = vmatpush.bf16.msra.mxu2 %v8344_v7  ;;  %5556 = vmatpush.bf16.msra.mxu3 %v8504_v42  ;;  %v7904_v7 = vor.u32 %v9651_v51, %v7901_v49  ;;  %v8424_v2 = vor.u32 %v9781_v45, %v8421_v13  ;;  %v8201_v51 = vld [vmem:[#allocation19 + $0x29c] sm:$0xf0]  ;;  %v8804_v49 = vor.u32 %v9876_v22, %v8801_v55  ;;  %v8187_v13 = vld [vmem:[#allocation19 + $0x268] sm:$0xf]  ;;  %v9816_v55 = vld [vmem:[#allocation19 + $0x55c] sm:$0xf] }
 0x481   :  { %5512 = vmatmul.bf16.vlgmr.msrb.gmra.mxu3 %v12106_v60  ;;  %v8204_v45 = vor.u32 %v9726_v34, %v8201_v51  ;;  %v9669_v51 = vld [vmem:[#allocation19 + $0xc0] sm:$0xf0] }
 0x482   :  { %5520 = vmatpush.bf16.msra.mxu0 %v7964_v17  ;;  %v5292_v42 = vpop.f32.mrf.mxu2  ;;  %v9776_v17 = vld [vmem:[#allocation19 + $0x41c] sm:$0xf] }
 0x483   :  { %5533 = vmatpush.bf16.msra.mxu1 %v8124_v63  ;;  %v5293_v6 = vadd.f32 %v5292_v42, %v4007_v19  ;;  %v8401_v63 = vld [vmem:[#allocation19 + $0x42c] sm:$0xf0]  ;;  %v9684_v19 = vld [vmem:[#allocation19 + $0x138] sm:$0xf0] }
 0x484   :  { %5544 = vmatpush.bf16.msra.mxu2 %v8324_v62  ;;  %5557 = vmatpush.bf16.msra.mxu3 %v8484_v4  ;;  %v5305_v15 = vpop.f32.mrf.mxu3  ;;  %v9841_v62 = vld [vmem:[#allocation19 + $0x624] sm:$0xf]  ;;  %v8404_v61 = vor.u32 %v9776_v17, %v8401_v63  ;;  %v8028_v42 = vor.u32 %v9684_v19, %v8027_v27  ;;  %v8541_v27 = vld [vmem:[#allocation19 + $0x544] sm:$0xf0]  ;;  %v9851_v19 = vld [vmem:[#allocation19 + $0x674] sm:$0xf] }
 0x485   :  { %v12147_v46 = vadd.f32 %v5305_v15, %v5293_v6  ;;  %v9881_v4 = vld [vmem:[#allocation19 + $0x764] sm:$0xf]  ;;  %v8664_v28 = vor.u32 %v9841_v62, %v8661_v58  ;;  %v8761_v15 = vld [vmem:[#allocation19 + $0x6fc] sm:$0xf0]  ;;  %v9719_v58 = vld [vmem:[#allocation19 + $0x250] sm:$0xf0] }
 0x486   :  { %5521 = vmatpush.bf16.msra.mxu0 %v7944_v38  ;;  %v9731_v38 = vld [vmem:[#allocation19 + $0x2b4] sm:$0xf]  ;;  %v8824_v18 = vor.u32 %v9881_v4, %v8821_v53  ;;  %v8167_v62 = vld [vmem:[#allocation19 + $0x240] sm:$0xf]  ;;  %v8764_v53 = vor.u32 %v9866_v0, %v8761_v15  ;;  %v9846_v15 = vld [vmem:[#allocation19 + $0x64c] sm:$0xf] }
 0x487   :  { %5534 = vmatpush.bf16.msra.mxu1 %v8104_v30  ;;  %v8221_v30 = vld [vmem:[#allocation19 + $0x2c4] sm:$0xf0] }
 0x488   :  { %5545 = vmatpush.bf16.msra.mxu2 %v8304_v35  ;;  %5558 = vmatpush.bf16.msra.mxu3 %v8464_v21  ;;  %v9771_v35 = vld [vmem:[#allocation19 + $0x3f4] sm:$0xf]  ;;  %v8641_v21 = vld [vmem:[#allocation19 + $0x60c] sm:$0xf0]  ;;  %v8224_v1 = vor.u32 %v9731_v38, %v8221_v30  ;;  %v8168_v38 = vor.u32 %v9719_v58, %v8167_v62  ;;  %v8741_v30 = vld [vmem:[#allocation19 + $0x6d4] sm:$0xf0] }
 0x489   :  { %v8384_v36 = vor.u32 %v9771_v35, %v8381_v47  ;;  %v9674_v35 = vld [vmem:[#allocation19 + $0xe8] sm:$0xf0]  ;;  %v7927_v62 = vld [vmem:[#allocation19 + $0x60] sm:$0xf]  ;;  %v9659_v58 = vld [vmem:[#allocation19 + $0x70] sm:$0xf0] }
 0x48a   :  { %5522 = vmatpush.bf16.msra.mxu0 %v7924_v10  ;;  %v5294_v33 = vpop.f32.mrf.mxu2  ;;  %v8644_v10 = vor.u32 %v9836_v37, %v8641_v21  ;;  %v9714_v47 = vld [vmem:[#allocation19 + $0x228] sm:$0xf0] }
 0x48b   :  { %5535 = vmatpush.bf16.msra.mxu1 %v8084_v52  ;;  %v9766_v52 = vld [vmem:[#allocation19 + $0x3cc] sm:$0xf]  ;;  %v9856_v33 = vld [vmem:[#allocation19 + $0x69c] sm:$0xf] }
 0x48c   :  { %5546 = vmatpush.bf16.msra.mxu2 %v8284_v57  ;;  %5559 = vmatpush.bf16.msra.mxu3 %v8444_v50  ;;  %v5307_v54 = vpop.f32.mrf.mxu3  ;;  %v8361_v57 = vld [vmem:[#allocation19 + $0x3dc] sm:$0xf0]  ;;  %v9871_v50 = vld [vmem:[#allocation19 + $0x714] sm:$0xf] }
 0x48d   :  { %v8364_v20 = vor.u32 %v9766_v52, %v8361_v57  ;;  %v8721_v54 = vld [vmem:[#allocation19 + $0x6ac] sm:$0xf0] }
 0x48e   :  { %5523 = vmatpush.bf16.msra.mxu0 %v7904_v7  ;;  %v9724_v7 = vld [vmem:[#allocation19 + $0x278] sm:$0xf0]  ;;  %v8127_v57 = vld [vmem:[#allocation19 + $0x1f0] sm:$0xf] }
 0x48f   :  { %5536 = vmatpush.bf16.msra.mxu1 %v8064_v32  ;;  %v8624_v32 = vor.u32 %v9831_v11, %v8621_v12  ;;  %v8724_v12 = vor.u32 %v9856_v33, %v8721_v54  ;;  %v9759_v33 = vld [vmem:[#allocation19 + $0x390] sm:$0xf0] }
 0x490   :  { %5547 = vmatpush.bf16.msra.mxu2 %v8264_v5  ;;  %5560 = vmatpush.bf16.msra.mxu3 %v8424_v2  ;;  %v8784_v5 = vor.u32 %v9871_v50, %v8781_v41  ;;  %v8188_v2 = vor.u32 %v9724_v7, %v8187_v13  ;;  %v9811_v41 = vld [vmem:[#allocation19 + $0x534] sm:$0xf]  ;;  %v8701_v13 = vld [vmem:[#allocation19 + $0x684] sm:$0xf0] }
 0x491   :  { %v7947_v7 = vld [vmem:[#allocation19 + $0x88] sm:$0xf] }
 0x492   :  { %5524 = vmatpush.bf16.msra.mxu0 %v7884_v44  ;;  %v5318_v6 = vpop.f32.mrf.mxu0  ;;  %v8604_v44 = vor.u32 %v9826_v39, %v8601_v9  ;;  %v9806_v39 = vld [vmem:[#allocation19 + $0x50c] sm:$0xf]  ;;  %v8704_v9 = vor.u32 %v9851_v19, %v8701_v13 }
 0x493   :  { %5537 = vmatpush.bf16.msra.mxu1 %v8044_v29  ;;  %v5319_v17 = vadd.f32 %v5318_v6, %v12147_v46  ;;  %v5331_v63 = vpop.f32.mrf.mxu1  ;;  %v8008_v29 = vor.u32 %v9679_v25, %v8007_v16  ;;  %v7987_v46 = vld [vmem:[#allocation19 + $0xd8] sm:$0xf]  ;;  %v8521_v6 = vld [vmem:[#allocation19 + $0x51c] sm:$0xf0]  ;;  %v9754_v19 = vld [vmem:[#allocation19 + $0x368] sm:$0xf0] }
 0x494   :  { %5548 = vmatpush.bf16.msra.mxu2 %v8244_v26  ;;  %5561 = vmatpush.bf16.msra.mxu3 %v8404_v61  ;;  %v9821_v26 = vld [vmem:[#allocation19 + $0x584] sm:$0xf]  ;;  %v8581_v61 = vld [vmem:[#allocation19 + $0x594] sm:$0xf0]  ;;  %v7988_v22 = vor.u32 %v9674_v35, %v7987_v46  ;;  %v8681_v16 = vld [vmem:[#allocation19 + $0x65c] sm:$0xf0]  ;;  %v7928_v35 = vor.u32 %v9659_v58, %v7927_v62 }
 0x495   :  { %5525 = vmatmul.bf16.vlgmr.msra.gmra.mxu0 %v12074_v14  ;;  %v5332_v4 = vadd.f32 %v5331_v63, %v5319_v17  ;;  %v8584_v37 = vor.u32 %v9821_v26, %v8581_v61  ;;  %v9764_v26 = vld [vmem:[#allocation19 + $0x3b8] sm:$0xf0]  ;;  %v8684_v46 = vor.u32 %v9846_v15, %v8681_v16  ;;  %v9794_v13 = vld [vmem:[#allocation19 + $0x4a8] sm:$0xf0]  ;;  %v8287_v15 = vld [vmem:[#allocation19 + $0x330] sm:$0xf] }
 0x496   :  { %5569 = vmatpush.bf16.msrb.mxu0 %v8664_v28  ;;  %5538 = vmatmul.bf16.vlgmr.msra.gmra.mxu1 %v12076_v3  ;;  %v9861_v28 = vld [vmem:[#allocation19 + $0x6c4] sm:$0xf]  ;;  %v8647_v58 = vld [vmem:[#allocation19 + $0x600] sm:$0xf] }
 0x497   :  { %5582 = vmatpush.bf16.msrb.mxu1 %v8824_v18  ;;  %v8147_v18 = vld [vmem:[#allocation19 + $0x218] sm:$0xf]  ;;  %v8744_v21 = vor.u32 %v9861_v28, %v8741_v30  ;;  %v8524_v28 = vor.u32 %v9806_v39, %v8521_v6  ;;  %v9804_v30 = vld [vmem:[#allocation19 + $0x4f8] sm:$0xf0]  ;;  %v4008_v39 = vperm.slane %v12144_v48, 1 }
 0x498   :  { %5549 = vmatpush.bf16.msra.mxu2 %v8224_v1  ;;  %5562 = vmatpush.bf16.msra.mxu3 %v8384_v36  ;;  %v8561_v1 = vld [vmem:[#allocation19 + $0x56c] sm:$0xf0]  ;;  %v8148_v34 = vor.u32 %v9714_v47, %v8147_v18  ;;  %v7907_v47 = vld [vmem:[#allocation19 + $0x38] sm:$0xf]  ;;  %v9749_v16 = vld [vmem:[#allocation19 + $0x340] sm:$0xf0] }
 0x499   :  { %v8564_v11 = vor.u32 %v9816_v55, %v8561_v1  ;;  %v9694_v55 = vld [vmem:[#allocation19 + $0x188] sm:$0xf0]  ;;  %v8327_v1 = vld [vmem:[#allocation19 + $0x380] sm:$0xf]  ;;  %v9789_v62 = vld [vmem:[#allocation19 + $0x480] sm:$0xf0] }
 0x49a   :  { %5570 = vmatpush.bf16.msrb.mxu0 %v8644_v10  ;;  %v5320_v36 = vpop.f32.mrf.mxu0  ;;  %v7967_v10 = vld [vmem:[#allocation19 + $0xb0] sm:$0xf] }
 0x49b   :  { %5583 = vmatpush.bf16.msrb.mxu1 %v8804_v49  ;;  %v5333_v52 = vpop.f32.mrf.mxu1  ;;  %v9709_v49 = vld [vmem:[#allocation19 + $0x200] sm:$0xf0]  ;;  %v7968_v50 = vor.u32 %v9669_v51, %v7967_v10  ;;  %v9799_v36 = vld [vmem:[#allocation19 + $0x4d0] sm:$0xf0]  ;;  %v7887_v51 = vld [vmem:[#allocation19 + $0x10] sm:$0xf] }
 0x49c   :  { %5550 = vmatpush.bf16.msra.mxu2 %v8204_v45  ;;  %5563 = vmatpush.bf16.msra.mxu3 %v8364_v20  ;;  %v8128_v45 = vor.u32 %v9709_v49, %v8127_v57  ;;  %v9664_v20 = vld [vmem:[#allocation19 + $0x98] sm:$0xf0]  ;;  %v8328_v49 = vor.u32 %v9759_v33, %v8327_v1  ;;  %v8787_v1 = vld [vmem:[#allocation19 + $0x718] sm:$0xf]  ;;  %v9874_v33 = vld [vmem:[#allocation19 + $0x728] sm:$0xf0] }
 0x49d   :  { %v7948_v0 = vor.u32 %v9664_v20, %v7947_v7  ;;  %v8667_v7 = vld [vmem:[#allocation19 + $0x628] sm:$0xf]  ;;  %v9844_v20 = vld [vmem:[#allocation19 + $0x638] sm:$0xf0] }
 0x49e   :  { %5571 = vmatpush.bf16.msrb.mxu0 %v8624_v32  ;;  %v8107_v32 = vld [vmem:[#allocation19 + $0x1c8] sm:$0xf]  ;;  %v8668_v6 = vor.u32 %v9844_v20, %v8667_v7  ;;  %v9734_v7 = vld [vmem:[#allocation19 + $0x2c8] sm:$0xf0]  ;;  %v8387_v20 = vld [vmem:[#allocation19 + $0x3f8] sm:$0xf] }
 0x49f   :  { %5584 = vmatpush.bf16.msrb.mxu1 %v8784_v5  ;;  %5551 = vmatmul.bf16.vlgmr.msra.gmra.mxu2 %v12097_v56  ;;  %v9704_v5 = vld [vmem:[#allocation19 + $0x1d8] sm:$0xf0] }
 0x4a0   :  { %5595 = vmatpush.bf16.msrb.mxu2 %v8028_v42  ;;  %5608 = vmatpush.bf16.msrb.mxu3 %v8188_v2  ;;  %v8544_v42 = vor.u32 %v9811_v41, %v8541_v27  ;;  %v8108_v25 = vor.u32 %v9704_v5, %v8107_v32  ;;  %v8307_v27 = vld [vmem:[#allocation19 + $0x358] sm:$0xf]  ;;  %v8827_v5 = vld [vmem:[#allocation19 + $0x768] sm:$0xf] }
 0x4a1   :  { %5564 = vmatmul.bf16.vlgmr.msra.gmra.mxu3 %v12099_v23 }
 0x4a2   :  { %5572 = vmatpush.bf16.msrb.mxu0 %v8604_v44  ;;  %v5344_v2 = vpop.f32.mrf.mxu2  ;;  %v8087_v44 = vld [vmem:[#allocation19 + $0x1a0] sm:$0xf] }
 0x4a3   :  { %5585 = vmatpush.bf16.msrb.mxu1 %v8764_v53  ;;  %v5345_v17 = vadd.f32 %v5344_v2, %v5332_v4  ;;  %v9699_v53 = vld [vmem:[#allocation19 + $0x1b0] sm:$0xf0] }
 0x4a4   :  { %5596 = vmatpush.bf16.msrb.mxu2 %v8008_v29  ;;  %5609 = vmatpush.bf16.msrb.mxu3 %v8168_v38  ;;  %v5357_v63 = vpop.f32.mrf.mxu3  ;;  %v8347_v29 = vld [vmem:[#allocation19 + $0x3a8] sm:$0xf]  ;;  %v8088_v18 = vor.u32 %v9699_v53, %v8087_v44  ;;  %v9839_v44 = vld [vmem:[#allocation19 + $0x610] sm:$0xf0] }
 0x4a5   :  { %v12154_v61 = vadd.f32 %v5357_v63, %v5345_v17  ;;  %v8507_v38 = vld [vmem:[#allocation19 + $0x4e8] sm:$0xf]  ;;  %v8348_v4 = vor.u32 %v9764_v26, %v8347_v29  ;;  %v8807_v26 = vld [vmem:[#allocation19 + $0x740] sm:$0xf] }
 0x4a6   :  { %5573 = vmatpush.bf16.msrb.mxu0 %v8584_v37  ;;  %v9654_v37 = vld [vmem:[#allocation19 + $0x48] sm:$0xf0] }
 0x4a7   :  { %5586 = vmatpush.bf16.msrb.mxu1 %v8744_v21  ;;  %v8067_v21 = vld [vmem:[#allocation19 + $0x178] sm:$0xf]  ;;  %v7908_v54 = vor.u32 %v9654_v37, %v7907_v47  ;;  %v8427_v47 = vld [vmem:[#allocation19 + $0x448] sm:$0xf] }
 0x4a8   :  { %5597 = vmatpush.bf16.msrb.mxu2 %v7988_v22  ;;  %5610 = vmatpush.bf16.msrb.mxu3 %v8148_v34  ;;  %v8508_v22 = vor.u32 %v9804_v30, %v8507_v38  ;;  %v8487_v34 = vld [vmem:[#allocation19 + $0x4c0] sm:$0xf]  ;;  %v8068_v52 = vor.u32 %v9694_v55, %v8067_v21  ;;  %v8288_v38 = vor.u32 %v9749_v16, %v8287_v15  ;;  %v9784_v21 = vld [vmem:[#allocation19 + $0x458] sm:$0xf0]  ;;  %v9834_v55 = vld [vmem:[#allocation19 + $0x5e8] sm:$0xf0] }
 0x4a9   :  { %v8488_v41 = vor.u32 %v9799_v36, %v8487_v34  ;;  %v8428_v36 = vor.u32 %v9784_v21, %v8427_v47  ;;  %v9814_v21 = vld [vmem:[#allocation19 + $0x548] sm:$0xf0] }
 0x4aa   :  { %5574 = vmatpush.bf16.msrb.mxu0 %v8564_v11  ;;  %v5346_v10 = vpop.f32.mrf.mxu2  ;;  %v9649_v11 = vld [vmem:[#allocation19 + $0x20] sm:$0xf0] }
 0x4ab   :  { %5587 = vmatpush.bf16.msrb.mxu1 %v8724_v12  ;;  %v8047_v12 = vld [vmem:[#allocation19 + $0x150] sm:$0xf]  ;;  %v7888_v32 = vor.u32 %v9649_v11, %v7887_v51  ;;  %v8247_v10 = vld [vmem:[#allocation19 + $0x2e0] sm:$0xf]  ;;  %v9739_v51 = vld [vmem:[#allocation19 + $0x2f0] sm:$0xf0] }
 0x4ac   :  { %5598 = vmatpush.bf16.msrb.mxu2 %v7968_v50  ;;  %5611 = vmatpush.bf16.msrb.mxu3 %v8128_v45  ;;  %v5359_v57 = vpop.f32.mrf.mxu3  ;;  %v9689_v50 = vld [vmem:[#allocation19 + $0x160] sm:$0xf0]  ;;  %v8467_v45 = vld [vmem:[#allocation19 + $0x498] sm:$0xf]  ;;  %v8607_v11 = vld [vmem:[#allocation19 + $0x5b0] sm:$0xf] }
 0x4ad   :  { %v8468_v2 = vor.u32 %v9794_v13, %v8467_v45  ;;  %v8788_v57 = vor.u32 %v9874_v33, %v8787_v1  ;;  %v8227_v13 = vld [vmem:[#allocation19 + $0x2b8] sm:$0xf] }
 0x4ae   :  { %5575 = vmatpush.bf16.msrb.mxu0 %v8544_v42  ;;  %v9884_v42 = vld [vmem:[#allocation19 + $0x778] sm:$0xf0] }
 0x4af   :  { %5588 = vmatpush.bf16.msrb.mxu1 %v8704_v9  ;;  %v8048_v9 = vor.u32 %v9689_v50, %v8047_v12  ;;  %v8828_v17 = vor.u32 %v9884_v42, %v8827_v5  ;;  %v9829_v12 = vld [vmem:[#allocation19 + $0x5c0] sm:$0xf0]  ;;  %v9774_v5 = vld [vmem:[#allocation19 + $0x408] sm:$0xf0]  ;;  %v8587_v42 = vld [vmem:[#allocation19 + $0x588] sm:$0xf] }
 0x4b0   :  { %5599 = vmatpush.bf16.msrb.mxu2 %v7948_v0  ;;  %5612 = vmatpush.bf16.msrb.mxu3 %v8108_v25  ;;  %v8308_v0 = vor.u32 %v9754_v19, %v8307_v27  ;;  %v8447_v25 = vld [vmem:[#allocation19 + $0x470] sm:$0xf]  ;;  %v8248_v27 = vor.u32 %v9739_v51, %v8247_v10  ;;  %v8608_v45 = vor.u32 %v9829_v12, %v8607_v11  ;;  %v9849_v51 = vld [vmem:[#allocation19 + $0x660] sm:$0xf0] }
 0x4b1   :  { %v8687_v10 = vld [vmem:[#allocation19 + $0x650] sm:$0xf] }
 0x4b2   :  { %5576 = vmatpush.bf16.msrb.mxu0 %v8524_v28  ;;  %v5370_v63 = vpop.f32.mrf.mxu0  ;;  %v9879_v28 = vld [vmem:[#allocation19 + $0x750] sm:$0xf0] }
 0x4b3   :  { %5589 = vmatpush.bf16.msrb.mxu1 %v8684_v46  ;;  %v5371_v53 = vadd.f32 %v5370_v63, %v4008_v39  ;;  %v5383_v29 = vpop.f32.mrf.mxu1  ;;  %v8448_v46 = vor.u32 %v9789_v62, %v8447_v25  ;;  %v8808_v37 = vor.u32 %v9879_v28, %v8807_v26  ;;  %v9824_v39 = vld [vmem:[#allocation19 + $0x598] sm:$0xf0]  ;;  %v8207_v25 = vld [vmem:[#allocation19 + $0x290] sm:$0xf]  ;;  %v9819_v26 = vld [vmem:[#allocation19 + $0x570] sm:$0xf0] }
 0x4b4   :  { %5600 = vmatpush.bf16.msrb.mxu2 %v7928_v35  ;;  %5613 = vmatpush.bf16.msrb.mxu3 %v8088_v18  ;;  %v8648_v35 = vor.u32 %v9839_v44, %v8647_v58  ;;  %v8267_v18 = vld [vmem:[#allocation19 + $0x308] sm:$0xf]  ;;  %v8588_v15 = vor.u32 %v9824_v39, %v8587_v42  ;;  %v8367_v63 = vld [vmem:[#allocation19 + $0x3d0] sm:$0xf]  ;;  %v8727_v28 = vld [vmem:[#allocation19 + $0x6a0] sm:$0xf] }
 0x4b5   :  { %5577 = vmatmul.bf16.vlgmr.msrb.gmra.mxu0 %v12104_v24  ;;  %v5384_v30 = vadd.f32 %v5383_v29, %v5371_v53  ;;  %v9769_v53 = vld [vmem:[#allocation19 + $0x3e0] sm:$0xf0]  ;;  %v8567_v29 = vld [vmem:[#allocation19 + $0x560] sm:$0xf] }
 0x4b6   :  { %5621 = vmatpush.bf16.msra.mxu0 %v8348_v4  ;;  %5590 = vmatmul.bf16.vlgmr.msrb.gmra.mxu1 %v12106_v60  ;;  %v9744_v4 = vld [vmem:[#allocation19 + $0x318] sm:$0xf0] }
 0x4b7   :  { %5634 = vmatpush.bf16.msra.mxu1 %v8508_v22  ;;  %v8627_v22 = vld [vmem:[#allocation19 + $0x5d8] sm:$0xf]  ;;  %v8268_v34 = vor.u32 %v9744_v4, %v8267_v18  ;;  %v8368_v18 = vor.u32 %v9769_v53, %v8367_v63  ;;  %v8568_v4 = vor.u32 %v9819_v26, %v8567_v29 }
 0x4b8   :  { %5601 = vmatpush.bf16.msrb.mxu2 %v7908_v54  ;;  %5614 = vmatpush.bf16.msrb.mxu3 %v8068_v52  ;;  %v8628_v54 = vor.u32 %v9834_v55, %v8627_v22  ;;  %v8407_v52 = vld [vmem:[#allocation19 + $0x420] sm:$0xf]  ;;  %v8707_v22 = vld [vmem:[#allocation19 + $0x678] sm:$0xf]  ;;  %v9854_v55 = vld [vmem:[#allocation19 + $0x688] sm:$0xf0] }
 0x4b9   :  { %v8708_v33 = vor.u32 %v9854_v55, %v8707_v22 }
 0x4ba   :  { %5622 = vmatpush.bf16.msra.mxu0 %v8328_v49  ;;  %v9779_v49 = vld [vmem:[#allocation19 + $0x430] sm:$0xf0] }
 0x4bb   :  { %5635 = vmatpush.bf16.msra.mxu1 %v8488_v41  ;;  %v5385_v50 = vpop.f32.mrf.mxu1  ;;  %v8767_v41 = vld [vmem:[#allocation19 + $0x6f0] sm:$0xf]  ;;  %v8408_v19 = vor.u32 %v9779_v49, %v8407_v52 }
 0x4bc   :  { %5602 = vmatpush.bf16.msrb.mxu2 %v7888_v32  ;;  %5615 = vmatpush.bf16.msrb.mxu3 %v8048_v9  ;;  %v8747_v9 = vld [vmem:[#allocation19 + $0x6c8] sm:$0xf] }
 0x4be   :  { %5623 = vmatpush.bf16.msra.mxu0 %v8308_v0  ;;  %v9864_v0 = vld [vmem:[#allocation19 + $0x6d8] sm:$0xf0] }
 0x4bf   :  { %5636 = vmatpush.bf16.msra.mxu1 %v8468_v2  ;;  %5603 = vmatmul.bf16.vlgmr.msrb.gmra.mxu2 %v12074_v14  ;;  %v5372_v14 = vpop.f32.mrf.mxu0  ;;  %v8228_v2 = vor.u32 %v9734_v7, %v8227_v13  ;;  %v8748_v62 = vor.u32 %v9864_v0, %v8747_v9 }
 0x4c0   :  { %5647 = vmatpush.bf16.msra.mxu2 %v8668_v6  ;;  %5660 = vmatpush.bf16.msra.mxu3 %v8828_v17  ;;  %v8388_v6 = vor.u32 %v9774_v5, %v8387_v20  ;;  %v9729_v17 = vld [vmem:[#allocation19 + $0x2a0] sm:$0xf0] }
 0x4c1   :  { %5616 = vmatmul.bf16.vlgmr.msrb.gmra.mxu3 %v12076_v3  ;;  %v9869_v3 = vld [vmem:[#allocation19 + $0x700] sm:$0xf0] }
 0x4c2   :  { %5624 = vmatpush.bf16.msra.mxu0 %v8288_v38  ;;  %v8768_v32 = vor.u32 %v9869_v3, %v8767_v41  ;;  %v5396_v16 = vpop.f32.mrf.mxu2  ;;  %v9859_v38 = vld [vmem:[#allocation19 + $0x6b0] sm:$0xf0]  ;;  %v4009_v41 = vperm.slane %v12144_v48, 2 }
 0x4c3   :  { %5637 = vmatpush.bf16.msra.mxu1 %v8448_v46  ;;  %v5397_v58 = vadd.f32 %v5396_v16, %v5384_v30  ;;  %v8728_v47 = vor.u32 %v9859_v38, %v8727_v28 }
 0x4c4   :  { %5648 = vmatpush.bf16.msra.mxu2 %v8648_v35  ;;  %5661 = vmatpush.bf16.msra.mxu3 %v8808_v37  ;;  %v5409_v44 = vpop.f32.mrf.mxu3  ;;  %v8208_v35 = vor.u32 %v9729_v17, %v8207_v25  ;;  %v8547_v37 = vld [vmem:[#allocation19 + $0x538] sm:$0xf] }
 0x4c5   :  { %v5410_v46 = vadd.f32 %v5409_v44, %v5397_v58  ;;  %v8548_v30 = vor.u32 %v9814_v21, %v8547_v37 }
 0x4c6   :  { %5625 = vmatpush.bf16.msra.mxu0 %v8268_v34 }
 0x4c7   :  { %5638 = vmatpush.bf16.msra.mxu1 %v8428_v36  ;;  %v8527_v36 = vld [vmem:[#allocation19 + $0x510] sm:$0xf] }
 0x4c8   :  { %5649 = vmatpush.bf16.msra.mxu2 %v8628_v54  ;;  %5662 = vmatpush.bf16.msra.mxu3 %v8788_v57  ;;  %v9809_v54 = vld [vmem:[#allocation19 + $0x520] sm:$0xf0]  ;;  %v8688_v57 = vor.u32 %v9849_v51, %v8687_v10 }
 0x4c9   :  { %v8528_v52 = vor.u32 %v9809_v54, %v8527_v36  ;;  %v10534_v54 = vmov 0  }
 0x4ca   :  { %5626 = vmatpush.bf16.msra.mxu0 %v8248_v27  ;;  %v5398_v1 = vpop.f32.mrf.mxu2  ;;  %10053 = vset.pattern.permute.xlu0 %v10534_v54  ;;  %v8863_v54 = vld [vmem:[#allocation22 + $0x40] sm:$0xf] }
 0x4cb   :  { %5639 = vmatpush.bf16.msra.mxu1 %v8408_v19  ;;  %v4011_v1 = vperm.slane %v12144_v48, 4 }
 0x4cc   :  { %5650 = vmatpush.bf16.msra.mxu2 %v8608_v45  ;;  %5663 = vmatpush.bf16.msra.mxu3 %v8768_v32  ;;  %v5411_v34 = vpop.f32.mrf.mxu3 }
 0x4ce   :  { %5627 = vmatpush.bf16.msra.mxu0 %v8228_v2 }
 0x4cf   :  { %5640 = vmatpush.bf16.msra.mxu1 %v8388_v6 }
 0x4d0   :  { %5651 = vmatpush.bf16.msra.mxu2 %v8588_v15  ;;  %5664 = vmatpush.bf16.msra.mxu3 %v8748_v62  ;;  %v4010_v15 = vperm.slane %v12144_v48, 3 }
 0x4d2   :  { %5628 = vmatpush.bf16.msra.mxu0 %v8208_v35  ;;  %v5422_v14 = vpop.f32.mrf.mxu0 }
 0x4d3   :  { %5641 = vmatpush.bf16.msra.mxu1 %v8368_v18  ;;  %v5423_v49 = vadd.f32 %v5422_v14, %v5410_v46  ;;  %v5435_v11 = vpop.f32.mrf.mxu1 }
 0x4d4   :  { %5652 = vmatpush.bf16.msra.mxu2 %v8568_v4  ;;  %5665 = vmatpush.bf16.msra.mxu3 %v8728_v47 }
 0x4d5   :  { %5629 = vmatmul.bf16.vlgmr.msra.gmra.mxu0 %v12097_v56  ;;  %v12163_v12 = vadd.f32 %v5435_v11, %v5423_v49 }
 0x4d6   :  { %5642 = vmatmul.bf16.vlgmr.msra.gmra.mxu1 %v12099_v23 }
 0x4d8   :  { %5653 = vmatpush.bf16.msra.mxu2 %v8548_v30  ;;  %5666 = vmatpush.bf16.msra.mxu3 %v8708_v33 }
 0x4da   :  { %v5424_v56 = vpop.f32.mrf.mxu0 }
 0x4db   :  { %v5437_v50 = vpop.f32.mrf.mxu1 }
 0x4dc   :  { %5654 = vmatpush.bf16.msra.mxu2 %v8528_v52  ;;  %5667 = vmatpush.bf16.msra.mxu3 %v8688_v57 }
 0x4df   :  { %5655 = vmatmul.bf16.vlgmr.msra.gmra.mxu2 %v12104_v24  ;;  %5668 = vmatmul.bf16.vlgmr.msra.gmra.mxu3 %v12106_v60 }
 0x4e2   :  { %v5448_v23 = vpop.f32.mrf.mxu2 }
 0x4e3   :  { %v5449_v3 = vadd.f32 %v5448_v23, %v4009_v41 }
 0x4e4   :  { %v5461_v27 = vpop.f32.mrf.mxu3 }
 0x4e5   :  { %v5462_v19 = vadd.f32 %v5461_v27, %v5449_v3 }
 0x4ea   :  { %v5450_v45 = vpop.f32.mrf.mxu2 }
 0x4ec   :  { %v5463_v13 = vpop.f32.mrf.mxu3 }
 0x4ed   :  { %v8887_v13 = vld [vmem:[#allocation22 + $0x70] sm:$0xf] }
 0x4f2   :  { %v5474_v7 = vpop.f32.mrf.mxu0 }
 0x4f3   :  { %v5475_v20 = vadd.f32 %v5474_v7, %v5462_v19  ;;  %v5487_v32 = vpop.f32.mrf.mxu1  ;;  %v9964_v7 = vld [vmem:[#allocation22 + $0x74] sm:$0xf0] }
 0x4f5   :  { %v5488_v5 = vadd.f32 %v5487_v32, %v5475_v20  ;;  %v8951_v20 = vld [vmem:[#allocation22 + $0xf0] sm:$0xf] }
 0x4fa   :  { %v5476_v42 = vpop.f32.mrf.mxu0 }
 0x4fb   :  { %v5489_v39 = vpop.f32.mrf.mxu1  ;;  %v9980_v42 = vld [vmem:[#allocation22 + $0xf4] sm:$0xf0] }
 0x4fc   :  { %v9015_v39 = vld [vmem:[#allocation22 + $0x170] sm:$0xf] }
 0x502   :  { %v5500_v9 = vpop.f32.mrf.mxu2 }
 0x503   :  { %v5501_v24 = vadd.f32 %v5500_v9, %v5488_v5  ;;  %v8888_v5 = vor.u32 %v9964_v7, %v8887_v13  ;;  %v9996_v9 = vld [vmem:[#allocation22 + $0x174] sm:$0xf0]  ;;  %v8983_v7 = vld [vmem:[#allocation22 + $0x130] sm:$0xf] }
 0x504   :  { %v5513_v0 = vpop.f32.mrf.mxu3  ;;  %v9972_v13 = vld [vmem:[#allocation22 + $0xb4] sm:$0xf0] }
 0x505   :  { %v12168_v60 = vadd.f32 %v5513_v0, %v5501_v24  ;;  %v8952_v0 = vor.u32 %v9980_v42, %v8951_v20  ;;  %6172 = vmatpush.bf16.msrb.mxu0 %v8888_v5  ;;  %v9988_v20 = vld [vmem:[#allocation22 + $0x134] sm:$0xf0]  ;;  %v9047_v42 = vld [vmem:[#allocation22 + $0x1b0] sm:$0xf] }
 0x507   :  { %6185 = vmatpush.bf16.msrb.mxu1 %v8952_v0 }
 0x50a   :  { %v5502_v2 = vpop.f32.mrf.mxu2 }
 0x50b   :  { %v9079_v2 = vld [vmem:[#allocation22 + $0x1f0] sm:$0xf] }
 0x50c   :  { %v5515_v6 = vpop.f32.mrf.mxu3 }
 0x50d   :  { %v10012_v6 = vld [vmem:[#allocation22 + $0x1f4] sm:$0xf0] }
 0x512   :  { %v5526_v16 = vpop.f32.mrf.mxu0 }
 0x513   :  { %v5527_v25 = vadd.f32 %v5526_v16, %v4010_v15  ;;  %v5539_v17 = vpop.f32.mrf.mxu1  ;;  %v8879_v15 = vld [vmem:[#allocation22 + $0x60] sm:$0xf] }
 0x515   :  { %v5540_v63 = vadd.f32 %v5539_v17, %v5527_v25  ;;  %v9080_v25 = vor.u32 %v10012_v6, %v9079_v2  ;;  %v9962_v17 = vld [vmem:[#allocation22 + $0x64] sm:$0xf0] }
 0x517   :  { %6211 = vmatpush.bf16.msrb.mxu3 %v9080_v25  ;;  %v8847_v25 = vld [vmem:[#allocation22 + $0x20] sm:$0xf] }
 0x51a   :  { %v5528_v62 = vpop.f32.mrf.mxu0 }
 0x51b   :  { %v5541_v58 = vpop.f32.mrf.mxu1  ;;  %v9978_v62 = vld [vmem:[#allocation22 + $0xe4] sm:$0xf0] }
 0x51c   :  { %v8880_v58 = vor.u32 %v9962_v17, %v8879_v15  ;;  %v8984_v15 = vor.u32 %v9988_v20, %v8983_v7  ;;  %v9954_v17 = vld [vmem:[#allocation22 + $0x24] sm:$0xf0]  ;;  %v9017_v20 = vld [vmem:[#allocation22 + $0x178] sm:$0xf0] }
 0x51e   :  { %6173 = vmatpush.bf16.msrb.mxu0 %v8880_v58  ;;  %v9970_v58 = vld [vmem:[#allocation22 + $0xa4] sm:$0xf0] }
 0x522   :  { %v5552_v44 = vpop.f32.mrf.mxu2 }
 0x523   :  { %v5553_v53 = vadd.f32 %v5552_v44, %v5540_v63  ;;  %v8943_v63 = vld [vmem:[#allocation22 + $0xe0] sm:$0xf] }
 0x524   :  { %v5565_v29 = vpop.f32.mrf.mxu3  ;;  %v8944_v44 = vor.u32 %v9978_v62, %v8943_v63  ;;  %v8911_v62 = vld [vmem:[#allocation22 + $0xa0] sm:$0xf] }
 0x525   :  { %v5566_v26 = vadd.f32 %v5565_v29, %v5553_v53  ;;  %v9007_v53 = vld [vmem:[#allocation22 + $0x160] sm:$0xf]  ;;  %v9994_v29 = vld [vmem:[#allocation22 + $0x164] sm:$0xf0] }
 0x526   :  { %6186 = vmatpush.bf16.msrb.mxu1 %v8944_v44  ;;  %v8975_v44 = vld [vmem:[#allocation22 + $0x120] sm:$0xf] }
 0x52a   :  { %v5554_v28 = vpop.f32.mrf.mxu2 }
 0x52b   :  { %v10010_v28 = vld [vmem:[#allocation22 + $0x1e4] sm:$0xf0] }
 0x52c   :  { %v5567_v38 = vpop.f32.mrf.mxu3 }
 0x52d   :  { %v9008_v38 = vor.u32 %v9994_v29, %v9007_v53  ;;  %v9986_v29 = vld [vmem:[#allocation22 + $0x124] sm:$0xf0] }
 0x532   :  { %v5578_v46 = vpop.f32.mrf.mxu0 }
 0x533   :  { %v5579_v35 = vadd.f32 %v5578_v46, %v5566_v26  ;;  %v5591_v18 = vpop.f32.mrf.mxu1  ;;  %v9071_v26 = vld [vmem:[#allocation22 + $0x1e0] sm:$0xf] }
 0x534   :  { %v9072_v46 = vor.u32 %v10010_v28, %v9071_v26  ;;  %v9039_v26 = vld [vmem:[#allocation22 + $0x1a0] sm:$0xf]  ;;  %v10002_v28 = vld [vmem:[#allocation22 + $0x1a4] sm:$0xf0] }
 0x535   :  { %v12171_v4 = vadd.f32 %v5591_v18, %v5579_v35  ;;  %v8871_v35 = vld [vmem:[#allocation22 + $0x50] sm:$0xf]  ;;  %v9960_v18 = vld [vmem:[#allocation22 + $0x54] sm:$0xf0] }
 0x536   :  { %6212 = vmatpush.bf16.msrb.mxu3 %v9072_v46  ;;  %v8848_v46 = vor.u32 %v9954_v17, %v8847_v25 }
 0x53a   :  { %v5580_v47 = vpop.f32.mrf.mxu0 }
 0x53b   :  { %v5593_v37 = vpop.f32.mrf.mxu1  ;;  %v8935_v47 = vld [vmem:[#allocation22 + $0xd0] sm:$0xf] }
 0x53c   :  { %v8872_v37 = vor.u32 %v9960_v18, %v8871_v35  ;;  %v8912_v18 = vor.u32 %v9970_v58, %v8911_v62  ;;  %v8945_v62 = vld [vmem:[#allocation22 + $0xe8] sm:$0xf0]  ;;  %v9993_v58 = vld [vmem:[#allocation22 + $0x164] sm:$0xf] }
 0x53e   :  { %6174 = vmatpush.bf16.msrb.mxu0 %v8872_v37  ;;  %v9952_v37 = vld [vmem:[#allocation22 + $0x14] sm:$0xf0] }
 0x542   :  { %v5604_v21 = vpop.f32.mrf.mxu2 }
 0x543   :  { %v5605_v36 = vadd.f32 %v5604_v21, %v4011_v1  ;;  %v9976_v21 = vld [vmem:[#allocation22 + $0xd4] sm:$0xf0]  ;;  %v9063_v1 = vld [vmem:[#allocation22 + $0x1d0] sm:$0xf] }
 0x544   :  { %v5617_v22 = vpop.f32.mrf.mxu3 }
 0x545   :  { %v5618_v10 = vadd.f32 %v5617_v22, %v5605_v36  ;;  %v8999_v22 = vld [vmem:[#allocation22 + $0x150] sm:$0xf] }
 0x54a   :  { %v5606_v55 = vpop.f32.mrf.mxu2 }
 0x54b   :  { %v8936_v55 = vor.u32 %v9976_v21, %v8935_v47  ;;  %v8839_v47 = vld [vmem:[#allocation22 + $0x10] sm:$0xf] }
 0x54c   :  { %v5619_v30 = vpop.f32.mrf.mxu3 }
 0x54d   :  { %v9992_v30 = vld [vmem:[#allocation22 + $0x154] sm:$0xf0]  ;;  %6187 = vmatpush.bf16.msrb.mxu1 %v8936_v55  ;;  %v9040_v55 = vor.u32 %v10002_v28, %v9039_v26  ;;  %v9959_v28 = vld [vmem:[#allocation22 + $0x54] sm:$0xf] }
 0x552   :  { %v5630_v33 = vpop.f32.mrf.mxu0 }
 0x553   :  { %v5643_v34 = vpop.f32.mrf.mxu1  ;;  %v5631_v57 = vadd.f32 %v5630_v33, %v5618_v10  ;;  %v10008_v33 = vld [vmem:[#allocation22 + $0x1d4] sm:$0xf0]  ;;  %v9958_v10 = vld [vmem:[#allocation22 + $0x44] sm:$0xf0] }
 0x554   :  { %v9064_v36 = vor.u32 %v10008_v33, %v9063_v1  ;;  %v8967_v1 = vld [vmem:[#allocation22 + $0x110] sm:$0xf] }
 0x555   :  { %v5644_v14 = vadd.f32 %v5643_v34, %v5631_v57  ;;  %v9000_v34 = vor.u32 %v9992_v30, %v8999_v22  ;;  %v8991_v57 = vld [vmem:[#allocation22 + $0x140] sm:$0xf]  ;;  %v8976_v22 = vor.u32 %v9986_v29, %v8975_v44  ;;  %v9968_v30 = vld [vmem:[#allocation22 + $0x94] sm:$0xf0]  ;;  %v9009_v44 = vld [vmem:[#allocation22 + $0x168] sm:$0xf0] }
 0x556   :  { %6213 = vmatpush.bf16.msrb.mxu3 %v9064_v36  ;;  %v9031_v36 = vld [vmem:[#allocation22 + $0x190] sm:$0xf]  ;;  %v9073_v29 = vld [vmem:[#allocation22 + $0x1e8] sm:$0xf0] }
 0x55a   :  { %v5632_v51 = vpop.f32.mrf.mxu0 }
 0x55b   :  { %v5645_v52 = vpop.f32.mrf.mxu1  ;;  %v8927_v51 = vld [vmem:[#allocation22 + $0xc0] sm:$0xf] }
 0x55c   :  { %v9974_v52 = vld [vmem:[#allocation22 + $0xc4] sm:$0xf0] }
 0x562   :  { %v5656_v49 = vpop.f32.mrf.mxu2  ;;  %v5669_v56 = vpop.f32.mrf.mxu3 }
 0x563   :  { %v5657_v11 = vadd.f32 %v5656_v49, %v5644_v14  ;;  %v9990_v14 = vld [vmem:[#allocation22 + $0x144] sm:$0xf0] }
 0x565   :  { %v5670_v50 = vadd.f32 %v5669_v56, %v5657_v11  ;;  %v8864_v11 = vor.u32 %v9958_v10, %v8863_v54  ;;  %v9055_v56 = vld [vmem:[#allocation22 + $0x1c0] sm:$0xf]  ;;  %v10000_v54 = vld [vmem:[#allocation22 + $0x194] sm:$0xf0]  ;;  %v8840_v10 = vor.u32 %v9952_v37, %v8839_v47  ;;  %v8937_v47 = vld [vmem:[#allocation22 + $0xd8] sm:$0xf0] }
 0x566   :  { %v9991_v37 = vld [vmem:[#allocation22 + $0x154] sm:$0xf] }
 0x567   :  { %v5673_v41 = vmax.f32 %v12137_v59, %v5670_v50  ;;  %6175 = vmatpush.bf16.msrb.mxu0 %v8864_v11 }
 0x569   :  { %v5674_v23 = vsub.f32 %v12137_v59, %v5673_v41  ;;  %v5677_v3 = vsub.f32 %v5670_v50, %v5673_v41  ;;  %v9016_v59 = vor.u32 %v9996_v9, %v9015_v39  ;;  %v10006_v50 = vld [vmem:[#allocation22 + $0x1c4] sm:$0xf0]  ;;  %v10004_v39 = vld [vmem:[#allocation22 + $0x1b4] sm:$0xf0] }
 0x56a   :  { %v5658_v48 = vpop.f32.mrf.mxu2  ;;  %v5671_v45 = vpop.f32.mrf.mxu3  ;;  %v9048_v63 = vor.u32 %v10004_v39, %v9047_v42  ;;  %v9081_v42 = vld [vmem:[#allocation22 + $0x1f8] sm:$0xf0] }
 0x56b   :  { %v5675_v27 = vmul.f32 1.442695, %v5674_v23  ;;  %v5678_v19 = vmul.f32 1.442695, %v5677_v3  ;;  %6198 = vmatpush.bf16.msrb.mxu2 %v9016_v59  ;;  %v8928_v23 = vor.u32 %v9974_v52, %v8927_v51  ;;  %v8992_v3 = vor.u32 %v9990_v14, %v8991_v57  ;;  %v8855_v48 = vld [vmem:[#allocation22 + $0x30] sm:$0xf] }
 0x56c   :  { %v9056_v45 = vor.u32 %v10006_v50, %v9055_v56  ;;  %v8831_v51 = vld [vmem:[#allocation22] sm:$0xf]  ;;  %v9950_v57 = vld [vmem:[#allocation22 + $0x4] sm:$0xf0]  ;;  %v9032_v56 = vor.u32 %v10000_v54, %v9031_v36  ;;  %v9973_v54 = vld [vmem:[#allocation22 + $0xc4] sm:$0xf] }
 0x56d   :  { %10067 = vpow2.f32 %v5675_v27  ;;  %v9956_v27 = vld [vmem:[#allocation22 + $0x34] sm:$0xf0]  ;;  %6188 = vmatpush.bf16.msrb.mxu1 %v8928_v23  ;;  %v8895_v14 = vld [vmem:[#allocation22 + $0x80] sm:$0xf] }
 0x56e   :  { %10069 = vpow2.f32 %v5678_v19  ;;  %v8919_v19 = vld [vmem:[#allocation22 + $0xb0] sm:$0xf]  ;;  %v8856_v59 = vor.u32 %v9956_v27, %v8855_v48  ;;  %6214 = vmatpush.bf16.msrb.mxu3 %v9056_v45  ;;  %v8959_v50 = vld [vmem:[#allocation22 + $0x100] sm:$0xf]  ;;  %v8889_v48 = vld [vmem:[#allocation22 + $0x78] sm:$0xf0]  ;;  %v8832_v27 = vor.u32 %v9950_v57, %v8831_v51 }
 0x56f   :  { %6199 = vmatpush.bf16.msrb.mxu2 %v9008_v38  ;;  %v8920_v6 = vor.u32 %v9972_v13, %v8919_v19  ;;  %v9023_v23 = vld [vmem:[#allocation22 + $0x180] sm:$0xf]  ;;  %v9979_v19 = vld [vmem:[#allocation22 + $0xf4] sm:$0xf]  ;;  %v8953_v45 = vld [vmem:[#allocation22 + $0xf8] sm:$0xf0] }
 0x570   :  { %6176 = vmatpush.bf16.msrb.mxu0 %v8856_v59  ;;  %v9995_v13 = vld [vmem:[#allocation22 + $0x174] sm:$0xf]  ;;  %v9989_v51 = vld [vmem:[#allocation22 + $0x144] sm:$0xf] }
 0x571   :  { %6189 = vmatpush.bf16.msrb.mxu1 %v8920_v6  ;;  %v9961_v6 = vld [vmem:[#allocation22 + $0x64] sm:$0xf]  ;;  %v9020_v25 = vor.u32 %v9995_v13, %v9017_v20 }
 0x572   :  { %6215 = vmatpush.bf16.msrb.mxu3 %v9048_v63  ;;  %v9977_v63 = vld [vmem:[#allocation22 + $0xe4] sm:$0xf] }
 0x573   :  { %v12176_v32 = vpop.eup %10067  ;;  %6200 = vmatpush.bf16.msrb.mxu2 %v9000_v34  ;;  %v9984_v34 = vld [vmem:[#allocation22 + $0x114] sm:$0xf0]  ;;  %v8948_v26 = vor.u32 %v9977_v63, %v8945_v62  ;;  %v10005_v57 = vld [vmem:[#allocation22 + $0x1c4] sm:$0xf]  ;;  %v9951_v63 = vld [vmem:[#allocation22 + $0x14] sm:$0xf] }
 0x574   :  { %v12178_v24 = vpop.eup %10069  ;;  %6177 = vmatpush.bf16.msrb.mxu0 %v8848_v46  ;;  %v8968_v11 = vor.u32 %v9984_v34, %v8967_v1  ;;  %v9012_v46 = vor.u32 %v9993_v58, %v9009_v44  ;;  %v9957_v1 = vld [vmem:[#allocation22 + $0x44] sm:$0xf]  ;;  %v8841_v62 = vld [vmem:[#allocation22 + $0x18] sm:$0xf0] }
 0x575   :  { %v12182_v16 = vadd.f32 %v12178_v24, %v12176_v32  ;;  %6190 = vmatpush.bf16.msrb.mxu1 %v8912_v18  ;;  %v9975_v18 = vld [vmem:[#allocation22 + $0xd4] sm:$0xf]  ;;  %v9953_v20 = vld [vmem:[#allocation22 + $0x24] sm:$0xf] }
 0x576   :  { %6216 = vmatpush.bf16.msrb.mxu3 %v9040_v55  ;;  %v9065_v55 = vld [vmem:[#allocation22 + $0x1d8] sm:$0xf0] }
 0x577   :  { %10071 = vrcp.f32 %v12182_v16  ;;  %v5690_v9 = vand.u32 2147483647, %v12182_v16  ;;  %v5692_v0 = vand.u32 2147483648, %v12182_v16  ;;  %6201 = vmatpush.bf16.msrb.mxu2 %v8992_v3  ;;  %vm5686_vm11 = vweird.f32 %v12182_v16  ;;  %v9963_v3 = vld [vmem:[#allocation22 + $0x74] sm:$0xf] }
 0x578   :  { %6178 = vmatpush.bf16.msrb.mxu0 %v8840_v10  ;;  %v8892_v59 = vor.u32 %v9963_v3, %v8889_v48  ;;  %v8929_v10 = vld [vmem:[#allocation22 + $0xc8] sm:$0xf0]  ;;  %v8921_v3 = vld [vmem:[#allocation22 + $0xb8] sm:$0xf0]  ;;  %v9987_v48 = vld [vmem:[#allocation22 + $0x134] sm:$0xf] }
 0x579   :  { %v5693_v38 = vor.u32 1.1754944e-38, %v5692_v0  ;;  %vm5691_vm13 = vcmp.eq.f32.partialorder %v5690_v9, 8.507059e+37 }
 0x57a   :  { %6217 = vmatpush.bf16.msrb.mxu3 %v9032_v56  ;;  %v9955_v56 = vld [vmem:[#allocation22 + $0x34] sm:$0xf] }
 0x57b   :  { %6202 = vmatpush.bf16.msrb.mxu2 %v8984_v15  ;;  %v8881_v15 = vld [vmem:[#allocation22 + $0x68] sm:$0xf0] }
 0x57c   :  { %6179 = vmatpush.bf16.msrb.mxu0 %v8832_v27  ;;  %v8985_v27 = vld [vmem:[#allocation22 + $0x138] sm:$0xf0] }
 0x57d   :  { %v10072_v49 = vpop.eup %10071 }
 0x57e   :  { %v5682_v41 = vmul.f32 %v10072_v49, %v12182_v16  ;;  %vm5687_vm10 = vweird.f32 %v10072_v49  ;;  %v8903_v16 = vld [vmem:[#allocation22 + $0x90] sm:$0xf] }
 0x57f   :  { %vm5688_vm12 = vmor %vm5686_vm11, %vm5687_vm10  ;;  %v8904_v52 = vor.u32 %v9968_v30, %v8903_v16  ;;  %6203 = vmatpush.bf16.msrb.mxu2 %v8976_v22  ;;  %v10007_v22 = vld [vmem:[#allocation22 + $0x1d4] sm:$0xf]  ;;  %v8940_v30 = vor.u32 %v9975_v18, %v8937_v47 }
 0x580   :  { %v5683_v5 = vsub.f32 1.0, %v5682_v41  ;;  %v9982_v41 = vld [vmem:[#allocation22 + $0x104] sm:$0xf0]  ;;  %6224 = vmatpush.bf16.msra.mxu0 %v8892_v59  ;;  %v9068_v36 = vor.u32 %v10007_v22, %v9065_v55  ;;  %v9985_v59 = vld [vmem:[#allocation22 + $0x124] sm:$0xf] }
 0x581   :  { %6191 = vmatpush.bf16.msrb.mxu1 %v8904_v52  ;;  %v8960_v39 = vor.u32 %v9982_v41, %v8959_v50  ;;  %v8993_v52 = vld [vmem:[#allocation22 + $0x148] sm:$0xf0]  ;;  %v8857_v50 = vld [vmem:[#allocation22 + $0x38] sm:$0xf0]  ;;  %v9965_v22 = vld [vmem:[#allocation22 + $0x84] sm:$0xf] }
 0x582   :  { %v5684_v2 = vmul.f32 %v10072_v49, %v5683_v5  ;;  %v10011_v5 = vld [vmem:[#allocation22 + $0x1f4] sm:$0xf]  ;;  %v8996_v41 = vor.u32 %v9989_v51, %v8993_v52  ;;  %v8860_v13 = vor.u32 %v9955_v56, %v8857_v50  ;;  %v9143_v51 = vld [vmem:[#allocation20 + $0x70] sm:$0xf]  ;;  %v9900_v52 = vld [vmem:[#allocation20 + $0x74] sm:$0xf0] }
 0x583   :  { %6204 = vmatpush.bf16.msrb.mxu2 %v8968_v11  ;;  %v9084_v17 = vor.u32 %v10011_v5, %v9081_v42  ;;  %v8932_v11 = vor.u32 %v9973_v54, %v8929_v10  ;;  %v8849_v5 = vld [vmem:[#allocation22 + $0x28] sm:$0xf0]  ;;  %v8988_v42 = vor.u32 %v9987_v48, %v8985_v27  ;;  %v9948_v48 = vld [vmem:[#allocation20 + $0x1f4] sm:$0xf0]  ;;  %v9144_v27 = vor.u32 %v9900_v52, %v9143_v51  ;;  %v9239_v52 = vld [vmem:[#allocation20 + $0x130] sm:$0xf] }
 0x584   :  { %v5685_v53 = vadd.f32 %v10072_v49, %v5684_v2  ;;  %v8956_v2 = vor.u32 %v9979_v19, %v8953_v45  ;;  %v10003_v19 = vld [vmem:[#allocation22 + $0x1b4] sm:$0xf]  ;;  %v9049_v45 = vld [vmem:[#allocation22 + $0x1b8] sm:$0xf0]  ;;  %v9025_v54 = vld [vmem:[#allocation22 + $0x188] sm:$0xf0] }
 0x585   :  { %v9908_v51 = vld [vmem:[#allocation20 + $0xb4] sm:$0xf0] }
 0x586   :  { %v5689_v35 = vsel %vm5688_vm12, %v10072_v49, %v5685_v53  ;;  %v9966_v49 = vld [vmem:[#allocation22 + $0x84] sm:$0xf0]  ;;  %v10009_v53 = vld [vmem:[#allocation22 + $0x1e4] sm:$0xf] }
 0x587   :  { %v5694_v21 = vsel %vm5691_vm13, %v5693_v38, %v5689_v35  ;;  %v8896_v7 = vor.u32 %v9966_v49, %v8895_v14  ;;  %6205 = vmatpush.bf16.msrb.mxu2 %v8960_v39  ;;  %v8873_v38 = vld [vmem:[#allocation22 + $0x58] sm:$0xf0]  ;;  %v9076_v35 = vor.u32 %v10009_v53, %v9073_v29  ;;  %v9057_v14 = vld [vmem:[#allocation22 + $0x1c8] sm:$0xf0]  ;;  %v9052_v39 = vor.u32 %v10003_v19, %v9049_v45  ;;  %v9967_v53 = vld [vmem:[#allocation22 + $0x94] sm:$0xf] }
 0x588   :  { %v5697_v33 = vmul.f32 %v12178_v24, %v5694_v21  ;;  %v9998_v24 = vld [vmem:[#allocation22 + $0x184] sm:$0xf0]  ;;  %v5696_v0 = vmul.f32 %v12176_v32, %v5694_v21  ;;  %v8884_v32 = vor.u32 %v9961_v6, %v8881_v15  ;;  %v9001_v21 = vld [vmem:[#allocation22 + $0x158] sm:$0xf0]  ;;  %v8876_v16 = vor.u32 %v9959_v28, %v8873_v38  ;;  %v10001_v6 = vld [vmem:[#allocation22 + $0x1a4] sm:$0xf] }
 0x589   :  { %v9024_v9 = vor.u32 %v9998_v24, %v9023_v23  ;;  %6192 = vmatpush.bf16.msrb.mxu1 %v8896_v7  ;;  %v9004_v34 = vor.u32 %v9991_v37, %v9001_v21  ;;  %v9060_v23 = vor.u32 %v10005_v57, %v9057_v14  ;;  %v9971_v24 = vld [vmem:[#allocation22 + $0xb4] sm:$0xf]  ;;  %v9041_v15 = vld [vmem:[#allocation22 + $0x1a8] sm:$0xf0]  ;;  %v8905_v29 = vld [vmem:[#allocation22 + $0x98] sm:$0xf0] }
 0x58a   :  { %5777 = vperm.xlu0 %10053, %v5697_v33   ;;  %6225 = vmatpush.bf16.msra.mxu0 %v8884_v32  ;;  %v8865_v33 = vld [vmem:[#allocation22 + $0x48] sm:$0xf0]  ;;  %v8924_v7 = vor.u32 %v9971_v24, %v8921_v3  ;;  %v9044_v44 = vor.u32 %v10001_v6, %v9041_v15  ;;  %v9983_v32 = vld [vmem:[#allocation22 + $0x114] sm:$0xf]  ;;  %v9033_v38 = vld [vmem:[#allocation22 + $0x198] sm:$0xf0] }
 0x58b   :  { %6218 = vmatpush.bf16.msrb.mxu3 %v9024_v9  ;;  %6250 = vmatpush.bf16.msra.mxu2 %v9020_v25  ;;  %v8868_v49 = vor.u32 %v9957_v1, %v8865_v33  ;;  %v9969_v9 = vld [vmem:[#allocation22 + $0xa4] sm:$0xf]  ;;  %v8852_v25 = vor.u32 %v9953_v20, %v8849_v5  ;;  %v9999_v28 = vld [vmem:[#allocation22 + $0x194] sm:$0xf]  ;;  %v8833_v21 = vld [vmem:[#allocation22 + $0x8] sm:$0xf0] }
 0x58c   :  { %v9036_v47 = vor.u32 %v9999_v28, %v9033_v38  ;;  %v9949_v37 = vld [vmem:[#allocation22 + $0x4] sm:$0xf]  ;;  %v8961_v1 = vld [vmem:[#allocation22 + $0x108] sm:$0xf0]  ;;  %v9207_v57 = vld [vmem:[#allocation20 + $0xf0] sm:$0xf] }
 0x58d   :  { %6237 = vmatpush.bf16.msra.mxu1 %v8956_v2  ;;  %v8977_v2 = vld [vmem:[#allocation22 + $0x128] sm:$0xf0]  ;;  %v8836_v55 = vor.u32 %v9949_v37, %v8833_v21  ;;  %v9916_v14 = vld [vmem:[#allocation20 + $0xf4] sm:$0xf0]  ;;  %v9335_v3 = vld [vmem:[#allocation20 + $0x1f0] sm:$0xf] }
 0x58e   :  { %6226 = vmatpush.bf16.msra.mxu0 %v8876_v16  ;;  %v8980_v58 = vor.u32 %v9985_v59, %v8977_v2  ;;  %v8897_v16 = vld [vmem:[#allocation22 + $0x88] sm:$0xf0]  ;;  %v9932_v24 = vld [vmem:[#allocation20 + $0x174] sm:$0xf0]  ;;  %v9208_v19 = vor.u32 %v9916_v14, %v9207_v57  ;;  %v9336_v5 = vor.u32 %v9948_v48, %v9335_v3  ;;  %v9946_v59 = vld [vmem:[#allocation20 + $0x1e4] sm:$0xf0] }
 0x58f   :  { %6263 = vmatpush.bf16.msra.mxu3 %v9084_v17  ;;  %6251 = vmatpush.bf16.msra.mxu2 %v9012_v46  ;;  %v8844_v46 = vor.u32 %v9951_v63, %v8841_v62  ;;  %v8900_v33 = vor.u32 %v9965_v22, %v8897_v16  ;;  %v9191_v63 = vld [vmem:[#allocation20 + $0xd0] sm:$0xf]  ;;  %v9910_v37 = vld [vmem:[#allocation20 + $0xc4] sm:$0xf0]  ;;  %v9247_v21 = vld [vmem:[#allocation20 + $0x140] sm:$0xf] }
 0x590   :  { %v9926_v22 = vld [vmem:[#allocation20 + $0x144] sm:$0xf0]  ;;  %v9924_v57 = vld [vmem:[#allocation20 + $0x134] sm:$0xf0]  ;;  %v9303_v14 = vld [vmem:[#allocation20 + $0x1b0] sm:$0xf] }
 0x591   :  { %6238 = vmatpush.bf16.msra.mxu1 %v8948_v26  ;;  %v8969_v26 = vld [vmem:[#allocation22 + $0x118] sm:$0xf0]  ;;  %v9942_v16 = vld [vmem:[#allocation20 + $0x1c4] sm:$0xf0] }
 0x592   :  { %5700 = vperm.xlu0 %10053, %v5696_v0   ;;  %6227 = vmatpush.bf16.msra.mxu0 %v8868_v49  ;;  %v8913_v0 = vld [vmem:[#allocation22 + $0xa8] sm:$0xf0]  ;;  %v8972_v18 = vor.u32 %v9983_v32, %v8969_v26  ;;  %v9944_v32 = vld [vmem:[#allocation20 + $0x1d4] sm:$0xf0]  ;;  %v9906_v48 = vld [vmem:[#allocation20 + $0xa4] sm:$0xf0] }
 0x593   :  { %6264 = vmatpush.bf16.msra.mxu3 %v9076_v35  ;;  %6252 = vmatpush.bf16.msra.mxu2 %v9004_v34  ;;  %v8916_v17 = vor.u32 %v9969_v9, %v8913_v0  ;;  %v8908_v35 = vor.u32 %v9967_v53, %v8905_v29  ;;  %v9930_v9 = vld [vmem:[#allocation20 + $0x164] sm:$0xf0]  ;;  %v9327_v0 = vld [vmem:[#allocation20 + $0x1e0] sm:$0xf]  ;;  %v9928_v53 = vld [vmem:[#allocation20 + $0x154] sm:$0xf0] }
 0x594   :  { %v9328_v62 = vor.u32 %v9946_v59, %v9327_v0  ;;  %v9319_v29 = vld [vmem:[#allocation20 + $0x1d0] sm:$0xf]  ;;  %v9904_v0 = vld [vmem:[#allocation20 + $0x94] sm:$0xf0] }
 0x595   :  { %6239 = vmatpush.bf16.msra.mxu1 %v8940_v30  ;;  %v9981_v30 = vld [vmem:[#allocation22 + $0x104] sm:$0xf]  ;;  %v9223_v59 = vld [vmem:[#allocation20 + $0x110] sm:$0xf] }
 0x596   :  { %6228 = vmatpush.bf16.msra.mxu0 %v8860_v13  ;;  %v8964_v34 = vor.u32 %v9981_v30, %v8961_v1 }
 0x597   :  { %6265 = vmatpush.bf16.msra.mxu3 %v9068_v36  ;;  %6253 = vmatpush.bf16.msra.mxu2 %v8996_v41  ;;  %v9997_v36 = vld [vmem:[#allocation22 + $0x184] sm:$0xf] }
 0x598   :  { %v9028_v10 = vor.u32 %v9997_v36, %v9025_v54  ;;  %v9892_v36 = vld [vmem:[#allocation20 + $0x34] sm:$0xf0]  ;;  %v9175_v54 = vld [vmem:[#allocation20 + $0xb0] sm:$0xf] }
 0x599   :  { %6240 = vmatpush.bf16.msra.mxu1 %v8932_v11  ;;  %v9271_v11 = vld [vmem:[#allocation20 + $0x170] sm:$0xf] }
 0x59a   :  { %6229 = vmatpush.bf16.msra.mxu0 %v8852_v25  ;;  %v9127_v25 = vld [vmem:[#allocation20 + $0x50] sm:$0xf] }
 0x59b   :  { %6266 = vmatpush.bf16.msra.mxu3 %v9060_v23  ;;  %6254 = vmatpush.bf16.msra.mxu2 %v8988_v42  ;;  %v9898_v42 = vld [vmem:[#allocation20 + $0x64] sm:$0xf0] }
 0x59d   :  { %6241 = vmatpush.bf16.msra.mxu1 %v8924_v7 }
 0x59e   :  { %6230 = vmatpush.bf16.msra.mxu0 %v8844_v46  ;;  %v9119_v46 = vld [vmem:[#allocation20 + $0x40] sm:$0xf] }
 0x59f   :  { %6267 = vmatpush.bf16.msra.mxu3 %v9052_v39  ;;  %6255 = vmatpush.bf16.msra.mxu2 %v8980_v58  ;;  %v9263_v39 = vld [vmem:[#allocation20 + $0x160] sm:$0xf]  ;;  %v9912_v58 = vld [vmem:[#allocation20 + $0xd4] sm:$0xf0] }
 0x5a0   :  { %v9264_v15 = vor.u32 %v9930_v9, %v9263_v39  ;;  %v9192_v28 = vor.u32 %v9912_v58, %v9191_v63  ;;  %v9159_v39 = vld [vmem:[#allocation20 + $0x90] sm:$0xf]  ;;  %v9151_v63 = vld [vmem:[#allocation20 + $0x80] sm:$0xf] }
 0x5a1   :  { %6242 = vmatpush.bf16.msra.mxu1 %v8916_v17  ;;  %v9896_v17 = vld [vmem:[#allocation20 + $0x54] sm:$0xf0]  ;;  %v9215_v58 = vld [vmem:[#allocation20 + $0x100] sm:$0xf] }
 0x5a2   :  { %6231 = vmatpush.bf16.msra.mxu0 %v8836_v55  ;;  %v9128_v26 = vor.u32 %v9896_v17, %v9127_v25  ;;  %v9311_v55 = vld [vmem:[#allocation20 + $0x1c0] sm:$0xf]  ;;  %v9160_v25 = vor.u32 %v9904_v0, %v9159_v39 }
 0x5a3   :  { %6268 = vmatpush.bf16.msra.mxu3 %v9044_v44  ;;  %6256 = vmatpush.bf16.msra.mxu2 %v8972_v18  ;;  %v9255_v44 = vld [vmem:[#allocation20 + $0x150] sm:$0xf]  ;;  %v9183_v18 = vld [vmem:[#allocation20 + $0xc0] sm:$0xf] }
 0x5a4   :  { %v9256_v38 = vor.u32 %v9928_v53, %v9255_v44  ;;  %v9184_v1 = vor.u32 %v9910_v37, %v9183_v18  ;;  %v9918_v53 = vld [vmem:[#allocation20 + $0x104] sm:$0xf0]  ;;  %v9209_v18 = vld [vmem:[#allocation20 + $0xf8] sm:$0xf0] }
 0x5a5   :  { %6243 = vmatpush.bf16.msra.mxu1 %v8908_v35  ;;  %v9894_v35 = vld [vmem:[#allocation20 + $0x44] sm:$0xf0]  ;;  %v9273_v37 = vld [vmem:[#allocation20 + $0x178] sm:$0xf0] }
 0x5a6   :  { %v9120_v30 = vor.u32 %v9894_v35, %v9119_v46  ;;  %v9915_v46 = vld [vmem:[#allocation20 + $0xf4] sm:$0xf] }
 0x5a7   :  { %6269 = vmatpush.bf16.msra.mxu3 %v9036_v47  ;;  %6257 = vmatpush.bf16.msra.mxu2 %v8964_v34  ;;  %v9320_v47 = vor.u32 %v9944_v32, %v9319_v29  ;;  %v9111_v34 = vld [vmem:[#allocation20 + $0x30] sm:$0xf]  ;;  %v9279_v29 = vld [vmem:[#allocation20 + $0x180] sm:$0xf]  ;;  %v9934_v32 = vld [vmem:[#allocation20 + $0x184] sm:$0xf0] }
 0x5a9   :  { %6244 = vmatpush.bf16.msra.mxu1 %v8900_v33  ;;  %v9248_v33 = vor.u32 %v9926_v22, %v9247_v21  ;;  %v9216_v22 = vor.u32 %v9918_v53, %v9215_v58  ;;  %v9113_v53 = vld [vmem:[#allocation20 + $0x38] sm:$0xf0] }
 0x5ab   :  { %6270 = vmatpush.bf16.msra.mxu3 %v9028_v10  ;;  %v9312_v10 = vor.u32 %v9942_v16, %v9311_v55  ;;  %v9947_v55 = vld [vmem:[#allocation20 + $0x1f4] sm:$0xf]  ;;  %v9337_v16 = vld [vmem:[#allocation20 + $0x1f8] sm:$0xf0] }
 0x5fc   :  { %v5778_v49 = vpop.permute.xlu0 %5777 }
 0x5fd   :  { %v5780_v56 = vmul.f32 %v5778_v49, %v12154_v61  ;;  %v5781_v50 = vmul.f32 %v5778_v49, %v12163_v12  ;;  %v5782_v41 = vmul.f32 %v5778_v49, %v12168_v60  ;;  %v5783_v23 = vmul.f32 %v5778_v49, %v12171_v4  ;;  %v9135_v12 = vld [vmem:[#allocation20 + $0x60] sm:$0xf]  ;;  %v9914_v4 = vld [vmem:[#allocation20 + $0xe4] sm:$0xf0]  ;;  %v9940_v49 = vld [vmem:[#allocation20 + $0x1b4] sm:$0xf0] }
 0x5fe   :  { %v9272_v61 = vor.u32 %v9932_v24, %v9271_v11  ;;  %v9199_v60 = vld [vmem:[#allocation20 + $0xe0] sm:$0xf]  ;;  %v9136_v2 = vor.u32 %v9898_v42, %v9135_v12  ;;  %v9112_v11 = vor.u32 %v9892_v36, %v9111_v34  ;;  %v9304_v3 = vor.u32 %v9940_v49, %v9303_v14 }
 0x5ff   :  { %v12196_v45 = vpack.c.bf16 %v5780_v56, %v5780_v56  ;;  %v12198_v13 = vpack.c.bf16 %v5781_v50, %v5781_v50  ;;  %v12200_v7 = vpack.c.bf16 %v5782_v41, %v5782_v41  ;;  %v12202_v20 = vpack.c.bf16 %v5783_v23, %v5783_v23  ;;  %v9103_v41 = vld [vmem:[#allocation20 + $0x20] sm:$0xf]  ;;  %v9890_v23 = vld [vmem:[#allocation20 + $0x24] sm:$0xf0] }
 0x600   :  { %v9200_v6 = vor.u32 %v9914_v4, %v9199_v60  ;;  %v9176_v56 = vor.u32 %v9908_v51, %v9175_v54  ;;  %v9240_v50 = vor.u32 %v9924_v57, %v9239_v52  ;;  %v9167_v24 = vld [vmem:[#allocation20 + $0xa0] sm:$0xf]  ;;  %v9104_v12 = vor.u32 %v9890_v23, %v9103_v41  ;;  %v9095_v4 = vld [vmem:[#allocation20 + $0x10] sm:$0xf]  ;;  %v9897_v51 = vld [vmem:[#allocation20 + $0x64] sm:$0xf] }
 0x601   :  { %6180 = vmatmul.bf16.vlgmr.msrb.gmra.mxu0 %v12196_v45  ;;  %6193 = vmatmul.bf16.vlgmr.msrb.gmra.mxu1 %v12198_v13  ;;  %v9168_v42 = vor.u32 %v9906_v48, %v9167_v24  ;;  %v9212_v54 = vor.u32 %v9915_v46, %v9209_v18  ;;  %v9137_v52 = vld [vmem:[#allocation20 + $0x68] sm:$0xf0]  ;;  %v9913_v57 = vld [vmem:[#allocation20 + $0xe4] sm:$0xf]  ;;  %v9340_v49 = vor.u32 %v9947_v55, %v9337_v16  ;;  %v9895_v48 = vld [vmem:[#allocation20 + $0x54] sm:$0xf] }
 0x602   :  { %6206 = vmatmul.bf16.vlgmr.msrb.gmra.mxu2 %v12200_v7  ;;  %6219 = vmatmul.bf16.vlgmr.msrb.gmra.mxu3 %v12202_v20  ;;  %v9939_v46 = vld [vmem:[#allocation20 + $0x1b4] sm:$0xf]  ;;  %v9905_v55 = vld [vmem:[#allocation20 + $0xa4] sm:$0xf] }
 0x603   :  { %6596 = vmatpush.bf16.msrb.mxu0 %v9144_v27  ;;  %6609 = vmatpush.bf16.msrb.mxu1 %v9208_v19  ;;  %v9231_v27 = vld [vmem:[#allocation20 + $0x120] sm:$0xf]  ;;  %v9922_v19 = vld [vmem:[#allocation20 + $0x124] sm:$0xf0] }
 0x604   :  { %6622 = vmatpush.bf16.msrb.mxu2 %v9272_v61  ;;  %6635 = vmatpush.bf16.msrb.mxu3 %v9336_v5  ;;  %v9295_v61 = vld [vmem:[#allocation20 + $0x1a0] sm:$0xf]  ;;  %v9938_v5 = vld [vmem:[#allocation20 + $0x1a4] sm:$0xf0]  ;;  %v9232_v60 = vor.u32 %v9922_v19, %v9231_v27  ;;  %v9129_v27 = vld [vmem:[#allocation20 + $0x58] sm:$0xf0] }
 0x605   :  { %v9296_v9 = vor.u32 %v9938_v5, %v9295_v61  ;;  %v9911_v19 = vld [vmem:[#allocation20 + $0xd4] sm:$0xf]  ;;  %v9132_v39 = vor.u32 %v9895_v48, %v9129_v27  ;;  %v9885_v48 = vld [vmem:[#allocation20 + $0x4] sm:$0xf]  ;;  %v9089_v27 = vld [vmem:[#allocation20 + $0x8] sm:$0xf0] }
 0x607   :  { %6597 = vmatpush.bf16.msrb.mxu0 %v9136_v2  ;;  %6610 = vmatpush.bf16.msrb.mxu1 %v9200_v6  ;;  %v9287_v2 = vld [vmem:[#allocation20 + $0x190] sm:$0xf] }
 0x608   :  { %6623 = vmatpush.bf16.msrb.mxu2 %v9264_v15  ;;  %6636 = vmatpush.bf16.msrb.mxu3 %v9328_v62  ;;  %v9087_v15 = vld [vmem:[#allocation20] sm:$0xf]  ;;  %v9902_v62 = vld [vmem:[#allocation20 + $0x84] sm:$0xf0] }
 0x609   :  { %v9152_v21 = vor.u32 %v9902_v62, %v9151_v63 }
 0x60b   :  { %6598 = vmatpush.bf16.msrb.mxu0 %v9128_v26  ;;  %6611 = vmatpush.bf16.msrb.mxu1 %v9192_v28  ;;  %v5701_v26 = vpop.permute.xlu0 %5700  ;;  %v9899_v28 = vld [vmem:[#allocation20 + $0x74] sm:$0xf] }
 0x60c   :  { %6624 = vmatpush.bf16.msrb.mxu2 %v9256_v38  ;;  %6637 = vmatpush.bf16.msrb.mxu3 %v9320_v47  ;;  %v9145_v38 = vld [vmem:[#allocation20 + $0x78] sm:$0xf0]  ;;  %v9931_v47 = vld [vmem:[#allocation20 + $0x174] sm:$0xf]  ;;  %v5705_v36 = vmul.f32 %v5701_v26, %v12108_v40  ;;  %v5706_v14 = vmul.f32 %v5701_v26, %v12125_v31  ;;  %v9140_v40 = vor.u32 %v9897_v51, %v9137_v52 }
 0x60d   :  { %v9148_v34 = vor.u32 %v9899_v28, %v9145_v38  ;;  %v9923_v28 = vld [vmem:[#allocation20 + $0x134] sm:$0xf]  ;;  %v9241_v38 = vld [vmem:[#allocation20 + $0x138] sm:$0xf0] }
 0x60e   :  { %v12220_v24 = vpack.c.bf16 %v5705_v36, %v5705_v36  ;;  %v12222_v61 = vpack.c.bf16 %v5706_v14, %v5706_v14  ;;  %v9297_v36 = vld [vmem:[#allocation20 + $0x1a8] sm:$0xf0]  ;;  %v9887_v52 = vld [vmem:[#allocation20 + $0x14] sm:$0xf] }
 0x60f   :  { %6599 = vmatpush.bf16.msrb.mxu0 %v9120_v30  ;;  %6612 = vmatpush.bf16.msrb.mxu1 %v9184_v1  ;;  %v5703_v30 = vmul.f32 %v5701_v26, %v12052_v8  ;;  %v5704_v1 = vmul.f32 %v5701_v26, %v12067_v43  ;;  %v9945_v8 = vld [vmem:[#allocation20 + $0x1e4] sm:$0xf]  ;;  %v9329_v43 = vld [vmem:[#allocation20 + $0x1e8] sm:$0xf0]  ;;  %v9177_v26 = vld [vmem:[#allocation20 + $0xb8] sm:$0xf0] }
 0x610   :  { %6625 = vmatpush.bf16.msrb.mxu2 %v9248_v33  ;;  %6638 = vmatpush.bf16.msrb.mxu3 %v9312_v10  ;;  %v9280_v33 = vor.u32 %v9934_v32, %v9279_v29  ;;  %v9276_v10 = vor.u32 %v9931_v47, %v9273_v37  ;;  %v9332_v5 = vor.u32 %v9945_v8, %v9329_v43  ;;  %v9907_v29 = vld [vmem:[#allocation20 + $0xb4] sm:$0xf]  ;;  %v9289_v43 = vld [vmem:[#allocation20 + $0x198] sm:$0xf0] }
 0x611   :  { %6232 = vmatmul.bf16.vlgmr.msra.gmra.mxu0 %v12196_v45  ;;  %6245 = vmatmul.bf16.vlgmr.msra.gmra.mxu1 %v12198_v13  ;;  %v9888_v45 = vld [vmem:[#allocation20 + $0x14] sm:$0xf0]  ;;  %v12216_v41 = vpack.c.bf16 %v5703_v30, %v5703_v30  ;;  %v12218_v23 = vpack.c.bf16 %v5704_v1, %v5704_v1  ;;  %v9180_v47 = vor.u32 %v9907_v29, %v9177_v26  ;;  %v9169_v30 = vld [vmem:[#allocation20 + $0xa8] sm:$0xf0]  ;;  %v9921_v1 = vld [vmem:[#allocation20 + $0x124] sm:$0xf] }
 0x612   :  { %6258 = vmatmul.bf16.vlgmr.msra.gmra.mxu2 %v12200_v7  ;;  %6271 = vmatmul.bf16.vlgmr.msra.gmra.mxu3 %v12202_v20  ;;  %v9920_v13 = vld [vmem:[#allocation20 + $0x114] sm:$0xf0]  ;;  %v9096_v6 = vor.u32 %v9888_v45, %v9095_v4  ;;  %v9886_v20 = vld [vmem:[#allocation20 + $0x4] sm:$0xf0]  ;;  %v9943_v4 = vld [vmem:[#allocation20 + $0x1d4] sm:$0xf]  ;;  %v9244_v37 = vor.u32 %v9923_v28, %v9241_v38 }
 0x613   :  { %6600 = vmatpush.bf16.msrb.mxu0 %v9112_v11  ;;  %6613 = vmatpush.bf16.msrb.mxu1 %v9176_v56  ;;  %v9936_v7 = vld [vmem:[#allocation20 + $0x194] sm:$0xf0]  ;;  %v9224_v17 = vor.u32 %v9920_v13, %v9223_v59  ;;  %v9088_v35 = vor.u32 %v9886_v20, %v9087_v15  ;;  %v9201_v11 = vld [vmem:[#allocation20 + $0xe8] sm:$0xf0]  ;;  %v9929_v56 = vld [vmem:[#allocation20 + $0x164] sm:$0xf] }
 0x614   :  { %6626 = vmatpush.bf16.msrb.mxu2 %v9240_v50  ;;  %6639 = vmatpush.bf16.msrb.mxu3 %v9304_v3  ;;  %v9288_v44 = vor.u32 %v9936_v7, %v9287_v2  ;;  %v9265_v50 = vld [vmem:[#allocation20 + $0x168] sm:$0xf0]  ;;  %v9204_v31 = vor.u32 %v9913_v57, %v9201_v11  ;;  %v9321_v45 = vld [vmem:[#allocation20 + $0x1d8] sm:$0xf0]  ;;  %v9893_v59 = vld [vmem:[#allocation20 + $0x44] sm:$0xf] }
 0x615   :  { %v9268_v3 = vor.u32 %v9929_v56, %v9265_v50  ;;  %v9121_v13 = vld [vmem:[#allocation20 + $0x48] sm:$0xf0]  ;;  %v9909_v2 = vld [vmem:[#allocation20 + $0xc4] sm:$0xf]  ;;  %v9324_v7 = vor.u32 %v9943_v4, %v9321_v45  ;;  %v9097_v57 = vld [vmem:[#allocation20 + $0x18] sm:$0xf0] }
 0x616   :  { %v9925_v15 = vld [vmem:[#allocation20 + $0x144] sm:$0xf]  ;;  %v9249_v20 = vld [vmem:[#allocation20 + $0x148] sm:$0xf0]  ;;  %v9124_v63 = vor.u32 %v9893_v59, %v9121_v13  ;;  %v9903_v14 = vld [vmem:[#allocation20 + $0x94] sm:$0xf] }
 0x617   :  { %6601 = vmatpush.bf16.msrb.mxu0 %v9104_v12  ;;  %6614 = vmatpush.bf16.msrb.mxu1 %v9168_v42  ;;  %v9193_v12 = vld [vmem:[#allocation20 + $0xd8] sm:$0xf0]  ;;  %v9927_v42 = vld [vmem:[#allocation20 + $0x154] sm:$0xf]  ;;  %v9252_v58 = vor.u32 %v9925_v15, %v9249_v20  ;;  %v9933_v4 = vld [vmem:[#allocation20 + $0x184] sm:$0xf] }
 0x618   :  { %6627 = vmatpush.bf16.msrb.mxu2 %v9232_v60  ;;  %6640 = vmatpush.bf16.msrb.mxu3 %v9296_v9  ;;  %v9257_v60 = vld [vmem:[#allocation20 + $0x158] sm:$0xf0]  ;;  %v9196_v9 = vor.u32 %v9911_v19, %v9193_v12  ;;  %v9919_v56 = vld [vmem:[#allocation20 + $0x114] sm:$0xf]  ;;  %v9901_v19 = vld [vmem:[#allocation20 + $0x84] sm:$0xf] }
 0x619   :  { %v9260_v0 = vor.u32 %v9927_v42, %v9257_v60  ;;  %v9161_v11 = vld [vmem:[#allocation20 + $0x98] sm:$0xf0]  ;;  %v9935_v8 = vld [vmem:[#allocation20 + $0x194] sm:$0xf]  ;;  %v9153_v12 = vld [vmem:[#allocation20 + $0x88] sm:$0xf0] }
 0x61a   :  { %v9225_v50 = vld [vmem:[#allocation20 + $0x118] sm:$0xf0]  ;;  %v9917_v42 = vld [vmem:[#allocation20 + $0x104] sm:$0xf]  ;;  %v9217_v60 = vld [vmem:[#allocation20 + $0x108] sm:$0xf0] }
 0x61b   :  { %6602 = vmatpush.bf16.msrb.mxu0 %v9096_v6  ;;  %6615 = vmatpush.bf16.msrb.mxu1 %v9160_v25  ;;  %v9185_v6 = vld [vmem:[#allocation20 + $0xc8] sm:$0xf0]  ;;  %v9941_v25 = vld [vmem:[#allocation20 + $0x1c4] sm:$0xf]  ;;  %v10020_v13 = vld [vmem:[#allocation25 + $0x38] sm:$0xff] }
 0x61c   :  { %6628 = vmatpush.bf16.msrb.mxu2 %v9224_v17  ;;  %6641 = vmatpush.bf16.msrb.mxu3 %v9288_v44  ;;  %v9313_v17 = vld [vmem:[#allocation20 + $0x1c8] sm:$0xf0]  ;;  %v9188_v62 = vor.u32 %v9909_v2, %v9185_v6  ;;  %v9891_v44 = vld [vmem:[#allocation20 + $0x34] sm:$0xf]  ;;  %v10017_v20 = vld [vmem:[#allocation25 + $0x20] sm:$0xff] }
 0x61d   :  { %v9316_v32 = vor.u32 %v9941_v25, %v9313_v17  ;;  %v9116_v18 = vor.u32 %v9891_v44, %v9113_v53  ;;  %v9281_v45 = vld [vmem:[#allocation20 + $0x188] sm:$0xf0]  ;;  %v10019_v2 = vld [vmem:[#allocation25 + $0x30] sm:$0xff]  ;;  %v10016_v25 = vld [vmem:[#allocation25 + $0x18] sm:$0xff] }
 0x61e   :  { %v9284_v59 = vor.u32 %v9933_v4, %v9281_v45  ;;  %v10014_v53 = vld [vmem:[#allocation25 + $0x8] sm:$0xff]  ;;  %v10028_v29 = vld [vmem:[#allocation25 + $0x78] sm:$0xff]  ;;  %v10013_v26 = vld [vmem:[#allocation25] sm:$0xff] }
 0x61f   :  { %6603 = vmatpush.bf16.msrb.mxu0 %v9088_v35  ;;  %6616 = vmatpush.bf16.msrb.mxu1 %v9152_v21  ;;  %v9305_v35 = vld [vmem:[#allocation20 + $0x1b8] sm:$0xf0]  ;;  %v9889_v21 = vld [vmem:[#allocation20 + $0x24] sm:$0xf] }
 0x620   :  { %6629 = vmatpush.bf16.msrb.mxu2 %v9216_v22  ;;  %6642 = vmatpush.bf16.msrb.mxu3 %v9280_v33  ;;  %v9105_v22 = vld [vmem:[#allocation20 + $0x28] sm:$0xf0]  ;;  %v9308_v16 = vor.u32 %v9939_v46, %v9305_v35 }
 0x621   :  { %v9233_v33 = vld [vmem:[#allocation20 + $0x128] sm:$0xf0] }
 0x622   :  { %6604 = vmatmul.bf16.vlgmr.msrb.gmra.mxu0 %v12216_v41  ;;  %6617 = vmatmul.bf16.vlgmr.msrb.gmra.mxu1 %v12218_v23  ;;  %v9236_v51 = vor.u32 %v9921_v1, %v9233_v33  ;;  %v10026_v35 = vld [vmem:[#allocation25 + $0x68] sm:$0xff]  ;;  %v10024_v1 = vld [vmem:[#allocation25 + $0x58] sm:$0xff] }
 0x623   :  { %6648 = vmatpush.bf16.msra.mxu0 %v9148_v34  ;;  %6661 = vmatpush.bf16.msra.mxu1 %v9212_v54  ;;  %v9937_v34 = vld [vmem:[#allocation20 + $0x1a4] sm:$0xf]  ;;  %v9108_v54 = vor.u32 %v9889_v21, %v9105_v22 }
 0x624   :  { %6674 = vmatpush.bf16.msra.mxu2 %v9276_v10  ;;  %6687 = vmatpush.bf16.msra.mxu3 %v9340_v49  ;;  %v9172_v10 = vor.u32 %v9905_v55, %v9169_v30  ;;  %v9300_v49 = vor.u32 %v9937_v34, %v9297_v36  ;;  %v6700_v36 = vld [vmem:[#allocation23] sm:$0x3] }
 0x625   :  { %6630 = vmatmul.bf16.vlgmr.msrb.gmra.mxu2 %v12220_v24  ;;  %6643 = vmatmul.bf16.vlgmr.msrb.gmra.mxu3 %v12222_v61 }
 0x627   :  { %6649 = vmatpush.bf16.msra.mxu0 %v9140_v40  ;;  %6662 = vmatpush.bf16.msra.mxu1 %v9204_v31  ;;  %v9100_v40 = vor.u32 %v9887_v52, %v9097_v57  ;;  %v9164_v31 = vor.u32 %v9903_v14, %v9161_v11  ;;  %v6702_v57 = vperm.slane %v6700_v36, 0  ;;  %v10023_v11 = vld [vmem:[#allocation25 + $0x50] sm:$0xff] }
 0x628   :  { %6675 = vmatpush.bf16.msra.mxu2 %v9268_v3  ;;  %6688 = vmatpush.bf16.msra.mxu3 %v9332_v5  ;;  %v9228_v3 = vor.u32 %v9919_v56, %v9225_v50  ;;  %v9292_v5 = vor.u32 %v9935_v8, %v9289_v43  ;;  %v10022_v8 = vld [vmem:[#allocation25 + $0x48] sm:$0xff] }
 0x62b   :  { %6650 = vmatpush.bf16.msra.mxu0 %v9132_v39  ;;  %6663 = vmatpush.bf16.msra.mxu1 %v9196_v9  ;;  %v9092_v39 = vor.u32 %v9885_v48, %v9089_v27  ;;  %v9156_v9 = vor.u32 %v9901_v19, %v9153_v12 }
 0x62c   :  { %6676 = vmatpush.bf16.msra.mxu2 %v9260_v0  ;;  %6689 = vmatpush.bf16.msra.mxu3 %v9324_v7  ;;  %v9220_v0 = vor.u32 %v9917_v42, %v9217_v60  ;;  %v10018_v7 = vld [vmem:[#allocation25 + $0x28] sm:$0xff] }
 0x62f   :  { %6651 = vmatpush.bf16.msra.mxu0 %v9124_v63  ;;  %6664 = vmatpush.bf16.msra.mxu1 %v9188_v62 }
 0x630   :  { %6677 = vmatpush.bf16.msra.mxu2 %v9252_v58  ;;  %6690 = vmatpush.bf16.msra.mxu3 %v9316_v32  ;;  %v10015_v58 = vld [vmem:[#allocation25 + $0x10] sm:$0xff] }
 0x631   :  { %v10027_v32 = vld [vmem:[#allocation25 + $0x70] sm:$0xff] }
 0x633   :  { %6652 = vmatpush.bf16.msra.mxu0 %v9116_v18  ;;  %6665 = vmatpush.bf16.msra.mxu1 %v9180_v47 }
 0x634   :  { %6678 = vmatpush.bf16.msra.mxu2 %v9244_v37  ;;  %6691 = vmatpush.bf16.msra.mxu3 %v9308_v16  ;;  %v10025_v37 = vld [vmem:[#allocation25 + $0x60] sm:$0xff] }
 0x637   :  { %6653 = vmatpush.bf16.msra.mxu0 %v9108_v54  ;;  %6666 = vmatpush.bf16.msra.mxu1 %v9172_v10 }
 0x638   :  { %6679 = vmatpush.bf16.msra.mxu2 %v9236_v51  ;;  %6692 = vmatpush.bf16.msra.mxu3 %v9300_v49 }
 0x63b   :  { %6654 = vmatpush.bf16.msra.mxu0 %v9100_v40  ;;  %6667 = vmatpush.bf16.msra.mxu1 %v9164_v31  ;;  %v10021_v31 = vld [vmem:[#allocation25 + $0x40] sm:$0xff] }
 0x63c   :  { %6680 = vmatpush.bf16.msra.mxu2 %v9228_v3  ;;  %6693 = vmatpush.bf16.msra.mxu3 %v9292_v5 }
 0x63f   :  { %6655 = vmatpush.bf16.msra.mxu0 %v9092_v39  ;;  %6668 = vmatpush.bf16.msra.mxu1 %v9156_v9 }
 0x640   :  { %6681 = vmatpush.bf16.msra.mxu2 %v9220_v0  ;;  %6694 = vmatpush.bf16.msra.mxu3 %v9284_v59  ;;  %v6703_v0 = vperm.slane %v6700_v36, 1 }
 0x642   :  { %6656 = vmatmul.bf16.vlgmr.msra.gmra.mxu0 %v12216_v41  ;;  %6669 = vmatmul.bf16.vlgmr.msra.gmra.mxu1 %v12218_v23 }
 0x643   :  { %6682 = vmatmul.bf16.vlgmr.msra.gmra.mxu2 %v12220_v24  ;;  %6695 = vmatmul.bf16.vlgmr.msra.gmra.mxu3 %v12222_v61 }
 0x644   :  { %6844 = vmatpush.bf16.msrb.mxu0 %v10020_v13  ;;  %6857 = vmatpush.bf16.msrb.mxu1 %v10028_v29 }
 0x648   :  { %6845 = vmatpush.bf16.msrb.mxu0 %v10019_v2  ;;  %6858 = vmatpush.bf16.msrb.mxu1 %v10027_v32 }
 0x64c   :  { %6846 = vmatpush.bf16.msrb.mxu0 %v10018_v7  ;;  %6859 = vmatpush.bf16.msrb.mxu1 %v10026_v35 }
 0x650   :  { %6847 = vmatpush.bf16.msrb.mxu0 %v10017_v20  ;;  %6860 = vmatpush.bf16.msrb.mxu1 %v10025_v37 }
 0x654   :  { %6848 = vmatpush.bf16.msrb.mxu0 %v10016_v25  ;;  %6861 = vmatpush.bf16.msrb.mxu1 %v10024_v1 }
 0x658   :  { %6849 = vmatpush.bf16.msrb.mxu0 %v10015_v58  ;;  %6862 = vmatpush.bf16.msrb.mxu1 %v10023_v11 }
 0x65c   :  { %6850 = vmatpush.bf16.msrb.mxu0 %v10014_v53  ;;  %6863 = vmatpush.bf16.msrb.mxu1 %v10022_v8 }
 0x660   :  { %6851 = vmatpush.bf16.msrb.mxu0 %v10013_v26  ;;  %6864 = vmatpush.bf16.msrb.mxu1 %v10021_v31 }
 0x67e   :  { %v6181_v6 = vpop.f32.mrf.mxu0  ;;  %v6194_v15 = vpop.f32.mrf.mxu1 }
 0x67f   :  { %v6195_v47 = vadd.f32 %v6194_v15, %v6181_v6 }
 0x685   :  { %v6207_v17 = vpop.f32.mrf.mxu2  ;;  %v6220_v63 = vpop.f32.mrf.mxu3 }
 0x686   :  { %v6183_v41 = vpop.f32.mrf.mxu0  ;;  %v6196_v62 = vpop.f32.mrf.mxu1  ;;  %v6208_v21 = vadd.f32 %v6207_v17, %v6195_v47 }
 0x687   :  { %v10054_v41 = vld [vmem:[#allocation26] ss:$0 sm:$0xff] }
 0x688   :  { %v6221_v16 = vadd.f32 %v6220_v63, %v6208_v21 }
 0x68d   :  { %v6209_v23 = vpop.f32.mrf.mxu2  ;;  %v6222_v24 = vpop.f32.mrf.mxu3 }
 0x68e   :  { %v6233_v61 = vpop.f32.mrf.mxu0  ;;  %v6246_v44 = vpop.f32.mrf.mxu1 }
 0x68f   :  { %v6247_v27 = vadd.f32 %v6246_v44, %v6233_v61 }
 0x695   :  { %v6259_v28 = vpop.f32.mrf.mxu2  ;;  %v6272_v38 = vpop.f32.mrf.mxu3 }
 0x696   :  { %v6235_v46 = vpop.f32.mrf.mxu0  ;;  %v6248_v18 = vpop.f32.mrf.mxu1  ;;  %v6260_v19 = vadd.f32 %v6259_v28, %v6247_v27 }
 0x698   :  { %v6273_v5 = vadd.f32 %v6272_v38, %v6260_v19 }
 0x69d   :  { %v6261_v22 = vpop.f32.mrf.mxu2  ;;  %v6274_v55 = vpop.f32.mrf.mxu3 }
 0x69f   :  { %v6605_v30 = vpop.f32.mrf.mxu0  ;;  %v6618_v33 = vpop.f32.mrf.mxu1 }
 0x6a0   :  { %v6606_v34 = vadd.f32 %v6605_v30, %v6221_v16 }
 0x6a2   :  { %v6619_v54 = vadd.f32 %v6618_v33, %v6606_v34 }
 0x6a7   :  { %v6607_v14 = vpop.f32.mrf.mxu0  ;;  %v6620_v49 = vpop.f32.mrf.mxu1 }
 0x6a8   :  { %v6631_v10 = vpop.f32.mrf.mxu2  ;;  %v6644_v52 = vpop.f32.mrf.mxu3 }
 0x6a9   :  { %v6632_v51 = vadd.f32 %v6631_v10, %v6619_v54 }
 0x6ab   :  { %v6645_v56 = vadd.f32 %v6644_v52, %v6632_v51 }
 0x6ad   :  { %v6706_v50 = vadd.f32 %v6702_v57, %v6645_v56 }
 0x6af   :  { %v6708_v43 = vmax.f32 %v6706_v50, 0.0 }
 0x6b0   :  { %v6633_v40 = vpop.f32.mrf.mxu2  ;;  %v6646_v48 = vpop.f32.mrf.mxu3 }
 0x6b1   :  { %v6710_v3 = vpack.c.bf16 %v6708_v43, %v6708_v43 }
 0x6b3   :  { %6852 = vmatmul.bf16.vlgmr.msrb.gmra.mxu0 %v6710_v3 }
 0x6bf   :  { %v6657_v12 = vpop.f32.mrf.mxu0  ;;  %v6670_v42 = vpop.f32.mrf.mxu1 }
 0x6c0   :  { %v6658_v60 = vadd.f32 %v6657_v12, %v6273_v5 }
 0x6c2   :  { %v6671_v4 = vadd.f32 %v6670_v42, %v6658_v60 }
 0x6c6   :  { %v6683_v45 = vpop.f32.mrf.mxu2  ;;  %v6696_v9 = vpop.f32.mrf.mxu3 }
 0x6c7   :  { %v6684_v39 = vadd.f32 %v6683_v45, %v6671_v4  ;;  %v6659_v59 = vpop.f32.mrf.mxu0  ;;  %v6672_v13 = vpop.f32.mrf.mxu1 }
 0x6c9   :  { %v6697_v2 = vadd.f32 %v6696_v9, %v6684_v39 }
 0x6cb   :  { %v6707_v7 = vadd.f32 %v6703_v0, %v6697_v2 }
 0x6cd   :  { %v6709_v6 = vmax.f32 %v6707_v7, 0.0 }
 0x6ce   :  { %v6685_v15 = vpop.f32.mrf.mxu2  ;;  %v6698_v25 = vpop.f32.mrf.mxu3 }
 0x6cf   :  { %v6711_v20 = vpack.c.bf16 %v6709_v6, %v6709_v6 }
 0x6d1   :  { %6865 = vmatmul.bf16.vlgmr.msrb.gmra.mxu1 %v6711_v20 }
 0x730   :  { %v6853_v17 = vpop.f32.mrf.mxu0 }
 0x731   :  { %v6854_v62 = vadd.f32 %v10054_v41, %v6853_v17 }
 0x738   :  { %v6855_v63 = vpop.f32.mrf.mxu0 }
 0x74e   :  { %v6866_v23 = vpop.f32.mrf.mxu1 }
 0x74f   :  { %v6867_v24 = vadd.f32 %v6866_v23, %v6854_v62 }
 0x751   :  { %6870 = vst [vmem:[#allocation28] sm:$0xf] %v6867_v24 }
 0x752   :  { %6881 = dma.vmem_to_hbm [thread:$0]  %s6877_s15, 64, %s6879_s23, [#allocation6]  }
 0x756   :  { %v6868_v58 = vpop.f32.mrf.mxu1 }
 0x757   :  { %10510 = dma.done.wait [#allocation6], 64  }
 0x758   :  { %10511 = vsyncadd [#allocation6], 4294967232 }
 0x759   :  { %6886 = vsyncpa [#allocation5], 1 }
 0x75a   :  { %6887 = vsyncpa [#allocation12], 1 }
 0x75b   :  { %6888 = vsyncpa [#allocation15], 1 }
 0x75c   :  { %6889 = vsyncpa [#allocation18], 1 }
 0x75d   :  { %6890 = vsyncpa [#allocation21], 1 }
 0x75e   :  { %6891 = vsyncpa [#allocation24], 1 }
 0x75f   :  { %6892 = vsyncpa [#allocation27], 1 }
 0x760   :  { %6893 = vsyncpa [#allocation6], 1 }
 0x761   :  { %6894 = vsyncpa [#allocation7], 1 }
 0x762   :  { %6895 = vsyncpa [#allocation9], 1 }

</bundles_post_ra>
